<compile_context>
chip_gen: v5e
topology: v5e:2x2
jax: 0.10.0
libtpu: 0.0.40
codegen_flags: <defaults>
</compile_context>

<pallas_src>
import math
import numpy as np
import jax
import jax.numpy as jnp
from jax.experimental import pallas as pl
from jax.experimental.pallas import tpu as pltpu

# ---------------- hyper-params (small, consistent with the module) ----------
B = 2            # batch
L = 8            # sequence length
V = 8            # n_views (SS2D default)
D_MODEL = 16
D_STATE = 16
D_CONV = 3
EXPAND = 2
D_INNER = EXPAND * D_MODEL            # 32
DT_RANK = math.ceil(D_MODEL / 16)     # 1
LN1_EPS = 1e-6                        # VSSBlock.ln_1 eps
OUTNORM_EPS = 1e-5                    # SS2D.out_norm default eps

MM_PREC = jax.lax.Precision.HIGHEST   # keep f32 matmuls accurate on the MXU


# ---------------- Pallas kernels --------------------------------------------
def vss_front_kernel(x_ref, g1_ref, b1_ref, wx_ref, cw_ref, cb_ref,
                     wb_ref, wc_ref, wxdt_ref, wdt_ref, dtb_ref, At_ref, D_ref,
                     y_ref):
    """One batch element: ln_1 + in_proj(x) + conv1d + SiLU + x_proj/dt_proj +
    selective scan over all V views at once.

    x_ref : (1, V*L, C)   token rows ordered (v, l)
    y_ref : (1, V, L, d_inner)   y_ref[0, v, l, :] = scan output for (v, :, l)
    """
    Vv, Ls, dd = y_ref.shape[1], y_ref.shape[2], y_ref.shape[3]
    N = wb_ref.shape[1]

    # --- ln_1 + in_proj (x branch) over the 64 token rows of this batch ---
    x = x_ref[0]                                            # (V*L, C)
    mu = jnp.mean(x, axis=-1, keepdims=True)
    var = jnp.mean((x - mu) ** 2, axis=-1, keepdims=True)
    xn = (x - mu) * jax.lax.rsqrt(var + LN1_EPS) * g1_ref[...] + b1_ref[...]
    xl = jnp.dot(xn, wx_ref[...], preferred_element_type=jnp.float32,
                 precision=MM_PREC)                         # (V*L, d)
    xl = xl.reshape(Vv, Ls, dd)                             # (V, L, d) tile-aligned split

    # --- depthwise conv1d (k=3, padding=1) along L + SiLU, all views at once ---
    cw = cw_ref[...]                                        # (3, d)
    zrow = jnp.zeros((Vv, 1, dd), jnp.float32)
    xm = jnp.concatenate([zrow, xl[:, :Ls - 1, :]], axis=1)     # x[l-1]
    xp = jnp.concatenate([xl[:, 1:, :], zrow], axis=1)          # x[l+1]
    xc = cw[0:1] * xm + cw[1:2] * xl + cw[2:3] * xp + cb_ref[...]
    xc = xc * jax.nn.sigmoid(xc)                            # (V, L, d)

    # --- x_proj: B and C for every view, batched on the MXU (leading batch v) ---
    Bs = jnp.einsum('vnd,vld->vnl', wb_ref[...], xc,
                    preferred_element_type=jnp.float32, precision=MM_PREC)  # (V,N,L)
    Cs = jnp.einsum('vnd,vld->vnl', wc_ref[...], xc,
                    preferred_element_type=jnp.float32, precision=MM_PREC)  # (V,N,L)

    # --- dt path (dt_rank == 1 for d_model=16): rank-1 on the VPU, no K=1 matmul ---
    dtl = jnp.sum(xc * wxdt_ref[...], axis=-1, keepdims=True)       # (V, L, 1)
    delta = jax.nn.softplus(dtl * wdt_ref[...] + dtb_ref[...])      # (V, L, d)
    du = delta * xc                                                 # (V, L, d)

    # --- selective scan: sequential over L only, vectorized over (v, n, d) ---
    At = At_ref[...]                                        # (V, N, d)
    Dp = D_ref[...]                                         # (V, 1, d)
    h = jnp.zeros((Vv, N, dd), jnp.float32)                 # state, N on sublanes
    ys = []
    # L == 8: full static unroll is fine; use lax.fori_loop + VMEM scratch if L grows.
    for l in range(Ls):
        dl = delta[:, l:l + 1, :]                           # (V, 1, d) sublane slice
        bl = Bs[:, :, l:l + 1]                              # (V, N, 1) lane slice
        cl = Cs[:, :, l:l + 1]                              # (V, N, 1)
        h = jnp.exp(dl * At) * h + du[:, l:l + 1, :] * bl   # (V, N, d)
        yl = jnp.sum(h * cl, axis=1, keepdims=True) + Dp * xc[:, l:l + 1, :]
        ys.append(yl)                                       # (V, 1, d)
    # accumulate in registers, single bulk store (no per-step width-1 stores)
    y_ref[0] = jnp.concatenate(ys, axis=1)                  # (V, L, d)


def vss_back_kernel(y_ref, x_ref, g1_ref, b1_ref, wz_ref, g2_ref, b2_ref,
                    wo_ref, o_ref):
    """One batch element: out_norm + SiLU(z) gate + out_proj + residual.

    y_ref : (1, L*V, d_inner)  scrambled scan output (rows follow PyTorch .view)
    x_ref : (1, L*V, C)        original input rows (l, v) -- residual + z recompute
    """
    x = x_ref[0]                                            # (L*V, C)
    mu = jnp.mean(x, axis=-1, keepdims=True)
    var = jnp.mean((x - mu) ** 2, axis=-1, keepdims=True)
    xn = (x - mu) * jax.lax.rsqrt(var + LN1_EPS) * g1_ref[...] + b1_ref[...]
    z = jnp.dot(xn, wz_ref[...], preferred_element_type=jnp.float32,
                precision=MM_PREC)                          # (L*V, d)  gate branch

    y = y_ref[0]                                            # (L*V, d)
    mu2 = jnp.mean(y, axis=-1, keepdims=True)
    var2 = jnp.mean((y - mu2) ** 2, axis=-1, keepdims=True)
    yn = (y - mu2) * jax.lax.rsqrt(var2 + OUTNORM_EPS) * g2_ref[...] + b2_ref[...]

    yg = yn * (z * jax.nn.sigmoid(z))
    o_ref[0] = (jnp.dot(yg, wo_ref[...], preferred_element_type=jnp.float32,
                        precision=MM_PREC) + x)             # out_proj + residual


# ---------------- wrapper ----------------------------------------------------
def vss_block_forward(x, p):
    Bb, Ls, Vv, C = x.shape
    d = D_INNER
    N = D_STATE
    R = DT_RANK
    assert R == 1, "dt_rank == 1 for d_model=16; general R needs one extra einsum"
    M = Ls * Vv

    # --- tiny, one-time weight relayouts (constant-folded under jit) ---
    w_in_x_t = p['w_in_t'][:, :d]                           # (C, d)
    w_in_z_t = p['w_in_t'][:, d:]                           # (C, d)
    conv_w_k = p['conv_w'].T                                # (3, d)
    conv_b_r = p['conv_b'].T                                # (1, d)
    wxdt = p['x_proj_w'][:, :R, :]                          # (V, 1, d)
    WB = p['x_proj_w'][:, R:R + N, :]                       # (V, N, d)
    WC = p['x_proj_w'][:, R + N:, :]                        # (V, N, d)
    wdt_r = jnp.transpose(p['dt_proj_w'], (0, 2, 1))        # (V, 1, d)
    dtb_r = jnp.transpose(p['dt_bias'], (0, 2, 1))          # (V, 1, d)
    At = jnp.transpose(p['A_neg'], (0, 2, 1))               # (V, N, d)
    D_r = jnp.transpose(p['D'], (0, 2, 1))                  # (V, 1, d)

    # 'b l v c -> b (v l) c' so every view's sequence is contiguous (tiny XLA op)
    x_vl = jnp.transpose(x, (0, 2, 1, 3)).reshape(Bb, Vv * Ls, C)

    def wspec(shape):
        return pl.BlockSpec(shape, lambda b: (0,) * len(shape))

    # --- call 1: ln_1 + in_proj + conv + SiLU + projections + selective scan ---
    y1 = pl.pallas_call(
        vss_front_kernel,
        out_shape=jax.ShapeDtypeStruct((Bb, Vv, Ls, d), jnp.float32),
        grid=(Bb,),
        in_specs=[
            pl.BlockSpec((1, Vv * Ls, C), lambda b: (b, 0, 0)),
            wspec((1, C)), wspec((1, C)), wspec((C, d)),
            wspec((D_CONV, d)), wspec((1, d)),
            wspec((Vv, N, d)), wspec((Vv, N, d)),
            wspec((Vv, 1, d)), wspec((Vv, 1, d)), wspec((Vv, 1, d)),
            wspec((Vv, N, d)), wspec((Vv, 1, d)),
        ],
        out_specs=pl.BlockSpec((1, Vv, Ls, d), lambda b: (b, 0, 0, 0)),
        compiler_params=pltpu.CompilerParams(dimension_semantics=("parallel",)),
    )(x_vl, p['ln1_g'], p['ln1_b'], w_in_x_t, conv_w_k, conv_b_r,
      WB, WC, wxdt, wdt_r, dtb_r, At, D_r)

    # PyTorch: scan output (B, V*d_inner, L) is `.view(B, L, V, -1)`-ed, i.e. a
    # raw row-major reinterpretation. y1[b, v, l, :] holds y(b, v, :, l); swap
    # the last two axes to recover the contiguous scan buffer and reinterpret.
    # This is a 16 KB XLA transpose+reshape -- free compared with doing a
    # lane<->sublane regroup inside the kernel.
    y_scr = jnp.transpose(y1, (0, 1, 3, 2)).reshape(Bb, M, d)   # rows follow (l', v')

    x_rows = x.reshape(Bb, M, C)

    # --- call 2: out_norm + SiLU(z) gate + out_proj + residual ---
    out = pl.pallas_call(
        vss_back_kernel,
        out_shape=jax.ShapeDtypeStruct((Bb, M, C), jnp.float32),
        grid=(Bb,),
        in_specs=[
            pl.BlockSpec((1, M, d), lambda b: (b, 0, 0)),
            pl.BlockSpec((1, M, C), lambda b: (b, 0, 0)),
            wspec((1, C)), wspec((1, C)), wspec((C, d)),
            wspec((1, d)), wspec((1, d)), wspec((d, C)),
        ],
        out_specs=pl.BlockSpec((1, M, C), lambda b: (b, 0, 0)),
        compiler_params=pltpu.CompilerParams(dimension_semantics=("parallel",)),
    )(y_scr, x_rows, p['ln1_g'], p['ln1_b'], w_in_z_t,
      p['ln2_g'], p['ln2_b'], p['w_out_t'])

    return out.reshape(Bb, Ls, Vv, C)


# ---------------- deterministic parameter init (shapes per SS2D.__init__) ----
def init_params(key):
    ks = jax.random.split(key, 8)

    def uni(k, shape, bound):
        return jax.random.uniform(k, shape, jnp.float32, -bound, bound)

    p = {}
    p['ln1_g'] = jnp.ones((1, D_MODEL), jnp.float32)
    p['ln1_b'] = jnp.zeros((1, D_MODEL), jnp.float32)
    w_in = uni(ks[0], (2 * D_INNER, D_MODEL), 1.0 / math.sqrt(D_MODEL))
    p['w_in_t'] = jnp.asarray(w_in.T)                      # (d_model, 2*d_inner)
    p['conv_w'] = uni(ks[1], (D_INNER, D_CONV), 1.0 / math.sqrt(D_CONV))
    p['conv_b'] = uni(ks[2], (D_INNER, 1), 1.0 / math.sqrt(D_CONV))
    p['x_proj_w'] = uni(ks[3], (V, DT_RANK + 2 * D_STATE, D_INNER),
                        1.0 / math.sqrt(D_INNER))
    p['dt_proj_w'] = uni(ks[4], (V, D_INNER, DT_RANK), DT_RANK ** -0.5)
    # dt_projs_bias init: softplus(inv_dt) == dt in [dt_min, dt_max]
    u = jax.random.uniform(ks[5], (V, D_INNER), jnp.float32)
    dt = jnp.exp(u * (math.log(0.1) - math.log(0.001)) + math.log(0.001))
    dt = jnp.maximum(dt, 1e-4)
    inv_dt = dt + jnp.log(-jnp.expm1(-dt))
    p['dt_bias'] = inv_dt[..., None]                       # (V, d_inner, 1)
    # A_logs = log(arange(1..N)) -> A = -exp(A_logs) = -(1..N)
    A = jnp.arange(1, D_STATE + 1, dtype=jnp.float32)
    p['A_neg'] = -jnp.broadcast_to(A, (V, D_INNER, D_STATE)).astype(jnp.float32)
    p['D'] = jnp.ones((V, D_INNER, 1), jnp.float32)        # D_init ones
    p['ln2_g'] = jnp.ones((1, D_INNER), jnp.float32)
    p['ln2_b'] = jnp.zeros((1, D_INNER), jnp.float32)
    w_out = uni(ks[6], (D_MODEL, D_INNER), 1.0 / math.sqrt(D_INNER))
    p['w_out_t'] = jnp.asarray(w_out.T)                    # (d_inner, d_model)
    return p


# ---------------- pure-JAX reference (same math) for the correctness check ---
def vss_block_reference(x, p):
    Bb, Ls, Vv, C = x.shape
    mu = jnp.mean(x, -1, keepdims=True)
    var = jnp.mean((x - mu) ** 2, -1, keepdims=True)
    xn = (x - mu) / jnp.sqrt(var + LN1_EPS) * p['ln1_g'][0] + p['ln1_b'][0]
    xz = jnp.dot(xn, p['w_in_t'], precision=MM_PREC)
    x_part, z = xz[..., :D_INNER], xz[..., D_INNER:]
    x_bv = jnp.transpose(x_part, (0, 2, 3, 1))
    xpad = jnp.pad(x_bv, ((0, 0), (0, 0), (0, 0), (1, 1)))
    cw, cb = p['conv_w'], p['conv_b']
    xc = (cw[None, None, :, 0:1] * xpad[..., 0:Ls]
          + cw[None, None, :, 1:2] * xpad[..., 1:Ls + 1]
          + cw[None, None, :, 2:3] * xpad[..., 2:Ls + 2]
          + cb[None, None, :, :])
    xc = xc * jax.nn.sigmoid(xc)
    xdbl = jnp.einsum('bvdl,vcd->bvcl', xc, p['x_proj_w'], precision=MM_PREC)
    R, N = DT_RANK, D_STATE
    dtl, Bs, Cs = xdbl[:, :, :R], xdbl[:, :, R:R + N], xdbl[:, :, R + N:]
    dts = jnp.einsum('bvrl,vdr->bvdl', dtl, p['dt_proj_w'], precision=MM_PREC)
    delta = jax.nn.softplus(dts + p['dt_bias'][None])
    A = p['A_neg'][None]
    Dp = p['D'][None, :, :, 0]
    h = jnp.zeros((Bb, Vv, D_INNER, N), jnp.float32)
    ys = []
    for l in range(Ls):
        dl, ul = delta[..., l], xc[..., l]
        Bl, Cl = Bs[..., l], Cs[..., l]
        h = jnp.exp(dl[..., None] * A) * h + (dl * ul)[..., None] * Bl[:, :, None, :]
        ys.append(jnp.sum(h * Cl[:, :, None, :], axis=-1) + Dp * ul)
    y_scan = jnp.stack(ys, axis=-1)                        # (B, V, d_inner, L)
    y = y_scan.reshape(Bb, Ls, Vv, D_INNER)                # PyTorch .view scramble
    mu2 = jnp.mean(y, -1, keepdims=True)
    var2 = jnp.mean((y - mu2) ** 2, -1, keepdims=True)
    yn = (y - mu2) / jnp.sqrt(var2 + OUTNORM_EPS) * p['ln2_g'][0] + p['ln2_b'][0]
    out = jnp.dot(yn * (z * jax.nn.sigmoid(z)), p['w_out_t'], precision=MM_PREC)
    return x + out


if __name__ == "__main__":
    key = jax.random.PRNGKey(0)
    kx, kp = jax.random.split(key)
    x = jax.random.normal(kx, (B, L, V, D_MODEL), jnp.float32)
    params = init_params(kp)

    fwd = jax.jit(vss_block_forward)
    ref_fn = jax.jit(vss_block_reference)

    out = jax.block_until_ready(fwd(x, params))
    ref = jax.block_until_ready(ref_fn(x, params))
    np.testing.assert_allclose(np.asarray(out), np.asarray(ref),
                               rtol=2e-5, atol=2e-5)
    assert out.shape == x.shape and out.dtype == jnp.float32
    print("KERNEL_OK")
</pallas_src>

<mosaic_0001>
module attributes {stable_mosaic.version = 11 : i64} {
  func.func @vss_back_kernel(%arg0: i32, %arg1: memref<1x64x32xf32, #tpu.memory_space<vmem>>, %arg2: memref<1x64x16xf32, #tpu.memory_space<vmem>>, %arg3: memref<1x16xf32, #tpu.memory_space<vmem>>, %arg4: memref<1x16xf32, #tpu.memory_space<vmem>>, %arg5: memref<16x32xf32, #tpu.memory_space<vmem>>, %arg6: memref<1x32xf32, #tpu.memory_space<vmem>>, %arg7: memref<1x32xf32, #tpu.memory_space<vmem>>, %arg8: memref<32x16xf32, #tpu.memory_space<vmem>>, %arg9: memref<1x64x16xf32, #tpu.memory_space<vmem>>) attributes {dimension_semantics = [#tpu.dimension_semantics<parallel>], iteration_bounds = array<i64: 2>, scalar_prefetch = 0 : i64, scratch_operands = 0 : i64, tpu.core_type = #tpu.core_type<tc>, window_params = [{transform_indices = @transform_0, window_bounds = array<i64: 1, 64, 32>}, {transform_indices = @transform_1, window_bounds = array<i64: 1, 64, 16>}, {pipeline_mode = #tpu.pipeline_mode<synchronous>, transform_indices = @transform_2, window_bounds = array<i64: 1, 16>}, {pipeline_mode = #tpu.pipeline_mode<synchronous>, transform_indices = @transform_3, window_bounds = array<i64: 1, 16>}, {pipeline_mode = #tpu.pipeline_mode<synchronous>, transform_indices = @transform_4, window_bounds = array<i64: 16, 32>}, {pipeline_mode = #tpu.pipeline_mode<synchronous>, transform_indices = @transform_5, window_bounds = array<i64: 1, 32>}, {pipeline_mode = #tpu.pipeline_mode<synchronous>, transform_indices = @transform_6, window_bounds = array<i64: 1, 32>}, {pipeline_mode = #tpu.pipeline_mode<synchronous>, transform_indices = @transform_7, window_bounds = array<i64: 32, 16>}, {transform_indices = @transform_8, window_bounds = array<i64: 1, 64, 16>}]} {
    %c0 = arith.constant 0 : index
    %c0_0 = arith.constant 0 : index
    %c0_1 = arith.constant 0 : index
    %0 = vector.load %arg2[%c0, %c0_0, %c0_1] : memref<1x64x16xf32, #tpu.memory_space<vmem>>, vector<1x64x16xf32>
    %1 = vector.shape_cast %0 : vector<1x64x16xf32> to vector<64x16xf32>
    %cst = arith.constant dense<0.000000e+00> : vector<64xf32>
    %2 = vector.multi_reduction <add>, %1, %cst [1] : vector<64x16xf32> to vector<64xf32>
    %3 = vector.shape_cast %2 : vector<64xf32> to vector<64x1xf32>
    %cst_2 = arith.constant 1.600000e+01 : f32
    %4 = vector.broadcast %cst_2 : f32 to vector<64x1xf32>
    %5 = arith.divf %3, %4 : vector<64x1xf32>
    %6 = vector.broadcast %5 : vector<64x1xf32> to vector<64x16xf32>
    %7 = arith.subf %1, %6 : vector<64x16xf32>
    %8 = arith.mulf %7, %7 : vector<64x16xf32>
    %cst_3 = arith.constant dense<0.000000e+00> : vector<64xf32>
    %9 = vector.multi_reduction <add>, %8, %cst_3 [1] : vector<64x16xf32> to vector<64xf32>
    %10 = vector.shape_cast %9 : vector<64xf32> to vector<64x1xf32>
    %cst_4 = arith.constant 1.600000e+01 : f32
    %11 = vector.broadcast %cst_4 : f32 to vector<64x1xf32>
    %12 = arith.divf %10, %11 : vector<64x1xf32>
    %13 = vector.broadcast %5 : vector<64x1xf32> to vector<64x16xf32>
    %14 = arith.subf %1, %13 : vector<64x16xf32>
    %cst_5 = arith.constant 9.99999997E-7 : f32
    %15 = vector.broadcast %cst_5 : f32 to vector<64x1xf32>
    %16 = arith.addf %12, %15 : vector<64x1xf32>
    %17 = math.rsqrt %16 : vector<64x1xf32>
    %18 = vector.broadcast %17 : vector<64x1xf32> to vector<64x16xf32>
    %19 = arith.mulf %14, %18 : vector<64x16xf32>
    %c0_6 = arith.constant 0 : index
    %c0_7 = arith.constant 0 : index
    %20 = vector.load %arg3[%c0_6, %c0_7] : memref<1x16xf32, #tpu.memory_space<vmem>>, vector<1x16xf32>
    %21 = vector.broadcast %20 : vector<1x16xf32> to vector<64x16xf32>
    %22 = arith.mulf %19, %21 : vector<64x16xf32>
    %c0_8 = arith.constant 0 : index
    %c0_9 = arith.constant 0 : index
    %23 = vector.load %arg4[%c0_8, %c0_9] : memref<1x16xf32, #tpu.memory_space<vmem>>, vector<1x16xf32>
    %24 = vector.broadcast %23 : vector<1x16xf32> to vector<64x16xf32>
    %25 = arith.addf %22, %24 : vector<64x16xf32>
    %c0_10 = arith.constant 0 : index
    %c0_11 = arith.constant 0 : index
    %26 = vector.load %arg5[%c0_10, %c0_11] : memref<16x32xf32, #tpu.memory_space<vmem>>, vector<16x32xf32>
    %cst_12 = arith.constant dense<0.000000e+00> : vector<64x32xf32>
    %27 = tpu.matmul %25, %26, %cst_12 {dimension_numbers = #tpu.dot_dimension_numbers<[1], [0], [0], [1], [0, 0, 1, 1], [], []>, precision = #tpu.contract_precision<fp32>} : vector<64x16xf32>, vector<16x32xf32>, vector<64x32xf32> -> vector<64x32xf32>
    %c0_13 = arith.constant 0 : index
    %c0_14 = arith.constant 0 : index
    %c0_15 = arith.constant 0 : index
    %28 = vector.load %arg1[%c0_13, %c0_14, %c0_15] : memref<1x64x32xf32, #tpu.memory_space<vmem>>, vector<1x64x32xf32>
    %29 = vector.shape_cast %28 : vector<1x64x32xf32> to vector<64x32xf32>
    %cst_16 = arith.constant dense<0.000000e+00> : vector<64xf32>
    %30 = vector.multi_reduction <add>, %29, %cst_16 [1] : vector<64x32xf32> to vector<64xf32>
    %31 = vector.shape_cast %30 : vector<64xf32> to vector<64x1xf32>
    %cst_17 = arith.constant 3.200000e+01 : f32
    %32 = vector.broadcast %cst_17 : f32 to vector<64x1xf32>
    %33 = arith.divf %31, %32 : vector<64x1xf32>
    %34 = vector.broadcast %33 : vector<64x1xf32> to vector<64x32xf32>
    %35 = arith.subf %29, %34 : vector<64x32xf32>
    %36 = arith.mulf %35, %35 : vector<64x32xf32>
    %cst_18 = arith.constant dense<0.000000e+00> : vector<64xf32>
    %37 = vector.multi_reduction <add>, %36, %cst_18 [1] : vector<64x32xf32> to vector<64xf32>
    %38 = vector.shape_cast %37 : vector<64xf32> to vector<64x1xf32>
    %cst_19 = arith.constant 3.200000e+01 : f32
    %39 = vector.broadcast %cst_19 : f32 to vector<64x1xf32>
    %40 = arith.divf %38, %39 : vector<64x1xf32>
    %41 = vector.broadcast %33 : vector<64x1xf32> to vector<64x32xf32>
    %42 = arith.subf %29, %41 : vector<64x32xf32>
    %cst_20 = arith.constant 9.99999974E-6 : f32
    %43 = vector.broadcast %cst_20 : f32 to vector<64x1xf32>
    %44 = arith.addf %40, %43 : vector<64x1xf32>
    %45 = math.rsqrt %44 : vector<64x1xf32>
    %46 = vector.broadcast %45 : vector<64x1xf32> to vector<64x32xf32>
    %47 = arith.mulf %42, %46 : vector<64x32xf32>
    %c0_21 = arith.constant 0 : index
    %c0_22 = arith.constant 0 : index
    %48 = vector.load %arg6[%c0_21, %c0_22] : memref<1x32xf32, #tpu.memory_space<vmem>>, vector<1x32xf32>
    %49 = vector.broadcast %48 : vector<1x32xf32> to vector<64x32xf32>
    %50 = arith.mulf %47, %49 : vector<64x32xf32>
    %c0_23 = arith.constant 0 : index
    %c0_24 = arith.constant 0 : index
    %51 = vector.load %arg7[%c0_23, %c0_24] : memref<1x32xf32, #tpu.memory_space<vmem>>, vector<1x32xf32>
    %52 = vector.broadcast %51 : vector<1x32xf32> to vector<64x32xf32>
    %53 = arith.addf %50, %52 : vector<64x32xf32>
    %54 = arith.negf %27 : vector<64x32xf32>
    %55 = math.exp %54 : vector<64x32xf32>
    %cst_25 = arith.constant 1.000000e+00 : f32
    %56 = vector.broadcast %cst_25 : f32 to vector<64x32xf32>
    %57 = arith.addf %56, %55 : vector<64x32xf32>
    %58 = arith.divf %56, %57 : vector<64x32xf32>
    %59 = arith.mulf %27, %58 : vector<64x32xf32>
    %60 = arith.mulf %53, %59 : vector<64x32xf32>
    %c0_26 = arith.constant 0 : index
    %c0_27 = arith.constant 0 : index
    %61 = vector.load %arg8[%c0_26, %c0_27] : memref<32x16xf32, #tpu.memory_space<vmem>>, vector<32x16xf32>
    %cst_28 = arith.constant dense<0.000000e+00> : vector<64x16xf32>
    %62 = tpu.matmul %60, %61, %cst_28 {dimension_numbers = #tpu.dot_dimension_numbers<[1], [0], [0], [1], [0, 0, 1, 1], [], []>, precision = #tpu.contract_precision<fp32>} : vector<64x32xf32>, vector<32x16xf32>, vector<64x16xf32> -> vector<64x16xf32>
    %63 = arith.addf %62, %1 : vector<64x16xf32>
    %c0_29 = arith.constant 0 : index
    %c0_30 = arith.constant 0 : index
    %c0_31 = arith.constant 0 : index
    %64 = vector.load %arg9[%c0_29, %c0_30, %c0_31] : memref<1x64x16xf32, #tpu.memory_space<vmem>>, vector<1x64x16xf32>
    %65 = vector.shape_cast %64 : vector<1x64x16xf32> to vector<64x16xf32>
    %66 = vector.shape_cast %63 : vector<64x16xf32> to vector<1x64x16xf32>
    tpu.vector_store %arg9[%c0_29, %c0_30, %c0_31], %66 {strides = array<i32>} : memref<1x64x16xf32, #tpu.memory_space<vmem>>, vector<1x64x16xf32>,
    return
  }
  func.func @transform_0(%arg0: i32) -> (i32, i32, i32) {
    %c0_i32 = arith.constant 0 : i32
    %c0_i32_0 = arith.constant 0 : i32
    %c0_i32_1 = arith.constant 0 : i32
    return %arg0, %c0_i32, %c0_i32_0 : i32, i32, i32
  }
  func.func @transform_1(%arg0: i32) -> (i32, i32, i32) {
    %c0_i32 = arith.constant 0 : i32
    %c0_i32_0 = arith.constant 0 : i32
    %c0_i32_1 = arith.constant 0 : i32
    return %arg0, %c0_i32, %c0_i32_0 : i32, i32, i32
  }
  func.func @transform_2(%arg0: i32) -> (i32, i32) {
    %c0_i32 = arith.constant 0 : i32
    %c0_i32_0 = arith.constant 0 : i32
    %c0_i32_1 = arith.constant 0 : i32
    return %c0_i32, %c0_i32_0 : i32, i32
  }
  func.func @transform_3(%arg0: i32) -> (i32, i32) {
    %c0_i32 = arith.constant 0 : i32
    %c0_i32_0 = arith.constant 0 : i32
    %c0_i32_1 = arith.constant 0 : i32
    return %c0_i32, %c0_i32_0 : i32, i32
  }
  func.func @transform_4(%arg0: i32) -> (i32, i32) {
    %c0_i32 = arith.constant 0 : i32
    %c0_i32_0 = arith.constant 0 : i32
    %c0_i32_1 = arith.constant 0 : i32
    return %c0_i32, %c0_i32_0 : i32, i32
  }
  func.func @transform_5(%arg0: i32) -> (i32, i32) {
    %c0_i32 = arith.constant 0 : i32
    %c0_i32_0 = arith.constant 0 : i32
    %c0_i32_1 = arith.constant 0 : i32
    return %c0_i32, %c0_i32_0 : i32, i32
  }
  func.func @transform_6(%arg0: i32) -> (i32, i32) {
    %c0_i32 = arith.constant 0 : i32
    %c0_i32_0 = arith.constant 0 : i32
    %c0_i32_1 = arith.constant 0 : i32
    return %c0_i32, %c0_i32_0 : i32, i32
  }
  func.func @transform_7(%arg0: i32) -> (i32, i32) {
    %c0_i32 = arith.constant 0 : i32
    %c0_i32_0 = arith.constant 0 : i32
    %c0_i32_1 = arith.constant 0 : i32
    return %c0_i32, %c0_i32_0 : i32, i32
  }
  func.func @transform_8(%arg0: i32) -> (i32, i32, i32) {
    %c0_i32 = arith.constant 0 : i32
    %c0_i32_0 = arith.constant 0 : i32
    %c0_i32_1 = arith.constant 0 : i32
    return %arg0, %c0_i32, %c0_i32_0 : i32, i32, i32
  }
}

module attributes {stable_mosaic.version = 11 : i64} {
  func.func @vss_front_kernel(%arg0: i32, %arg1: memref<1x64x16xf32, #tpu.memory_space<vmem>>, %arg2: memref<1x16xf32, #tpu.memory_space<vmem>>, %arg3: memref<1x16xf32, #tpu.memory_space<vmem>>, %arg4: memref<16x32xf32, #tpu.memory_space<vmem>>, %arg5: memref<3x32xf32, #tpu.memory_space<vmem>>, %arg6: memref<1x32xf32, #tpu.memory_space<vmem>>, %arg7: memref<8x16x32xf32, #tpu.memory_space<vmem>>, %arg8: memref<8x16x32xf32, #tpu.memory_space<vmem>>, %arg9: memref<8x1x32xf32, #tpu.memory_space<vmem>>, %arg10: memref<8x1x32xf32, #tpu.memory_space<vmem>>, %arg11: memref<8x1x32xf32, #tpu.memory_space<vmem>>, %arg12: memref<8x16x32xf32, #tpu.memory_space<vmem>>, %arg13: memref<8x1x32xf32, #tpu.memory_space<vmem>>, %arg14: memref<1x8x8x32xf32, #tpu.memory_space<vmem>>) attributes {dimension_semantics = [#tpu.dimension_semantics<parallel>], iteration_bounds = array<i64: 2>, scalar_prefetch = 0 : i64, scratch_operands = 0 : i64, tpu.core_type = #tpu.core_type<tc>, window_params = [{transform_indices = @transform_0, window_bounds = array<i64: 1, 64, 16>}, {pipeline_mode = #tpu.pipeline_mode<synchronous>, transform_indices = @transform_1, window_bounds = array<i64: 1, 16>}, {pipeline_mode = #tpu.pipeline_mode<synchronous>, transform_indices = @transform_2, window_bounds = array<i64: 1, 16>}, {pipeline_mode = #tpu.pipeline_mode<synchronous>, transform_indices = @transform_3, window_bounds = array<i64: 16, 32>}, {pipeline_mode = #tpu.pipeline_mode<synchronous>, transform_indices = @transform_4, window_bounds = array<i64: 3, 32>}, {pipeline_mode = #tpu.pipeline_mode<synchronous>, transform_indices = @transform_5, window_bounds = array<i64: 1, 32>}, {pipeline_mode = #tpu.pipeline_mode<synchronous>, transform_indices = @transform_6, window_bounds = array<i64: 8, 16, 32>}, {pipeline_mode = #tpu.pipeline_mode<synchronous>, transform_indices = @transform_7, window_bounds = array<i64: 8, 16, 32>}, {pipeline_mode = #tpu.pipeline_mode<synchronous>, transform_indices = @transform_8, window_bounds = array<i64: 8, 1, 32>}, {pipeline_mode = #tpu.pipeline_mode<synchronous>, transform_indices = @transform_9, window_bounds = array<i64: 8, 1, 32>}, {pipeline_mode = #tpu.pipeline_mode<synchronous>, transform_indices = @transform_10, window_bounds = array<i64: 8, 1, 32>}, {pipeline_mode = #tpu.pipeline_mode<synchronous>, transform_indices = @transform_11, window_bounds = array<i64: 8, 16, 32>}, {pipeline_mode = #tpu.pipeline_mode<synchronous>, transform_indices = @transform_12, window_bounds = array<i64: 8, 1, 32>}, {transform_indices = @transform_13, window_bounds = array<i64: 1, 8, 8, 32>}]} {
    %c0 = arith.constant 0 : index
    %c0_0 = arith.constant 0 : index
    %c0_1 = arith.constant 0 : index
    %0 = vector.load %arg1[%c0, %c0_0, %c0_1] : memref<1x64x16xf32, #tpu.memory_space<vmem>>, vector<1x64x16xf32>
    %1 = vector.shape_cast %0 : vector<1x64x16xf32> to vector<64x16xf32>
    %cst = arith.constant dense<0.000000e+00> : vector<64xf32>
    %2 = vector.multi_reduction <add>, %1, %cst [1] : vector<64x16xf32> to vector<64xf32>
    %3 = vector.shape_cast %2 : vector<64xf32> to vector<64x1xf32>
    %cst_2 = arith.constant 1.600000e+01 : f32
    %4 = vector.broadcast %cst_2 : f32 to vector<64x1xf32>
    %5 = arith.divf %3, %4 : vector<64x1xf32>
    %6 = vector.broadcast %5 : vector<64x1xf32> to vector<64x16xf32>
    %7 = arith.subf %1, %6 : vector<64x16xf32>
    %8 = arith.mulf %7, %7 : vector<64x16xf32>
    %cst_3 = arith.constant dense<0.000000e+00> : vector<64xf32>
    %9 = vector.multi_reduction <add>, %8, %cst_3 [1] : vector<64x16xf32> to vector<64xf32>
    %10 = vector.shape_cast %9 : vector<64xf32> to vector<64x1xf32>
    %cst_4 = arith.constant 1.600000e+01 : f32
    %11 = vector.broadcast %cst_4 : f32 to vector<64x1xf32>
    %12 = arith.divf %10, %11 : vector<64x1xf32>
    %13 = vector.broadcast %5 : vector<64x1xf32> to vector<64x16xf32>
    %14 = arith.subf %1, %13 : vector<64x16xf32>
    %cst_5 = arith.constant 9.99999997E-7 : f32
    %15 = vector.broadcast %cst_5 : f32 to vector<64x1xf32>
    %16 = arith.addf %12, %15 : vector<64x1xf32>
    %17 = math.rsqrt %16 : vector<64x1xf32>
    %18 = vector.broadcast %17 : vector<64x1xf32> to vector<64x16xf32>
    %19 = arith.mulf %14, %18 : vector<64x16xf32>
    %c0_6 = arith.constant 0 : index
    %c0_7 = arith.constant 0 : index
    %20 = vector.load %arg2[%c0_6, %c0_7] : memref<1x16xf32, #tpu.memory_space<vmem>>, vector<1x16xf32>
    %21 = vector.broadcast %20 : vector<1x16xf32> to vector<64x16xf32>
    %22 = arith.mulf %19, %21 : vector<64x16xf32>
    %c0_8 = arith.constant 0 : index
    %c0_9 = arith.constant 0 : index
    %23 = vector.load %arg3[%c0_8, %c0_9] : memref<1x16xf32, #tpu.memory_space<vmem>>, vector<1x16xf32>
    %24 = vector.broadcast %23 : vector<1x16xf32> to vector<64x16xf32>
    %25 = arith.addf %22, %24 : vector<64x16xf32>
    %c0_10 = arith.constant 0 : index
    %c0_11 = arith.constant 0 : index
    %26 = vector.load %arg4[%c0_10, %c0_11] : memref<16x32xf32, #tpu.memory_space<vmem>>, vector<16x32xf32>
    %cst_12 = arith.constant dense<0.000000e+00> : vector<64x32xf32>
    %27 = tpu.matmul %25, %26, %cst_12 {dimension_numbers = #tpu.dot_dimension_numbers<[1], [0], [0], [1], [0, 0, 1, 1], [], []>, precision = #tpu.contract_precision<fp32>} : vector<64x16xf32>, vector<16x32xf32>, vector<64x32xf32> -> vector<64x32xf32>
    %28 = vector.shape_cast %27 : vector<64x32xf32> to vector<8x8x32xf32>
    %c0_13 = arith.constant 0 : index
    %c0_14 = arith.constant 0 : index
    %29 = vector.load %arg5[%c0_13, %c0_14] : memref<3x32xf32, #tpu.memory_space<vmem>>, vector<3x32xf32>
    %cst_15 = arith.constant 0.000000e+00 : f32
    %30 = vector.broadcast %cst_15 : f32 to vector<8x1x32xf32>
    %31 = vector.extract_strided_slice %28 {offsets = [0, 0, 0], sizes = [8, 7, 32], strides = [1, 1, 1]} : vector<8x8x32xf32> to vector<8x7x32xf32>
    %32 = tpu.concatenate %30, %31 in 1 : vector<8x1x32xf32>, vector<8x7x32xf32> -> vector<8x8x32xf32>
    %33 = vector.extract_strided_slice %28 {offsets = [0, 1, 0], sizes = [8, 7, 32], strides = [1, 1, 1]} : vector<8x8x32xf32> to vector<8x7x32xf32>
    %34 = tpu.concatenate %33, %30 in 1 : vector<8x7x32xf32>, vector<8x1x32xf32> -> vector<8x8x32xf32>
    %35 = vector.extract_strided_slice %29 {offsets = [0, 0], sizes = [1, 32], strides = [1, 1]} : vector<3x32xf32> to vector<1x32xf32>
    %36 = vector.shape_cast %35 : vector<1x32xf32> to vector<1x1x32xf32>
    %37 = vector.broadcast %36 : vector<1x1x32xf32> to vector<8x8x32xf32>
    %38 = arith.mulf %37, %32 : vector<8x8x32xf32>
    %39 = vector.extract_strided_slice %29 {offsets = [1, 0], sizes = [1, 32], strides = [1, 1]} : vector<3x32xf32> to vector<1x32xf32>
    %40 = vector.shape_cast %39 : vector<1x32xf32> to vector<1x1x32xf32>
    %41 = vector.broadcast %40 : vector<1x1x32xf32> to vector<8x8x32xf32>
    %42 = arith.mulf %41, %28 : vector<8x8x32xf32>
    %43 = arith.addf %38, %42 : vector<8x8x32xf32>
    %44 = vector.extract_strided_slice %29 {offsets = [2, 0], sizes = [1, 32], strides = [1, 1]} : vector<3x32xf32> to vector<1x32xf32>
    %45 = vector.shape_cast %44 : vector<1x32xf32> to vector<1x1x32xf32>
    %46 = vector.broadcast %45 : vector<1x1x32xf32> to vector<8x8x32xf32>
    %47 = arith.mulf %46, %34 : vector<8x8x32xf32>
    %48 = arith.addf %43, %47 : vector<8x8x32xf32>
    %c0_16 = arith.constant 0 : index
    %c0_17 = arith.constant 0 : index
    %49 = vector.load %arg6[%c0_16, %c0_17] : memref<1x32xf32, #tpu.memory_space<vmem>>, vector<1x32xf32>
    %50 = vector.shape_cast %49 : vector<1x32xf32> to vector<1x1x32xf32>
    %51 = vector.broadcast %50 : vector<1x1x32xf32> to vector<8x8x32xf32>
    %52 = arith.addf %48, %51 : vector<8x8x32xf32>
    %53 = arith.negf %52 : vector<8x8x32xf32>
    %54 = math.exp %53 : vector<8x8x32xf32>
    %cst_18 = arith.constant 1.000000e+00 : f32
    %55 = vector.broadcast %cst_18 : f32 to vector<8x8x32xf32>
    %56 = arith.addf %55, %54 : vector<8x8x32xf32>
    %57 = arith.divf %55, %56 : vector<8x8x32xf32>
    %58 = arith.mulf %52, %57 : vector<8x8x32xf32>
    %c0_19 = arith.constant 0 : index
    %c0_20 = arith.constant 0 : index
    %c0_21 = arith.constant 0 : index
    %59 = vector.load %arg7[%c0_19, %c0_20, %c0_21] : memref<8x16x32xf32, #tpu.memory_space<vmem>>, vector<8x16x32xf32>
    "tpu.trace_start"() <{level = 10 : i32, message = "vnd,vld->vnl"}> : () -> ()
    %cst_22 = arith.constant dense<0.000000e+00> : vector<8x16x8xf32>
    %60 = tpu.matmul %59, %58, %cst_22 {dimension_numbers = #tpu.dot_dimension_numbers<[2], [2], [1], [1], [0, 0, 0, 1, 1, 1], [0], [0]>, precision = #tpu.contract_precision<fp32>} : vector<8x16x32xf32>, vector<8x8x32xf32>, vector<8x16x8xf32> -> vector<8x16x8xf32>
    "tpu.trace_stop"() : () -> ()
    %c0_23 = arith.constant 0 : index
    %c0_24 = arith.constant 0 : index
    %c0_25 = arith.constant 0 : index
    %61 = vector.load %arg8[%c0_23, %c0_24, %c0_25] : memref<8x16x32xf32, #tpu.memory_space<vmem>>, vector<8x16x32xf32>
    "tpu.trace_start"() <{level = 10 : i32, message = "vnd,vld->vnl"}> : () -> ()
    %cst_26 = arith.constant dense<0.000000e+00> : vector<8x16x8xf32>
    %62 = tpu.matmul %61, %58, %cst_26 {dimension_numbers = #tpu.dot_dimension_numbers<[2], [2], [1], [1], [0, 0, 0, 1, 1, 1], [0], [0]>, precision = #tpu.contract_precision<fp32>} : vector<8x16x32xf32>, vector<8x8x32xf32>, vector<8x16x8xf32> -> vector<8x16x8xf32>
    "tpu.trace_stop"() : () -> ()
    %c0_27 = arith.constant 0 : index
    %c0_28 = arith.constant 0 : index
    %c0_29 = arith.constant 0 : index
    %63 = vector.load %arg9[%c0_27, %c0_28, %c0_29] : memref<8x1x32xf32, #tpu.memory_space<vmem>>, vector<8x1x32xf32>
    %64 = vector.broadcast %63 : vector<8x1x32xf32> to vector<8x8x32xf32>
    %65 = arith.mulf %58, %64 : vector<8x8x32xf32>
    %cst_30 = arith.constant dense<0.000000e+00> : vector<8x8xf32>
    %66 = vector.multi_reduction <add>, %65, %cst_30 [2] : vector<8x8x32xf32> to vector<8x8xf32>
    %67 = vector.shape_cast %66 : vector<8x8xf32> to vector<8x8x1xf32>
    %c0_31 = arith.constant 0 : index
    %c0_32 = arith.constant 0 : index
    %c0_33 = arith.constant 0 : index
    %68 = vector.load %arg10[%c0_31, %c0_32, %c0_33] : memref<8x1x32xf32, #tpu.memory_space<vmem>>, vector<8x1x32xf32>
    %69 = vector.broadcast %67 : vector<8x8x1xf32> to vector<8x8x32xf32>
    %70 = vector.broadcast %68 : vector<8x1x32xf32> to vector<8x8x32xf32>
    %71 = arith.mulf %69, %70 : vector<8x8x32xf32>
    %c0_34 = arith.constant 0 : index
    %c0_35 = arith.constant 0 : index
    %c0_36 = arith.constant 0 : index
    %72 = vector.load %arg11[%c0_34, %c0_35, %c0_36] : memref<8x1x32xf32, #tpu.memory_space<vmem>>, vector<8x1x32xf32>
    %73 = vector.broadcast %72 : vector<8x1x32xf32> to vector<8x8x32xf32>
    %74 = arith.addf %71, %73 : vector<8x8x32xf32>
    %cst_37 = arith.constant 0.000000e+00 : f32
    %75 = vector.broadcast %cst_37 : f32 to vector<8x8x32xf32>
    %76 = arith.maximumf %74, %75 : vector<8x8x32xf32>
    %77 = vector.broadcast %cst_37 : f32 to vector<8x8x32xf32>
    %78 = arith.subf %74, %77 : vector<8x8x32xf32>
    %79 = arith.cmpf one, %78, %78 : vector<8x8x32xf32>
    %80 = vector.broadcast %cst_37 : f32 to vector<8x8x32xf32>
    %81 = arith.addf %74, %80 : vector<8x8x32xf32>
    %82 = math.absf %78 : vector<8x8x32xf32>
    %cst_38 = arith.constant 0.000000e+00 : f32
    %83 = vector.broadcast %cst_38 : f32 to vector<8x8x32xf32>
    %84 = arith.subf %83, %82 : vector<8x8x32xf32>
    %85 = math.exp %84 : vector<8x8x32xf32>
    %86 = math.log1p %85 : vector<8x8x32xf32>
    %87 = arith.addf %76, %86 : vector<8x8x32xf32>
    %88 = arith.select %79, %81, %87 : vector<8x8x32xi1>, vector<8x8x32xf32>
    %89 = arith.mulf %88, %58 : vector<8x8x32xf32>
    %c0_39 = arith.constant 0 : index
    %c0_40 = arith.constant 0 : index
    %c0_41 = arith.constant 0 : index
    %90 = vector.load %arg12[%c0_39, %c0_40, %c0_41] : memref<8x16x32xf32, #tpu.memory_space<vmem>>, vector<8x16x32xf32>
    %c0_42 = arith.constant 0 : index
    %c0_43 = arith.constant 0 : index
    %c0_44 = arith.constant 0 : index
    %91 = vector.load %arg13[%c0_42, %c0_43, %c0_44] : memref<8x1x32xf32, #tpu.memory_space<vmem>>, vector<8x1x32xf32>
    %cst_45 = arith.constant 0.000000e+00 : f32
    %92 = vector.broadcast %cst_45 : f32 to vector<8x16x32xf32>
    %93 = vector.extract_strided_slice %88 {offsets = [0, 0, 0], sizes = [8, 1, 32], strides = [1, 1, 1]} : vector<8x8x32xf32> to vector<8x1x32xf32>
    %94 = vector.extract_strided_slice %60 {offsets = [0, 0, 0], sizes = [8, 16, 1], strides = [1, 1, 1]} : vector<8x16x8xf32> to vector<8x16x1xf32>
    %95 = vector.extract_strided_slice %62 {offsets = [0, 0, 0], sizes = [8, 16, 1], strides = [1, 1, 1]} : vector<8x16x8xf32> to vector<8x16x1xf32>
    %96 = vector.broadcast %93 : vector<8x1x32xf32> to vector<8x16x32xf32>
    %97 = arith.mulf %96, %90 : vector<8x16x32xf32>
    %98 = math.exp %97 : vector<8x16x32xf32>
    %99 = arith.mulf %98, %92 : vector<8x16x32xf32>
    %100 = vector.extract_strided_slice %89 {offsets = [0, 0, 0], sizes = [8, 1, 32], strides = [1, 1, 1]} : vector<8x8x32xf32> to vector<8x1x32xf32>
    %101 = vector.broadcast %100 : vector<8x1x32xf32> to vector<8x16x32xf32>
    %102 = vector.broadcast %94 : vector<8x16x1xf32> to vector<8x16x32xf32>
    %103 = arith.mulf %101, %102 : vector<8x16x32xf32>
    %104 = arith.addf %99, %103 : vector<8x16x32xf32>
    %105 = vector.broadcast %95 : vector<8x16x1xf32> to vector<8x16x32xf32>
    %106 = arith.mulf %104, %105 : vector<8x16x32xf32>
    %cst_46 = arith.constant dense<0.000000e+00> : vector<8x32xf32>
    %107 = vector.multi_reduction <add>, %106, %cst_46 [1] : vector<8x16x32xf32> to vector<8x32xf32>
    %108 = vector.shape_cast %107 : vector<8x32xf32> to vector<8x1x32xf32>
    %109 = vector.extract_strided_slice %58 {offsets = [0, 0, 0], sizes = [8, 1, 32], strides = [1, 1, 1]} : vector<8x8x32xf32> to vector<8x1x32xf32>
    %110 = arith.mulf %91, %109 : vector<8x1x32xf32>
    %111 = arith.addf %108, %110 : vector<8x1x32xf32>
    %112 = vector.extract_strided_slice %88 {offsets = [0, 1, 0], sizes = [8, 1, 32], strides = [1, 1, 1]} : vector<8x8x32xf32> to vector<8x1x32xf32>
    %113 = vector.extract_strided_slice %60 {offsets = [0, 0, 1], sizes = [8, 16, 1], strides = [1, 1, 1]} : vector<8x16x8xf32> to vector<8x16x1xf32>
    %114 = vector.extract_strided_slice %62 {offsets = [0, 0, 1], sizes = [8, 16, 1], strides = [1, 1, 1]} : vector<8x16x8xf32> to vector<8x16x1xf32>
    %115 = vector.broadcast %112 : vector<8x1x32xf32> to vector<8x16x32xf32>
    %116 = arith.mulf %115, %90 : vector<8x16x32xf32>
    %117 = math.exp %116 : vector<8x16x32xf32>
    %118 = arith.mulf %117, %104 : vector<8x16x32xf32>
    %119 = vector.extract_strided_slice %89 {offsets = [0, 1, 0], sizes = [8, 1, 32], strides = [1, 1, 1]} : vector<8x8x32xf32> to vector<8x1x32xf32>
    %120 = vector.broadcast %119 : vector<8x1x32xf32> to vector<8x16x32xf32>
    %121 = vector.broadcast %113 : vector<8x16x1xf32> to vector<8x16x32xf32>
    %122 = arith.mulf %120, %121 : vector<8x16x32xf32>
    %123 = arith.addf %118, %122 : vector<8x16x32xf32>
    %124 = vector.broadcast %114 : vector<8x16x1xf32> to vector<8x16x32xf32>
    %125 = arith.mulf %123, %124 : vector<8x16x32xf32>
    %cst_47 = arith.constant dense<0.000000e+00> : vector<8x32xf32>
    %126 = vector.multi_reduction <add>, %125, %cst_47 [1] : vector<8x16x32xf32> to vector<8x32xf32>
    %127 = vector.shape_cast %126 : vector<8x32xf32> to vector<8x1x32xf32>
    %128 = vector.extract_strided_slice %58 {offsets = [0, 1, 0], sizes = [8, 1, 32], strides = [1, 1, 1]} : vector<8x8x32xf32> to vector<8x1x32xf32>
    %129 = arith.mulf %91, %128 : vector<8x1x32xf32>
    %130 = arith.addf %127, %129 : vector<8x1x32xf32>
    %131 = vector.extract_strided_slice %88 {offsets = [0, 2, 0], sizes = [8, 1, 32], strides = [1, 1, 1]} : vector<8x8x32xf32> to vector<8x1x32xf32>
    %132 = vector.extract_strided_slice %60 {offsets = [0, 0, 2], sizes = [8, 16, 1], strides = [1, 1, 1]} : vector<8x16x8xf32> to vector<8x16x1xf32>
    %133 = vector.extract_strided_slice %62 {offsets = [0, 0, 2], sizes = [8, 16, 1], strides = [1, 1, 1]} : vector<8x16x8xf32> to vector<8x16x1xf32>
    %134 = vector.broadcast %131 : vector<8x1x32xf32> to vector<8x16x32xf32>
    %135 = arith.mulf %134, %90 : vector<8x16x32xf32>
    %136 = math.exp %135 : vector<8x16x32xf32>
    %137 = arith.mulf %136, %123 : vector<8x16x32xf32>
    %138 = vector.extract_strided_slice %89 {offsets = [0, 2, 0], sizes = [8, 1, 32], strides = [1, 1, 1]} : vector<8x8x32xf32> to vector<8x1x32xf32>
    %139 = vector.broadcast %138 : vector<8x1x32xf32> to vector<8x16x32xf32>
    %140 = vector.broadcast %132 : vector<8x16x1xf32> to vector<8x16x32xf32>
    %141 = arith.mulf %139, %140 : vector<8x16x32xf32>
    %142 = arith.addf %137, %141 : vector<8x16x32xf32>
    %143 = vector.broadcast %133 : vector<8x16x1xf32> to vector<8x16x32xf32>
    %144 = arith.mulf %142, %143 : vector<8x16x32xf32>
    %cst_48 = arith.constant dense<0.000000e+00> : vector<8x32xf32>
    %145 = vector.multi_reduction <add>, %144, %cst_48 [1] : vector<8x16x32xf32> to vector<8x32xf32>
    %146 = vector.shape_cast %145 : vector<8x32xf32> to vector<8x1x32xf32>
    %147 = vector.extract_strided_slice %58 {offsets = [0, 2, 0], sizes = [8, 1, 32], strides = [1, 1, 1]} : vector<8x8x32xf32> to vector<8x1x32xf32>
    %148 = arith.mulf %91, %147 : vector<8x1x32xf32>
    %149 = arith.addf %146, %148 : vector<8x1x32xf32>
    %150 = vector.extract_strided_slice %88 {offsets = [0, 3, 0], sizes = [8, 1, 32], strides = [1, 1, 1]} : vector<8x8x32xf32> to vector<8x1x32xf32>
    %151 = vector.extract_strided_slice %60 {offsets = [0, 0, 3], sizes = [8, 16, 1], strides = [1, 1, 1]} : vector<8x16x8xf32> to vector<8x16x1xf32>
    %152 = vector.extract_strided_slice %62 {offsets = [0, 0, 3], sizes = [8, 16, 1], strides = [1, 1, 1]} : vector<8x16x8xf32> to vector<8x16x1xf32>
    %153 = vector.broadcast %150 : vector<8x1x32xf32> to vector<8x16x32xf32>
    %154 = arith.mulf %153, %90 : vector<8x16x32xf32>
    %155 = math.exp %154 : vector<8x16x32xf32>
    %156 = arith.mulf %155, %142 : vector<8x16x32xf32>
    %157 = vector.extract_strided_slice %89 {offsets = [0, 3, 0], sizes = [8, 1, 32], strides = [1, 1, 1]} : vector<8x8x32xf32> to vector<8x1x32xf32>
    %158 = vector.broadcast %157 : vector<8x1x32xf32> to vector<8x16x32xf32>
    %159 = vector.broadcast %151 : vector<8x16x1xf32> to vector<8x16x32xf32>
    %160 = arith.mulf %158, %159 : vector<8x16x32xf32>
    %161 = arith.addf %156, %160 : vector<8x16x32xf32>
    %162 = vector.broadcast %152 : vector<8x16x1xf32> to vector<8x16x32xf32>
    %163 = arith.mulf %161, %162 : vector<8x16x32xf32>
    %cst_49 = arith.constant dense<0.000000e+00> : vector<8x32xf32>
    %164 = vector.multi_reduction <add>, %163, %cst_49 [1] : vector<8x16x32xf32> to vector<8x32xf32>
    %165 = vector.shape_cast %164 : vector<8x32xf32> to vector<8x1x32xf32>
    %166 = vector.extract_strided_slice %58 {offsets = [0, 3, 0], sizes = [8, 1, 32], strides = [1, 1, 1]} : vector<8x8x32xf32> to vector<8x1x32xf32>
    %167 = arith.mulf %91, %166 : vector<8x1x32xf32>
    %168 = arith.addf %165, %167 : vector<8x1x32xf32>
    %169 = vector.extract_strided_slice %88 {offsets = [0, 4, 0], sizes = [8, 1, 32], strides = [1, 1, 1]} : vector<8x8x32xf32> to vector<8x1x32xf32>
    %170 = vector.extract_strided_slice %60 {offsets = [0, 0, 4], sizes = [8, 16, 1], strides = [1, 1, 1]} : vector<8x16x8xf32> to vector<8x16x1xf32>
    %171 = vector.extract_strided_slice %62 {offsets = [0, 0, 4], sizes = [8, 16, 1], strides = [1, 1, 1]} : vector<8x16x8xf32> to vector<8x16x1xf32>
    %172 = vector.broadcast %169 : vector<8x1x32xf32> to vector<8x16x32xf32>
    %173 = arith.mulf %172, %90 : vector<8x16x32xf32>
    %174 = math.exp %173 : vector<8x16x32xf32>
    %175 = arith.mulf %174, %161 : vector<8x16x32xf32>
    %176 = vector.extract_strided_slice %89 {offsets = [0, 4, 0], sizes = [8, 1, 32], strides = [1, 1, 1]} : vector<8x8x32xf32> to vector<8x1x32xf32>
    %177 = vector.broadcast %176 : vector<8x1x32xf32> to vector<8x16x32xf32>
    %178 = vector.broadcast %170 : vector<8x16x1xf32> to vector<8x16x32xf32>
    %179 = arith.mulf %177, %178 : vector<8x16x32xf32>
    %180 = arith.addf %175, %179 : vector<8x16x32xf32>
    %181 = vector.broadcast %171 : vector<8x16x1xf32> to vector<8x16x32xf32>
    %182 = arith.mulf %180, %181 : vector<8x16x32xf32>
    %cst_50 = arith.constant dense<0.000000e+00> : vector<8x32xf32>
    %183 = vector.multi_reduction <add>, %182, %cst_50 [1] : vector<8x16x32xf32> to vector<8x32xf32>
    %184 = vector.shape_cast %183 : vector<8x32xf32> to vector<8x1x32xf32>
    %185 = vector.extract_strided_slice %58 {offsets = [0, 4, 0], sizes = [8, 1, 32], strides = [1, 1, 1]} : vector<8x8x32xf32> to vector<8x1x32xf32>
    %186 = arith.mulf %91, %185 : vector<8x1x32xf32>
    %187 = arith.addf %184, %186 : vector<8x1x32xf32>
    %188 = vector.extract_strided_slice %88 {offsets = [0, 5, 0], sizes = [8, 1, 32], strides = [1, 1, 1]} : vector<8x8x32xf32> to vector<8x1x32xf32>
    %189 = vector.extract_strided_slice %60 {offsets = [0, 0, 5], sizes = [8, 16, 1], strides = [1, 1, 1]} : vector<8x16x8xf32> to vector<8x16x1xf32>
    %190 = vector.extract_strided_slice %62 {offsets = [0, 0, 5], sizes = [8, 16, 1], strides = [1, 1, 1]} : vector<8x16x8xf32> to vector<8x16x1xf32>
    %191 = vector.broadcast %188 : vector<8x1x32xf32> to vector<8x16x32xf32>
    %192 = arith.mulf %191, %90 : vector<8x16x32xf32>
    %193 = math.exp %192 : vector<8x16x32xf32>
    %194 = arith.mulf %193, %180 : vector<8x16x32xf32>
    %195 = vector.extract_strided_slice %89 {offsets = [0, 5, 0], sizes = [8, 1, 32], strides = [1, 1, 1]} : vector<8x8x32xf32> to vector<8x1x32xf32>
    %196 = vector.broadcast %195 : vector<8x1x32xf32> to vector<8x16x32xf32>
    %197 = vector.broadcast %189 : vector<8x16x1xf32> to vector<8x16x32xf32>
    %198 = arith.mulf %196, %197 : vector<8x16x32xf32>
    %199 = arith.addf %194, %198 : vector<8x16x32xf32>
    %200 = vector.broadcast %190 : vector<8x16x1xf32> to vector<8x16x32xf32>
    %201 = arith.mulf %199, %200 : vector<8x16x32xf32>
    %cst_51 = arith.constant dense<0.000000e+00> : vector<8x32xf32>
    %202 = vector.multi_reduction <add>, %201, %cst_51 [1] : vector<8x16x32xf32> to vector<8x32xf32>
    %203 = vector.shape_cast %202 : vector<8x32xf32> to vector<8x1x32xf32>
    %204 = vector.extract_strided_slice %58 {offsets = [0, 5, 0], sizes = [8, 1, 32], strides = [1, 1, 1]} : vector<8x8x32xf32> to vector<8x1x32xf32>
    %205 = arith.mulf %91, %204 : vector<8x1x32xf32>
    %206 = arith.addf %203, %205 : vector<8x1x32xf32>
    %207 = vector.extract_strided_slice %88 {offsets = [0, 6, 0], sizes = [8, 1, 32], strides = [1, 1, 1]} : vector<8x8x32xf32> to vector<8x1x32xf32>
    %208 = vector.extract_strided_slice %60 {offsets = [0, 0, 6], sizes = [8, 16, 1], strides = [1, 1, 1]} : vector<8x16x8xf32> to vector<8x16x1xf32>
    %209 = vector.extract_strided_slice %62 {offsets = [0, 0, 6], sizes = [8, 16, 1], strides = [1, 1, 1]} : vector<8x16x8xf32> to vector<8x16x1xf32>
    %210 = vector.broadcast %207 : vector<8x1x32xf32> to vector<8x16x32xf32>
    %211 = arith.mulf %210, %90 : vector<8x16x32xf32>
    %212 = math.exp %211 : vector<8x16x32xf32>
    %213 = arith.mulf %212, %199 : vector<8x16x32xf32>
    %214 = vector.extract_strided_slice %89 {offsets = [0, 6, 0], sizes = [8, 1, 32], strides = [1, 1, 1]} : vector<8x8x32xf32> to vector<8x1x32xf32>
    %215 = vector.broadcast %214 : vector<8x1x32xf32> to vector<8x16x32xf32>
    %216 = vector.broadcast %208 : vector<8x16x1xf32> to vector<8x16x32xf32>
    %217 = arith.mulf %215, %216 : vector<8x16x32xf32>
    %218 = arith.addf %213, %217 : vector<8x16x32xf32>
    %219 = vector.broadcast %209 : vector<8x16x1xf32> to vector<8x16x32xf32>
    %220 = arith.mulf %218, %219 : vector<8x16x32xf32>
    %cst_52 = arith.constant dense<0.000000e+00> : vector<8x32xf32>
    %221 = vector.multi_reduction <add>, %220, %cst_52 [1] : vector<8x16x32xf32> to vector<8x32xf32>
    %222 = vector.shape_cast %221 : vector<8x32xf32> to vector<8x1x32xf32>
    %223 = vector.extract_strided_slice %58 {offsets = [0, 6, 0], sizes = [8, 1, 32], strides = [1, 1, 1]} : vector<8x8x32xf32> to vector<8x1x32xf32>
    %224 = arith.mulf %91, %223 : vector<8x1x32xf32>
    %225 = arith.addf %222, %224 : vector<8x1x32xf32>
    %226 = vector.extract_strided_slice %88 {offsets = [0, 7, 0], sizes = [8, 1, 32], strides = [1, 1, 1]} : vector<8x8x32xf32> to vector<8x1x32xf32>
    %227 = vector.extract_strided_slice %60 {offsets = [0, 0, 7], sizes = [8, 16, 1], strides = [1, 1, 1]} : vector<8x16x8xf32> to vector<8x16x1xf32>
    %228 = vector.extract_strided_slice %62 {offsets = [0, 0, 7], sizes = [8, 16, 1], strides = [1, 1, 1]} : vector<8x16x8xf32> to vector<8x16x1xf32>
    %229 = vector.broadcast %226 : vector<8x1x32xf32> to vector<8x16x32xf32>
    %230 = arith.mulf %229, %90 : vector<8x16x32xf32>
    %231 = math.exp %230 : vector<8x16x32xf32>
    %232 = arith.mulf %231, %218 : vector<8x16x32xf32>
    %233 = vector.extract_strided_slice %89 {offsets = [0, 7, 0], sizes = [8, 1, 32], strides = [1, 1, 1]} : vector<8x8x32xf32> to vector<8x1x32xf32>
    %234 = vector.broadcast %233 : vector<8x1x32xf32> to vector<8x16x32xf32>
    %235 = vector.broadcast %227 : vector<8x16x1xf32> to vector<8x16x32xf32>
    %236 = arith.mulf %234, %235 : vector<8x16x32xf32>
    %237 = arith.addf %232, %236 : vector<8x16x32xf32>
    %238 = vector.broadcast %228 : vector<8x16x1xf32> to vector<8x16x32xf32>
    %239 = arith.mulf %237, %238 : vector<8x16x32xf32>
    %cst_53 = arith.constant dense<0.000000e+00> : vector<8x32xf32>
    %240 = vector.multi_reduction <add>, %239, %cst_53 [1] : vector<8x16x32xf32> to vector<8x32xf32>
    %241 = vector.shape_cast %240 : vector<8x32xf32> to vector<8x1x32xf32>
    %242 = vector.extract_strided_slice %58 {offsets = [0, 7, 0], sizes = [8, 1, 32], strides = [1, 1, 1]} : vector<8x8x32xf32> to vector<8x1x32xf32>
    %243 = arith.mulf %91, %242 : vector<8x1x32xf32>
    %244 = arith.addf %241, %243 : vector<8x1x32xf32>
    %245 = tpu.concatenate %111, %130, %149, %168, %187, %206, %225, %244 in 1 : vector<8x1x32xf32>, vector<8x1x32xf32>, vector<8x1x32xf32>, vector<8x1x32xf32>, vector<8x1x32xf32>, vector<8x1x32xf32>, vector<8x1x32xf32>, vector<8x1x32xf32> -> vector<8x8x32xf32>
    %c0_54 = arith.constant 0 : index
    %c0_55 = arith.constant 0 : index
    %c0_56 = arith.constant 0 : index
    %c0_57 = arith.constant 0 : index
    %246 = vector.load %arg14[%c0_54, %c0_55, %c0_56, %c0_57] : memref<1x8x8x32xf32, #tpu.memory_space<vmem>>, vector<1x8x8x32xf32>
    %247 = vector.shape_cast %246 : vector<1x8x8x32xf32> to vector<8x8x32xf32>
    %248 = vector.shape_cast %245 : vector<8x8x32xf32> to vector<1x8x8x32xf32>
    tpu.vector_store %arg14[%c0_54, %c0_55, %c0_56, %c0_57], %248 {strides = array<i32>} : memref<1x8x8x32xf32, #tpu.memory_space<vmem>>, vector<1x8x8x32xf32>,
    return
  }
  func.func @transform_0(%arg0: i32) -> (i32, i32, i32) {
    %c0_i32 = arith.constant 0 : i32
    %c0_i32_0 = arith.constant 0 : i32
    %c0_i32_1 = arith.constant 0 : i32
    return %arg0, %c0_i32, %c0_i32_0 : i32, i32, i32
  }
  func.func @transform_1(%arg0: i32) -> (i32, i32) {
    %c0_i32 = arith.constant 0 : i32
    %c0_i32_0 = arith.constant 0 : i32
    %c0_i32_1 = arith.constant 0 : i32
    return %c0_i32, %c0_i32_0 : i32, i32
  }
  func.func @transform_2(%arg0: i32) -> (i32, i32) {
    %c0_i32 = arith.constant 0 : i32
    %c0_i32_0 = arith.constant 0 : i32
    %c0_i32_1 = arith.constant 0 : i32
    return %c0_i32, %c0_i32_0 : i32, i32
  }
  func.func @transform_3(%arg0: i32) -> (i32, i32) {
    %c0_i32 = arith.constant 0 : i32
    %c0_i32_0 = arith.constant 0 : i32
    %c0_i32_1 = arith.constant 0 : i32
    return %c0_i32, %c0_i32_0 : i32, i32
  }
  func.func @transform_4(%arg0: i32) -> (i32, i32) {
    %c0_i32 = arith.constant 0 : i32
    %c0_i32_0 = arith.constant 0 : i32
    %c0_i32_1 = arith.constant 0 : i32
    return %c0_i32, %c0_i32_0 : i32, i32
  }
  func.func @transform_5(%arg0: i32) -> (i32, i32) {
    %c0_i32 = arith.constant 0 : i32
    %c0_i32_0 = arith.constant 0 : i32
    %c0_i32_1 = arith.constant 0 : i32
    return %c0_i32, %c0_i32_0 : i32, i32
  }
  func.func @transform_6(%arg0: i32) -> (i32, i32, i32) {
    %c0_i32 = arith.constant 0 : i32
    %c0_i32_0 = arith.constant 0 : i32
    %c0_i32_1 = arith.constant 0 : i32
    %c0_i32_2 = arith.constant 0 : i32
    return %c0_i32, %c0_i32_0, %c0_i32_1 : i32, i32, i32
  }
  func.func @transform_7(%arg0: i32) -> (i32, i32, i32) {
    %c0_i32 = arith.constant 0 : i32
    %c0_i32_0 = arith.constant 0 : i32
    %c0_i32_1 = arith.constant 0 : i32
    %c0_i32_2 = arith.constant 0 : i32
    return %c0_i32, %c0_i32_0, %c0_i32_1 : i32, i32, i32
  }
  func.func @transform_8(%arg0: i32) -> (i32, i32, i32) {
    %c0_i32 = arith.constant 0 : i32
    %c0_i32_0 = arith.constant 0 : i32
    %c0_i32_1 = arith.constant 0 : i32
    %c0_i32_2 = arith.constant 0 : i32
    return %c0_i32, %c0_i32_0, %c0_i32_1 : i32, i32, i32
  }
  func.func @transform_9(%arg0: i32) -> (i32, i32, i32) {
    %c0_i32 = arith.constant 0 : i32
    %c0_i32_0 = arith.constant 0 : i32
    %c0_i32_1 = arith.constant 0 : i32
    %c0_i32_2 = arith.constant 0 : i32
    return %c0_i32, %c0_i32_0, %c0_i32_1 : i32, i32, i32
  }
  func.func @transform_10(%arg0: i32) -> (i32, i32, i32) {
    %c0_i32 = arith.constant 0 : i32
    %c0_i32_0 = arith.constant 0 : i32
    %c0_i32_1 = arith.constant 0 : i32
    %c0_i32_2 = arith.constant 0 : i32
    return %c0_i32, %c0_i32_0, %c0_i32_1 : i32, i32, i32
  }
  func.func @transform_11(%arg0: i32) -> (i32, i32, i32) {
    %c0_i32 = arith.constant 0 : i32
    %c0_i32_0 = arith.constant 0 : i32
    %c0_i32_1 = arith.constant 0 : i32
    %c0_i32_2 = arith.constant 0 : i32
    return %c0_i32, %c0_i32_0, %c0_i32_1 : i32, i32, i32
  }
  func.func @transform_12(%arg0: i32) -> (i32, i32, i32) {
    %c0_i32 = arith.constant 0 : i32
    %c0_i32_0 = arith.constant 0 : i32
    %c0_i32_1 = arith.constant 0 : i32
    %c0_i32_2 = arith.constant 0 : i32
    return %c0_i32, %c0_i32_0, %c0_i32_1 : i32, i32, i32
  }
  func.func @transform_13(%arg0: i32) -> (i32, i32, i32, i32) {
    %c0_i32 = arith.constant 0 : i32
    %c0_i32_0 = arith.constant 0 : i32
    %c0_i32_1 = arith.constant 0 : i32
    %c0_i32_2 = arith.constant 0 : i32
    return %arg0, %c0_i32, %c0_i32_0, %c0_i32_1 : i32, i32, i32, i32
  }
}

</mosaic_0001>

<bundles_post_ra>
// kernel: vss_block_forward.3
= control target key start
LH: loop header
LB: loop body
LE: loop exit
PB: predicated region body
PF: predicated region fallthrough
CT: control target
= control target key end

     0   :  { %13 = vsyncpa [#allocation3], 0  ;;  %s3038_s0 = inlined_call_operand.vmem [shape: f32[2,64,32], index: 0, kind: input, shape index: {}]   ;;  %s3039_s1 = inlined_call_operand.vmem [shape: f32[2,64,16], index: 1, kind: input, shape index: {}]   ;;  %s3040_s2 = inlined_call_operand.vmem [shape: f32[1,16], index: 2, kind: input, shape index: {}]   ;;  %s3041_s3 = inlined_call_operand.vmem [shape: f32[1,16], index: 3, kind: input, shape index: {}]   ;;  %s3042_s4 = inlined_call_operand.vmem [shape: f32[16,32], index: 4, kind: input, shape index: {}]   ;;  %s3043_s5 = inlined_call_operand.vmem [shape: f32[1,32], index: 5, kind: input, shape index: {}]   ;;  %s3044_s6 = inlined_call_operand.vmem [shape: f32[1,32], index: 6, kind: input, shape index: {}]   ;;  %s3045_s7 = inlined_call_operand.vmem [shape: f32[32,16], index: 7, kind: input, shape index: {}]   ;;  %s3046_s8 = inlined_call_operand.hbm [shape: f32[2,64,16], index: 8, kind: output, shape index: {}]  }
   0x1   :  { %15 = vsyncpa [#allocation3 + $0x1], 0  ;;  %s2115_s27 = smov 0   ;;  %s2117_s28 = smov 0  }
   0x2   :  { %s2119_s29 = smov 0   ;;  %s2121_s30 = smov 0  }
   0x3 LB: > { %s2136_s9 = sadd.s32 4294967295, %s2064_s30   ;;  %s1854_s10 = sadd.s32 4294967294, %s2064_s30   ;;  %s2064_s30 = sphi %s2121_s30, %s3076_s30   ;;  %s2060_s29 = sphi %s2119_s29, %s3075_s29   ;;  %s2056_s28 = sphi %s2117_s28, %s3074_s28   ;;  %s2052_s27 = sphi %s2115_s27, %s3073_s27  }
   0x4   : > { %s2140_s11 = sadd.s32 1, %s2064_s30   ;;  %s206_s12 = sadd.s32 1, %s2060_s29 }
   0x5   : > { %s203_s13 = ssub.s32 %s2064_s30, %s2140_s11  ;;  %p216_p0 = scmp.ne.s32.totalorder %s2060_s29, %s2056_s28 }
   0x6   : > { %p204_p1 = scmp.eq.s32.totalorder %s203_s13, 0  ;;  %p217_p2 = scmp.eq.s32.totalorder %s2136_s9, 1 }
   0x7   : > { %p222_p3 = scmp.ne.s32.totalorder %s2056_s28, %s2052_s27  ;;  %p223_p4 = scmp.eq.s32.totalorder %s1854_s10, 1 }
   0x8   : > { %s2151_s14 = scalar_select %p204_p1, %s2060_s29, %s206_s12  }
   0x9   : > { %p2153_p5 = por %p217_p2, %p216_p0  ;;  %p2157_p6 = por %p223_p4, %p222_p3 }
   0xa   : > { %p1857_p7 = scmp.ge.s32.totalorder %s2064_s30, 1  ;;  %p275_p8 = scmp.lt.s32.totalorder %s2064_s30, 3 }
   0xc   : > { %p276_p9 = pnand %p1857_p7, %p275_p8 }
   0xd   : > { %p314_p10 = scmp.lt.s32.totalorder (!%p276_p9), %s2136_s9, 1  ;;  %s311_s20 = sand.u32 (!%p276_p9), 1, %s2056_s28  }
   0xe   : > { %279 = sbr.rel (%p276_p9) target bundleno = 876 (0x36c), region = 52  ;;  %s1858_s22 = sshll.u32 (!%p276_p9), %s311_s20, 6 }
   0xf   : > { %s2976_s23 = scalar_lea.vmem (!%p276_p9), [#allocation2], %s1858_s22  ;;  %s2022_s22 = scalar_lea.hbm (!%p276_p9), %s3046_s8, 128 }
  0x10   : > { %s1777_s10 = sshll.u32 (!%p276_p9), %s2976_s23, 4  ;;  %s1778_s10 = int_to_ptr.vmem [resolvable:$true] %s1777_s10 }
  0x13   : > { %s2165_s17 = scalar_select %p314_p10, %s2136_s9, 1  ;;  %vm332_vm0 = vcmask 130048   ;;  %v2066_v14 = vmov 16.0   ;;  %vm950_vm2 = vcmask 261120  }
  0x14   : > { %1926 = vrcp.f32 %v2066_v14 }
  0x15   : > { %s1876_s18 = sshll.u32 %s2165_s17, 6 }
  0x16   : > { %s2173_s21 = scalar_lea.vmem %s3039_s1, %s1876_s18  ;;  %s2230_s24 = scalar_lea.vmem %s3038_s0, %s1876_s18 }
  0x17   : > { %v328_v0 = vld [vmem:[%s2173_s21 + $0x20] sm:$0xff]  ;;  %v326_v1 = vld [vmem:[%s2173_s21 + $0x10] sm:$0xff]  ;;  %v329_v6 = vld [vmem:[%s2173_s21 + $0x28] sm:$0xff] }
  0x18   : > { %v324_v2 = vld [vmem:[%s2173_s21] sm:$0xff]  ;;  %v345_v3 = vsel %vm332_vm0, %v328_v0, 0.0  ;;  %v339_v4 = vsel %vm332_vm0, %v326_v1, 0.0  ;;  %v327_v7 = vld [vmem:[%s2173_s21 + $0x18] sm:$0xff]  ;;  %v325_v8 = vld [vmem:[%s2173_s21 + $0x8] sm:$0xff]  ;;  %v348_v9 = vsel %vm332_vm0, %v329_v6, 0.0 }
  0x19   : > { %v333_v5 = vsel %vm332_vm0, %v324_v2, 0.0  ;;  %346 = vadd.xlane.f32.xlu2 %v345_v3  ;;  %340 = vadd.xlane.f32.xlu1 %v339_v4  ;;  %v342_v10 = vsel %vm332_vm0, %v327_v7, 0.0  ;;  %v336_v11 = vsel %vm332_vm0, %v325_v8, 0.0  ;;  %v330_v12 = vld [vmem:[%s2173_s21 + $0x30] sm:$0xff]  ;;  %v2210_v40 = vld [vmem:[%s2173_s21 + $0x38] sm:$0xff]  ;;  %v2239_v53 = vld [vmem:[%s2230_s24] sm:$0xff] }
  0x1a   : > { %334 = vadd.xlane.f32.xlu0 %v333_v5  ;;  %v351_v13 = vsel %vm332_vm0, %v330_v12, 0.0  ;;  %v1927_v15 = vpop.eup %1926  ;;  %v354_v45 = vsel %vm332_vm0, %v2210_v40, 0.0  ;;  %v951_v54 = vsel %vm950_vm2, %v2239_v53, 0.0  ;;  %v2250_v59 = vld [vmem:[%s2230_s24 + $0x18] sm:$0xff]  ;;  %v2256_v62 = vld [vmem:[%s2230_s24 + $0x8] sm:$0xff]  ;;  %v2067_v4 = vmov 32.0  }
  0x1b   : > { %v358_v16 = vmul.f32 16.0, %v1927_v15  ;;  %vm362_vm1 = vweird.f32 %v1927_v15  ;;  %v960_v60 = vsel %vm950_vm2, %v2250_v59, 0.0  ;;  %v954_v63 = vsel %vm950_vm2, %v2256_v62, 0.0  ;;  %v541_v5 = vld [vmem:[%s3042_s4 + $0x8] sm:$0xff] }
  0x1c   : > { %1928 = vrcp.f32 %v2067_v4 }
  0x1d   : > { %v359_v17 = vsub.f32 1.0, %v358_v16 }
  0x1f   : > { %v360_v18 = vmul.f32 %v1927_v15, %v359_v17 }
  0x21   : > { %349 = vadd.xlane.f32.xlu2 %v348_v9  ;;  %343 = vadd.xlane.f32.xlu1 %v342_v10  ;;  %v361_v19 = vadd.f32 %v1927_v15, %v360_v18 }
  0x22   : > { %337 = vadd.xlane.f32.xlu0 %v336_v11 }
  0x23   : > { %v2189_v20 = vsel %vm362_vm1, %v1927_v15, %v361_v19 }
  0x29   : > { %352 = vadd.xlane.f32.xlu1 %v351_v13 }
  0x8c   : > { %v347_v21 = vpop.xlane.xlu2 %346  ;;  %v341_v22 = vpop.xlane.xlu1 %340 }
  0x8d   : > { %v366_v23 = vmul.f32 %v2189_v20, %v341_v22  ;;  %v335_v24 = vpop.xlane.xlu0 %334  ;;  %v368_v36 = vmul.f32 %v2189_v20, %v347_v21 }
  0x8e   : > { %v364_v25 = vmul.f32 %v2189_v20, %v335_v24 }
  0x8f   : > { %v2193_v26 = vsub.f32 %v326_v1, %v366_v23  ;;  %v2216_v43 = vsub.f32 %v328_v0, %v368_v36  ;;  %v2261_v0 = vld [vmem:[%s2230_s24 + $0x20] sm:$0xff] }
  0x90   : > { %v2195_v27 = vsub.f32 %v324_v2, %v364_v25  ;;  %v963_v1 = vsel %vm950_vm2, %v2261_v0, 0.0  ;;  %v2266_v2 = vld [vmem:[%s2230_s24 + $0x30] sm:$0xff] }
  0x91   : > { %v382_v28 = vmul.f32 %v2193_v26, %v2193_v26  ;;  %v384_v51 = vmul.f32 %v2216_v43, %v2216_v43  ;;  %v969_v3 = vsel %vm950_vm2, %v2266_v2, 0.0 }
  0x92   : > { %v380_v29 = vmul.f32 %v2195_v27, %v2195_v27 }
  0x93   : > { %v394_v30 = vsel %vm332_vm0, %v382_v28, 0.0  ;;  %v400_v56 = vsel %vm332_vm0, %v384_v51, 0.0 }
  0x94   : > { %v350_v31 = vpop.xlane.xlu2 %349  ;;  %395 = vadd.xlane.f32.xlu1 %v394_v30  ;;  %v388_v32 = vsel %vm332_vm0, %v380_v29, 0.0  ;;  %v344_v33 = vpop.xlane.xlu1 %343 }
  0x95   : > { %v369_v34 = vmul.f32 %v2189_v20, %v350_v31  ;;  %389 = vadd.xlane.f32.xlu0 %v388_v32  ;;  %v338_v35 = vpop.xlane.xlu0 %337  ;;  %v367_v38 = vmul.f32 %v2189_v20, %v344_v33 }
  0x96   : > { %v365_v37 = vmul.f32 %v2189_v20, %v338_v35 }
  0x97   : > { %v2207_v39 = vsub.f32 %v329_v6, %v369_v34  ;;  %v2218_v44 = vsub.f32 %v327_v7, %v367_v38  ;;  %v580_v6 = vand.u32 4294901760, %v541_v5  ;;  %v540_v7 = vld [vmem:[%s3042_s4] sm:$0xff] }
  0x98   : > { %v2212_v41 = vsub.f32 %v325_v8, %v365_v37  ;;  %v582_v9 = vand.u32 4294901760, %v540_v7 }
  0x99   : > { %v385_v42 = vmul.f32 %v2207_v39, %v2207_v39  ;;  %v383_v52 = vmul.f32 %v2218_v44, %v2218_v44  ;;  %v664_v8 = vsub.f32 %v541_v5, %v580_v6  ;;  %784 = vmatpush.msra.mxu3 %v580_v6  ;;  %581 = vmatpush.msra.mxu0 %v580_v6 }
  0x9a   : > { %v381_v46 = vmul.f32 %v2212_v41, %v2212_v41  ;;  %v670_v11 = vsub.f32 %v540_v7, %v582_v9  ;;  %v2302_v7 = vld [vmem:[%s2230_s24 + $0x10] sm:$0xff] }
  0x9b   : > { %v403_v47 = vsel %vm332_vm0, %v385_v42, 0.0  ;;  %v397_v57 = vsel %vm332_vm0, %v383_v52, 0.0  ;;  %v665_v10 = vand.u32 4294901760, %v664_v8  ;;  %724 = vmatpush.msra.mxu2 %v664_v8  ;;  %786 = vmatpush.msra.mxu3 %v582_v9 }
  0x9c   : > { %404 = vadd.xlane.f32.xlu1 %v403_v47  ;;  %v391_v48 = vsel %vm332_vm0, %v381_v46, 0.0  ;;  %v353_v49 = vpop.xlane.xlu1 %352  ;;  %583 = vmatpush.msra.mxu0 %v582_v9  ;;  %v671_v14 = vand.u32 4294901760, %v670_v11 }
  0x9d   : > { %355 = vadd.xlane.f32.xlu0 %v354_v45  ;;  %392 = vadd.xlane.f32.xlu2 %v391_v48  ;;  %v370_v50 = vmul.f32 %v2189_v20, %v353_v49  ;;  %v666_v13 = vsub.f32 %v664_v8, %v665_v10 }
  0x9e   : > { %727 = vmatpush.msra.mxu2 %v670_v11  ;;  %853 = vmatpush.msrb.mxu0 %v665_v10  ;;  %v672_v17 = vsub.f32 %v670_v11, %v671_v14 }
  0x9f   : > { %v2243_v55 = vsub.f32 %v330_v12, %v370_v50  ;;  %v1929_v12 = vpop.eup %1928  ;;  %v667_v16 = vand.u32 4294901760, %v666_v13 }
  0xa0   : > { %v976_v15 = vmul.f32 32.0, %v1929_v12  ;;  %857 = vmatpush.msrb.mxu0 %v671_v14  ;;  %v673_v19 = vand.u32 4294901760, %v672_v17  ;;  %vm980_vm3 = vweird.f32 %v1929_v12 }
  0xa1   : > { %v386_v58 = vmul.f32 %v2243_v55, %v2243_v55  ;;  %668 = vmatpush.msra.mxu1 %v667_v16 }
  0xa2   : > { %v977_v24 = vsub.f32 1.0, %v976_v15  ;;  %v2314_v15 = vld [vmem:[%s3040_s2] ss:$0 sm:$0xff] }
  0xa3   : > { %v406_v61 = vsel %vm332_vm0, %v386_v58, 0.0  ;;  %674 = vmatpush.msra.mxu1 %v673_v19 }
  0xa4   : > { %952 = vadd.xlane.f32.xlu1 %v951_v54  ;;  %v978_v29 = vmul.f32 %v1929_v12, %v977_v24 }
  0xa5   : > { %401 = vadd.xlane.f32.xlu0 %v400_v56  ;;  %398 = vadd.xlane.f32.xlu2 %v397_v57 }
  0xa6   : > { %906 = vmatpush.msrb.mxu1 %v580_v6  ;;  %v979_v36 = vadd.f32 %v1929_v12, %v978_v29 }
  0xa8   : > { %908 = vmatpush.msrb.mxu1 %v582_v9  ;;  %v2289_v51 = vsel %vm980_vm3, %v1929_v12, %v979_v36 }
  0xac   : > { %961 = vadd.xlane.f32.xlu1 %v960_v60 }
  0xad   : > { %407 = vadd.xlane.f32.xlu2 %v406_v61 }
  0xb5   : > { %955 = vadd.xlane.f32.xlu2 %v954_v63 }
  0xbd   : > { %964 = vadd.xlane.f32.xlu2 %v963_v1 }
  0xc5   : > { %970 = vadd.xlane.f32.xlu2 %v969_v3 }
 0x107   : > { %v396_v18 = vpop.xlane.xlu1 %395 }
 0x108   : > { %v414_v21 = vmul.f32 %v396_v18, %v2189_v20  ;;  %v390_v22 = vpop.xlane.xlu0 %389 }
 0x109   : > { %v412_v23 = vmul.f32 %v390_v22, %v2189_v20 }
 0x10a   : > { %v422_v25 = vadd.f32 1e-06, %v414_v21 }
 0x10b   : > { %v420_v28 = vadd.f32 1e-06, %v412_v23  ;;  %v2330_v23 = vld [vmem:[%s3041_s3] ss:$0 sm:$0xff] }
 0x10c   : > { %1930 = vrsqrt.f32 %v422_v25  ;;  %vm454_vm4 = vweird.f32 %v422_v25 }
 0x10d   : > { %1932 = vrsqrt.f32 %v420_v28  ;;  %vm434_vm8 = vweird.f32 %v420_v28 }
 0x10f   : > { %v405_v30 = vpop.xlane.xlu1 %404 }
 0x110   : > { %v417_v31 = vmul.f32 %v405_v30, %v2189_v20  ;;  %v393_v32 = vpop.xlane.xlu2 %392  ;;  %v356_v33 = vpop.xlane.xlu0 %355 }
 0x111   : > { %v413_v34 = vmul.f32 %v393_v32, %v2189_v20  ;;  %v371_v35 = vmul.f32 %v2189_v20, %v356_v33  ;;  %v2338_v33 = vld [vmem:[%s2230_s24 + $0x28] sm:$0xff] }
 0x112   : > { %v1931_v37 = vpop.eup %1930  ;;  %v2281_v38 = vadd.f32 1e-06, %v417_v31 }
 0x113   : > { %v1933_v42 = vpop.eup %1932  ;;  %v449_v45 = vmul.f32 %v1931_v37, %v422_v25  ;;  %v421_v46 = vadd.f32 1e-06, %v413_v34  ;;  %v2284_v47 = vsub.f32 %v2210_v40, %v371_v35  ;;  %vm455_vm5 = vweird.f32 %v1931_v37  ;;  %v2341_v34 = vld [vmem:[%s2230_s24 + $0x38] sm:$0xff]  ;;  %s1878_s24 = sshll.u32 %s2136_s9, 6  ;;  %s1765_s9 = scalar_lea.sflag [#allocation3], %s311_s20 }
 0x114   : > { %v429_v48 = vmul.f32 %v1933_v42, %v420_v28  ;;  %1934 = vrsqrt.f32 %v2281_v38  ;;  %vm2297_vm6 = vmor %vm454_vm4, %vm455_vm5  ;;  %vm435_vm7 = vweird.f32 %v1933_v42  ;;  %vm484_vm5 = vweird.f32 %v2281_v38  ;;  %s1776_s26 = scalar_lea.hbm %s3046_s8, %s1878_s24 }
 0x115   : > { %v450_v49 = vmul.f32 %v1931_v37, %v449_v45  ;;  %1936 = vrsqrt.f32 %v421_v46  ;;  %v387_v50 = vmul.f32 %v2284_v47, %v2284_v47  ;;  %vm436_vm9 = vmor %vm434_vm8, %vm435_vm7  ;;  %vm444_vm10 = vweird.f32 %v421_v46  ;;  %s1779_s12 = sshll.u32 %s1776_s26, 4  ;;  %s1780_s12 = int_to_ptr.hbm [resolvable:$true] %s1779_s12 }
 0x116   : > { %v430_v52 = vmul.f32 %v1933_v42, %v429_v48  ;;  %s2016_s13 = sshra.s32 %s1780_s12, 4  ;;  %s2017_s13 = int_to_ptr.hbm [resolvable:$true] %s2016_s13 }
 0x117   : > { %v451_v54 = vmul.f32 0.5, %v450_v49  ;;  %v409_v56 = vsel %vm332_vm0, %v387_v50, 0.0  ;;  %v953_v57 = vpop.xlane.xlu1 %952  ;;  %v966_v49 = vsel %vm950_vm2, %v2338_v33, 0.0  ;;  %v972_v50 = vsel %vm950_vm2, %v2341_v34, 0.0  ;;  %s2018_s17 = scalar_lea.hbm %s2017_s13, 64  ;;  %p2023_p0 = scmp.lt.s32.totalorder %s2017_s13, %s3046_s8 }
 0x118   : > { %v431_v40 = vmul.f32 0.5, %v430_v52  ;;  %v399_v58 = vpop.xlane.xlu2 %398  ;;  %410 = vadd.xlane.f32.xlu0 %v409_v56  ;;  %v402_v60 = vpop.xlane.xlu0 %401  ;;  %v982_v61 = vmul.f32 %v2289_v51, %v953_v57  ;;  %p2019_p11 = scmp.ne.s32.totalorder %s2017_s13, %s2018_s17  ;;  %p2024_p1 = scmp.lt.s32.totalorder %s2022_s22, %s2018_s17 }
 0x119   : > { %v452_v63 = vsub.f32 1.5, %v451_v54  ;;  %v415_v1 = vmul.f32 %v399_v58, %v2189_v20  ;;  %v416_v3 = vmul.f32 %v402_v60, %v2189_v20 }
 0x11a   : > { %v2295_v4 = vpop.eup %1934  ;;  %v432_v6 = vsub.f32 1.5, %v431_v40  ;;  %v2307_v11 = vsub.f32 %v2239_v53, %v982_v61  ;;  %v957_v53 = vsel %vm950_vm2, %v2302_v7, 0.0  ;;  %p2020_p12 = pnand %p2019_p11, %p2153_p5  ;;  %p2025_p2 = por %p2024_p1, %p2023_p0 }
 0x11b   : > { %v1937_v8 = vpop.eup %1936  ;;  %v453_v9 = vmul.f32 %v1931_v37, %v452_v63  ;;  %v2304_v10 = vadd.f32 1e-06, %v415_v1  ;;  %v2309_v14 = vadd.f32 1e-06, %v416_v3  ;;  %v479_v18 = vmul.f32 %v2295_v4, %v2281_v38 }
 0x11c   : > { %v433_v12 = vmul.f32 %v1933_v42, %v432_v6  ;;  %v439_v13 = vmul.f32 %v1937_v8, %v421_v46  ;;  %v998_v22 = vmul.f32 %v2307_v11, %v2307_v11  ;;  %vm445_vm11 = vweird.f32 %v1937_v8  ;;  %p2021_p13 = pneg %p2020_p12 }
 0x11d   : > { %v457_v16 = vsel %vm2297_vm6, %v1931_v37, %v453_v9  ;;  %1938 = vrsqrt.f32 %v2304_v10  ;;  %v480_v31 = vmul.f32 %v2295_v4, %v479_v18  ;;  %vm446_vm12 = vmor %vm444_vm10, %vm445_vm11  ;;  %vm464_vm13 = vweird.f32 %v2304_v10 }
 0x11e   : > { %v437_v17 = vsel %vm436_vm9, %v1933_v42, %v433_v12  ;;  %v440_v19 = vmul.f32 %v1937_v8, %v439_v13  ;;  %1940 = vrsqrt.f32 %v2309_v14  ;;  %v510_v24 = vmul.f32 %v457_v16, %v2193_v26  ;;  %p2026_p3 = pnand %p2025_p2, %p2021_p13 }
 0x11f   : > { %v508_v21 = vmul.f32 %v437_v17, %v2195_v27  ;;  %v1006_v30 = vsel %vm950_vm2, %v998_v22, 0.0  ;;  %v481_v52 = vmul.f32 0.5, %v480_v31  ;;  %vm474_vm14 = vweird.f32 %v2309_v14 }
 0x120   : > { %v441_v25 = vmul.f32 0.5, %v440_v19  ;;  %v408_v28 = vpop.xlane.xlu2 %407  ;;  %958 = vadd.xlane.f32.xlu0 %v957_v53  ;;  %1007 = vadd.xlane.f32.xlu1 %v1006_v30  ;;  %v522_v42 = vmul.f32 %v2314_v15, %v510_v24  ;;  %v962_v30 = vpop.xlane.xlu1 %961  ;;  %vm485_vm6 = vweird.f32 %v2295_v4 }
 0x121   : > { %v520_v29 = vmul.f32 %v2314_v15, %v508_v21  ;;  %v418_v27 = vmul.f32 %v408_v28, %v2189_v20  ;;  %v482_v17 = vsub.f32 1.5, %v481_v52  ;;  %vm2410_vm7 = vmor %vm484_vm5, %vm485_vm6 }
 0x122   : > { %v442_v32 = vsub.f32 1.5, %v441_v25  ;;  %v534_v63 = vadd.f32 %v2330_v23, %v522_v42 }
 0x123   : > { %v1939_v26 = vpop.eup %1938  ;;  %v2343_v35 = vadd.f32 1e-06, %v418_v27  ;;  %v532_v36 = vadd.f32 %v2330_v23, %v520_v29 }
 0x124   : > { %v1941_v37 = vpop.eup %1940  ;;  %v443_v45 = vmul.f32 %v1937_v8, %v442_v32  ;;  %v459_v46 = vmul.f32 %v1939_v26, %v2304_v10  ;;  %vm465_vm15 = vweird.f32 %v1939_v26  ;;  %v549_v25 = vsel %vm332_vm0, %v534_v63, 0 }
 0x125   : > { %v469_v48 = vmul.f32 %v1941_v37, %v2309_v14  ;;  %1942 = vrsqrt.f32 %v2343_v35  ;;  %v543_v58 = vsel %vm332_vm0, %v532_v36, 0  ;;  %vm475_vm1 = vweird.f32 %v1941_v37  ;;  %vm2369_vm3 = vmor %vm464_vm13, %vm465_vm15 }
 0x126   : > { %v447_v54 = vsel %vm446_vm12, %v1937_v8, %v443_v45  ;;  %v460_v56 = vmul.f32 %v1939_v26, %v459_v46  ;;  %v2358_v61 = vand.u32 4294901760, %v543_v58  ;;  %vm2379_vm4 = vmor %vm474_vm14, %vm475_vm1  ;;  %v2401_v45 = vand.u32 4294901760, %v549_v25 }
 0x127   : > { %v509_v57 = vmul.f32 %v447_v54, %v2212_v41  ;;  %v470_v40 = vmul.f32 %v1941_v37, %v469_v48  ;;  %vm494_vm8 = vweird.f32 %v2343_v35 }
 0x128   : > { %v461_v60 = vmul.f32 0.5, %v460_v56  ;;  %967 = vadd.xlane.f32.xlu0 %v966_v49  ;;  %v956_v1 = vpop.xlane.xlu2 %955  ;;  %676 = vmatmul.f32.vlgmr.msra.gmra.mxu1 %v2358_v61  ;;  %v585_v8 = vsub.f32 %v543_v58, %v2358_v61  ;;  %v985_v49 = vmul.f32 %v2289_v51, %v962_v30 }
 0x129   : > { %v521_v3 = vmul.f32 %v2314_v15, %v509_v57  ;;  %v471_v5 = vmul.f32 0.5, %v470_v40  ;;  %v983_v6 = vmul.f32 %v2289_v51, %v956_v1  ;;  %973 = vadd.xlane.f32.xlu1 %v972_v50 }
 0x12a   : > { %v462_v41 = vsub.f32 1.5, %v461_v60  ;;  %730 = vmatmul.f32.vlgmr.msra.gmra.mxu2 %v585_v8  ;;  %v586_v21 = vand.u32 4294901760, %v585_v8  ;;  %v2417_v57 = vsub.f32 %v2250_v59, %v985_v49 }
 0x12b   : > { %v2365_v9 = vpop.eup %1942  ;;  %v472_v13 = vsub.f32 1.5, %v471_v5  ;;  %v533_v16 = vadd.f32 %v2330_v23, %v521_v3  ;;  %v2375_v53 = vsub.f32 %v2256_v62, %v983_v6 }
 0x12c   : > { %v463_v18 = vmul.f32 %v1939_v26, %v462_v41  ;;  %v489_v10 = vmul.f32 %v2365_v9, %v2343_v35  ;;  %790 = vmatmul.f32.vlgmr.msra.gmra.mxu3 %v586_v21  ;;  %v587_v29 = vsub.f32 %v585_v8, %v586_v21  ;;  %vm495_vm9 = vweird.f32 %v2365_v9 }
 0x12d   : > { %v473_v22 = vmul.f32 %v1941_v37, %v472_v13  ;;  %v546_v24 = vsel %vm332_vm0, %v533_v16, 0  ;;  %v999_v62 = vmul.f32 %v2375_v53, %v2375_v53  ;;  %v1001_v6 = vmul.f32 %v2417_v57, %v2417_v57  ;;  %vm496_vm10 = vmor %vm494_vm8, %vm495_vm9 }
 0x12e   : > { %v467_v14 = vsel %vm2369_vm3, %v1939_v26, %v463_v18  ;;  %v490_v28 = vmul.f32 %v2365_v9, %v489_v10  ;;  %v2392_v27 = vand.u32 4294901760, %v546_v24  ;;  %v588_v42 = vand.u32 4294901760, %v587_v29 }
 0x12f   : > { %v511_v31 = vmul.f32 %v467_v14, %v2218_v44  ;;  %v477_v32 = vsel %vm2379_vm4, %v1941_v37, %v473_v22  ;;  %v1009_v36 = vsel %vm950_vm2, %v999_v62, 0.0  ;;  %v483_v44 = vmul.f32 %v2295_v4, %v482_v17 }
 0x130   : > { %v593_v26 = vsub.f32 %v546_v24, %v2392_v27  ;;  %1010 = vadd.xlane.f32.xlu0 %v1009_v36  ;;  %v512_v48 = vmul.f32 %v477_v32, %v2216_v43  ;;  %v491_v50 = vmul.f32 0.5, %v490_v28  ;;  %589 = vmatmul.f32.vlgmr.msra.gmra.mxu0 %v588_v42  ;;  %v601_v43 = vsub.f32 %v549_v25, %v2401_v45  ;;  %v965_v1 = vpop.xlane.xlu2 %964 }
 0x131   : > { %v523_v46 = vmul.f32 %v2314_v15, %v511_v31  ;;  %680 = vmatmul.f32.gmra.mxu1 %v2392_v27  ;;  %v487_v38 = vsel %vm2410_vm7, %v2295_v4, %v483_v44  ;;  %v986_v3 = vmul.f32 %v2289_v51, %v965_v1  ;;  %v1015_v12 = vsel %vm950_vm2, %v1001_v6, 0.0 }
 0x132   : > { %v594_v37 = vand.u32 4294901760, %v593_v26  ;;  %735 = vmatmul.f32.gmra.mxu2 %v593_v26  ;;  %v524_v40 = vmul.f32 %v2314_v15, %v512_v48  ;;  %v492_v60 = vsub.f32 1.5, %v491_v50  ;;  %v602_v59 = vand.u32 4294901760, %v601_v43 }
 0x133   : > { %v535_v54 = vadd.f32 %v2330_v23, %v523_v46  ;;  %v513_v41 = vmul.f32 %v487_v38, %v2207_v39  ;;  %v2436_v35 = vsub.f32 %v2261_v0, %v986_v3 }
 0x134   : > { %v595_v56 = vsub.f32 %v593_v26, %v594_v37  ;;  %796 = vmatmul.f32.gmra.mxu3 %v594_v37  ;;  %v536_v4 = vadd.f32 %v2330_v23, %v524_v40  ;;  %v493_v8 = vmul.f32 %v2365_v9, %v492_v60  ;;  %v603_v13 = vsub.f32 %v601_v43, %v602_v59 }
 0x135   : > { %v552_v58 = vsel %vm332_vm0, %v535_v54, 0  ;;  %v525_v39 = vmul.f32 %v2314_v15, %v513_v41  ;;  %v1002_v19 = vmul.f32 %v2436_v35, %v2436_v35 }
 0x136   : > { %v596_v63 = vand.u32 4294901760, %v595_v56  ;;  %v2427_v5 = vand.u32 4294901760, %v552_v58  ;;  %v555_v17 = vsel %vm332_vm0, %v536_v4, 0  ;;  %v497_v18 = vsel %vm496_vm10, %v2365_v9, %v493_v8 }
 0x137   : > { %v604_v0 = vand.u32 4294901760, %v603_v13  ;;  %v2445_v21 = vand.u32 4294901760, %v555_v17  ;;  %v1018_v22 = vsel %vm950_vm2, %v1002_v19, 0.0  ;;  %v514_v24 = vmul.f32 %v497_v18, %v2243_v55 }
 0x138   : > { %597 = vmatmul.f32.gmra.mxu0 %v596_v63  ;;  %1016 = vadd.xlane.f32.xlu0 %v1015_v12  ;;  %v609_v16 = vsub.f32 %v552_v58, %v2427_v5  ;;  %v537_v25 = vadd.f32 %v2330_v23, %v525_v39  ;;  %v971_v62 = vpop.xlane.xlu2 %970 }
 0x139   : > { %684 = vmatmul.f32.gmra.mxu1 %v2401_v45  ;;  %1019 = vadd.xlane.f32.xlu1 %v1018_v22  ;;  %v988_v9 = vmul.f32 %v2289_v51, %v971_v62  ;;  %v617_v28 = vsub.f32 %v555_v17, %v2445_v21  ;;  %v526_v29 = vmul.f32 %v2314_v15, %v514_v24 }
 0x13a   : > { %740 = vmatmul.f32.gmra.mxu2 %v601_v43  ;;  %v610_v10 = vand.u32 4294901760, %v609_v16  ;;  %v558_v30 = vsel %vm332_vm0, %v537_v25, 0 }
 0x13b   : > { %v2456_v31 = vsub.f32 %v2266_v2, %v988_v9  ;;  %v618_v36 = vand.u32 4294901760, %v617_v28  ;;  %v2460_v42 = vand.u32 4294901760, %v558_v30  ;;  %v538_v26 = vadd.f32 %v2330_v23, %v526_v29 }
 0x13c   : > { %802 = vmatmul.f32.gmra.mxu3 %v602_v59  ;;  %v611_v14 = vsub.f32 %v609_v16, %v610_v10 }
 0x13d   : > { %v1004_v55 = vmul.f32 %v2456_v31, %v2456_v31  ;;  %v619_v48 = vsub.f32 %v617_v28, %v618_v36  ;;  %v625_v2 = vsub.f32 %v558_v30, %v2460_v42  ;;  %v561_v49 = vsel %vm332_vm0, %v538_v26, 0 }
 0x13e   : > { %v612_v32 = vand.u32 4294901760, %v611_v14  ;;  %v2467_v37 = vand.u32 4294901760, %v561_v49 }
 0x13f   : > { %v1024_v46 = vsel %vm950_vm2, %v1004_v55, 0.0  ;;  %v620_v44 = vand.u32 4294901760, %v619_v48  ;;  %v626_v50 = vand.u32 4294901760, %v625_v2 }
 0x140   : > { %605 = vmatmul.f32.gmra.mxu0 %v604_v0  ;;  %1025 = vadd.xlane.f32.xlu0 %v1024_v46  ;;  %v633_v54 = vsub.f32 %v561_v49, %v2467_v37 }
 0x141   : > { %688 = vmatmul.f32.gmra.mxu1 %v2427_v5  ;;  %v627_v52 = vsub.f32 %v625_v2, %v626_v50 }
 0x142   : > { %745 = vmatmul.f32.gmra.mxu2 %v609_v16  ;;  %v634_v43 = vand.u32 4294901760, %v633_v54 }
 0x143   : > { %v628_v56 = vand.u32 4294901760, %v627_v52 }
 0x144   : > { %808 = vmatmul.f32.gmra.mxu3 %v610_v10  ;;  %v635_v40 = vsub.f32 %v633_v54, %v634_v43 }
 0x146   : > { %v636_v58 = vand.u32 4294901760, %v635_v40 }
 0x148   : > { %613 = vmatmul.f32.gmra.mxu0 %v612_v32 }
 0x149   : > { %692 = vmatmul.f32.gmra.mxu1 %v2445_v21 }
 0x14a   : > { %750 = vmatmul.f32.gmra.mxu2 %v617_v28 }
 0x14c   : > { %814 = vmatmul.f32.gmra.mxu3 %v618_v36 }
 0x150   : > { %621 = vmatmul.f32.gmra.mxu0 %v620_v44 }
 0x151   : > { %696 = vmatmul.f32.gmra.mxu1 %v2460_v42 }
 0x152   : > { %755 = vmatmul.f32.gmra.mxu2 %v625_v2 }
 0x154   : > { %820 = vmatmul.f32.gmra.mxu3 %v626_v50 }
 0x158   : > { %629 = vmatmul.f32.gmra.mxu0 %v628_v56 }
 0x159   : > { %700 = vmatmul.f32.gmra.mxu1 %v2467_v37 }
 0x15a   : > { %760 = vmatmul.f32.gmra.mxu2 %v633_v54 }
 0x15c   : > { %826 = vmatmul.f32.gmra.mxu3 %v634_v43 }
 0x160   : > { %637 = vmatmul.f32.gmra.mxu0 %v636_v58 }
 0x18b   : > { %v411_v38 = vpop.xlane.xlu0 %410 }
 0x18c   : > { %v419_v60 = vmul.f32 %v411_v38, %v2189_v20 }
 0x18e   : > { %v427_v63 = vadd.f32 1e-06, %v419_v60 }
 0x190   : > { %1944 = vrsqrt.f32 %v427_v63  ;;  %vm504_vm12 = vweird.f32 %v427_v63 }
 0x193   : > { %v959_v1 = vpop.xlane.xlu0 %958  ;;  %v2474_v59 = vpop.xlane.xlu1 %1007 }
 0x194   : > { %v984_v3 = vmul.f32 %v2289_v51, %v959_v1  ;;  %v1030_v56 = vmul.f32 %v2474_v59, %v2289_v51 }
 0x196   : > { %v1945_v6 = vpop.eup %1944  ;;  %v2477_v41 = vsub.f32 %v2302_v7, %v984_v3  ;;  %v2550_v38 = vadd.f32 1e-05, %v1030_v56 }
 0x197   : > { %v499_v4 = vmul.f32 %v1945_v6, %v427_v63  ;;  %vm505_vm11 = vweird.f32 %v1945_v6 }
 0x198   : > { %v1000_v8 = vmul.f32 %v2477_v41, %v2477_v41  ;;  %vm506_vm13 = vmor %vm504_vm12, %vm505_vm11  ;;  %1946 = vrsqrt.f32 %v2550_v38  ;;  %vm1052_vm14 = vweird.f32 %v2550_v38 }
 0x199   : > { %v500_v12 = vmul.f32 %v1945_v6, %v499_v4 }
 0x19a   : > { %v1012_v13 = vsel %vm950_vm2, %v1000_v8, 0.0 }
 0x19b   : > { %v501_v16 = vmul.f32 0.5, %v500_v12  ;;  %v968_v20 = vpop.xlane.xlu0 %967  ;;  %1013 = vadd.xlane.f32.xlu2 %v1012_v13 }
 0x19c   : > { %v987_v39 = vmul.f32 %v2289_v51, %v968_v20  ;;  %v974_v18 = vpop.xlane.xlu1 %973 }
 0x19d   : > { %v502_v17 = vsub.f32 1.5, %v501_v16  ;;  %v989_v7 = vmul.f32 %v2289_v51, %v974_v18 }
 0x19e   : > { %v2484_v19 = vsub.f32 %v2338_v33, %v987_v39  ;;  %v2566_v20 = vpop.eup %1946 }
 0x19f   : > { %v503_v0 = vmul.f32 %v1945_v6, %v502_v17  ;;  %v2488_v10 = vsub.f32 %v2341_v34, %v989_v7  ;;  %v1047_v7 = vmul.f32 %v2566_v20, %v2550_v38  ;;  %vm1053_vm15 = vweird.f32 %v2566_v20 }
 0x1a0   : > { %v1003_v22 = vmul.f32 %v2484_v19, %v2484_v19  ;;  %vm2644_vm4 = vmor %vm1052_vm14, %vm1053_vm15 }
 0x1a1   : > { %v507_v24 = vsel %vm506_vm13, %v1945_v6, %v503_v0  ;;  %v1005_v33 = vmul.f32 %v2488_v10, %v2488_v10 }
 0x1a2   : > { %v515_v25 = vmul.f32 %v507_v24, %v2284_v47  ;;  %v1021_v62 = vsel %vm950_vm2, %v1003_v22, 0.0 }
 0x1a3   : > { %1022 = vadd.xlane.f32.xlu2 %v1021_v62  ;;  %v1027_v14 = vsel %vm950_vm2, %v1005_v33, 0.0  ;;  %v1011_v52 = vpop.xlane.xlu0 %1010 }
 0x1a4   : > { %v527_v9 = vmul.f32 %v2314_v15, %v515_v25  ;;  %1028 = vadd.xlane.f32.xlu1 %v1027_v14  ;;  %v1031_v40 = vmul.f32 %v1011_v52, %v2289_v51  ;;  %v1048_v14 = vmul.f32 %v2566_v20, %v1047_v7 }
 0x1a5   : > { %v677_v15 = vpop.f32.mrf.mxu1 }
 0x1a6   : > { %v539_v34 = vadd.f32 %v2330_v23, %v527_v9  ;;  %v2552_v1 = vadd.f32 1e-05, %v1031_v40 }
 0x1a8   : > { %v564_v28 = vsel %vm332_vm0, %v539_v34, 0  ;;  %1948 = vrsqrt.f32 %v2552_v1  ;;  %vm1062_vm1 = vweird.f32 %v2552_v1 }
 0x1a9   : > { %v640_v29 = vand.u32 4294901760, %v564_v28 }
 0x1ab   : > { %704 = vmatmul.f32.gmra.mxu1 %v640_v29  ;;  %v641_v30 = vsub.f32 %v564_v28, %v640_v29  ;;  %v1017_v60 = vpop.xlane.xlu0 %1016  ;;  %v1328_v28 = vld [vmem:[%s3045_s7 + $0x10] sm:$0xff] }
 0x1ac   : > { %v1020_v3 = vpop.xlane.xlu1 %1019  ;;  %v1033_v6 = vmul.f32 %v1017_v60, %v2289_v51  ;;  %v1326_v60 = vld [vmem:[%s3045_s7] sm:$0xff] }
 0x1ad   : > { %765 = vmatmul.f32.gmra.mxu2 %v641_v30  ;;  %v642_v47 = vand.u32 4294901760, %v641_v30  ;;  %v590_v23 = vpop.f32.mrf.mxu0  ;;  %v731_v43 = vpop.f32.mrf.mxu2  ;;  %v1034_v59 = vmul.f32 %v1020_v3, %v2289_v51 }
 0x1ae   : > { %v2562_v13 = vadd.f32 1e-05, %v1033_v6  ;;  %v2568_v39 = vpop.eup %1948  ;;  %v678_v18 = vadd.f32 %v677_v15, %v590_v23  ;;  %v1327_v23 = vld [vmem:[%s3045_s7 + $0x8] sm:$0xff] }
 0x1af   : > { %832 = vmatmul.f32.gmra.mxu3 %v642_v47  ;;  %v643_v55 = vsub.f32 %v641_v30, %v642_v47  ;;  %v791_v63 = vpop.f32.mrf.mxu3  ;;  %v2564_v16 = vadd.f32 1e-05, %v1034_v59  ;;  %v1057_v22 = vmul.f32 %v2568_v39, %v2552_v1  ;;  %v2592_v47 = vand.u32 4294901760, %v1328_v28 }
 0x1b0   : > { %1950 = vrsqrt.f32 %v2562_v13  ;;  %v732_v25 = vadd.f32 %v731_v43, %v678_v18  ;;  %v2603_v56 = vand.u32 4294901760, %v1327_v23  ;;  %v2616_v18 = vand.u32 4294901760, %v1326_v60 }
 0x1b1   : > { %v644_v32 = vand.u32 4294901760, %v643_v55  ;;  %1952 = vrsqrt.f32 %v2564_v16  ;;  %v1058_v34 = vmul.f32 %v2568_v39, %v1057_v22  ;;  %v1458_v52 = vsub.f32 %v1328_v28, %v2592_v47 }
 0x1b2   : > { %v792_v55 = vadd.f32 %v791_v63, %v732_v25  ;;  %v1464_v59 = vsub.f32 %v1327_v23, %v2603_v56  ;;  %v1470_v28 = vsub.f32 %v1326_v60, %v2616_v18  ;;  %vm1063_vm3 = vweird.f32 %v2568_v39 }
 0x1b3   : > { %645 = vmatmul.f32.gmra.mxu0 %v644_v32  ;;  %910 = vmatmul.f32.vlgmr.msrb.gmra.mxu1 %v2358_v61  ;;  %v1026_v63 = vpop.xlane.xlu0 %1025  ;;  %v1459_v6 = vand.u32 4294901760, %v1458_v52  ;;  %vm2655_vm5 = vmor %vm1062_vm1, %vm1063_vm3  ;;  %vm1082_vm6 = vweird.f32 %v2562_v13  ;;  %vm1092_vm9 = vweird.f32 %v2564_v16 }
 0x1b5   : > { %v736_v12 = vpop.f32.mrf.mxu2 }
 0x1b6   : > { %v2582_v9 = vpop.eup %1950 }
 0x1b7   : > { %v2570_v17 = vpop.f32.mrf.mxu3  ;;  %v1077_v15 = vmul.f32 %v2582_v9, %v2562_v13  ;;  %vm1083_vm7 = vweird.f32 %v2582_v9 }
 0x1b8   : > { %vm2682_vm8 = vmor %vm1082_vm6, %vm1083_vm7 }
 0x1b9   : > { %v1078_v22 = vmul.f32 %v2582_v9, %v1077_v15 }
 0x1bb   : > { %859 = vmatmul.f32.vlgmr.msrb.gmra.mxu0 %v2358_v61  ;;  %914 = vmatmul.f32.gmra.mxu1 %v2392_v27  ;;  %v681_v61 = vpop.f32.mrf.mxu1 }
 0x1bd   : > { %v2580_v62 = vpop.f32.mrf.mxu2 }
 0x1c3   : > { %863 = vmatmul.f32.gmra.mxu0 %v2392_v27  ;;  %918 = vmatmul.f32.gmra.mxu1 %v2401_v45  ;;  %v598_v27 = vpop.f32.mrf.mxu0 }
 0x1c4   : > { %v682_v32 = vadd.f32 %v681_v61, %v598_v27  ;;  %v1059_v61 = vmul.f32 0.5, %v1058_v34  ;;  %v1465_v34 = vand.u32 4294901760, %v1464_v59 }
 0x1c6   : > { %v737_v7 = vadd.f32 %v736_v12, %v682_v32  ;;  %v1036_v12 = vmul.f32 %v1026_v63, %v2289_v51  ;;  %v1466_v15 = vsub.f32 %v1464_v59, %v1465_v34 }
 0x1cb   : > { %867 = vmatmul.f32.gmra.mxu0 %v2401_v45  ;;  %922 = vmatmul.f32.gmra.mxu1 %v2427_v5  ;;  %v2514_v45 = vpop.f32.mrf.mxu1 }
 0x1d3   : > { %871 = vmatmul.f32.gmra.mxu0 %v2427_v5  ;;  %926 = vmatmul.f32.gmra.mxu1 %v2445_v21  ;;  %v2516_v5 = vpop.f32.mrf.mxu0  ;;  %v2518_v36 = vpop.f32.mrf.mxu1 }
 0x1db   : > { %875 = vmatmul.f32.gmra.mxu0 %v2445_v21  ;;  %930 = vmatmul.f32.gmra.mxu1 %v2460_v42  ;;  %v2520_v21 = vpop.f32.mrf.mxu0  ;;  %v2522_v26 = vpop.f32.mrf.mxu1 }
 0x1dc   : > { %v690_v13 = vadd.f32 %v2518_v36, %v2520_v21 }
 0x1e3   : > { %879 = vmatmul.f32.gmra.mxu0 %v2460_v42  ;;  %934 = vmatmul.f32.gmra.mxu1 %v2467_v37  ;;  %v1329_v42 = vld [vmem:[%s3045_s7 + $0x18] sm:$0xff]  ;;  %v2534_v2 = vpop.f32.mrf.mxu0  ;;  %v2538_v44 = vpop.f32.mrf.mxu1 }
 0x1e4   : > { %v2527_v46 = vand.u32 4294901760, %v1329_v42 }
 0x1e6   : > { %1367 = vmatpush.msrb.mxu2 %v2527_v46  ;;  %v2531_v48 = vsub.f32 %v1329_v42, %v2527_v46  ;;  %1586 = vmatpush.msra.mxu1 %v2527_v46  ;;  %v1049_v42 = vmul.f32 0.5, %v1048_v14  ;;  %v1460_v14 = vsub.f32 %v1458_v52, %v1459_v6 }
 0x1e8   : > { %v1453_v49 = vand.u32 4294901760, %v2531_v48  ;;  %1522 = vmatpush.msra.mxu0 %v2531_v48  ;;  %1369 = vmatpush.msrb.mxu2 %v2592_v47  ;;  %v1461_v32 = vand.u32 4294901760, %v1460_v14 }
 0x1e9   : > { %1588 = vmatpush.msra.mxu1 %v2592_v47 }
 0x1ea   : > { %v1454_v50 = vsub.f32 %v2531_v48, %v1453_v49  ;;  %1371 = vmatpush.msrb.mxu2 %v2603_v56  ;;  %1525 = vmatpush.msra.mxu0 %v1458_v52  ;;  %v686_v52 = vadd.f32 %v2514_v45, %v2516_v5 }
 0x1eb   : > { %883 = vmatmul.f32.gmra.mxu0 %v2467_v37  ;;  %938 = vmatmul.f32.gmra.mxu1 %v640_v29  ;;  %v2543_v54 = vpop.f32.mrf.mxu0  ;;  %v2548_v58 = vpop.f32.mrf.mxu1 }
 0x1ec   : > { %v1455_v37 = vand.u32 4294901760, %v1454_v50  ;;  %v2599_v50 = vpop.f32.mrf.mxu3  ;;  %1590 = vmatpush.msra.mxu1 %v2603_v56  ;;  %1373 = vmatpush.msrb.mxu2 %v2616_v18  ;;  %v742_v38 = vadd.f32 %v2580_v62, %v686_v52 }
 0x1ed   : > { %1528 = vmatpush.msra.mxu0 %v1464_v59  ;;  %v2649_v59 = vadd.f32 1e-05, %v1036_v12 }
 0x1ee   : > { %1456 = vmatpush.msrb.mxu3 %v1455_v37  ;;  %1592 = vmatpush.msra.mxu1 %v2616_v18  ;;  %v804_v12 = vadd.f32 %v2599_v50, %v742_v38  ;;  %v698_v38 = vadd.f32 %v2538_v44, %v2543_v54 }
 0x1ef   : > { %1657 = vmatpush.msra.mxu2 %v1453_v49  ;;  %1531 = vmatpush.msra.mxu0 %v1470_v28  ;;  %v1467_v49 = vand.u32 4294901760, %v1466_v15 }
 0x1f0   : > { %1462 = vmatpush.msrb.mxu3 %v1461_v32 }
 0x1f1   : > { %1661 = vmatpush.msra.mxu2 %v1459_v6 }
 0x1f2   : > { %1468 = vmatpush.msrb.mxu3 %v1467_v49 }
 0x1f3   : > { %887 = vmatmul.f32.gmra.mxu0 %v640_v29  ;;  %v2558_v4 = vpop.f32.mrf.mxu0  ;;  %v2589_v29 = vpop.eup %1952  ;;  %1665 = vmatpush.msra.mxu2 %v1465_v34 }
 0x1f4   : > { %v1087_v27 = vmul.f32 %v2589_v29, %v2564_v16  ;;  %vm1093_vm10 = vweird.f32 %v2589_v29 }
 0x1f5   : > { %vm2704_vm11 = vmor %vm1092_vm9, %vm1093_vm10 }
 0x1f6   : > { %v1088_v23 = vmul.f32 %v2589_v29, %v1087_v27 }
 0x1f8   : > { %v1089_v6 = vmul.f32 0.5, %v1088_v23 }
 0x20e   : > { %v1014_v33 = vpop.xlane.xlu2 %1013 }
 0x20f   : > { %v1032_v30 = vmul.f32 %v1014_v33, %v2289_v51  ;;  %v1050_v33 = vsub.f32 1.5, %v1049_v42  ;;  %v1471_v42 = vand.u32 4294901760, %v1470_v28 }
 0x211   : > { %v2612_v3 = vadd.f32 1e-05, %v1032_v30  ;;  %v1060_v30 = vsub.f32 1.5, %v1059_v61  ;;  %v1079_v61 = vmul.f32 0.5, %v1078_v22  ;;  %v1472_v27 = vsub.f32 %v1470_v28, %v1471_v42  ;;  %1669 = vmatpush.msra.mxu2 %v1471_v42 }
 0x213   : > { %1954 = vrsqrt.f32 %v2612_v3  ;;  %v1061_v5 = vmul.f32 %v2568_v39, %v1060_v30  ;;  %vm1072_vm13 = vweird.f32 %v2612_v3 }
 0x215   : > { %v1065_v62 = vsel %vm2655_vm5, %v2568_v39, %v1061_v5 }
 0x216   : > { %v1127_v50 = vmul.f32 %v1065_v62, %v2375_v53  ;;  %v1023_v53 = vpop.xlane.xlu2 %1022 }
 0x219   : > { %v2662_v34 = vpop.eup %1954 }
 0x21a   : > { %v1067_v39 = vmul.f32 %v2662_v34, %v2612_v3  ;;  %vm1073_vm15 = vweird.f32 %v2662_v34 }
 0x228   : > { %v2560_v8 = vpop.f32.mrf.mxu1 }
 0x230   : > { %v2576_v0 = vpop.f32.mrf.mxu0  ;;  %v911_v24 = vpop.f32.mrf.mxu1 }
 0x238   : > { %v860_v37 = vpop.f32.mrf.mxu0  ;;  %v915_v40 = vpop.f32.mrf.mxu1 }
 0x239   : > { %v861_v43 = vadd.f32 %v860_v37, %v792_v55  ;;  %v2625_v55 = vpop.f32.mrf.mxu2  ;;  %v798_v37 = vadd.f32 %v2570_v17, %v737_v7  ;;  %v809_v17 = vpop.f32.mrf.mxu3  ;;  %v1473_v7 = vand.u32 4294901760, %v1472_v27  ;;  %v2720_v27 = vld [vmem:[%s3044_s6] ss:$0 sm:$0xff] }
 0x23a   : > { %v747_v42 = vadd.f32 %v2625_v55, %v690_v13  ;;  %v1068_v55 = vmul.f32 %v2662_v34, %v1067_v39 }
 0x23b   : > { %v2620_v25 = vadd.f32 %v911_v24, %v861_v43  ;;  %v1051_v43 = vmul.f32 %v2566_v20, %v1050_v33  ;;  %v1080_v33 = vsub.f32 1.5, %v1079_v61  ;;  %1474 = vmatpush.msrb.mxu3 %v1473_v7 }
 0x23c   : > { %v810_v5 = vadd.f32 %v809_v17, %v747_v42 }
 0x23d   : > { %v1863_v24 = vmul.f32 -1.442695, %v2620_v25  ;;  %v1055_v30 = vsel %vm2644_vm4, %v2566_v20, %v1051_v43  ;;  %1716 = vmatpush.msra.mxu3 %v2527_v46  ;;  %v1081_v20 = vmul.f32 %v2582_v9, %v1080_v33  ;;  %vm2767_vm4 = vmor %vm1072_vm13, %vm1073_vm15 }
 0x23e   : > { %v1126_v21 = vmul.f32 %v1055_v30, %v2307_v11  ;;  %v1029_v11 = vpop.xlane.xlu1 %1028 }
 0x23f   : > { %1956 = vpow2.f32 %v1863_v24  ;;  %1718 = vmatpush.msra.mxu3 %v2592_v47  ;;  %v2696_v47 = vld [vmem:[%s3043_s5] ss:$0 sm:$0xff] }
 0x240   : > { %v864_v48 = vpop.f32.mrf.mxu0  ;;  %v919_v63 = vpop.f32.mrf.mxu1  ;;  %1958 = vrsqrt.f32 %v2649_v59  ;;  %v1139_v43 = vmul.f32 %v2696_v47, %v1127_v50 }
 0x241   : > { %v865_v60 = vadd.f32 %v864_v48, %v798_v37  ;;  %v751_v24 = vpop.f32.mrf.mxu2  ;;  %1720 = vmatpush.msra.mxu3 %v2603_v56  ;;  %v1085_v37 = vsel %vm2682_vm8, %v2582_v9, %v1081_v20  ;;  %v694_v56 = vadd.f32 %v2522_v26, %v2534_v2  ;;  %v815_v48 = vpop.f32.mrf.mxu3  ;;  %v1138_v9 = vmul.f32 %v2696_v47, %v1126_v21 }
 0x242   : > { %v1035_v2 = vmul.f32 %v1023_v53, %v2289_v51  ;;  %v2739_v17 = vadd.f32 %v2720_v27, %v1139_v43 }
 0x243   : > { %v2660_v14 = vadd.f32 %v915_v40, %v865_v60  ;;  %v1090_v40 = vsub.f32 1.5, %v1089_v6  ;;  %1722 = vmatpush.msra.mxu3 %v2616_v18  ;;  %v752_v22 = vadd.f32 %v751_v24, %v694_v56 }
 0x245   : > { %v1957_v28 = vpop.eup %1956  ;;  %v1864_v1 = vmul.f32 -1.442695, %v2660_v14  ;;  %v1091_v16 = vmul.f32 %v2589_v29, %v1090_v40  ;;  %v2742_v40 = vadd.f32 1e-05, %v1035_v2  ;;  %v816_v24 = vadd.f32 %v815_v48, %v752_v22 }
 0x246   : > { %v2675_v23 = vadd.f32 1.0, %v1957_v28  ;;  %v2711_v61 = vpop.eup %1958  ;;  %v1150_v28 = vadd.f32 %v2720_v27, %v1138_v9 }
 0x247   : > { %1960 = vpow2.f32 %v1864_v1  ;;  %v1095_v26 = vsel %vm2704_vm11, %v2589_v29, %v1091_v16  ;;  %v1107_v6 = vmul.f32 %v2711_v61, %v2649_v59  ;;  %vm1102_vm11 = vweird.f32 %v2742_v40 }
 0x248   : > { %1962 = vrcp.f32 %v2675_v23  ;;  %v868_v36 = vpop.f32.mrf.mxu0  ;;  %v923_v15 = vpop.f32.mrf.mxu1  ;;  %v1130_v62 = vmul.f32 %v1095_v26, %v2436_v35  ;;  %v1199_v13 = vand.u32 2147483647, %v2675_v23  ;;  %vm1195_vm14 = vweird.f32 %v2675_v23 }
 0x249   : > { %v869_v32 = vadd.f32 %v868_v36, %v804_v12  ;;  %v756_v29 = vpop.f32.mrf.mxu2  ;;  %v1201_v12 = vand.u32 2147483648, %v2675_v23  ;;  %v1108_v39 = vmul.f32 %v2711_v61, %v1107_v6  ;;  %v821_v42 = vpop.f32.mrf.mxu3 }
 0x24a   : > { %v757_v46 = vadd.f32 %v756_v29, %v698_v38  ;;  %vm1200_vm3 = vcmp.eq.f32.partialorder %v1199_v13, 8.507059e+37  ;;  %v2779_v2 = vmul.f32 %v2696_v47, %v1130_v62 }
 0x24b   : > { %v2708_v52 = vadd.f32 %v919_v63, %v869_v32  ;;  %v1129_v63 = vmul.f32 %v1085_v37, %v2417_v57  ;;  %v1069_v57 = vmul.f32 0.5, %v1068_v55 }
 0x24c   : > { %v822_v22 = vadd.f32 %v821_v42, %v757_v46 }
 0x24d   : > { %v1961_v49 = vpop.eup %1960  ;;  %v1865_v18 = vmul.f32 -1.442695, %v2708_v52  ;;  %v1141_v44 = vmul.f32 %v2696_v47, %v1129_v63  ;;  %v1070_v36 = vsub.f32 1.5, %v1069_v57  ;;  %v2785_v57 = vmul.f32 0.5, %v1108_v39 }
 0x24e   : > { %v1963_v60 = vpop.eup %1962  ;;  %v2729_v45 = vadd.f32 1.0, %v1961_v49 }
 0x24f   : > { %v1191_v7 = vmul.f32 %v1963_v60, %v2675_v23  ;;  %1964 = vpow2.f32 %v1865_v18  ;;  %vm1196_vm12 = vweird.f32 %v1963_v60  ;;  %v702_v23 = vadd.f32 %v2548_v58, %v2558_v4 }
 0x250   : > { %1966 = vrcp.f32 %v2729_v45  ;;  %v872_v33 = vpop.f32.mrf.mxu0  ;;  %v927_v21 = vpop.f32.mrf.mxu1  ;;  %vm1197_vm1 = vmor %vm1195_vm14, %vm1196_vm12  ;;  %v1071_v48 = vmul.f32 %v2662_v34, %v1070_v36  ;;  %v1037_v4 = vmul.f32 %v1029_v11, %v2289_v51  ;;  %v1214_v63 = vand.u32 2147483647, %v2729_v45 }
 0x251   : > { %v1192_v30 = vsub.f32 1.0, %v1191_v7  ;;  %v873_v1 = vadd.f32 %v872_v33, %v810_v5  ;;  %1968 = vrsqrt.f32 %v2742_v40  ;;  %v1216_v26 = vand.u32 2147483648, %v2729_v45  ;;  %v761_v3 = vpop.f32.mrf.mxu2 }
 0x252   : > { %v762_v38 = vadd.f32 %v761_v3, %v702_v23  ;;  %v1075_v51 = vsel %vm2767_vm4, %v2662_v34, %v1071_v48  ;;  %vm1210_vm6 = vweird.f32 %v2729_v45  ;;  %v2793_v62 = vadd.f32 1e-05, %v1037_v4 }
 0x253   : > { %v1193_v54 = vmul.f32 %v1963_v60, %v1192_v30  ;;  %v2747_v20 = vadd.f32 %v923_v15, %v873_v1  ;;  %v1202_v15 = vor.u32 1.1754944e-38, %v1201_v12  ;;  %v1217_v12 = vor.u32 1.1754944e-38, %v1216_v26 }
 0x254   : > { %vm1215_vm8 = vcmp.eq.f32.partialorder %v1214_v63, 8.507059e+37  ;;  %v1128_v46 = vmul.f32 %v1075_v51, %v2477_v41  ;;  %vm1113_vm4 = vweird.f32 %v2711_v61 }
 0x255   : > { %v1965_v50 = vpop.eup %1964  ;;  %v1194_v35 = vadd.f32 %v1963_v60, %v1193_v54  ;;  %v1866_v32 = vmul.f32 -1.442695, %v2747_v20 }
 0x256   : > { %v1967_v16 = vpop.eup %1966  ;;  %v2756_v37 = vadd.f32 1.0, %v1965_v50  ;;  %v1140_v48 = vmul.f32 %v2696_v47, %v1128_v46 }
 0x257   : > { %v1198_v53 = vsel %vm1197_vm1, %v1963_v60, %v1194_v35  ;;  %v1206_v56 = vmul.f32 %v1967_v16, %v2729_v45  ;;  %1970 = vpow2.f32 %v1866_v32  ;;  %v2773_v60 = vadd.f32 %v2720_v27, %v1141_v44  ;;  %v827_v45 = vpop.f32.mrf.mxu3 }
 0x258   : > { %v1203_v55 = vsel %vm1200_vm3, %v1202_v15, %v1198_v53  ;;  %1972 = vrcp.f32 %v2756_v37  ;;  %v876_v49 = vpop.f32.mrf.mxu0  ;;  %vm1211_vm5 = vweird.f32 %v1967_v16  ;;  %v931_v54 = vpop.f32.mrf.mxu1  ;;  %v828_v50 = vadd.f32 %v827_v45, %v762_v38 }
 0x259   : > { %v1310_v43 = vmul.f32 %v1203_v55, %v2620_v25  ;;  %v1207_v18 = vsub.f32 1.0, %v1206_v56  ;;  %v877_v58 = vadd.f32 %v876_v49, %v816_v24  ;;  %v2783_v25 = vpop.eup %1968  ;;  %vm1212_vm7 = vmor %vm1210_vm6, %vm1211_vm5  ;;  %v1229_v42 = vand.u32 2147483647, %v2756_v37  ;;  %v766_v63 = vpop.f32.mrf.mxu2 }
 0x25a   : > { %v1097_v39 = vmul.f32 %v2783_v25, %v2742_v40  ;;  %v1231_v41 = vand.u32 2147483648, %v2756_v37  ;;  %vm1225_vm10 = vweird.f32 %v2756_v37  ;;  %vm1103_vm15 = vweird.f32 %v2783_v25 }
 0x25b   : > { %v1318_v5 = vmul.f32 %v1310_v43, %v1150_v28  ;;  %v1208_v6 = vmul.f32 %v1967_v16, %v1207_v18  ;;  %v2781_v7 = vadd.f32 %v927_v21, %v877_v58  ;;  %vm1230_vm13 = vcmp.eq.f32.partialorder %v1229_v42, 8.507059e+37 }
 0x25c   : > { %v1098_v23 = vmul.f32 %v2783_v25, %v1097_v39  ;;  %v1232_v58 = vor.u32 1.1754944e-38, %v1231_v41  ;;  %vm1112_vm3 = vweird.f32 %v2649_v59 }
 0x25d   : > { %v1971_v33 = vpop.eup %1970  ;;  %v1209_v29 = vadd.f32 %v1967_v16, %v1208_v6  ;;  %v1867_v28 = vmul.f32 -1.442695, %v2781_v7  ;;  %v1331_v30 = vsel %vm950_vm2, %v1318_v5, 0 }
 0x25e   : > { %v1973_v1 = vpop.eup %1972  ;;  %v2795_v44 = vadd.f32 1.0, %v1971_v33  ;;  %v2797_v13 = vand.u32 4294901760, %v1331_v30  ;;  %v1099_v5 = vmul.f32 0.5, %v1098_v23  ;;  %v1152_v33 = vadd.f32 %v2720_v27, %v1140_v48 }
 0x25f   : > { %v1213_v24 = vsel %vm1212_vm7, %v1967_v16, %v1209_v29  ;;  %v1221_v34 = vmul.f32 %v1973_v1, %v2756_v37  ;;  %1974 = vpow2.f32 %v1867_v28  ;;  %vm1226_vm9 = vweird.f32 %v1973_v1  ;;  %vm2858_vm7 = vmor %vm1102_vm11, %vm1103_vm15 }
 0x260   : > { %v1218_v36 = vsel %vm1215_vm8, %v1217_v12, %v1213_v24  ;;  %1976 = vrcp.f32 %v2795_v44  ;;  %v880_v21 = vpop.f32.mrf.mxu0  ;;  %1476 = vmatmul.f32.vlgmr.msrb.gmra.mxu3 %v2797_v13  ;;  %v1375_v15 = vsub.f32 %v1331_v30, %v2797_v13  ;;  %vm1227_vm12 = vmor %vm1225_vm10, %vm1226_vm9  ;;  %v935_v38 = vpop.f32.mrf.mxu1  ;;  %v1246_v12 = vand.u32 2147483648, %v2795_v44 }
 0x261   : > { %v1311_v35 = vmul.f32 %v1218_v36, %v2660_v14  ;;  %v1222_v32 = vsub.f32 1.0, %v1221_v34  ;;  %v881_v16 = vadd.f32 %v880_v21, %v822_v22  ;;  %1978 = vrsqrt.f32 %v2793_v62  ;;  %v833_v34 = vpop.f32.mrf.mxu3 }
 0x262   : > { %v706_v14 = vadd.f32 %v2560_v8, %v2576_v0  ;;  %1534 = vmatmul.f32.vlgmr.msra.gmra.mxu0 %v1375_v15  ;;  %v1376_v55 = vand.u32 4294901760, %v1375_v15  ;;  %v1100_v36 = vsub.f32 1.5, %v1099_v5  ;;  %vm1240_vm1 = vweird.f32 %v2795_v44 }
 0x263   : > { %v1319_v11 = vmul.f32 %v1311_v35, %v2739_v17  ;;  %v1223_v53 = vmul.f32 %v1973_v1, %v1222_v32  ;;  %v2811_v56 = vadd.f32 %v931_v54, %v881_v16  ;;  %v1247_v41 = vor.u32 1.1754944e-38, %v1246_v12 }
 0x264   : > { %1596 = vmatmul.f32.vlgmr.msra.gmra.mxu1 %v1376_v55  ;;  %v1377_v8 = vsub.f32 %v1375_v15, %v1376_v55  ;;  %v767_v6 = vadd.f32 %v766_v63, %v706_v14  ;;  %v1101_v14 = vmul.f32 %v2783_v25, %v1100_v36 }
 0x265   : > { %v1975_v49 = vpop.eup %1974  ;;  %v1224_v9 = vadd.f32 %v1973_v1, %v1223_v53  ;;  %v1868_v43 = vmul.f32 -1.442695, %v2811_v56  ;;  %v1334_v17 = vsel %vm950_vm2, %v1319_v11, 0 }
 0x266   : > { %v1977_v18 = vpop.eup %1976  ;;  %v2821_v4 = vadd.f32 1.0, %v1975_v49  ;;  %v2823_v0 = vand.u32 4294901760, %v1334_v17  ;;  %v1378_v54 = vand.u32 4294901760, %v1377_v8  ;;  %v834_v21 = vadd.f32 %v833_v34, %v767_v6 }
 0x267   : > { %v1228_v26 = vsel %vm1227_vm12, %v1973_v1, %v1224_v9  ;;  %v1236_v37 = vmul.f32 %v1977_v18, %v2795_v44  ;;  %1980 = vpow2.f32 %v1868_v43  ;;  %v2826_v3 = vpop.eup %1978  ;;  %v1244_v1 = vand.u32 2147483647, %v2795_v44  ;;  %vm2891_vm12 = vmor %vm1112_vm3, %vm1113_vm4 }
 0x268   : > { %v1233_v22 = vsel %vm1230_vm13, %v1232_v58, %v1228_v26  ;;  %1982 = vrcp.f32 %v2821_v4  ;;  %v884_v51 = vpop.f32.mrf.mxu0  ;;  %1480 = vmatmul.f32.gmra.mxu3 %v2823_v0  ;;  %v1383_v24 = vsub.f32 %v1334_v17, %v2823_v0  ;;  %vm1241_vm14 = vweird.f32 %v1977_v18  ;;  %1379 = vmatmul.f32.vlgmr.msrb.gmra.mxu2 %v1378_v54  ;;  %v939_v26 = vpop.f32.mrf.mxu1 }
 0x269   : > { %v1312_v29 = vmul.f32 %v1233_v22, %v2708_v52  ;;  %v1237_v28 = vsub.f32 1.0, %v1236_v37  ;;  %v885_v30 = vadd.f32 %v884_v51, %v828_v50  ;;  %vm1242_vm5 = vmor %vm1240_vm1, %vm1241_vm14  ;;  %vm1245_vm6 = vcmp.eq.f32.partialorder %v1244_v1, 8.507059e+37 }
 0x26a   : > { %1539 = vmatmul.f32.gmra.mxu0 %v1383_v24  ;;  %v1384_v52 = vand.u32 4294901760, %v1383_v24  ;;  %v1117_v48 = vmul.f32 %v2826_v3, %v2793_v62  ;;  %v1154_v17 = vadd.f32 %v2720_v27, %v2779_v2  ;;  %v1259_v8 = vand.u32 2147483647, %v2821_v4 }
 0x26b   : > { %v1320_v45 = vmul.f32 %v1312_v29, %v1152_v33  ;;  %v1238_v46 = vmul.f32 %v1977_v18, %v1237_v28  ;;  %v2835_v39 = vadd.f32 %v935_v38, %v885_v30  ;;  %v1261_v63 = vand.u32 2147483648, %v2821_v4 }
 0x26c   : > { %1602 = vmatmul.f32.gmra.mxu1 %v1384_v52  ;;  %v1385_v11 = vsub.f32 %v1383_v24, %v1384_v52  ;;  %v1105_v2 = vsel %vm2858_vm7, %v2783_v25, %v1101_v14  ;;  %v1118_v38 = vmul.f32 %v2826_v3, %v1117_v48  ;;  %vm1255_vm9 = vweird.f32 %v2821_v4 }
 0x26d   : > { %v1981_v50 = vpop.eup %1980  ;;  %v1239_v35 = vadd.f32 %v1977_v18, %v1238_v46  ;;  %v1869_v32 = vmul.f32 -1.442695, %v2835_v39  ;;  %v1337_v16 = vsel %vm950_vm2, %v1320_v45, 0  ;;  %vm1260_vm11 = vcmp.eq.f32.partialorder %v1259_v8, 8.507059e+37 }
 0x26e   : > { %v1983_v42 = vpop.eup %1982  ;;  %v2844_v15 = vadd.f32 1.0, %v1981_v50  ;;  %v2846_v53 = vand.u32 4294901760, %v1337_v16  ;;  %v1386_v37 = vand.u32 4294901760, %v1385_v11  ;;  %v1119_v34 = vmul.f32 0.5, %v1118_v38 }
 0x26f   : > { %v1243_v23 = vsel %vm1242_vm5, %v1977_v18, %v1239_v35  ;;  %v1251_v44 = vmul.f32 %v1983_v42, %v2821_v4  ;;  %1984 = vpow2.f32 %v1869_v32  ;;  %vm1256_vm8 = vweird.f32 %v1983_v42 }
 0x270   : > { %v1248_v55 = vsel %vm1245_vm6, %v1247_v41, %v1243_v23  ;;  %1986 = vrcp.f32 %v2844_v15  ;;  %v888_v49 = vpop.f32.mrf.mxu0  ;;  %1484 = vmatmul.f32.gmra.mxu3 %v2846_v53  ;;  %v1391_v5 = vsub.f32 %v1337_v16, %v2846_v53  ;;  %1387 = vmatmul.f32.gmra.mxu2 %v1386_v37  ;;  %vm1257_vm10 = vmor %vm1255_vm9, %vm1256_vm8  ;;  %v1131_v36 = vmul.f32 %v1105_v2, %v2484_v19 }
 0x271   : > { %v1313_v43 = vmul.f32 %v1248_v55, %v2747_v20  ;;  %v1252_v18 = vsub.f32 1.0, %v1251_v44  ;;  %v889_v58 = vadd.f32 %v888_v49, %v834_v21  ;;  %v1110_v20 = vsub.f32 1.5, %v2785_v57 }
 0x272   : > { %1544 = vmatmul.f32.gmra.mxu0 %v1391_v5  ;;  %v1392_v51 = vand.u32 4294901760, %v1391_v5  ;;  %v1262_v57 = vor.u32 1.1754944e-38, %v1261_v63  ;;  %v1276_v35 = vand.u32 2147483648, %v2844_v15  ;;  %v1274_v41 = vand.u32 2147483647, %v2844_v15 }
 0x273   : > { %v1321_v40 = vmul.f32 %v1313_v43, %v2773_v60  ;;  %v1253_v6 = vmul.f32 %v1983_v42, %v1252_v18  ;;  %v2869_v22 = vadd.f32 %v939_v26, %v889_v58  ;;  %v1111_v4 = vmul.f32 %v2711_v61, %v1110_v20 }
 0x274   : > { %1608 = vmatmul.f32.gmra.mxu1 %v1392_v51  ;;  %v1393_v25 = vsub.f32 %v1391_v5, %v1392_v51  ;;  %v1120_v11 = vsub.f32 1.5, %v1119_v34  ;;  %v1143_v23 = vmul.f32 %v2696_v47, %v1131_v36  ;;  %vm1270_vm14 = vweird.f32 %v2844_v15 }
 0x275   : > { %v1985_v33 = vpop.eup %1984  ;;  %v1254_v29 = vadd.f32 %v1983_v42, %v1253_v6  ;;  %v1870_v60 = vmul.f32 -1.442695, %v2869_v22  ;;  %v1340_v28 = vsel %vm950_vm2, %v1321_v40, 0  ;;  %v1115_v59 = vsel %vm2891_vm12, %v2711_v61, %v1111_v4 }
 0x276   : > { %v1987_v30 = vpop.eup %1986  ;;  %v2879_v1 = vadd.f32 1.0, %v1985_v33  ;;  %v2881_v12 = vand.u32 4294901760, %v1340_v28  ;;  %v1394_v50 = vand.u32 4294901760, %v1393_v25  ;;  %v1277_v55 = vor.u32 1.1754944e-38, %v1276_v35 }
 0x277   : > { %v1258_v54 = vsel %vm1257_vm10, %v1983_v42, %v1254_v29  ;;  %v1266_v24 = vmul.f32 %v1987_v30, %v2844_v15  ;;  %1988 = vpow2.f32 %v1870_v60  ;;  %vm1271_vm13 = vweird.f32 %v1987_v30 }
 0x278   : > { %v1263_v45 = vsel %vm1260_vm11, %v1262_v57, %v1258_v54  ;;  %1990 = vrcp.f32 %v2879_v1  ;;  %1488 = vmatmul.f32.gmra.mxu3 %v2881_v12  ;;  %v1399_v32 = vsub.f32 %v1340_v28, %v2881_v12  ;;  %1395 = vmatmul.f32.gmra.mxu2 %v1394_v50  ;;  %vm1272_vm15 = vmor %vm1270_vm14, %vm1271_vm13  ;;  %v1132_v43 = vmul.f32 %v1115_v59, %v2456_v31 }
 0x279   : > { %v1314_v21 = vmul.f32 %v1263_v45, %v2781_v7  ;;  %v1267_v52 = vsub.f32 1.0, %v1266_v24  ;;  %vm1275_vm1 = vcmp.eq.f32.partialorder %v1274_v41, 8.507059e+37  ;;  %vm1122_vm3 = vweird.f32 %v2793_v62 }
 0x27a   : > { %1549 = vmatmul.f32.gmra.mxu0 %v1399_v32  ;;  %v1400_v19 = vand.u32 4294901760, %v1399_v32  ;;  %vm1123_vm4 = vweird.f32 %v2826_v3  ;;  %v1155_v58 = vadd.f32 %v2720_v27, %v1143_v23  ;;  %v1121_v31 = vmul.f32 %v2826_v3, %v1120_v11 }
 0x27b   : > { %v1322_v16 = vmul.f32 %v1314_v21, %v1154_v17  ;;  %v1268_v42 = vmul.f32 %v1987_v30, %v1267_v52  ;;  %v1291_v37 = vand.u32 2147483648, %v2879_v1  ;;  %vm2921_vm5 = vmor %vm1122_vm3, %vm1123_vm4  ;;  %v1289_v20 = vand.u32 2147483647, %v2879_v1 }
 0x27c   : > { %1614 = vmatmul.f32.gmra.mxu1 %v1400_v19  ;;  %v1401_v9 = vsub.f32 %v1399_v32, %v1400_v19  ;;  %v1144_v2 = vmul.f32 %v2696_v47, %v1132_v43  ;;  %vm1285_vm7 = vweird.f32 %v2879_v1  ;;  %v1125_v29 = vsel %vm2921_vm5, %v2826_v3, %v1121_v31 }
 0x27d   : > { %v1989_v7 = vpop.eup %1988  ;;  %v1269_v44 = vadd.f32 %v1987_v30, %v1268_v42  ;;  %v1343_v14 = vsel %vm950_vm2, %v1322_v16, 0  ;;  %v1292_v60 = vor.u32 1.1754944e-38, %v1291_v37  ;;  %vm1290_vm9 = vcmp.eq.f32.partialorder %v1289_v20, 8.507059e+37 }
 0x27e   : > { %v1991_v48 = vpop.eup %1990  ;;  %v2906_v49 = vadd.f32 1.0, %v1989_v7  ;;  %v2908_v61 = vand.u32 4294901760, %v1343_v14  ;;  %v1402_v26 = vand.u32 4294901760, %v1401_v9  ;;  %v1133_v4 = vmul.f32 %v1125_v29, %v2488_v10  ;;  %v1995_v29 = vld [vmem:[%s2173_s21 + $0x8] sm:$0xff] }
 0x27f   : > { %v1273_v17 = vsel %vm1272_vm15, %v1987_v30, %v1269_v44  ;;  %v1281_v18 = vmul.f32 %v1991_v48, %v2879_v1  ;;  %vm1286_vm6 = vweird.f32 %v1991_v48  ;;  %v1156_v3 = vadd.f32 %v2720_v27, %v1144_v2 }
 0x280   : > { %v1278_v15 = vsel %vm1275_vm1, %v1277_v55, %v1273_v17  ;;  %1992 = vrcp.f32 %v2906_v49  ;;  %1492 = vmatmul.f32.gmra.mxu3 %v2908_v61  ;;  %v1407_v5 = vsub.f32 %v1343_v14, %v2908_v61  ;;  %1403 = vmatmul.f32.gmra.mxu2 %v1402_v26  ;;  %vm1287_vm8 = vmor %vm1285_vm7, %vm1286_vm6  ;;  %v1306_v46 = vand.u32 2147483648, %v2906_v49 }
 0x281   : > { %v1315_v8 = vmul.f32 %v1278_v15, %v2811_v56  ;;  %v1282_v63 = vsub.f32 1.0, %v1281_v18  ;;  %v1304_v50 = vand.u32 2147483647, %v2906_v49  ;;  %v1145_v32 = vmul.f32 %v2696_v47, %v1133_v4  ;;  %v1996_v4 = vld [vmem:[%s2173_s21 + $0x10] sm:$0xff] }
 0x282   : > { %1554 = vmatmul.f32.gmra.mxu0 %v1407_v5  ;;  %v1408_v56 = vand.u32 4294901760, %v1407_v5  ;;  %vm1300_vm11 = vweird.f32 %v2906_v49 }
 0x283   : > { %v1323_v40 = vmul.f32 %v1315_v8, %v1155_v58  ;;  %v1283_v6 = vmul.f32 %v1991_v48, %v1282_v63  ;;  %vm1305_vm13 = vcmp.eq.f32.partialorder %v1304_v50, 8.507059e+37  ;;  %v1157_v7 = vadd.f32 %v2720_v27, %v1145_v32 }
 0x284   : > { %1620 = vmatmul.f32.gmra.mxu1 %v1408_v56  ;;  %v1409_v28 = vsub.f32 %v1407_v5, %v1408_v56 }
 0x285   : > { %v1284_v38 = vadd.f32 %v1991_v48, %v1283_v6  ;;  %v1346_v51 = vsel %vm950_vm2, %v1323_v40, 0  ;;  %v1994_v6 = vld [vmem:[%s2173_s21] sm:$0xff] }
 0x286   : > { %v1993_v33 = vpop.eup %1992  ;;  %v2932_v30 = vand.u32 4294901760, %v1346_v51  ;;  %v1410_v24 = vand.u32 4294901760, %v1409_v28 }
 0x287   : > { %v1288_v57 = vsel %vm1287_vm8, %v1991_v48, %v1284_v38  ;;  %v1296_v25 = vmul.f32 %v1993_v33, %v2906_v49  ;;  %vm1301_vm10 = vweird.f32 %v1993_v33 }
 0x288   : > { %v1293_v54 = vsel %vm1290_vm9, %v1292_v60, %v1288_v57  ;;  %1496 = vmatmul.f32.gmra.mxu3 %v2932_v30  ;;  %v1415_v1 = vsub.f32 %v1346_v51, %v2932_v30  ;;  %1411 = vmatmul.f32.gmra.mxu2 %v1410_v24  ;;  %vm1302_vm12 = vmor %vm1300_vm11, %vm1301_vm10 }
 0x289   : > { %v1316_v34 = vmul.f32 %v1293_v54, %v2835_v39  ;;  %v1297_v45 = vsub.f32 1.0, %v1296_v25  ;;  %v1307_v39 = vor.u32 1.1754944e-38, %v1306_v46 }
 0x28a   : > { %v1416_v36 = vand.u32 4294901760, %v1415_v1  ;;  %1559 = vmatmul.f32.gmra.mxu0 %v1415_v1 }
 0x28b   : > { %v1324_v21 = vmul.f32 %v1316_v34, %v1156_v3  ;;  %v1298_v52 = vmul.f32 %v1993_v33, %v1297_v45 }
 0x28c   : > { %v1417_v35 = vsub.f32 %v1415_v1, %v1416_v36  ;;  %1626 = vmatmul.f32.gmra.mxu1 %v1416_v36 }
 0x28d   : > { %v1299_v16 = vadd.f32 %v1993_v33, %v1298_v52  ;;  %v1349_v10 = vsel %vm950_vm2, %v1324_v21, 0 }
 0x28e   : > { %v1422_v42 = vand.u32 4294901760, %v1349_v10  ;;  %v1418_v11 = vand.u32 4294901760, %v1417_v35 }
 0x28f   : > { %v1303_v41 = vsel %vm1302_vm12, %v1993_v33, %v1299_v16  ;;  %v1997_v16 = vld [vmem:[%s2173_s21 + $0x18] sm:$0xff] }
 0x290   : > { %v1308_v59 = vsel %vm1305_vm13, %v1307_v39, %v1303_v41  ;;  %1500 = vmatmul.f32.gmra.mxu3 %v1422_v42  ;;  %v1423_v19 = vsub.f32 %v1349_v10, %v1422_v42  ;;  %1419 = vmatmul.f32.gmra.mxu2 %v1418_v11 }
 0x291   : > { %v1317_v23 = vmul.f32 %v1308_v59, %v2869_v22 }
 0x292   : > { %v1424_v47 = vand.u32 4294901760, %v1423_v19  ;;  %1564 = vmatmul.f32.gmra.mxu0 %v1423_v19 }
 0x293   : > { %v1325_v44 = vmul.f32 %v1317_v23, %v1157_v7 }
 0x294   : > { %v1425_v14 = vsub.f32 %v1423_v19, %v1424_v47  ;;  %1632 = vmatmul.f32.gmra.mxu1 %v1424_v47  ;;  %v1998_v47 = vld [vmem:[%s2173_s21 + $0x20] sm:$0xff] }
 0x295   : > { %v1352_v48 = vsel %vm950_vm2, %v1325_v44, 0 }
 0x296   : > { %v1430_v55 = vand.u32 4294901760, %v1352_v48  ;;  %v1426_v49 = vand.u32 4294901760, %v1425_v14 }
 0x298   : > { %1504 = vmatmul.f32.gmra.mxu3 %v1430_v55  ;;  %v1431_v9 = vsub.f32 %v1352_v48, %v1430_v55  ;;  %1427 = vmatmul.f32.gmra.mxu2 %v1426_v49 }
 0x29a   : > { %v1432_v43 = vand.u32 4294901760, %v1431_v9  ;;  %1569 = vmatmul.f32.gmra.mxu0 %v1431_v9 }
 0x29c   : > { %v1433_v17 = vsub.f32 %v1431_v9, %v1432_v43  ;;  %1638 = vmatmul.f32.gmra.mxu1 %v1432_v43 }
 0x29e   : > { %v1434_v27 = vand.u32 4294901760, %v1433_v17 }
 0x2a0   : > { %1724 = vmatmul.f32.vlgmr.msra.gmra.mxu3 %v2797_v13  ;;  %1435 = vmatmul.f32.gmra.mxu2 %v1434_v27 }
 0x2a8   : > { %1728 = vmatmul.f32.gmra.mxu3 %v2823_v0  ;;  %1671 = vmatmul.f32.vlgmr.msra.gmra.mxu2 %v2797_v13 }
 0x2b0   : > { %1732 = vmatmul.f32.gmra.mxu3 %v2846_v53  ;;  %1675 = vmatmul.f32.gmra.mxu2 %v2823_v0 }
 0x2b8   : > { %1736 = vmatmul.f32.gmra.mxu3 %v2881_v12  ;;  %1679 = vmatmul.f32.gmra.mxu2 %v2846_v53 }
 0x2c0   : > { %1740 = vmatmul.f32.gmra.mxu3 %v2908_v61  ;;  %1683 = vmatmul.f32.gmra.mxu2 %v2881_v12 }
 0x2c8   : > { %1744 = vmatmul.f32.gmra.mxu3 %v2932_v30  ;;  %1687 = vmatmul.f32.gmra.mxu2 %v2908_v61 }
 0x2d0   : > { %1748 = vmatmul.f32.gmra.mxu3 %v1422_v42  ;;  %1691 = vmatmul.f32.gmra.mxu2 %v2932_v30 }
 0x2d8   : > { %1752 = vmatmul.f32.gmra.mxu3 %v1430_v55  ;;  %1695 = vmatmul.f32.gmra.mxu2 %v1422_v42 }
 0x2df   : > { %v1535_v37 = vpop.f32.mrf.mxu0 }
 0x2e0   : > { %1699 = vmatmul.f32.gmra.mxu2 %v1430_v55 }
 0x2e1   : > { %v1597_v62 = vpop.f32.mrf.mxu1 }
 0x2e3   : > { %v1477_v13 = vpop.f32.mrf.mxu3 }
 0x2e7   : > { %v1540_v2 = vpop.f32.mrf.mxu0 }
 0x2e9   : > { %v1603_v33 = vpop.f32.mrf.mxu1 }
 0x2eb   : > { %v1481_v0 = vpop.f32.mrf.mxu3  ;;  %v1380_v22 = vpop.f32.mrf.mxu2 }
 0x2ec   : > { %v1381_v20 = vadd.f32 %v1994_v6, %v1380_v22 }
 0x2ee   : > { %v1478_v38 = vadd.f32 %v1477_v13, %v1381_v20  ;;  %v1999_v13 = vld [vmem:[%s2173_s21 + $0x28] sm:$0xff] }
 0x2ef   : > { %v1545_v54 = vpop.f32.mrf.mxu0 }
 0x2f0   : > { %v1536_v28 = vadd.f32 %v1535_v37, %v1478_v38 }
 0x2f1   : > { %v1609_v46 = vpop.f32.mrf.mxu1 }
 0x2f2   : > { %v1598_v25 = vadd.f32 %v1597_v62, %v1536_v28  ;;  %v2000_v62 = vld [vmem:[%s2173_s21 + $0x30] sm:$0xff] }
 0x2f3   : > { %v1485_v18 = vpop.f32.mrf.mxu3  ;;  %v1388_v53 = vpop.f32.mrf.mxu2 }
 0x2f4   : > { %v1389_v60 = vadd.f32 %v1995_v29, %v1388_v53 }
 0x2f6   : > { %v1482_v57 = vadd.f32 %v1481_v0, %v1389_v60  ;;  %v2001_v60 = vld [vmem:[%s2173_s21 + $0x38] sm:$0xff] }
 0x2f7   : > { %v1550_v32 = vpop.f32.mrf.mxu0 }
 0x2f8   : > { %v1541_v45 = vadd.f32 %v1540_v2, %v1482_v57 }
 0x2f9   : > { %v1615_v41 = vpop.f32.mrf.mxu1 }
 0x2fa   : > { %v1604_v21 = vadd.f32 %v1603_v33, %v1541_v45 }
 0x2fb   : > { %v1489_v15 = vpop.f32.mrf.mxu3  ;;  %v1396_v58 = vpop.f32.mrf.mxu2 }
 0x2fc   : > { %v1397_v3 = vadd.f32 %v1996_v4, %v1396_v58 }
 0x2fe   : > { %v1486_v36 = vadd.f32 %v1485_v18, %v1397_v3 }
 0x2ff   : > { %v1555_v55 = vpop.f32.mrf.mxu0 }
 0x300   : > { %v1546_v42 = vadd.f32 %v1545_v54, %v1486_v36 }
 0x301   : > { %v1621_v43 = vpop.f32.mrf.mxu1 }
 0x302   : > { %v1610_v11 = vadd.f32 %v1609_v46, %v1546_v42 }
 0x303   : > { %v1493_v8 = vpop.f32.mrf.mxu3  ;;  %v1404_v12 = vpop.f32.mrf.mxu2 }
 0x304   : > { %v1405_v10 = vadd.f32 %v1997_v16, %v1404_v12 }
 0x306   : > { %v1490_v59 = vadd.f32 %v1489_v15, %v1405_v10 }
 0x307   : > { %v1560_v15 = vpop.f32.mrf.mxu0 }
 0x308   : > { %v1551_v48 = vadd.f32 %v1550_v32, %v1490_v59 }
 0x309   : > { %v1627_v37 = vpop.f32.mrf.mxu1 }
 0x30a   : > { %v1616_v9 = vadd.f32 %v1615_v41, %v1551_v48 }
 0x30b   : > { %v2960_v63 = vpop.f32.mrf.mxu3  ;;  %v1412_v61 = vpop.f32.mrf.mxu2 }
 0x30c   : > { %v1413_v44 = vadd.f32 %v1998_v47, %v1412_v61 }
 0x30e   : > { %v1494_v49 = vadd.f32 %v1493_v8, %v1413_v44 }
 0x30f   : > { %v1565_v33 = vpop.f32.mrf.mxu0 }
 0x310   : > { %v1556_v18 = vadd.f32 %v1555_v55, %v1494_v49 }
 0x312   : > { %v1622_v12 = vadd.f32 %v1621_v43, %v1556_v18 }
 0x313   : > { %v2962_v26 = vpop.f32.mrf.mxu3  ;;  %v1420_v31 = vpop.f32.mrf.mxu2 }
 0x314   : > { %v1421_v0 = vadd.f32 %v1999_v13, %v1420_v31 }
 0x316   : > { %v1498_v58 = vadd.f32 %v2960_v63, %v1421_v0 }
 0x317   : > { %v1570_v4 = vpop.f32.mrf.mxu0 }
 0x31b   : > { %v2964_v5 = vpop.f32.mrf.mxu3  ;;  %v2966_v40 = vpop.f32.mrf.mxu2 }
 0x31c   : > { %v1429_v6 = vadd.f32 %v2000_v62, %v2966_v40  ;;  %v1633_v40 = vpop.f32.mrf.mxu1 }
 0x31e   : > { %v1502_v2 = vadd.f32 %v2962_v26, %v1429_v6 }
 0x320   : > { %v1566_v57 = vadd.f32 %v1565_v33, %v1502_v2 }
 0x322   : > { %v1634_v54 = vadd.f32 %v1633_v40, %v1566_v57 }
 0x323   : > { %v1725_v56 = vpop.f32.mrf.mxu3  ;;  %v2969_v51 = vpop.f32.mrf.mxu2 }
 0x324   : > { %v1437_v28 = vadd.f32 %v2001_v60, %v2969_v51  ;;  %v1639_v51 = vpop.f32.mrf.mxu1 }
 0x32b   : > { %v1729_v30 = vpop.f32.mrf.mxu3  ;;  %v1672_v24 = vpop.f32.mrf.mxu2 }
 0x32c   : > { %v1673_v1 = vadd.f32 %v1672_v24, %v1598_v25  ;;  %v1506_v25 = vadd.f32 %v2964_v5, %v1437_v28 }
 0x32e   : > { %v1726_v34 = vadd.f32 %v1725_v56, %v1673_v1  ;;  %v1561_v56 = vadd.f32 %v1560_v15, %v1498_v58 }
 0x330   : > { %1756 = vst.msk [vmem:[%s2976_s23] sm:$0xff] %vm332_vm0, %v1726_v34  ;;  %v1628_v38 = vadd.f32 %v1627_v37, %v1561_v56  ;;  %v1571_v34 = vadd.f32 %v1570_v4, %v1506_v25 }
 0x332   : > { %v1640_v45 = vadd.f32 %v1639_v51, %v1571_v34 }
 0x333   : > { %v1676_v52 = vpop.f32.mrf.mxu2  ;;  %v1733_v50 = vpop.f32.mrf.mxu3 }
 0x334   : > { %v1677_v35 = vadd.f32 %v1676_v52, %v1604_v21 }
 0x336   : > { %v1730_v39 = vadd.f32 %v1729_v30, %v1677_v35 }
 0x338   : > { %1757 = vst.msk [vmem:[%s2976_s23 + $0x8] sm:$0xff] %vm332_vm0, %v1730_v39 }
 0x33b   : > { %v1680_v19 = vpop.f32.mrf.mxu2  ;;  %v1737_v23 = vpop.f32.mrf.mxu3 }
 0x33c   : > { %v1681_v7 = vadd.f32 %v1680_v19, %v1610_v11 }
 0x33e   : > { %v1734_v14 = vadd.f32 %v1733_v50, %v1681_v7 }
 0x340   : > { %1758 = vst.msk [vmem:[%s2976_s23 + $0x10] sm:$0xff] %vm332_vm0, %v1734_v14 }
 0x343   : > { %v1684_v17 = vpop.f32.mrf.mxu2  ;;  %v1741_v53 = vpop.f32.mrf.mxu3 }
 0x344   : > { %v1685_v27 = vadd.f32 %v1684_v17, %v1616_v9 }
 0x346   : > { %v1738_v22 = vadd.f32 %v1737_v23, %v1685_v27 }
 0x348   : > { %1759 = vst.msk [vmem:[%s2976_s23 + $0x18] sm:$0xff] %vm332_vm0, %v1738_v22 }
 0x34b   : > { %v1688_v61 = vpop.f32.mrf.mxu2  ;;  %v1745_v31 = vpop.f32.mrf.mxu3 }
 0x34c   : > { %v1689_v8 = vadd.f32 %v1688_v61, %v1622_v12 }
 0x34e   : > { %v1742_v20 = vadd.f32 %v1741_v53, %v1689_v8 }
 0x350   : > { %1760 = vst.msk [vmem:[%s2976_s23 + $0x20] sm:$0xff] %vm332_vm0, %v1742_v20 }
 0x353   : > { %v1692_v63 = vpop.f32.mrf.mxu2  ;;  %v1749_v24 = vpop.f32.mrf.mxu3 }
 0x354   : > { %v1693_v29 = vadd.f32 %v1692_v63, %v1628_v38 }
 0x356   : > { %v1746_v30 = vadd.f32 %v1745_v31, %v1693_v29 }
 0x358   : > { %1761 = vst.msk [vmem:[%s2976_s23 + $0x28] sm:$0xff] %vm332_vm0, %v1746_v30 }
 0x35b   : > { %v1696_v26 = vpop.f32.mrf.mxu2  ;;  %v1753_v36 = vpop.f32.mrf.mxu3 }
 0x35c   : > { %v1697_v1 = vadd.f32 %v1696_v26, %v1634_v54 }
 0x35e   : > { %v1750_v3 = vadd.f32 %v1749_v24, %v1697_v1 }
 0x360   : > { %1762 = vst.msk [vmem:[%s2976_s23 + $0x30] sm:$0xff] %vm332_vm0, %v1750_v3 }
 0x363   : > { %v1700_v5 = vpop.f32.mrf.mxu2 }
 0x364   : > { %v1701_v46 = vadd.f32 %v1700_v5, %v1640_v45 }
 0x366   : > { %v1754_v21 = vadd.f32 %v1753_v36, %v1701_v46 }
 0x368   : > { %1763 = vst.msk [vmem:[%s2976_s23 + $0x38] sm:$0xff] %vm332_vm0, %v1754_v21 }
 0x369   : > { %2029 = shalt.err (!%p2026_p3)
}
 0x36a   : > { %s2068_s20 = smov 128   ;;  %s2069_s23 = smov 8  }
 0x36b   : > { %1879 = dma.vmem_to_hbm [thread:$0]  (%p2153_p5), %s1778_s10, 1024, %s1780_s12, %s1765_s9, %s2068_s20, %s2068_s20, %s2069_s23  }
 0x36c PF: > { %p1885_p4 = scmp.ge.s32.totalorder %s2064_s30, 2  ;;  %s1794_s25 = sand.u32 1, %s2052_s27  }
 0x36d   : > { %s1795_s26 = scalar_lea.sflag [#allocation3], %s1794_s25 }
 0x36e   : > { %p1882_p7 = pnand %p1885_p4, %p2157_p6 }
 0x370   : > { %p1883_p8 = pneg %p1882_p7 }
 0x372   : > { %2047 = dma.done.wait (%p1883_p8), %s1795_s26, 1024  }
 0x373   : > { %2049 = vsyncadd (%p1883_p8), %s1795_s26, 4294966272  ;;  %p18_p9 = scmp.ge.s32.totalorder %s2140_s11, 4   ;;  %s3073_s27 = smov %s2056_s28 }
 0x374   : > { %s3074_s28 = smov %s2060_s29  ;;  %s3075_s29 = smov %s2151_s14 }
 0x375   : > { %s3076_s30 = smov %s2140_s11  ;;  %20 = sbr.rel (!%p18_p9) target bundleno = 3 (0x3), region = 90 }
 0x37a   :  { %1801 = vsyncpa [#allocation3], 1 }
 0x37b   :  { %1803 = vsyncpa [#allocation3 + $0x1], 1 }

// kernel: vss_block_forward.2
= control target key start
LH: loop header
LB: loop body
LE: loop exit
PB: predicated region body
PF: predicated region fallthrough
CT: control target
= control target key end

     0   :  { %s8650_s25 = smov 0   ;;  %s13953_s0 = inlined_call_operand.vmem [shape: f32[2,64,16], index: 0, kind: input, shape index: {}]   ;;  %s13954_s1 = inlined_call_operand.vmem [shape: f32[1,16], index: 1, kind: input, shape index: {}]   ;;  %s13955_s2 = inlined_call_operand.vmem [shape: f32[1,16], index: 2, kind: input, shape index: {}]   ;;  %s13956_s3 = inlined_call_operand.vmem [shape: f32[16,32], index: 3, kind: input, shape index: {}]   ;;  %s13957_s4 = inlined_call_operand.vmem [shape: f32[3,32], index: 4, kind: input, shape index: {}]   ;;  %s13958_s5 = inlined_call_operand.vmem [shape: f32[1,32], index: 5, kind: input, shape index: {}]   ;;  %s13959_s6 = inlined_call_operand.vmem [shape: f32[8,16,32], index: 6, kind: input, shape index: {}]   ;;  %s13960_s7 = inlined_call_operand.vmem [shape: f32[8,16,32], index: 7, kind: input, shape index: {}]   ;;  %s13961_s8 = inlined_call_operand.vmem [shape: f32[8,1,32], index: 8, kind: input, shape index: {}]   ;;  %s13962_s9 = inlined_call_operand.vmem [shape: f32[8,1,32], index: 9, kind: input, shape index: {}]   ;;  %s13963_s10 = inlined_call_operand.vmem [shape: f32[8,1,32], index: 10, kind: input, shape index: {}]   ;;  %s13964_s11 = inlined_call_operand.vmem [shape: f32[8,16,32], index: 11, kind: input, shape index: {}]   ;;  %s13965_s12 = inlined_call_operand.vmem [shape: f32[8,1,32], index: 12, kind: input, shape index: {}]   ;;  %s13966_s13 = inlined_call_operand.vmem [shape: f32[2,8,8,32], index: 13, kind: output, shape index: {}]  }
   0x1 LB: > { %s7889_s26 = sadd.s32 4294967295, %s8569_s25   ;;  %p7893_p0 = scmp.ge.s32.totalorder %s8569_s25, 1  ;;  %s8569_s25 = sphi %s8650_s25, %s23_s25  }
   0x2   : > { %p387_p1 = scmp.lt.s32.totalorder %s8569_s25, 3 }
   0x4   : > { %p388_p2 = pnand %p7893_p0, %p387_p1 }
   0x6   : > { %391 = sbr.rel (%p388_p2) target bundleno = 1710 (0x6ae), region = 72 }
   0xb   : > { %p431_p3 = scmp.lt.s32.totalorder %s7889_s26, 1  ;;  %vm449_vm0 = vcmask 130048   ;;  %v8571_v16 = vmov 16.0   ;;  %v658_v63 = vld [vmem:[%s13956_s3 + $0x8] sm:$0xff] }
   0xc   : > { %8209 = vrcp.f32 %v8571_v16 }
   0xd   : > { %s15176_s26 = smov (!%p431_p3, %s7889_s26), 1 }
   0xe   : > { %s7908_s27 = sshll.u32 %s15176_s26, 6 }
   0xf   : > { %s435_s30 = scalar_lea.vmem %s13953_s0, %s7908_s27  ;;  %s12504_s22 = scalar_lea.vmem %s13966_s13, %s7908_s27 }
  0x10   : > { %v445_v0 = vld [vmem:[%s435_s30 + $0x20] sm:$0xff]  ;;  %v443_v1 = vld [vmem:[%s435_s30 + $0x10] sm:$0xff]  ;;  %v446_v6 = vld [vmem:[%s435_s30 + $0x28] sm:$0xff] }
  0x11   : > { %v441_v2 = vld [vmem:[%s435_s30] sm:$0xff]  ;;  %v462_v3 = vsel %vm449_vm0, %v445_v0, 0.0  ;;  %v456_v4 = vsel %vm449_vm0, %v443_v1, 0.0  ;;  %v444_v7 = vld [vmem:[%s435_s30 + $0x18] sm:$0xff]  ;;  %v442_v8 = vld [vmem:[%s435_s30 + $0x8] sm:$0xff]  ;;  %v465_v9 = vsel %vm449_vm0, %v446_v6, 0.0 }
  0x12   : > { %v450_v5 = vsel %vm449_vm0, %v441_v2, 0.0  ;;  %463 = vadd.xlane.f32.xlu2 %v462_v3  ;;  %457 = vadd.xlane.f32.xlu1 %v456_v4  ;;  %v459_v10 = vsel %vm449_vm0, %v444_v7, 0.0  ;;  %v453_v11 = vsel %vm449_vm0, %v442_v8, 0.0  ;;  %v448_v12 = vld [vmem:[%s435_s30 + $0x38] sm:$0xff]  ;;  %v447_v13 = vld [vmem:[%s435_s30 + $0x30] sm:$0xff]  ;;  %v8210_v17 = vpop.eup %8209 }
  0x13   : > { %451 = vadd.xlane.f32.xlu0 %v450_v5  ;;  %v471_v14 = vsel %vm449_vm0, %v448_v12, 0.0  ;;  %v468_v15 = vsel %vm449_vm0, %v447_v13, 0.0  ;;  %v475_v18 = vmul.f32 16.0, %v8210_v17  ;;  %vm479_vm1 = vweird.f32 %v8210_v17 }
  0x15   : > { %v476_v19 = vsub.f32 1.0, %v475_v18 }
  0x17   : > { %v477_v20 = vmul.f32 %v8210_v17, %v476_v19 }
  0x19   : > { %v478_v21 = vadd.f32 %v8210_v17, %v477_v20 }
  0x1a   : > { %466 = vadd.xlane.f32.xlu2 %v465_v9  ;;  %460 = vadd.xlane.f32.xlu1 %v459_v10 }
  0x1b   : > { %454 = vadd.xlane.f32.xlu0 %v453_v11  ;;  %v8674_v22 = vsel %vm479_vm1, %v8210_v17, %v478_v21 }
  0x22   : > { %472 = vadd.xlane.f32.xlu1 %v471_v14 }
  0x23   : > { %469 = vadd.xlane.f32.xlu0 %v468_v15 }
  0x85   : > { %v464_v23 = vpop.xlane.xlu2 %463  ;;  %v458_v24 = vpop.xlane.xlu1 %457 }
  0x86   : > { %v483_v25 = vmul.f32 %v8674_v22, %v458_v24  ;;  %v452_v26 = vpop.xlane.xlu0 %451  ;;  %v485_v39 = vmul.f32 %v8674_v22, %v464_v23 }
  0x87   : > { %v481_v27 = vmul.f32 %v8674_v22, %v452_v26 }
  0x88   : > { %v8678_v28 = vsub.f32 %v443_v1, %v483_v25  ;;  %v8702_v46 = vsub.f32 %v445_v0, %v485_v39  ;;  %v697_v0 = vand.u32 4294901760, %v658_v63  ;;  %v657_v1 = vld [vmem:[%s13956_s3] sm:$0xff] }
  0x89   : > { %v8680_v29 = vsub.f32 %v441_v2, %v481_v27  ;;  %v699_v3 = vand.u32 4294901760, %v657_v1 }
  0x8a   : > { %v499_v30 = vmul.f32 %v8678_v28, %v8678_v28  ;;  %v501_v55 = vmul.f32 %v8702_v46, %v8702_v46  ;;  %v781_v2 = vsub.f32 %v658_v63, %v697_v0  ;;  %901 = vmatpush.msra.mxu3 %v697_v0  ;;  %698 = vmatpush.msra.mxu0 %v697_v0 }
  0x8b   : > { %v497_v31 = vmul.f32 %v8680_v29, %v8680_v29  ;;  %v787_v5 = vsub.f32 %v657_v1, %v699_v3 }
  0x8c   : > { %v511_v32 = vsel %vm449_vm0, %v499_v30, 0.0  ;;  %v517_v58 = vsel %vm449_vm0, %v501_v55, 0.0  ;;  %v782_v4 = vand.u32 4294901760, %v781_v2  ;;  %841 = vmatpush.msra.mxu2 %v781_v2  ;;  %903 = vmatpush.msra.mxu3 %v699_v3  ;;  %v8747_v55 = vld [vmem:[%s13954_s1] ss:$0 sm:$0xff] }
  0x8d   : > { %v467_v33 = vpop.xlane.xlu2 %466  ;;  %512 = vadd.xlane.f32.xlu1 %v511_v32  ;;  %v461_v34 = vpop.xlane.xlu1 %460  ;;  %v505_v35 = vsel %vm449_vm0, %v497_v31, 0.0  ;;  %700 = vmatpush.msra.mxu0 %v699_v3 }
  0x8e   : > { %v486_v36 = vmul.f32 %v8674_v22, %v467_v33  ;;  %v484_v37 = vmul.f32 %v8674_v22, %v461_v34  ;;  %506 = vadd.xlane.f32.xlu2 %v505_v35  ;;  %v455_v38 = vpop.xlane.xlu0 %454  ;;  %844 = vmatpush.msra.mxu2 %v787_v5 }
  0x8f   : > { %v482_v40 = vmul.f32 %v8674_v22, %v455_v38  ;;  %970 = vmatpush.msrb.mxu0 %v782_v4 }
  0x90   : > { %v8692_v41 = vsub.f32 %v446_v6, %v486_v36  ;;  %v8694_v42 = vsub.f32 %v444_v7, %v484_v37  ;;  %v783_v6 = vsub.f32 %v781_v2, %v782_v4  ;;  %v788_v7 = vand.u32 4294901760, %v787_v5  ;;  %v8757_v2 = vld [vmem:[%s13955_s2] ss:$0 sm:$0xff] }
  0x91   : > { %v8696_v43 = vsub.f32 %v442_v8, %v482_v40 }
  0x92   : > { %v502_v44 = vmul.f32 %v8692_v41, %v8692_v41  ;;  %v500_v45 = vmul.f32 %v8694_v42, %v8694_v42  ;;  %v784_v8 = vand.u32 4294901760, %v783_v6  ;;  %v789_v9 = vsub.f32 %v787_v5, %v788_v7  ;;  %974 = vmatpush.msrb.mxu0 %v788_v7 }
  0x93   : > { %v498_v47 = vmul.f32 %v8696_v43, %v8696_v43 }
  0x94   : > { %v520_v48 = vsel %vm449_vm0, %v502_v44, 0.0  ;;  %v514_v49 = vsel %vm449_vm0, %v500_v45, 0.0  ;;  %785 = vmatpush.msra.mxu1 %v784_v8 }
  0x95   : > { %521 = vadd.xlane.f32.xlu1 %v520_v48  ;;  %v508_v50 = vsel %vm449_vm0, %v498_v47, 0.0  ;;  %v473_v51 = vpop.xlane.xlu1 %472 }
  0x96   : > { %515 = vadd.xlane.f32.xlu2 %v514_v49  ;;  %509 = vadd.xlane.f32.xlu0 %v508_v50  ;;  %v470_v52 = vpop.xlane.xlu0 %469  ;;  %v488_v54 = vmul.f32 %v8674_v22, %v473_v51 }
  0x97   : > { %v487_v53 = vmul.f32 %v8674_v22, %v470_v52 }
  0x98   : > { %v8715_v57 = vsub.f32 %v448_v12, %v488_v54 }
  0x99   : > { %v8713_v56 = vsub.f32 %v447_v13, %v487_v53  ;;  %v790_v13 = vand.u32 4294901760, %v789_v9 }
  0x9a   : > { %v504_v61 = vmul.f32 %v8715_v57, %v8715_v57 }
  0x9b   : > { %v503_v59 = vmul.f32 %v8713_v56, %v8713_v56  ;;  %791 = vmatpush.msra.mxu1 %v790_v13 }
  0x9c   : > { %v526_v62 = vsel %vm449_vm0, %v504_v61, 0.0 }
  0x9d   : > { %v523_v60 = vsel %vm449_vm0, %v503_v59, 0.0  ;;  %1023 = vmatpush.msrb.mxu1 %v697_v0 }
  0x9e   : > { %518 = vadd.xlane.f32.xlu0 %v517_v58  ;;  %524 = vadd.xlane.f32.xlu2 %v523_v60 }
  0x9f   : > { %1025 = vmatpush.msrb.mxu1 %v699_v3 }
  0xa6   : > { %527 = vadd.xlane.f32.xlu0 %v526_v62 }
 0x100   : > { %v513_v10 = vpop.xlane.xlu1 %512 }
 0x101   : > { %v531_v11 = vmul.f32 %v513_v10, %v8674_v22  ;;  %v507_v12 = vpop.xlane.xlu2 %506 }
 0x102   : > { %v529_v14 = vmul.f32 %v507_v12, %v8674_v22 }
 0x103   : > { %v539_v15 = vadd.f32 1e-06, %v531_v11 }
 0x104   : > { %v537_v16 = vadd.f32 1e-06, %v529_v14 }
 0x105   : > { %8211 = vrsqrt.f32 %v539_v15  ;;  %vm571_vm2 = vweird.f32 %v539_v15 }
 0x106   : > { %8213 = vrsqrt.f32 %v537_v16  ;;  %vm551_vm6 = vweird.f32 %v537_v16 }
 0x108   : > { %v522_v17 = vpop.xlane.xlu1 %521 }
 0x109   : > { %v516_v18 = vpop.xlane.xlu2 %515  ;;  %v510_v19 = vpop.xlane.xlu0 %509  ;;  %v534_v26 = vmul.f32 %v522_v17, %v8674_v22 }
 0x10a   : > { %v532_v20 = vmul.f32 %v516_v18, %v8674_v22  ;;  %v530_v21 = vmul.f32 %v510_v19, %v8674_v22 }
 0x10b   : > { %v8212_v23 = vpop.eup %8211  ;;  %v8735_v35 = vadd.f32 1e-06, %v534_v26 }
 0x10c   : > { %v8214_v24 = vpop.eup %8213  ;;  %v566_v25 = vmul.f32 %v8212_v23, %v539_v15  ;;  %v540_v27 = vadd.f32 1e-06, %v532_v20  ;;  %v538_v30 = vadd.f32 1e-06, %v530_v21  ;;  %vm572_vm3 = vweird.f32 %v8212_v23 }
 0x10d   : > { %v546_v31 = vmul.f32 %v8214_v24, %v537_v16  ;;  %vm552_vm4 = vweird.f32 %v8214_v24  ;;  %vm8740_vm5 = vmor %vm571_vm2, %vm572_vm3  ;;  %vm601_vm2 = vweird.f32 %v8735_v35 }
 0x10e   : > { %v567_v32 = vmul.f32 %v8212_v23, %v566_v25  ;;  %8215 = vrsqrt.f32 %v540_v27  ;;  %vm553_vm7 = vmor %vm551_vm6, %vm552_vm4  ;;  %vm581_vm8 = vweird.f32 %v540_v27  ;;  %vm561_vm12 = vweird.f32 %v538_v30 }
 0x10f   : > { %v547_v33 = vmul.f32 %v8214_v24, %v546_v31  ;;  %8217 = vrsqrt.f32 %v538_v30 }
 0x110   : > { %v568_v34 = vmul.f32 0.5, %v567_v32  ;;  %8219 = vrsqrt.f32 %v8735_v35 }
 0x111   : > { %v548_v36 = vmul.f32 0.5, %v547_v33  ;;  %v525_v37 = vpop.xlane.xlu2 %524  ;;  %v519_v38 = vpop.xlane.xlu0 %518 }
 0x112   : > { %v569_v39 = vsub.f32 1.5, %v568_v34  ;;  %v533_v40 = vmul.f32 %v519_v38, %v8674_v22  ;;  %v535_v48 = vmul.f32 %v525_v37, %v8674_v22 }
 0x113   : > { %v549_v44 = vsub.f32 1.5, %v548_v36 }
 0x114   : > { %v8216_v45 = vpop.eup %8215  ;;  %v570_v47 = vmul.f32 %v8212_v23, %v569_v39  ;;  %v541_v53 = vadd.f32 1e-06, %v533_v40  ;;  %v8752_v63 = vadd.f32 1e-06, %v535_v48 }
 0x115   : > { %v8218_v49 = vpop.eup %8217  ;;  %v550_v51 = vmul.f32 %v8214_v24, %v549_v44  ;;  %v576_v52 = vmul.f32 %v8216_v45, %v540_v27  ;;  %vm582_vm9 = vweird.f32 %v8216_v45 }
 0x116   : > { %v556_v54 = vmul.f32 %v8218_v49, %v538_v30  ;;  %v574_v60 = vsel %vm8740_vm5, %v8212_v23, %v570_v47  ;;  %8221 = vrsqrt.f32 %v541_v53  ;;  %v8759_v3 = vpop.eup %8219  ;;  %vm562_vm10 = vweird.f32 %v8218_v49  ;;  %vm8768_vm11 = vmor %vm581_vm8, %vm582_vm9 }
 0x117   : > { %v554_v58 = vsel %vm553_vm7, %v8214_v24, %v550_v51  ;;  %v577_v59 = vmul.f32 %v8216_v45, %v576_v52  ;;  %v627_v6 = vmul.f32 %v574_v60, %v8678_v28  ;;  %8223 = vrsqrt.f32 %v8752_v63  ;;  %vm563_vm13 = vmor %vm561_vm12, %vm562_vm10 }
 0x118   : > { %v625_v61 = vmul.f32 %v554_v58, %v8680_v29  ;;  %v557_v62 = vmul.f32 %v8218_v49, %v556_v54  ;;  %v596_v9 = vmul.f32 %v8759_v3, %v8735_v35  ;;  %vm591_vm14 = vweird.f32 %v541_v53 }
 0x119   : > { %v578_v0 = vmul.f32 0.5, %v577_v59  ;;  %v528_v1 = vpop.xlane.xlu0 %527  ;;  %vm602_vm3 = vweird.f32 %v8759_v3  ;;  %vm611_vm5 = vweird.f32 %v8752_v63  ;;  %vm1349_vm12 = vcmask 261120  }
 0x11a   : > { %v558_v4 = vmul.f32 0.5, %v557_v62  ;;  %v637_v5 = vmul.f32 %v8747_v55, %v625_v61  ;;  %v536_v7 = vmul.f32 %v528_v1, %v8674_v22  ;;  %v639_v22 = vmul.f32 %v8747_v55, %v627_v6  ;;  %vm603_vm4 = vmor %vm601_vm2, %vm602_vm3 }
 0x11b   : > { %v579_v29 = vsub.f32 1.5, %v578_v0  ;;  %v597_v17 = vmul.f32 %v8759_v3, %v596_v9 }
 0x11c   : > { %v559_v8 = vsub.f32 1.5, %v558_v4  ;;  %v649_v11 = vadd.f32 %v8757_v2, %v637_v5  ;;  %v8222_v28 = vpop.eup %8221  ;;  %v8772_v14 = vadd.f32 1e-06, %v536_v7  ;;  %v651_v26 = vadd.f32 %v8757_v2, %v639_v22 }
 0x11d   : > { %v580_v10 = vmul.f32 %v8216_v45, %v579_v29  ;;  %v586_v16 = vmul.f32 %v8222_v28, %v541_v53  ;;  %v8780_v21 = vpop.eup %8223  ;;  %vm592_vm15 = vweird.f32 %v8222_v28  ;;  %v598_v31 = vmul.f32 0.5, %v597_v17 }
 0x11e   : > { %v560_v13 = vmul.f32 %v8218_v49, %v559_v8  ;;  %v660_v20 = vsel %vm449_vm0, %v649_v11, 0  ;;  %8225 = vrsqrt.f32 %v8772_v14  ;;  %v606_v32 = vmul.f32 %v8780_v21, %v8752_v63  ;;  %vm8793_vm1 = vmor %vm591_vm14, %vm592_vm15 }
 0x11f   : > { %v584_v18 = vsel %vm8768_vm11, %v8216_v45, %v580_v10  ;;  %v587_v23 = vmul.f32 %v8222_v28, %v586_v16  ;;  %v8782_v24 = vand.u32 4294901760, %v660_v20  ;;  %v666_v40 = vsel %vm449_vm0, %v651_v26, 0 }
 0x120   : > { %v564_v15 = vsel %vm563_vm13, %v8218_v49, %v560_v13  ;;  %v628_v27 = vmul.f32 %v584_v18, %v8694_v42  ;;  %v599_v47 = vsub.f32 1.5, %v598_v31  ;;  %v607_v48 = vmul.f32 %v8780_v21, %v606_v32 }
 0x121   : > { %v626_v19 = vmul.f32 %v564_v15, %v8696_v43  ;;  %v588_v30 = vmul.f32 0.5, %v587_v23  ;;  %793 = vmatmul.f32.vlgmr.msra.gmra.mxu1 %v8782_v24  ;;  %v702_v43 = vsub.f32 %v660_v20, %v8782_v24  ;;  %v8810_v53 = vand.u32 4294901760, %v666_v40 }
 0x122   : > { %v640_v44 = vmul.f32 %v8747_v55, %v628_v27  ;;  %v600_v60 = vmul.f32 %v8759_v3, %v599_v47  ;;  %v608_v61 = vmul.f32 0.5, %v607_v48  ;;  %vm612_vm6 = vweird.f32 %v8780_v21 }
 0x123   : > { %v638_v25 = vmul.f32 %v8747_v55, %v626_v19  ;;  %v589_v34 = vsub.f32 1.5, %v588_v30  ;;  %847 = vmatmul.f32.vlgmr.msra.gmra.mxu2 %v702_v43  ;;  %v703_v37 = vand.u32 4294901760, %v702_v43  ;;  %v718_v0 = vsub.f32 %v666_v40, %v8810_v53  ;;  %vm613_vm7 = vmor %vm611_vm5, %vm612_vm6 }
 0x124   : > { %v8802_v45 = vpop.eup %8225  ;;  %v652_v59 = vadd.f32 %v8757_v2, %v640_v44  ;;  %v604_v4 = vsel %vm603_vm4, %v8759_v3, %v600_v60  ;;  %v609_v5 = vsub.f32 1.5, %v608_v61  ;;  %vm621_vm8 = vweird.f32 %v8772_v14 }
 0x125   : > { %v650_v33 = vadd.f32 %v8757_v2, %v638_v25  ;;  %v590_v38 = vmul.f32 %v8222_v28, %v589_v34  ;;  %907 = vmatmul.f32.vlgmr.msra.gmra.mxu3 %v703_v37  ;;  %v704_v49 = vsub.f32 %v702_v43, %v703_v37  ;;  %v616_v62 = vmul.f32 %v8802_v45, %v8772_v14 }
 0x126   : > { %v669_v1 = vsel %vm449_vm0, %v652_v59, 0  ;;  %v719_v7 = vand.u32 4294901760, %v718_v0  ;;  %v630_v9 = vmul.f32 %v604_v4, %v8692_v41  ;;  %v610_v3 = vmul.f32 %v8780_v21, %v609_v5 }
 0x127   : > { %v663_v42 = vsel %vm449_vm0, %v650_v33, 0  ;;  %v594_v50 = vsel %vm8793_vm1, %v8222_v28, %v590_v38  ;;  %v705_v52 = vand.u32 4294901760, %v704_v49  ;;  %v617_v6 = vmul.f32 %v8802_v45, %v616_v62 }
 0x128   : > { %v8798_v39 = vand.u32 4294901760, %v663_v42  ;;  %v629_v54 = vmul.f32 %v594_v50, %v8702_v46  ;;  %v8825_v8 = vand.u32 4294901760, %v669_v1  ;;  %v720_v12 = vsub.f32 %v718_v0, %v719_v7 }
 0x129   : > { %706 = vmatmul.f32.vlgmr.msra.gmra.mxu0 %v705_v52  ;;  %v618_v11 = vmul.f32 0.5, %v617_v6  ;;  %v642_v28 = vmul.f32 %v8747_v55, %v630_v9  ;;  %v614_v22 = vsel %vm613_vm7, %v8780_v21, %v610_v3  ;;  %vm622_vm9 = vweird.f32 %v8802_v45 }
 0x12a   : > { %v710_v51 = vsub.f32 %v663_v42, %v8798_v39  ;;  %797 = vmatmul.f32.gmra.mxu1 %v8798_v39  ;;  %v641_v46 = vmul.f32 %v8747_v55, %v629_v54  ;;  %v726_v63 = vsub.f32 %v669_v1, %v8825_v8  ;;  %v721_v15 = vand.u32 4294901760, %v720_v12  ;;  %vm623_vm10 = vmor %vm621_vm8, %vm622_vm9 }
 0x12b   : > { %v619_v41 = vsub.f32 1.5, %v618_v11  ;;  %v631_v18 = vmul.f32 %v614_v22, %v8713_v56  ;;  %v654_v19 = vadd.f32 %v8757_v2, %v642_v28  ;;  %vm1109_vm11 = vcmask 1046528  }
 0x12c   : > { %v711_v58 = vand.u32 4294901760, %v710_v51  ;;  %852 = vmatmul.f32.gmra.mxu2 %v710_v51  ;;  %v653_v10 = vadd.f32 %v8757_v2, %v641_v46  ;;  %v727_v16 = vand.u32 4294901760, %v726_v63 }
 0x12d   : > { %v620_v20 = vmul.f32 %v8802_v45, %v619_v41  ;;  %v675_v23 = vsel %vm449_vm0, %v654_v19, 0  ;;  %v643_v25 = vmul.f32 %v8747_v55, %v631_v18 }
 0x12e   : > { %v712_v35 = vsub.f32 %v710_v51, %v711_v58  ;;  %913 = vmatmul.f32.gmra.mxu3 %v711_v58  ;;  %v672_v13 = vsel %vm449_vm0, %v653_v10, 0  ;;  %v728_v21 = vsub.f32 %v726_v63, %v727_v16  ;;  %v741_v30 = vand.u32 4294901760, %v675_v23 }
 0x12f   : > { %v8837_v17 = vand.u32 4294901760, %v672_v13  ;;  %v624_v26 = vsel %vm623_vm10, %v8802_v45, %v620_v20  ;;  %v655_v31 = vadd.f32 %v8757_v2, %v643_v25  ;;  %v1059_v20 = vld [vmem:[%s13957_s4] sm:$0x7] }
 0x130   : > { %v713_v29 = vand.u32 4294901760, %v712_v35  ;;  %v729_v56 = vand.u32 4294901760, %v728_v21  ;;  %v632_v43 = vmul.f32 %v624_v26, %v8715_v57  ;;  %v742_v33 = vsub.f32 %v675_v23, %v741_v30 }
 0x131   : > { %v734_v14 = vsub.f32 %v672_v13, %v8837_v17  ;;  %v678_v34 = vsel %vm449_vm0, %v655_v31, 0  ;;  %v8887_v25 = vperm.slane %v1059_v20, 0  ;;  %v8889_v26 = vperm.slane %v1059_v20, 1 }
 0x132   : > { %801 = vmatmul.f32.gmra.mxu1 %v8810_v53  ;;  %714 = vmatmul.f32.gmra.mxu0 %v713_v29  ;;  %v644_v36 = vmul.f32 %v8747_v55, %v632_v43  ;;  %v743_v42 = vand.u32 4294901760, %v742_v33  ;;  %v749_v38 = vand.u32 4294901760, %v678_v34 }
 0x133   : > { %v735_v27 = vand.u32 4294901760, %v734_v14 }
 0x134   : > { %857 = vmatmul.f32.gmra.mxu2 %v718_v0  ;;  %v656_v40 = vadd.f32 %v8757_v2, %v644_v36  ;;  %v744_v57 = vsub.f32 %v742_v33, %v743_v42  ;;  %v750_v44 = vsub.f32 %v678_v34, %v749_v38 }
 0x135   : > { %v736_v32 = vsub.f32 %v734_v14, %v735_v27 }
 0x136   : > { %919 = vmatmul.f32.gmra.mxu3 %v719_v7  ;;  %v681_v45 = vsel %vm449_vm0, %v656_v40, 0  ;;  %v745_v47 = vand.u32 4294901760, %v744_v57  ;;  %v751_v48 = vand.u32 4294901760, %v750_v44  ;;  %vm1084_vm0 = vcmask 1040384  }
 0x137   : > { %v737_v37 = vand.u32 4294901760, %v736_v32  ;;  %v757_v49 = vand.u32 4294901760, %v681_v45 }
 0x138   : > { %v752_v55 = vsub.f32 %v750_v44, %v751_v48 }
 0x139   : > { %v758_v50 = vsub.f32 %v681_v45, %v757_v49  ;;  %v8901_v45 = vld [vmem:[%s13958_s5] ss:$0 sm:$0xff] }
 0x13a   : > { %805 = vmatmul.f32.gmra.mxu1 %v8825_v8  ;;  %722 = vmatmul.f32.gmra.mxu0 %v721_v15  ;;  %v753_v51 = vand.u32 4294901760, %v752_v55 }
 0x13b   : > { %v759_v52 = vand.u32 4294901760, %v758_v50 }
 0x13c   : > { %862 = vmatmul.f32.gmra.mxu2 %v726_v63 }
 0x13d   : > { %v760_v2 = vsub.f32 %v758_v50, %v759_v52 }
 0x13e   : > { %925 = vmatmul.f32.gmra.mxu3 %v727_v16 }
 0x13f   : > { %v761_v54 = vand.u32 4294901760, %v760_v2 }
 0x142   : > { %809 = vmatmul.f32.gmra.mxu1 %v8837_v17  ;;  %730 = vmatmul.f32.gmra.mxu0 %v729_v56 }
 0x144   : > { %867 = vmatmul.f32.gmra.mxu2 %v734_v14 }
 0x146   : > { %931 = vmatmul.f32.gmra.mxu3 %v735_v27 }
 0x14a   : > { %813 = vmatmul.f32.gmra.mxu1 %v741_v30  ;;  %738 = vmatmul.f32.gmra.mxu0 %v737_v37 }
 0x14c   : > { %872 = vmatmul.f32.gmra.mxu2 %v742_v33 }
 0x14e   : > { %937 = vmatmul.f32.gmra.mxu3 %v743_v42 }
 0x152   : > { %817 = vmatmul.f32.gmra.mxu1 %v749_v38  ;;  %746 = vmatmul.f32.gmra.mxu0 %v745_v47 }
 0x154   : > { %877 = vmatmul.f32.gmra.mxu2 %v750_v44 }
 0x156   : > { %943 = vmatmul.f32.gmra.mxu3 %v751_v48 }
 0x15a   : > { %821 = vmatmul.f32.gmra.mxu1 %v757_v49  ;;  %754 = vmatmul.f32.gmra.mxu0 %v753_v51 }
 0x15c   : > { %882 = vmatmul.f32.gmra.mxu2 %v758_v50 }
 0x15e   : > { %949 = vmatmul.f32.gmra.mxu3 %v759_v52 }
 0x162   : > { %1027 = vmatmul.f32.vlgmr.msrb.gmra.mxu1 %v8782_v24  ;;  %762 = vmatmul.f32.gmra.mxu0 %v761_v54 }
 0x16a   : > { %1031 = vmatmul.f32.gmra.mxu1 %v8798_v39  ;;  %976 = vmatmul.f32.vlgmr.msrb.gmra.mxu0 %v8782_v24 }
 0x172   : > { %1035 = vmatmul.f32.gmra.mxu1 %v8810_v53  ;;  %980 = vmatmul.f32.gmra.mxu0 %v8798_v39 }
 0x17a   : > { %1039 = vmatmul.f32.gmra.mxu1 %v8825_v8  ;;  %984 = vmatmul.f32.gmra.mxu0 %v8810_v53 }
 0x182   : > { %1043 = vmatmul.f32.gmra.mxu1 %v8837_v17  ;;  %988 = vmatmul.f32.gmra.mxu0 %v8825_v8 }
 0x18a   : > { %1047 = vmatmul.f32.gmra.mxu1 %v741_v30  ;;  %992 = vmatmul.f32.gmra.mxu0 %v8837_v17 }
 0x192   : > { %1051 = vmatmul.f32.gmra.mxu1 %v749_v38  ;;  %996 = vmatmul.f32.gmra.mxu0 %v741_v30  ;;  %v8891_v30 = vperm.slane %v1059_v20, 2 }
 0x19a   : > { %1055 = vmatmul.f32.gmra.mxu1 %v757_v49  ;;  %1000 = vmatmul.f32.gmra.mxu0 %v749_v38 }
 0x19e   : > { %v794_v24 = vpop.f32.mrf.mxu1 }
 0x1a2   : > { %1004 = vmatmul.f32.gmra.mxu0 %v757_v49 }
 0x1a6   : > { %v707_v59 = vpop.f32.mrf.mxu0  ;;  %v848_v53 = vpop.f32.mrf.mxu2 }
 0x1a7   : > { %v798_v58 = vpop.f32.mrf.mxu1  ;;  %v795_v12 = vadd.f32 %v794_v24, %v707_v59  ;;  %v1333_v59 = vld [vmem:[%s13959_s6] sm:$0xff] }
 0x1a8   : > { %v908_v1 = vpop.f32.mrf.mxu3 }
 0x1a9   : > { %v849_v22 = vadd.f32 %v848_v53, %v795_v12 }
 0x1ab   : > { %v909_v41 = vadd.f32 %v908_v1, %v849_v22 }
 0x1af   : > { %v802_v39 = vpop.f32.mrf.mxu1  ;;  %v715_v60 = vpop.f32.mrf.mxu0 }
 0x1b0   : > { %v853_v5 = vpop.f32.mrf.mxu2  ;;  %v799_v15 = vadd.f32 %v798_v58, %v715_v60 }
 0x1b1   : > { %v914_v6 = vpop.f32.mrf.mxu3 }
 0x1b2   : > { %v854_v21 = vadd.f32 %v853_v5, %v799_v15 }
 0x1b4   : > { %v915_v43 = vadd.f32 %v914_v6, %v854_v21 }
 0x1b7   : > { %v806_v61 = vpop.f32.mrf.mxu1  ;;  %v723_v62 = vpop.f32.mrf.mxu0 }
 0x1b8   : > { %v858_v8 = vpop.f32.mrf.mxu2  ;;  %v803_v31 = vadd.f32 %v802_v39, %v723_v62 }
 0x1b9   : > { %v920_v9 = vpop.f32.mrf.mxu3 }
 0x1ba   : > { %v859_v47 = vadd.f32 %v858_v8, %v803_v31  ;;  %v1351_v8 = vsel %vm1349_vm12, %v1333_v59, 0 }
 0x1bb   : > { %v8918_v15 = vand.u32 4294901760, %v1351_v8 }
 0x1bc   : > { %v921_v54 = vadd.f32 %v920_v9, %v859_v47 }
 0x1bf   : > { %v8864_v35 = vpop.f32.mrf.mxu1  ;;  %v731_v0 = vpop.f32.mrf.mxu0 }
 0x1c0   : > { %v863_v11 = vpop.f32.mrf.mxu2  ;;  %v807_v55 = vadd.f32 %v806_v61, %v731_v0 }
 0x1c1   : > { %v926_v28 = vpop.f32.mrf.mxu3 }
 0x1c2   : > { %v864_v53 = vadd.f32 %v863_v11, %v807_v55 }
 0x1c7   : > { %v8866_v46 = vpop.f32.mrf.mxu1  ;;  %v8868_v4 = vpop.f32.mrf.mxu0 }
 0x1c8   : > { %v8880_v16 = vpop.f32.mrf.mxu2 }
 0x1c9   : > { %v8885_v14 = vpop.f32.mrf.mxu3 }
 0x1cf   : > { %v8870_v29 = vpop.f32.mrf.mxu1  ;;  %v8872_v7 = vpop.f32.mrf.mxu0 }
 0x1d0   : > { %v873_v38 = vpop.f32.mrf.mxu2 }
 0x1d1   : > { %v8903_v50 = vpop.f32.mrf.mxu3 }
 0x1d7   : > { %v8874_v10 = vpop.f32.mrf.mxu1  ;;  %v8876_v3 = vpop.f32.mrf.mxu0 }
 0x1d8   : > { %v878_v9 = vpop.f32.mrf.mxu2  ;;  %v819_v20 = vadd.f32 %v8870_v29, %v8876_v3 }
 0x1d9   : > { %v944_v21 = vpop.f32.mrf.mxu3 }
 0x1df   : > { %v1028_v63 = vpop.f32.mrf.mxu1  ;;  %v8878_v13 = vpop.f32.mrf.mxu0 }
 0x1e0   : > { %v823_v29 = vadd.f32 %v8874_v10, %v8878_v13  ;;  %v883_v10 = vpop.f32.mrf.mxu2 }
 0x1e7   : > { %v1032_v17 = vpop.f32.mrf.mxu1  ;;  %v977_v18 = vpop.f32.mrf.mxu0 }
 0x1e8   : > { %v978_v19 = vadd.f32 %v977_v18, %v909_v41  ;;  %v811_v18 = vadd.f32 %v8864_v35, %v8868_v4 }
 0x1ea   : > { %v1029_v23 = vadd.f32 %v1028_v63, %v978_v19  ;;  %v815_v19 = vadd.f32 %v8866_v46, %v8872_v7  ;;  %v8937_v46 = vsub.f32 %v1351_v8, %v8918_v15  ;;  %v1335_v8 = vld [vmem:[%s13959_s6 + $0x10] sm:$0xff] }
 0x1ec   : > { %v1068_v56 = vrot.slane %v1029_v23, 7  ;;  %v1093_v27 = vrot.slane %v1029_v23, 1  ;;  %v1128_v36 = vmul.f32 %v8889_v26, %v1029_v23  ;;  %v1378_v13 = vand.u32 4294901760, %v8937_v46 }
 0x1ee   : > { %v1085_v32 = vsel %vm1084_vm0, 0.0, %v1068_v56  ;;  %v1110_v33 = vsel %vm1109_vm11, %v1093_v27, 0.0 }
 0x1ef   : > { %v1119_v34 = vmul.f32 %v8887_v25, %v1085_v32  ;;  %v981_v37 = vpop.f32.mrf.mxu0  ;;  %v1036_v42 = vpop.f32.mrf.mxu1  ;;  %v1145_v44 = vmul.f32 %v8891_v30, %v1110_v33  ;;  %v869_v33 = vadd.f32 %v8880_v16, %v811_v18 }
 0x1f0   : > { %v982_v40 = vadd.f32 %v981_v37, %v915_v43  ;;  %v1334_v37 = vld [vmem:[%s13959_s6 + $0x8] sm:$0xff] }
 0x1f1   : > { %v1136_v57 = vadd.f32 %v1128_v36, %v1119_v34  ;;  %v874_v34 = vadd.f32 %v873_v38, %v815_v19  ;;  %v879_v36 = vadd.f32 %v878_v9, %v819_v20  ;;  %v933_v55 = vadd.f32 %v8885_v14, %v869_v33 }
 0x1f2   : > { %v1033_v48 = vadd.f32 %v1032_v17, %v982_v40  ;;  %v927_v17 = vadd.f32 %v926_v28, %v864_v53 }
 0x1f3   : > { %v1153_v49 = vadd.f32 %v1145_v44, %v1136_v57  ;;  %v1354_v44 = vsel %vm1349_vm12, %v1334_v37, 0 }
 0x1f4   : > { %v1069_v51 = vrot.slane %v1033_v48, 7  ;;  %v1094_v52 = vrot.slane %v1033_v48, 1  ;;  %v1129_v61 = vmul.f32 %v8889_v26, %v1033_v48  ;;  %v8949_v47 = vand.u32 4294901760, %v1354_v44 }
 0x1f5   : > { %v8906_v2 = vadd.f32 %v8901_v45, %v1153_v49  ;;  %v884_v48 = vadd.f32 %v883_v10, %v823_v29 }
 0x1f6   : > { %v1086_v24 = vsel %vm1084_vm0, 0.0, %v1069_v51  ;;  %v1111_v58 = vsel %vm1109_vm11, %v1094_v52, 0.0  ;;  %v939_v51 = vadd.f32 %v8903_v50, %v874_v34  ;;  %v8956_v52 = vadd.f32 %v944_v21, %v879_v36 }
 0x1f7   : > { %v7898_v39 = vmul.f32 -1.442695, %v8906_v2  ;;  %v1120_v60 = vmul.f32 %v8887_v25, %v1086_v24  ;;  %v985_v62 = vpop.f32.mrf.mxu0  ;;  %v1146_v5 = vmul.f32 %v8891_v30, %v1111_v58  ;;  %v1040_v6 = vpop.f32.mrf.mxu1  ;;  %v1537_v21 = vsel %vm1349_vm12, %v1335_v8, 0 }
 0x1f8   : > { %v986_v0 = vadd.f32 %v985_v62, %v921_v54  ;;  %v950_v62 = vpop.f32.mrf.mxu3 }
 0x1f9   : > { %8227 = vpow2.f32 %v7898_v39  ;;  %v1137_v1 = vadd.f32 %v1129_v61, %v1120_v60  ;;  %v8962_v60 = vsub.f32 %v1354_v44, %v8949_v47 }
 0x1fa   : > { %v1037_v12 = vadd.f32 %v1036_v42, %v986_v0  ;;  %v8970_v0 = vsub.f32 %v8937_v46, %v1378_v13 }
 0x1fb   : > { %v1154_v63 = vadd.f32 %v1146_v5, %v1137_v1  ;;  %v8972_v1 = vadd.f32 %v950_v62, %v884_v48  ;;  %v1386_v18 = vand.u32 4294901760, %v8962_v60 }
 0x1fc   : > { %v1070_v22 = vrot.slane %v1037_v12, 7  ;;  %v1095_v41 = vrot.slane %v1037_v12, 1  ;;  %v1130_v35 = vmul.f32 %v8889_v26, %v1037_v12  ;;  %v1380_v20 = vand.u32 4294901760, %v8970_v0 }
 0x1fd   : > { %v8923_v11 = vadd.f32 %v8901_v45, %v1154_v63 }
 0x1fe   : > { %v1087_v23 = vsel %vm1084_vm0, 0.0, %v1070_v22  ;;  %v1112_v56 = vsel %vm1109_vm11, %v1095_v41, 0.0 }
 0x1ff   : > { %v8228_v27 = vpop.eup %8227  ;;  %v7899_v28 = vmul.f32 -1.442695, %v8923_v11  ;;  %v1121_v43 = vmul.f32 %v8887_v25, %v1087_v23  ;;  %v989_v4 = vpop.f32.mrf.mxu0  ;;  %v1147_v3 = vmul.f32 %v8891_v30, %v1112_v56 }
 0x200   : > { %v8934_v31 = vadd.f32 1.0, %v8228_v27  ;;  %v990_v32 = vadd.f32 %v989_v4, %v927_v17  ;;  %v1044_v57 = vpop.f32.mrf.mxu1 }
 0x201   : > { %8229 = vpow2.f32 %v7899_v28  ;;  %v1138_v7 = vadd.f32 %v1130_v35, %v1121_v43 }
 0x202   : > { %8231 = vrcp.f32 %v8934_v31  ;;  %v1041_v40 = vadd.f32 %v1040_v6, %v990_v32  ;;  %v1214_v9 = vand.u32 2147483647, %v8934_v31  ;;  %v1216_v12 = vand.u32 2147483648, %v8934_v31 }
 0x203   : > { %v1155_v42 = vadd.f32 %v1147_v3, %v1138_v7  ;;  %vm1210_vm14 = vweird.f32 %v8934_v31 }
 0x204   : > { %v1071_v38 = vrot.slane %v1041_v40, 7  ;;  %v1096_v49 = vrot.slane %v1041_v40, 1  ;;  %v1131_v6 = vmul.f32 %v8889_v26, %v1041_v40  ;;  %vm8988_vm15 = vcmp.eq.f32.partialorder %v1214_v9, 8.507059e+37 }
 0x205   : > { %v8952_v16 = vadd.f32 %v8901_v45, %v1155_v42  ;;  %v1217_v4 = vor.u32 1.1754944e-38, %v1216_v12 }
 0x206   : > { %v1088_v58 = vsel %vm1084_vm0, 0.0, %v1071_v38  ;;  %v1113_v59 = vsel %vm1109_vm11, %v1096_v49, 0.0 }
 0x207   : > { %v8230_v54 = vpop.eup %8229  ;;  %v7900_v24 = vmul.f32 -1.442695, %v8952_v16  ;;  %v993_v39 = vpop.f32.mrf.mxu0  ;;  %v1122_v14 = vmul.f32 %v8887_v25, %v1088_v58  ;;  %v1148_v63 = vmul.f32 %v8891_v30, %v1113_v59 }
 0x208   : > { %v8232_v61 = vpop.eup %8231  ;;  %v8964_v53 = vadd.f32 1.0, %v8230_v54  ;;  %v994_v50 = vadd.f32 %v993_v39, %v933_v55  ;;  %v1048_v43 = vpop.f32.mrf.mxu1  ;;  %v8185_v55 = vld [vmem:[%s13961_s8] ss:$0 sm:$0xff] }
 0x209   : > { %v1206_v5 = vmul.f32 %v8232_v61, %v8934_v31  ;;  %8233 = vpow2.f32 %v7900_v24  ;;  %v1139_v41 = vadd.f32 %v1131_v6, %v1122_v14  ;;  %vm1211_vm13 = vweird.f32 %v8232_v61 }
 0x20a   : > { %8235 = vrcp.f32 %v8964_v53  ;;  %v1045_v17 = vadd.f32 %v1044_v57, %v994_v50  ;;  %v1229_v19 = vand.u32 2147483647, %v8964_v53  ;;  %v1231_v32 = vand.u32 2147483648, %v8964_v53  ;;  %vm1212_vm2 = vmor %vm1210_vm14, %vm1211_vm13 }
 0x20b   : > { %v1207_v22 = vsub.f32 1.0, %v1206_v5  ;;  %v1156_v56 = vadd.f32 %v1148_v63, %v1139_v41  ;;  %vm1225_vm1 = vweird.f32 %v8964_v53  ;;  %v9001_v31 = vsub.f32 %v8962_v60, %v1386_v18 }
 0x20c   : > { %v1072_v27 = vrot.slane %v1045_v17, 7  ;;  %v1097_v28 = vrot.slane %v1045_v17, 1  ;;  %v9007_v57 = vand.u32 4294901760, %v1537_v21  ;;  %vm9010_vm3 = vcmp.eq.f32.partialorder %v1229_v19, 8.507059e+37 }
 0x20d   : > { %v1208_v23 = vmul.f32 %v8232_v61, %v1207_v22  ;;  %v8995_v3 = vadd.f32 %v8901_v45, %v1156_v56  ;;  %v1232_v54 = vor.u32 1.1754944e-38, %v1231_v32  ;;  %v1132_v24 = vmul.f32 %v8889_v26, %v1045_v17 }
 0x20e   : > { %v1089_v33 = vsel %vm1084_vm0, 0.0, %v1072_v27  ;;  %v1114_v49 = vsel %vm1109_vm11, %v1097_v28, 0.0  ;;  %v1388_v39 = vand.u32 4294901760, %v9001_v31  ;;  %v9029_v50 = vsub.f32 %v1537_v21, %v9007_v57 }
 0x20f   : > { %v8234_v29 = vpop.eup %8233  ;;  %v1209_v7 = vadd.f32 %v8232_v61, %v1208_v23  ;;  %v997_v34 = vpop.f32.mrf.mxu0  ;;  %v1123_v42 = vmul.f32 %v8887_v25, %v1089_v33  ;;  %v7901_v38 = vmul.f32 -1.442695, %v8995_v3  ;;  %v1149_v62 = vmul.f32 %v8891_v30, %v1114_v49 }
 0x210   : > { %v8236_v36 = vpop.eup %8235  ;;  %v9004_v37 = vadd.f32 1.0, %v8234_v29  ;;  %v998_v40 = vadd.f32 %v997_v34, %v939_v51  ;;  %v1052_v17 = vpop.f32.mrf.mxu1 }
 0x211   : > { %v1213_v44 = vsel %vm1212_vm2, %v8232_v61, %v1209_v7  ;;  %v1221_v10 = vmul.f32 %v8236_v36, %v8964_v53  ;;  %v1140_v61 = vadd.f32 %v1132_v24, %v1123_v42  ;;  %vm1226_vm4 = vweird.f32 %v8236_v36 }
 0x212   : > { %v1218_v51 = vsel %vm8988_vm15, %v1217_v4, %v1213_v44  ;;  %8237 = vrcp.f32 %v9004_v37  ;;  %v1049_v14 = vadd.f32 %v1048_v43, %v998_v40  ;;  %v1244_v8 = vand.u32 2147483647, %v9004_v37  ;;  %vm1227_vm5 = vmor %vm1225_vm1, %vm1226_vm4 }
 0x213   : > { %v9024_v58 = vmul.f32 %v1218_v51, %v8906_v2  ;;  %v1222_v59 = vsub.f32 1.0, %v1221_v10  ;;  %8239 = vpow2.f32 %v7901_v38  ;;  %v1157_v9 = vadd.f32 %v1149_v62, %v1140_v61 }
 0x214   : > { %v1073_v12 = vrot.slane %v1049_v14, 7  ;;  %v1098_v63 = vrot.slane %v1049_v14, 1  ;;  %v1246_v41 = vand.u32 2147483648, %v9004_v37  ;;  %v1133_v33 = vmul.f32 %v8889_v26, %v1049_v14 }
 0x215   : > { %14096 = vst [vmem:[#allocation2_spill] sm:$0xff] %v9024_v58  ;;  %v1223_v5 = vmul.f32 %v8236_v36, %v1222_v59  ;;  %v4350_v6 = vmul.f32 %v8185_v55, %v9024_v58  ;;  %v1357_v2 = vsel %vm1349_vm12, %v9024_v58, 0  ;;  %v9043_v27 = vadd.f32 %v8901_v45, %v1157_v9 }
 0x216   : > { %5342 = vst [vmem:[#allocation1] sm:$0xff] %v9024_v58  ;;  %v9038_v23 = vand.u32 4294901760, %v1357_v2  ;;  %v1090_v28 = vsel %vm1084_vm0, 0.0, %v1073_v12  ;;  %v1115_v43 = vsel %vm1109_vm11, %v1098_v63, 0.0  ;;  %vm1240_vm6 = vweird.f32 %v9004_v37 }
 0x217   : > { %v1224_v22 = vadd.f32 %v8236_v36, %v1223_v5  ;;  %v1001_v19 = vpop.f32.mrf.mxu0  ;;  %v4358_v21 = vsel %vm1349_vm12, %v4350_v6, 0.0  ;;  %v1124_v7 = vmul.f32 %v8887_v25, %v1090_v28  ;;  %v7902_v42 = vmul.f32 -1.442695, %v9043_v27 }
 0x218   : > { %v8238_v56 = vpop.eup %8237  ;;  %v1002_v35 = vadd.f32 %v1001_v19, %v8956_v52  ;;  %4359 = vadd.xlane.f32.xlu1 %v4358_v21  ;;  %1375 = vmatpush.xpose.msrb.mxu2 %v9038_v23  ;;  %v1150_v52 = vmul.f32 %v8891_v30, %v1115_v43  ;;  %vm9064_vm8 = vcmp.eq.f32.partialorder %v1244_v8, 8.507059e+37  ;;  %v9082_v14 = vsub.f32 %v1357_v2, %v9038_v23  ;;  %v1056_v2 = vpop.f32.mrf.mxu1 }
 0x219   : > { %v8240_v4 = vpop.eup %8239  ;;  %v1228_v32 = vsel %vm1227_vm5, %v8236_v36, %v1224_v22  ;;  %v1236_v29 = vmul.f32 %v8238_v56, %v9004_v37  ;;  %v1141_v44 = vadd.f32 %v1133_v33, %v1124_v7  ;;  %vm1241_vm7 = vweird.f32 %v8238_v56 }
 0x21a   : > { %v1233_v53 = vsel %vm9010_vm3, %v1232_v54, %v1228_v32  ;;  %v9054_v34 = vadd.f32 1.0, %v8240_v4  ;;  %v1053_v10 = vadd.f32 %v1052_v17, %v1002_v35  ;;  %v1247_v54 = vor.u32 1.1754944e-38, %v1246_v41  ;;  %vm1242_vm9 = vmor %vm1240_vm6, %vm1241_vm7 }
 0x21b   : > { %v9059_v40 = vmul.f32 %v1233_v53, %v8923_v11  ;;  %v1237_v36 = vsub.f32 1.0, %v1236_v29  ;;  %1381 = vmatmul.f32.vlgmr.msrb.gmra.mxu2 %v1380_v20  ;;  %v8186_v11 = vld [vmem:[%s13961_s8 + $0x1] ss:$0 sm:$0xff]  ;;  %v1158_v55 = vadd.f32 %v1150_v52, %v1141_v44  ;;  %v9095_v17 = vand.u32 4294901760, %v9082_v14 }
 0x21c   : > { %8241 = vrcp.f32 %v9054_v34  ;;  %v1074_v51 = vrot.slane %v1053_v10, 7  ;;  %v1259_v24 = vand.u32 2147483647, %v9054_v34  ;;  %v1099_v59 = vrot.slane %v1053_v10, 1  ;;  %1440 = vmatpush.xpose.msra.mxu2 %v9082_v14 }
 0x21d   : > { %v9061_v38 = vld [vmem:[#allocation1 + $0x1] ss:$9 sm:$0xff]  ;;  %v1238_v49 = vmul.f32 %v8238_v56, %v1237_v36  ;;  %8243 = vpow2.f32 %v7902_v42  ;;  %v1134_v61 = vmul.f32 %v8889_v26, %v1053_v10  ;;  %v9078_v0 = vadd.f32 %v8901_v45, %v1158_v55 }
 0x21e   : > { %14097 = vst [vmem:[#allocation3_spill] sm:$0xff] %v9061_v38  ;;  %v1091_v20 = vsel %vm1084_vm0, 0.0, %v1074_v51  ;;  %v1116_v6 = vsel %vm1109_vm11, %v1099_v59, 0.0  ;;  %v4351_v12 = vmul.f32 %v8186_v11, %v9059_v40  ;;  %v1261_v32 = vand.u32 2147483648, %v9054_v34 }
 0x21f   : > { %5345 = vst [vmem:[#allocation1] sm:$0xff] %v9059_v40  ;;  %v1239_v62 = vadd.f32 %v8238_v56, %v1238_v49  ;;  %v1005_v5 = vpop.f32.mrf.mxu0  ;;  %v1125_v8 = vmul.f32 %v8887_v25, %v1091_v20  ;;  %v7903_v22 = vmul.f32 -1.442695, %v9078_v0  ;;  %v1151_v41 = vmul.f32 %v8891_v30, %v1116_v6 }
 0x220   : > { %v1006_v9 = vadd.f32 %v1005_v5, %v8972_v1  ;;  %v4361_v1 = vsel %vm1349_vm12, %v4351_v12, 0.0  ;;  %1500 = vmatpush.xpose.msrb.mxu2 %v9095_v17  ;;  %v1411_v52 = vsub.f32 %v9082_v14, %v9095_v17  ;;  %v1564_v36 = vand.u32 4294901760, %v9029_v50 }
 0x221   : > { %v1243_v63 = vsel %vm1242_vm9, %v8238_v56, %v1239_v62  ;;  %v1142_v21 = vadd.f32 %v1134_v61, %v1125_v8  ;;  %v1336_v56 = vld [vmem:[%s13959_s6 + $0x18] sm:$0xff]  ;;  %8245 = vpow2.f32 %v7903_v22  ;;  %4362 = vadd.xlane.f32.xlu2 %v4361_v1  ;;  %vm1255_vm10 = vweird.f32 %v9054_v34 }
 0x222   : > { %v8242_v37 = vpop.eup %8241  ;;  %v1248_v19 = vsel %vm9064_vm8, %v1247_v54, %v1243_v63  ;;  %v1057_v28 = vadd.f32 %v1056_v2, %v1006_v9  ;;  %v1540_v44 = vsel %vm1349_vm12, %v1336_v56, 0  ;;  %vm9121_vm13 = vcmp.eq.f32.partialorder %v1259_v24, 8.507059e+37 }
 0x223   : > { %v8244_v43 = vpop.eup %8243  ;;  %v9104_v35 = vmul.f32 %v1248_v19, %v8952_v16  ;;  %v1251_v4 = vmul.f32 %v8242_v37, %v9054_v34  ;;  %v1159_v33 = vadd.f32 %v1151_v41, %v1142_v21  ;;  %1389 = vmatmul.f32.gmra.mxu2 %v1388_v39  ;;  %v1543_v31 = vsel %vm1349_vm12, %v9059_v40, 0  ;;  %v8187_v39 = vld [vmem:[%s13961_s8 + $0x2] ss:$0 sm:$0xff]  ;;  %v8188_v34 = vld [vmem:[%s13961_s8 + $0x3] ss:$0 sm:$0xff] }
 0x224   : > { %v9111_v7 = vadd.f32 1.0, %v8244_v43  ;;  %v1075_v53 = vrot.slane %v1057_v28, 7  ;;  %v1100_v42 = vrot.slane %v1057_v28, 1  ;;  %vm1256_vm14 = vweird.f32 %v8242_v37 }
 0x225   : > { %v1252_v16 = vsub.f32 1.0, %v1251_v4  ;;  %v9132_v11 = vadd.f32 %v8901_v45, %v1159_v33  ;;  %v1262_v55 = vor.u32 1.1754944e-38, %v1261_v32  ;;  %v1135_v24 = vmul.f32 %v8889_v26, %v1057_v28  ;;  %vm1257_vm15 = vmor %vm1255_vm10, %vm1256_vm14  ;;  %v1337_v28 = vld [vmem:[%s13959_s6 + $0x20] sm:$0xff] }
 0x226   : > { %v9109_v29 = vld [vmem:[#allocation1 + $0x1] ss:$9 sm:$0xff]  ;;  %8247 = vrcp.f32 %v9111_v7  ;;  %v1092_v49 = vsel %vm1084_vm0, 0.0, %v1075_v53  ;;  %v1117_v51 = vsel %vm1109_vm11, %v1100_v42, 0.0  ;;  %v9139_v20 = vand.u32 4294901760, %v1411_v52 }
 0x227   : > { %14100 = vst [vmem:[#allocation4_spill] sm:$0xff] %v9109_v29  ;;  %v1253_v48 = vmul.f32 %v8242_v37, %v1252_v16  ;;  %v1126_v54 = vmul.f32 %v8887_v25, %v1092_v49  ;;  %v8246_v59 = vpop.eup %8245  ;;  %v7904_v62 = vmul.f32 -1.442695, %v9132_v11  ;;  %v9141_v5 = vand.u32 4294901760, %v1543_v31 }
 0x228   : > { %5347 = vst [vmem:[#allocation1] sm:$0xff] %v9104_v35  ;;  %v9145_v6 = vadd.f32 1.0, %v8246_v59  ;;  %v4352_v9 = vmul.f32 %v8187_v39, %v9104_v35  ;;  %v1729_v25 = vsel %vm1349_vm12, %v9104_v35, 0  ;;  %1413 = vmatpush.xpose.msrb.mxu3 %v9139_v20  ;;  %vm1270_vm1 = vweird.f32 %v9111_v7 }
 0x229   : > { %v1254_v61 = vadd.f32 %v8242_v37, %v1253_v48  ;;  %v1143_v8 = vadd.f32 %v1135_v24, %v1126_v54  ;;  %8249 = vpow2.f32 %v7904_v62  ;;  %1654 = vmatpush.xpose.msra.mxu1 %v9141_v5  ;;  %v9153_v12 = vsub.f32 %v1543_v31, %v9141_v5 }
 0x22a   : > { %v9155_v63 = vand.u32 4294901760, %v1729_v25  ;;  %8251 = vrcp.f32 %v9145_v6  ;;  %v9182_v1 = vand.u32 4294901760, %v1540_v44  ;;  %v1274_v43 = vand.u32 2147483647, %v9111_v7 }
 0x22b   : > { %v1258_v26 = vsel %vm1257_vm15, %v8242_v37, %v1254_v61  ;;  %v1152_v37 = vmul.f32 %v8891_v30, %v1117_v51  ;;  %1443 = vmatmul.f32.vlgmr.msra.gmra.mxu2 %v8937_v46  ;;  %1626 = vmatpush.xpose.msra.mxu0 %v9153_v12  ;;  %v1276_v33 = vand.u32 2147483648, %v9111_v7  ;;  %v1723_v16 = vsel %vm1349_vm12, %v1337_v28, 0 }
 0x22c   : > { %v8248_v22 = vpop.eup %8247  ;;  %v1263_v2 = vsel %vm9121_vm13, %v1262_v55, %v1258_v26  ;;  %1468 = vmatpush.xpose.msra.mxu3 %v9038_v23  ;;  %1561 = vmatpush.xpose.msra.mxu2 %v9141_v5  ;;  %v9188_v4 = vsub.f32 %v1729_v25, %v9155_v63  ;;  %v9197_v42 = vsub.f32 %v1540_v44, %v9182_v1  ;;  %v9210_v55 = vand.u32 4294901760, %v9153_v12  ;;  %v8189_v26 = vld [vmem:[%s13961_s8 + $0x4] ss:$0 sm:$0xff] }
 0x22d   : > { %v9169_v19 = vmul.f32 %v1263_v2, %v8995_v3  ;;  %v1266_v21 = vmul.f32 %v8248_v22, %v9111_v7  ;;  %v1160_v30 = vadd.f32 %v1152_v37, %v1143_v8  ;;  %1415 = vmatmul.f32.vlgmr.msrb.gmra.mxu3 %v8918_v15  ;;  %1658 = vmatmul.f32.vlgmr.msra.gmra.mxu1 %v1564_v36  ;;  %v4364_v3 = vsel %vm1349_vm12, %v4352_v9, 0.0  ;;  %v1338_v7 = vld [vmem:[%s13959_s6 + $0x28] sm:$0xff] }
 0x22e   : > { %4365 = vadd.xlane.f32.xlu0 %v4364_v3  ;;  %1629 = vmatmul.f32.vlgmr.msra.gmra.mxu0 %v9029_v50  ;;  %vm1271_vm2 = vweird.f32 %v8248_v22  ;;  %v9202_v31 = vand.u32 4294901760, %v9188_v4  ;;  %v1572_v44 = vand.u32 4294901760, %v9197_v42  ;;  %v9216_v59 = vand.u32 4294901760, %v1723_v16 }
 0x22f   : > { %v9160_v41 = vld [vmem:[#allocation1 + $0x1] ss:$9 sm:$0xff]  ;;  %v1267_v56 = vsub.f32 1.0, %v1266_v21  ;;  %v4353_v32 = vmul.f32 %v8188_v34, %v9169_v19  ;;  %v9193_v53 = vadd.f32 %v8901_v45, %v1160_v30  ;;  %v8250_v52 = vpop.eup %8249  ;;  %1747 = vmatpush.xpose.msrb.mxu0 %v9155_v63  ;;  %vm1272_vm3 = vmor %vm1270_vm1, %vm1271_vm2  ;;  %vm1275_vm4 = vcmp.eq.f32.partialorder %v1274_v43, 8.507059e+37 }
 0x230   : > { %14103 = vst [vmem:[#allocation5_spill] sm:$0xff] %v9160_v41  ;;  %1526 = vmatpush.xpose.msrb.mxu3 %v9038_v23  ;;  %v8252_v48 = vpop.eup %8251  ;;  %v9205_v45 = vadd.f32 1.0, %v8250_v52  ;;  %v1783_v24 = vsub.f32 %v9188_v4, %v9202_v31  ;;  %v1277_v61 = vor.u32 1.1754944e-38, %v1276_v33  ;;  %v1289_v62 = vand.u32 2147483647, %v9145_v6 }
 0x231   : > { %5349 = vst [vmem:[#allocation1] sm:$0xff] %v9169_v19  ;;  %v1268_v10 = vmul.f32 %v8248_v22, %v1267_v56  ;;  %v4367_v39 = vsel %vm1349_vm12, %v4353_v32, 0.0  ;;  %v7905_v49 = vmul.f32 -1.442695, %v9193_v53  ;;  %v1281_v54 = vmul.f32 %v8252_v48, %v9145_v6 }
 0x232   : > { %4368 = vadd.xlane.f32.xlu1 %v4367_v39  ;;  %8253 = vrcp.f32 %v9205_v45  ;;  %v9224_v25 = vand.u32 4294901760, %v1783_v24  ;;  %vm1286_vm5 = vweird.f32 %v8252_v48  ;;  %v1291_v37 = vand.u32 2147483648, %v9145_v6 }
 0x233   : > { %v1269_v51 = vadd.f32 %v8248_v22, %v1268_v10  ;;  %1872 = vmatpush.xpose.msra.mxu0 %v9202_v31  ;;  %1448 = vmatmul.f32.gmra.mxu2 %v8962_v60  ;;  %v1282_v9 = vsub.f32 1.0, %v1281_v54  ;;  %8255 = vpow2.f32 %v7905_v49  ;;  %v9245_v30 = vsub.f32 %v1723_v16, %v9216_v59 }
 0x234   : > { %1785 = vmatpush.xpose.msrb.mxu1 %v9224_v25  ;;  %v1915_v3 = vsel %vm1349_vm12, %v9169_v19, 0  ;;  %vm1285_vm6 = vweird.f32 %v9145_v6  ;;  %v1726_v56 = vsel %vm1349_vm12, %v1338_v7, 0  ;;  %vm1290_vm8 = vcmp.eq.f32.partialorder %v1289_v62, 8.507059e+37 }
 0x235   : > { %v1273_v8 = vsel %vm1272_vm3, %v8248_v22, %v1269_v51  ;;  %1419 = vmatmul.f32.gmra.mxu3 %v8949_v47  ;;  %1664 = vmatmul.f32.gmra.mxu1 %v1572_v44  ;;  %v1597_v22 = vsub.f32 %v9153_v12, %v9210_v55  ;;  %v1283_v28 = vmul.f32 %v8252_v48, %v1282_v9  ;;  %v1750_v43 = vand.u32 4294901760, %v9245_v30  ;;  %vm1287_vm7 = vmor %vm1285_vm6, %vm1286_vm5 }
 0x236   : > { %v1278_v2 = vsel %vm1275_vm4, %v1277_v61, %v1273_v8  ;;  %1634 = vmatmul.f32.gmra.mxu0 %v9197_v42  ;;  %v9256_v33 = vand.u32 4294901760, %v1726_v56  ;;  %v1292_v6 = vor.u32 1.1754944e-38, %v1291_v37  ;;  %v9259_v52 = vand.u32 4294901760, %v1915_v3  ;;  %v8190_v61 = vld [vmem:[%s13961_s8 + $0x5] ss:$0 sm:$0xff] }
 0x237   : > { %v9241_v21 = vmul.f32 %v1278_v2, %v9043_v27  ;;  %v1284_v27 = vadd.f32 %v8252_v48, %v1283_v28  ;;  %v9264_v54 = vand.u32 4294901760, %v1597_v22  ;;  %v1751_v24 = vsub.f32 %v9245_v30, %v1750_v43 }
 0x238   : > { %v9232_v34 = vld [vmem:[#allocation1 + $0x1] ss:$9 sm:$0xff]  ;;  %1898 = vmatpush.xpose.msra.mxu1 %v9155_v63  ;;  %v8254_v16 = vpop.eup %8253  ;;  %v1304_v22 = vand.u32 2147483647, %v9205_v45  ;;  %v1306_v28 = vand.u32 2147483648, %v9205_v45  ;;  %vm1300_vm10 = vweird.f32 %v9205_v45 }
 0x239   : > { %14104 = vst [vmem:[#allocation6_spill] sm:$0xff] %v9232_v34  ;;  %v4354_v32 = vmul.f32 %v8189_v26, %v9241_v21  ;;  %v2101_v10 = vsel %vm1349_vm12, %v9241_v21, 0  ;;  %v8256_v39 = vpop.eup %8255  ;;  %v1288_v49 = vsel %vm1287_vm7, %v8252_v48, %v1284_v27  ;;  %v1296_v51 = vmul.f32 %v8254_v16, %v9205_v45  ;;  %v8191_v45 = vld [vmem:[%s13961_s8 + $0x6] ss:$0 sm:$0xff] }
 0x23a   : > { %5351 = vst [vmem:[#allocation1] sm:$0xff] %v9241_v21  ;;  %v1293_v62 = vsel %vm1290_vm8, %v1292_v6, %v1288_v49  ;;  %v9272_v8 = vadd.f32 1.0, %v8256_v39  ;;  %v9277_v48 = vsub.f32 %v1726_v56, %v9256_v33  ;;  %v1752_v2 = vand.u32 4294901760, %v1751_v24 }
 0x23b   : > { %v4370_v9 = vsel %vm1349_vm12, %v4354_v32, 0.0  ;;  %1502 = vmatmul.f32.vlgmr.msrb.gmra.mxu2 %v8918_v15  ;;  %v9280_v26 = vmul.f32 %v1293_v62, %v9078_v0  ;;  %v1297_v7 = vsub.f32 1.0, %v1296_v51  ;;  %v9283_v37 = vand.u32 4294901760, %v2101_v10 }
 0x23c   : > { %4371 = vadd.xlane.f32.xlu2 %v4370_v9  ;;  %1686 = vmatpush.xpose.msrb.mxu2 %v9210_v55  ;;  %8257 = vrcp.f32 %v9272_v8  ;;  %v9292_v0 = vsub.f32 %v1915_v3, %v9259_v52  ;;  %vm1301_vm9 = vweird.f32 %v8254_v16  ;;  %v13968_v27 = vand.u32 4294901760, %v9277_v48 }
 0x23d   : > { %14105 = vst [vmem:[#allocation7_spill] sm:$0xff] %v9280_v26  ;;  %1472 = vmatmul.f32.vlgmr.msra.gmra.mxu3 %v1378_v13  ;;  %1787 = vmatmul.f32.vlgmr.msrb.gmra.mxu1 %v9216_v59  ;;  %v1298_v56 = vmul.f32 %v8254_v16, %v1297_v7  ;;  %v4355_v32 = vmul.f32 %v8190_v61, %v9280_v26  ;;  %vm1302_vm13 = vmor %vm1300_vm10, %vm1301_vm9  ;;  %v1307_v49 = vor.u32 1.1754944e-38, %v1306_v28  ;;  %vm1305_vm14 = vcmp.eq.f32.partialorder %v1304_v22, 8.507059e+37 }
 0x23e   : > { %1599 = vmatpush.xpose.msra.mxu3 %v9264_v54  ;;  %2026 = vmatpush.xpose.msrb.mxu1 %v9259_v52  ;;  %v1759_v13 = vsub.f32 %v9277_v48, %v13968_v27  ;;  %v9308_v39 = vsub.f32 %v2101_v10, %v9283_v37  ;;  %v1565_v9 = vsub.f32 %v9029_v50, %v1564_v36  ;;  %v1319_v50 = vand.u32 2147483647, %v9272_v8 }
 0x23f   : > { %1753 = vmatmul.f32.vlgmr.msrb.gmra.mxu0 %v1752_v2  ;;  %v1299_v46 = vadd.f32 %v8254_v16, %v1298_v56  ;;  %v4373_v3 = vsel %vm1349_vm12, %v4355_v32, 0.0  ;;  %v1321_v36 = vand.u32 2147483648, %v9272_v8  ;;  %vm1315_vm1 = vweird.f32 %v9272_v8 }
 0x240   : > { %1998 = vmatpush.xpose.msrb.mxu0 %v9292_v0  ;;  %14107 = vst [vmem:[#allocation9_spill] sm:$0xff] %v9308_v39  ;;  %4374 = vadd.xlane.f32.xlu0 %v4373_v3  ;;  %v1760_v62 = vand.u32 4294901760, %v1759_v13  ;;  %v1573_v13 = vsub.f32 %v9197_v42, %v1572_v44  ;;  %v1339_v3 = vld [vmem:[%s13959_s6 + $0x30] sm:$0xff]  ;;  %vm1320_vm3 = vcmp.eq.f32.partialorder %v1319_v50, 8.507059e+37 }
 0x241   : > { %v9298_v6 = vld [vmem:[#allocation1 + $0x1] ss:$9 sm:$0xff]  ;;  %v1303_v51 = vsel %vm1302_vm13, %v8254_v16, %v1299_v46  ;;  %v9322_v16 = vand.u32 4294901760, %v9308_v39  ;;  %v1322_v46 = vor.u32 1.1754944e-38, %v1321_v36  ;;  %v1909_v44 = vsel %vm1349_vm12, %v1339_v3, 0 }
 0x242   : > { %14106 = vst [vmem:[#allocation8_spill] sm:$0xff] %v9298_v6  ;;  %v8258_v24 = vpop.eup %8257  ;;  %v1308_v61 = vsel %vm1305_vm14, %v1307_v49, %v1303_v51 }
 0x243   : > { %5353 = vst [vmem:[#allocation1] sm:$0xff] %v9280_v26  ;;  %1506 = vmatmul.f32.gmra.mxu2 %v8949_v47  ;;  %v9318_v10 = vmul.f32 %v1308_v61, %v9132_v11  ;;  %v1311_v7 = vmul.f32 %v8258_v24, %v9272_v8  ;;  %v1566_v11 = vand.u32 4294901760, %v1565_v9  ;;  %vm1316_vm15 = vweird.f32 %v8258_v24  ;;  %v8192_v8 = vld [vmem:[%s13961_s8 + $0x7] ss:$0 sm:$0xff]  ;;  %v1340_v9 = vld [vmem:[%s13959_s6 + $0x38] sm:$0xff] }
 0x244   : > { %v2155_v60 = vsub.f32 %v9308_v39, %v9322_v16  ;;  %vm1317_vm2 = vmor %vm1315_vm1, %vm1316_vm15  ;;  %v1574_v61 = vand.u32 4294901760, %v1573_v13 }
 0x245   : > { %1478 = vmatmul.f32.gmra.mxu3 %v1386_v18  ;;  %1791 = vmatmul.f32.gmra.mxu1 %v9256_v33  ;;  %v1312_v2 = vsub.f32 1.0, %v1311_v7  ;;  %v4356_v22 = vmul.f32 %v8191_v45, %v9318_v10  ;;  %v1341_v7 = vld [vmem:[%s13959_s6 + $0x40] sm:$0xff] }
 0x246   : > { %v9343_v51 = vand.u32 4294901760, %v2155_v60  ;;  %v2095_v50 = vsel %vm1349_vm12, %v1341_v7, 0 }
 0x247   : > { %1761 = vmatmul.f32.gmra.mxu0 %v1760_v62  ;;  %v1313_v56 = vmul.f32 %v8258_v24, %v1312_v2  ;;  %v4376_v18 = vsel %vm1349_vm12, %v4356_v22, 0.0  ;;  %v9363_v62 = vand.u32 4294901760, %v1909_v44  ;;  %v1912_v2 = vsel %vm1349_vm12, %v1340_v9, 0 }
 0x248   : > { %4377 = vadd.xlane.f32.xlu1 %v4376_v18 }
 0x249   : > { %v1314_v32 = vadd.f32 %v8258_v24, %v1313_v56 }
 0x24a   : > { %v9328_v28 = vld [vmem:[#allocation1 + $0x1] ss:$9 sm:$0xff] }
 0x24b   : > { %14108 = vst [vmem:[#allocation10_spill] sm:$0xff] %v9328_v28  ;;  %1567 = vmatmul.f32.vlgmr.msra.gmra.mxu2 %v1566_v11  ;;  %v1318_v49 = vsel %vm1317_vm2, %v8258_v24, %v1314_v32  ;;  %v9384_v11 = vand.u32 4294901760, %v2095_v50 }
 0x24c   : > { %5355 = vst [vmem:[#allocation1] sm:$0xff] %v9318_v10  ;;  %1812 = vmatpush.xpose.msra.mxu2 %v9188_v4  ;;  %v1323_v45 = vsel %vm1320_vm3, %v1322_v46, %v1318_v49  ;;  %v9407_v49 = vand.u32 4294901760, %v9292_v0 }
 0x24d   : > { %1528 = vmatmul.f32.vlgmr.msrb.gmra.mxu3 %v8918_v15  ;;  %1900 = vmatmul.f32.vlgmr.msra.gmra.mxu1 %v9216_v59  ;;  %v9352_v42 = vmul.f32 %v1323_v45, %v9193_v53  ;;  %v9397_v18 = vsub.f32 %v2095_v50, %v9384_v11  ;;  %v2287_v45 = vsel %vm1349_vm12, %v9280_v26, 0 }
 0x24e   : > { %1712 = vmatpush.xpose.msrb.mxu3 %v9141_v5  ;;  %2157 = vmatpush.xpose.msra.mxu1 %v9343_v51  ;;  %v9425_v9 = vand.u32 4294901760, %v2287_v45 }
 0x24f   : > { %14109 = vst [vmem:[#allocation11_spill] sm:$0xff] %v9352_v42  ;;  %1874 = vmatmul.f32.vlgmr.msra.gmra.mxu0 %v9216_v59  ;;  %v4357_v15 = vmul.f32 %v8192_v8, %v9352_v42  ;;  %v1935_v59 = vsub.f32 %v1909_v44, %v9363_v62  ;;  %v13967_v13 = vand.u32 4294901760, %v9397_v18 }
 0x250   : > { %2119 = vmatpush.xpose.msra.mxu0 %v9283_v37 }
 0x251   : > { %v4379_v53 = vsel %vm1349_vm12, %v4357_v15, 0.0  ;;  %v1936_v36 = vand.u32 4294901760, %v1935_v59  ;;  %v2123_v44 = vsub.f32 %v9397_v18, %v13967_v13  ;;  %v1969_v15 = vsub.f32 %v9292_v0, %v9407_v49 }
 0x252   : > { %4380 = vadd.xlane.f32.xlu2 %v4379_v53  ;;  %v2473_v53 = vsel %vm1349_vm12, %v9318_v10, 0 }
 0x253   : > { %v9357_v24 = vld [vmem:[#allocation1 + $0x1] ss:$9 sm:$0xff]  ;;  %1575 = vmatmul.f32.gmra.mxu2 %v1574_v61  ;;  %v2124_v7 = vand.u32 4294901760, %v2123_v44  ;;  %v9429_v50 = vand.u32 4294901760, %v1969_v15  ;;  %v1937_v27 = vsub.f32 %v1935_v59, %v1936_v36 }
 0x254   : > { %14110 = vst [vmem:[#allocation12_spill] sm:$0xff] %v9357_v24 }
 0x255   : > { %5357 = vst [vmem:[#allocation1] sm:$0xff] %v9352_v42  ;;  %1532 = vmatmul.f32.gmra.mxu3 %v8949_v47  ;;  %1904 = vmatmul.f32.gmra.mxu1 %v9256_v33  ;;  %v9381_v47 = vand.u32 4294901760, %v1912_v2 }
 0x257   : > { %1878 = vmatmul.f32.gmra.mxu0 %v9256_v33  ;;  %v1943_v56 = vsub.f32 %v1912_v2, %v9381_v47  ;;  %v1342_v33 = vld [vmem:[%s13959_s6 + $0x48] sm:$0xff] }
 0x258   : > { %v2098_v32 = vsel %vm1349_vm12, %v1342_v33, 0  ;;  %v9432_v33 = vand.u32 4294901760, %v2473_v53 }
 0x259   : > { %v1944_v46 = vand.u32 4294901760, %v1943_v56  ;;  %v9404_v3 = vand.u32 4294901760, %v2098_v32 }
 0x25a   : > { %14114 = vst [vmem:[#allocation16_spill] sm:$0xff] %v9432_v33 }
 0x25b   : > { %1688 = vmatmul.f32.vlgmr.msrb.gmra.mxu2 %v9007_v57  ;;  %v9418_v61 = vsub.f32 %v2098_v32, %v9404_v3  ;;  %v9439_v32 = vsub.f32 %v2287_v45, %v9425_v9 }
 0x25c   : > { %v9376_v22 = vld [vmem:[#allocation1 + $0x1] ss:$9 sm:$0xff]  ;;  %1933 = vmatpush.xpose.msrb.mxu2 %v9259_v52 }
 0x25d   : > { %14111 = vst [vmem:[#allocation13_spill] sm:$0xff] %v9376_v22  ;;  %1601 = vmatmul.f32.vlgmr.msra.gmra.mxu3 %v9007_v57  ;;  %2030 = vmatmul.f32.vlgmr.msrb.gmra.mxu1 %v1936_v36  ;;  %v13969_v2 = vand.u32 4294901760, %v9418_v61 }
 0x25e   : > { %5711 = vst [vmem:[#allocation1] sm:$0xff] %v9024_v58  ;;  %1840 = vmatpush.xpose.msra.mxu3 %v9155_v63  ;;  %2270 = vmatpush.xpose.msrb.mxu1 %v9283_v37 }
 0x25f   : > { %2001 = vmatmul.f32.vlgmr.msrb.gmra.mxu0 %v1935_v59  ;;  %v2131_v15 = vsub.f32 %v9418_v61, %v13969_v2  ;;  %v1938_v2 = vand.u32 4294901760, %v1937_v27  ;;  %v1343_v59 = vld [vmem:[%s13959_s6 + $0x50] sm:$0xff] }
 0x260   : > { %2244 = vmatpush.xpose.msrb.mxu0 %v9322_v16 }
 0x261   : > { %v2132_v13 = vand.u32 4294901760, %v2131_v15  ;;  %v1945_v15 = vsub.f32 %v1943_v56, %v1944_v46 }
 0x263   : > { %1692 = vmatmul.f32.gmra.mxu2 %v9182_v1 }
 0x265   : > { %v9394_v60 = vld [vmem:[#allocation1 + $0x2] ss:$9 sm:$0xff]  ;;  %1605 = vmatmul.f32.gmra.mxu3 %v9182_v1  ;;  %2036 = vmatmul.f32.gmra.mxu1 %v1944_v46 }
 0x266   : > { %14112 = vst [vmem:[#allocation14_spill] sm:$0xff] %v9394_v60 }
 0x267   : > { %5714 = vst [vmem:[#allocation1] sm:$0xff] %v9059_v40  ;;  %2006 = vmatmul.f32.gmra.mxu0 %v1943_v56  ;;  %v1946_v56 = vand.u32 4294901760, %v1945_v15 }
 0x26b   : > { %1815 = vmatmul.f32.vlgmr.msra.gmra.mxu2 %v9245_v30  ;;  %v1344_v30 = vld [vmem:[%s13959_s6 + $0x58] sm:$0xff] }
 0x26c   : > { %2058 = vmatpush.xpose.msra.mxu2 %v9407_v49 }
 0x26d   : > { %1714 = vmatmul.f32.vlgmr.msrb.gmra.mxu3 %v9007_v57  ;;  %2159 = vmatmul.f32.vlgmr.msra.gmra.mxu1 %v9384_v11  ;;  %v9449_v57 = vsub.f32 %v2473_v53, %v9432_v33 }
 0x26e   : > { %v9410_v8 = vld [vmem:[#allocation1 + $0x2] ss:$9 sm:$0xff]  ;;  %1971 = vmatpush.xpose.msrb.mxu3 %v9429_v50  ;;  %2398 = vmatpush.xpose.msra.mxu1 %v9425_v9 }
 0x26f   : > { %14113 = vst [vmem:[#allocation15_spill] sm:$0xff] %v9410_v8  ;;  %2125 = vmatmul.f32.vlgmr.msra.gmra.mxu0 %v2124_v7  ;;  %v9453_v45 = vand.u32 4294901760, %v9449_v57 }
 0x270   : > { %5716 = vst [vmem:[#allocation1] sm:$0xff] %v9104_v35  ;;  %2370 = vmatpush.xpose.msra.mxu0 %v9439_v32 }
 0x271   : > { %14116 = vst [vmem:[#allocation18_spill] sm:$0xff] %v9449_v57  ;;  %v2527_v53 = vsub.f32 %v9449_v57, %v9453_v45 }
 0x272   : > { %14117 = vst [vmem:[#allocation19_spill] sm:$0xff] %v9453_v45 }
 0x273   : > { %1820 = vmatmul.f32.gmra.mxu2 %v9277_v48  ;;  %v9465_v36 = vand.u32 4294901760, %v2527_v53 }
 0x275   : > { %1718 = vmatmul.f32.gmra.mxu3 %v9182_v1  ;;  %2163 = vmatmul.f32.gmra.mxu1 %v9404_v3  ;;  %v2281_v1 = vsel %vm1349_vm12, %v1343_v59, 0 }
 0x276   : > { %v9479_v46 = vand.u32 4294901760, %v2281_v1 }
 0x277   : > { %v9441_v44 = vld [vmem:[#allocation1 + $0x2] ss:$9 sm:$0xff]  ;;  %2133 = vmatmul.f32.gmra.mxu0 %v2132_v13 }
 0x278   : > { %14115 = vst [vmem:[#allocation17_spill] sm:$0xff] %v9441_v44  ;;  %v2307_v13 = vsub.f32 %v2281_v1, %v9479_v46 }
 0x279   : > { %5718 = vst [vmem:[#allocation1] sm:$0xff] %v9169_v19 }
 0x27b   : > { %1939 = vmatmul.f32.vlgmr.msrb.gmra.mxu2 %v1938_v2  ;;  %v2284_v2 = vsel %vm1349_vm12, %v1344_v30, 0 }
 0x27c   : > { %2184 = vmatpush.xpose.msrb.mxu2 %v9308_v39  ;;  %v9497_v59 = vand.u32 4294901760, %v2284_v2  ;;  %v14004_v39 = vmov 6  }
 0x27d   : > { %1844 = vmatmul.f32.vlgmr.msra.gmra.mxu3 %v1750_v43  ;;  %2272 = vmatmul.f32.vlgmr.msrb.gmra.mxu1 %v9384_v11  ;;  %v14120_v43 = vand.u32 4294901760, %v9277_v48  ;;  %v2308_v48 = vand.u32 4294901760, %v2307_v13 }
 0x27e   : > { %2084 = vmatpush.xpose.msra.mxu3 %v9259_v52  ;;  %2529 = vmatpush.xpose.msrb.mxu1 %v9465_v36 }
 0x27f   : > { %2246 = vmatmul.f32.vlgmr.msrb.gmra.mxu0 %v9384_v11  ;;  %v1345_v11 = vld [vmem:[%s13959_s6 + $0x60] sm:$0xff]  ;;  %v2309_v8 = vsub.f32 %v2307_v13, %v2308_v48 }
 0x280   : > { %v9457_v7 = vld [vmem:[#allocation1 + $0x2] ss:$9 sm:$0xff]  ;;  %2491 = vmatpush.xpose.msrb.mxu0 %v9432_v33  ;;  %v2467_v15 = vsel %vm1349_vm12, %v1345_v11, 0 }
 0x281   : > { %14118 = vst [vmem:[#allocation20_spill] sm:$0xff] %v9457_v7  ;;  %v9500_v1 = vand.u32 4294901760, %v2467_v15 }
 0x282   : > { %5720 = vst [vmem:[#allocation1] sm:$0xff] %v9241_v21 }
 0x283   : > { %1947 = vmatmul.f32.gmra.mxu2 %v1946_v56  ;;  %v2315_v56 = vsub.f32 %v2284_v2, %v9497_v59 }
 0x285   : > { %1850 = vmatmul.f32.gmra.mxu3 %v14120_v43  ;;  %2276 = vmatmul.f32.gmra.mxu1 %v9404_v3  ;;  %v9513_v43 = vsub.f32 %v2467_v15, %v9500_v1  ;;  %v2316_v2 = vand.u32 4294901760, %v2315_v56 }
 0x287   : > { %2250 = vmatmul.f32.gmra.mxu0 %v9404_v3  ;;  %v1346_v3 = vld [vmem:[%s13959_s6 + $0x68] sm:$0xff]  ;;  %v13970_v22 = vand.u32 4294901760, %v9513_v43 }
 0x288   : > { %v2470_v11 = vsel %vm1349_vm12, %v1346_v3, 0 }
 0x289   : > { %v9474_v27 = vld [vmem:[#allocation1 + $0x2] ss:$9 sm:$0xff]  ;;  %v2495_v3 = vsub.f32 %v9513_v43, %v13970_v22 }
 0x28a   : > { %14119 = vst [vmem:[#allocation21_spill] sm:$0xff] %v9474_v27  ;;  %v9523_v27 = vand.u32 4294901760, %v9439_v32 }
 0x28b   : > { %5722 = vst [vmem:[#allocation1] sm:$0xff] %v9280_v26  ;;  %2060 = vmatmul.f32.vlgmr.msra.gmra.mxu2 %v9363_v62  ;;  %v2496_v7 = vand.u32 4294901760, %v2495_v3 }
 0x28c   : > { %2305 = vmatpush.xpose.msra.mxu2 %v9425_v9  ;;  %14123 = vst [vmem:[#allocation24_spill] sm:$0xff] %v9523_v27  ;;  %v2341_v28 = vsub.f32 %v9439_v32, %v9523_v27 }
 0x28d   : > { %1973 = vmatmul.f32.vlgmr.msrb.gmra.mxu3 %v9363_v62  ;;  %2402 = vmatmul.f32.vlgmr.msra.gmra.mxu1 %v2308_v48 }
 0x28e   : > { %2212 = vmatpush.xpose.msrb.mxu3 %v9283_v37  ;;  %2642 = vmatpush.xpose.msra.mxu1 %v9432_v33  ;;  %v9543_v44 = vand.u32 4294901760, %v2341_v28 }
 0x28f   : > { %2373 = vmatmul.f32.vlgmr.msra.gmra.mxu0 %v2307_v13 }
 0x290   : > { %2616 = vmatpush.xpose.msra.mxu0 %v9453_v45  ;;  %14126 = vst [vmem:[#allocation27_spill] sm:$0xff] %v9543_v44 }
 0x292   : > { %v9492_v53 = vld [vmem:[#allocation1 + $0x2] ss:$9 sm:$0xff] }
 0x293   : > { %14121 = vst [vmem:[#allocation22_spill] sm:$0xff] %v9492_v53  ;;  %2064 = vmatmul.f32.gmra.mxu2 %v9381_v47  ;;  %v9520_v53 = vand.u32 4294901760, %v2470_v11 }
 0x294   : > { %5724 = vst [vmem:[#allocation1] sm:$0xff] %v9318_v10 }
 0x295   : > { %2408 = vmatmul.f32.gmra.mxu1 %v2316_v2  ;;  %1977 = vmatmul.f32.gmra.mxu3 %v9381_v47  ;;  %v9534_v24 = vsub.f32 %v2470_v11, %v9520_v53 }
 0x297   : > { %2378 = vmatmul.f32.gmra.mxu0 %v2315_v56 }
 0x29b   : > { %v9510_v30 = vld [vmem:[#allocation1 + $0x2] ss:$9 sm:$0xff]  ;;  %2187 = vmatmul.f32.vlgmr.msrb.gmra.mxu2 %v9397_v18 }
 0x29c   : > { %14122 = vst [vmem:[#allocation23_spill] sm:$0xff] %v9510_v30  ;;  %v2659_v30 = vsel %vm1349_vm12, %v9352_v42, 0  ;;  %2430 = vmatpush.xpose.msrb.mxu2 %v9523_v27 }
 0x29d   : > { %5726 = vst [vmem:[#allocation1] sm:$0xff] %v9352_v42  ;;  %v9539_v6 = vand.u32 4294901760, %v2659_v30  ;;  %2086 = vmatmul.f32.vlgmr.msra.gmra.mxu3 %v9363_v62  ;;  %2531 = vmatmul.f32.vlgmr.msrb.gmra.mxu1 %v9500_v1 }
 0x29e   : > { %2343 = vmatpush.xpose.msra.mxu3 %v9543_v44  ;;  %v9553_v3 = vpop.f32.mrf.mxu2 }
 0x29f   : > { %14125 = vst [vmem:[#allocation26_spill] sm:$0xff] %v9539_v6  ;;  %2770 = vmatpush.xpose.msrb.mxu1 %v9539_v6  ;;  %v9551_v11 = vsub.f32 %v2659_v30, %v9539_v6  ;;  %2497 = vmatmul.f32.vlgmr.msrb.gmra.mxu0 %v2496_v7  ;;  %v2310_v7 = vand.u32 4294901760, %v2309_v8 }
 0x2a1   : > { %14127 = vst [vmem:[#allocation28_spill] sm:$0xff] %v9551_v11  ;;  %2742 = vmatpush.xpose.msrb.mxu0 %v9551_v11 }
 0x2a3   : > { %2192 = vmatmul.f32.gmra.mxu2 %v9418_v61 }
 0x2a4   : > { %v9526_v15 = vld [vmem:[#allocation1 + $0x2] ss:$9 sm:$0xff] }
 0x2a5   : > { %14124 = vst [vmem:[#allocation25_spill] sm:$0xff] %v9526_v15  ;;  %v13971_v15 = vand.u32 4294901760, %v9534_v24  ;;  %2090 = vmatmul.f32.gmra.mxu3 %v9381_v47  ;;  %2535 = vmatmul.f32.gmra.mxu1 %v9520_v53  ;;  %v14130_v47 = vand.u32 4294901760, %v9397_v18  ;;  %v14132_v18 = vand.u32 4294901760, %v9418_v61 }
 0x2a6   : > { %6080 = vst [vmem:[#allocation1] sm:$0xff] %v9024_v58  ;;  %v9565_v30 = vpop.f32.mrf.mxu2 }
 0x2a7   : > { %v2503_v28 = vsub.f32 %v9534_v24, %v13971_v15  ;;  %v2317_v15 = vsub.f32 %v2315_v56, %v2316_v2 }
 0x2a9   : > { %v2504_v62 = vand.u32 4294901760, %v2503_v28  ;;  %v1347_v28 = vld [vmem:[%s13959_s6 + $0x70] sm:$0xff]  ;;  %v2318_v56 = vand.u32 4294901760, %v2317_v15  ;;  %v2838_v15 = vld [vmem:[%s13960_s7] sm:$0xff] }
 0x2aa   : > { %v2653_v8 = vsel %vm1349_vm12, %v1347_v28, 0  ;;  %v9663_v27 = vpop.f32.mrf.mxu1 }
 0x2ab   : > { %2505 = vmatmul.f32.gmra.mxu0 %v2504_v62  ;;  %2311 = vmatmul.f32.vlgmr.msra.gmra.mxu2 %v2310_v7  ;;  %v9585_v62 = vand.u32 4294901760, %v2653_v8 }
 0x2ac   : > { %2556 = vmatpush.xpose.msra.mxu2 %v9449_v57 }
 0x2ad   : > { %v9555_v22 = vld [vmem:[#allocation1 + $0x3] ss:$9 sm:$0xff]  ;;  %2644 = vmatmul.f32.vlgmr.msra.gmra.mxu1 %v9500_v1  ;;  %2216 = vmatmul.f32.vlgmr.msrb.gmra.mxu3 %v14130_v47 }
 0x2ae   : > { %14128 = vst [vmem:[#allocation29_spill] sm:$0xff] %v9555_v22  ;;  %2456 = vmatpush.xpose.msrb.mxu3 %v9425_v9  ;;  %2914 = vmatpush.xpose.msra.mxu1 %v9139_v20  ;;  %v1444_v13 = vpop.f32.mrf.mxu2  ;;  %v1348_v20 = vld [vmem:[%s13959_s6 + $0x78] sm:$0xff] }
 0x2af   : > { %6083 = vst [vmem:[#allocation1] sm:$0xff] %v9059_v40  ;;  %v2656_v7 = vsel %vm1349_vm12, %v1348_v20, 0 }
 0x2b0   : > { %v1416_v2 = vpop.f32.mrf.mxu3 }
 0x2b3   : > { %2618 = vmatmul.f32.vlgmr.msra.gmra.mxu0 %v9500_v1  ;;  %2319 = vmatmul.f32.gmra.mxu2 %v2318_v56  ;;  %v9594_v1 = vsub.f32 %v2653_v8, %v9585_v62  ;;  %v2855_v56 = vsel %vm1349_vm12, %v2838_v15, 0  ;;  %v13972_v8 = vmov 1  }
 0x2b4   : > { %2876 = vmatpush.xpose.msra.mxu0 %v9038_v23  ;;  %7928 = vset.pattern.permute.xlu2 %v13972_v8  ;;  %v2839_v8 = vld [vmem:[%s13960_s7 + $0x8] sm:$0xff] }
 0x2b5   : > { %2222 = vmatmul.f32.gmra.mxu3 %v14132_v18  ;;  %2648 = vmatmul.f32.gmra.mxu1 %v9520_v53  ;;  %v13974_v18 = vmov 0   ;;  %v13976_v20 = vand.u32 4294901760, %v9594_v1 }
 0x2b6   : > { %v9567_v22 = vld [vmem:[#allocation1 + $0x3] ss:$9 sm:$0xff]  ;;  %v9600_v28 = vpop.f32.mrf.mxu2  ;;  %7927 = vset.pattern.permute.xlu0 %v13974_v18  ;;  %7935 = vset.pattern.permute.xlu1 %v13974_v18 }
 0x2b7   : > { %14129 = vst [vmem:[#allocation30_spill] sm:$0xff] %v9567_v22 }
 0x2b8   : > { %6085 = vst [vmem:[#allocation1] sm:$0xff] %v9104_v35  ;;  %v9606_v61 = vpop.f32.mrf.mxu3 }
 0x2bb   : > { %2622 = vmatmul.f32.gmra.mxu0 %v9520_v53  ;;  %2432 = vmatmul.f32.vlgmr.msrb.gmra.mxu2 %v9479_v46  ;;  %v9616_v53 = vand.u32 4294901760, %v2855_v56 }
 0x2bc   : > { %2677 = vmatpush.xpose.msrb.mxu2 %v9539_v6 }
 0x2bd   : > { %2345 = vmatmul.f32.vlgmr.msra.gmra.mxu3 %v9479_v46  ;;  %2774 = vmatmul.f32.vlgmr.msrb.gmra.mxu1 %v13976_v20  ;;  %v9634_v22 = vsub.f32 %v2855_v56, %v9616_v53  ;;  %v2858_v20 = vsel %vm1349_vm12, %v2839_v8, 0 }
 0x2be   : > { %2584 = vmatpush.xpose.msra.mxu3 %v9432_v33  ;;  %3027 = vmatpush.xpose.msrb.mxu1 %v9038_v23  ;;  %v1503_v18 = vpop.f32.mrf.mxu2  ;;  %v9642_v41 = vand.u32 4294901760, %v2858_v20 }
 0x2bf   : > { %v9580_v48 = vld [vmem:[#allocation1 + $0x3] ss:$9 sm:$0xff]  ;;  %v13982_v60 = vand.u32 4294901760, %v9634_v22 }
 0x2c0   : > { %14131 = vst [vmem:[#allocation31_spill] sm:$0xff] %v9580_v48  ;;  %v9612_v48 = vand.u32 4294901760, %v2656_v7  ;;  %v9657_v29 = vsub.f32 %v2858_v20, %v9642_v41 }
 0x2c1   : > { %6087 = vst [vmem:[#allocation1] sm:$0xff] %v9169_v19  ;;  %v2880_v8 = vsub.f32 %v9634_v22, %v13982_v60 }
 0x2c2   : > { %v9623_v15 = vsub.f32 %v2656_v7, %v9612_v48  ;;  %v1473_v7 = vpop.f32.mrf.mxu3  ;;  %v13983_v45 = vand.u32 4294901760, %v9657_v29 }
 0x2c3   : > { %2745 = vmatmul.f32.vlgmr.msrb.gmra.mxu0 %v9594_v1  ;;  %2436 = vmatmul.f32.gmra.mxu2 %v9497_v59  ;;  %v2881_v44 = vand.u32 4294901760, %v2880_v8 }
 0x2c4   : > { %3001 = vmatpush.xpose.msrb.mxu0 %v9095_v17  ;;  %v13978_v34 = vand.u32 4294901760, %v9623_v15 }
 0x2c5   : > { %2349 = vmatmul.f32.gmra.mxu3 %v9497_v59 }
 0x2c6   : > { %2780 = vmatmul.f32.gmra.mxu1 %v13978_v34  ;;  %v1507_v17 = vpop.f32.mrf.mxu2  ;;  %v1417_v34 = vadd.f32 %v1416_v2, %v9553_v3  ;;  %v1630_v2 = vpop.f32.mrf.mxu0 }
 0x2c8   : > { %v9602_v47 = vld [vmem:[#allocation1 + $0x3] ss:$9 sm:$0xff] }
 0x2c9   : > { %14133 = vst [vmem:[#allocation32_spill] sm:$0xff] %v9602_v47 }
 0x2ca   : > { %6089 = vst [vmem:[#allocation1] sm:$0xff] %v9241_v21  ;;  %v1479_v38 = vpop.f32.mrf.mxu3 }
 0x2cb   : > { %2750 = vmatmul.f32.gmra.mxu0 %v9623_v15  ;;  %2559 = vmatmul.f32.vlgmr.msra.gmra.mxu2 %v9513_v43 }
 0x2cd   : > { %2458 = vmatmul.f32.vlgmr.msrb.gmra.mxu3 %v9479_v46 }
 0x2ce   : > { %2916 = vmatmul.f32.vlgmr.msra.gmra.mxu1 %v9616_v53  ;;  %v1568_v3 = vpop.f32.mrf.mxu2 }
 0x2cf   : > { %3152 = vmatpush.xpose.msra.mxu1 %v9141_v5 }
 0x2d1   : > { %v9630_v47 = vld [vmem:[#allocation1 + $0x3] ss:$9 sm:$0xff] }
 0x2d2   : > { %14134 = vst [vmem:[#allocation33_spill] sm:$0xff] %v9630_v47  ;;  %v9645_v47 = vand.u32 4294901760, %v9551_v11  ;;  %v1529_v46 = vpop.f32.mrf.mxu3 }
 0x2d3   : > { %6091 = vst [vmem:[#allocation1] sm:$0xff] %v9280_v26  ;;  %2882 = vmatmul.f32.vlgmr.msra.gmra.mxu0 %v2881_v44  ;;  %2564 = vmatmul.f32.gmra.mxu2 %v9534_v24 }
 0x2d4   : > { %14135 = vst [vmem:[#allocation34_spill] sm:$0xff] %v9645_v47  ;;  %v2713_v57 = vsub.f32 %v9551_v11, %v9645_v47  ;;  %2802 = vmatpush.xpose.msra.mxu2 %v9645_v47  ;;  %3124 = vmatpush.xpose.msra.mxu0 %v9153_v12  ;;  %v14139_v12 = vand.u32 4294901760, %v9594_v1 }
 0x2d5   : > { %2462 = vmatmul.f32.gmra.mxu3 %v9497_v59 }
 0x2d6   : > { %v9667_v60 = vand.u32 4294901760, %v2713_v57  ;;  %v2888_v57 = vsub.f32 %v9657_v29, %v13983_v45  ;;  %2920 = vmatmul.f32.gmra.mxu1 %v9642_v41 }
 0x2d8   : > { %14137 = vst [vmem:[#allocation36_spill] sm:$0xff] %v9667_v60  ;;  %2715 = vmatpush.xpose.msrb.mxu3 %v9667_v60  ;;  %v2889_v44 = vand.u32 4294901760, %v2888_v57 }
 0x2da   : > { %v9650_v56 = vld [vmem:[#allocation1 + $0x3] ss:$9 sm:$0xff] }
 0x2db   : > { %14136 = vst [vmem:[#allocation35_spill] sm:$0xff] %v9650_v56  ;;  %v1445_v56 = vadd.f32 %v1444_v13, %v1417_v34  ;;  %2890 = vmatmul.f32.gmra.mxu0 %v2889_v44 }
 0x2dc   : > { %6093 = vst [vmem:[#allocation1] sm:$0xff] %v9318_v10 }
 0x2dd   : > { %v1474_v20 = vadd.f32 %v1473_v7, %v1445_v56  ;;  %v1421_v7 = vadd.f32 %v9606_v61, %v9565_v30  ;;  %v9696_v30 = vpop.f32.mrf.mxu2 }
 0x2de   : > { %3029 = vmatmul.f32.vlgmr.msrb.gmra.mxu1 %v9616_v53 }
 0x2df   : > { %v1504_v13 = vadd.f32 %v1503_v18, %v1474_v20  ;;  %v1450_v8 = vadd.f32 %v9600_v28, %v1421_v7  ;;  %v9688_v18 = vpop.f32.mrf.mxu1  ;;  %v2681_v20 = vsub.f32 %v9594_v1, %v14139_v12  ;;  %v14141_v1 = vand.u32 4294901760, %v9513_v43  ;;  %3280 = vmatpush.xpose.msrb.mxu1 %v9224_v25 }
 0x2e1   : > { %v9683_v56 = vadd.f32 %v1529_v46, %v1504_v13  ;;  %v1480_v45 = vadd.f32 %v1479_v38, %v1450_v8  ;;  %v1533_v13 = vpop.f32.mrf.mxu3  ;;  %v2682_v57 = vand.u32 4294901760, %v2681_v20  ;;  %v9701_v46 = vpop.f32.mrf.mxu0  ;;  %v13989_v38 = vmov 2   ;;  %2588 = vmatmul.f32.vlgmr.msra.gmra.mxu3 %v14141_v1 }
 0x2e2   : > { %2828 = vmatpush.xpose.msra.mxu3 %v9539_v6  ;;  %v14143_v20 = vmov 1  }
 0x2e3   : > { %v9674_v34 = vld [vmem:[#allocation1 + $0x3] ss:$9 sm:$0xff]  ;;  %4720 = vperm.xlu0 %7927, %v9683_v56   ;;  %5095 = vperm.xlu2 %7928, %v9683_v56   ;;  %v1508_v61 = vadd.f32 %v1507_v17, %v1480_v45  ;;  %v14142_v17 = vand.u32 4294901760, %v9623_v15 }
 0x2e4   : > { %14138 = vst [vmem:[#allocation37_spill] sm:$0xff] %v9674_v34  ;;  %2683 = vmatmul.f32.vlgmr.msrb.gmra.mxu2 %v2682_v57  ;;  %v2840_v45 = vld [vmem:[%s13960_s7 + $0x10] sm:$0xff]  ;;  %3003 = vmatmul.f32.vlgmr.msrb.gmra.mxu0 %v9616_v53  ;;  %v13984_v53 = vmov 3   ;;  %v14145_v34 = vmov 3  }
 0x2e5   : > { %6095 = vst [vmem:[#allocation1] sm:$0xff] %v9352_v42  ;;  %v9703_v7 = vadd.f32 %v1533_v13, %v1508_v61  ;;  %v2689_v8 = vsub.f32 %v9623_v15, %v14142_v17  ;;  %v1689_v44 = vpop.f32.mrf.mxu2  ;;  %2941 = vmatpush.xpose.msrb.mxu2 %v9082_v14  ;;  %v3038_v12 = vsel %vm1349_vm12, %v2840_v45, 0  ;;  %3242 = vmatpush.xpose.msrb.mxu0 %v9155_v63  ;;  %v2841_v14 = vld [vmem:[%s13960_s7 + $0x18] sm:$0xff]  ;;  %v14144_v45 = vand.u32 4294901760, %v9534_v24 }
 0x2e6   : > { %v9728_v57 = vand.u32 4294901760, %v3038_v12  ;;  %3033 = vmatmul.f32.gmra.mxu1 %v9642_v41  ;;  %v3041_v24 = vsel %vm1349_vm12, %v2841_v14, 0  ;;  %v13987_v14 = vmov 4   ;;  %v14148_v42 = vmov 5  }
 0x2e7   : > { %4725 = vperm.xlu1 %7935, %v9703_v7   ;;  %v9711_v59 = vpop.f32.mrf.mxu1  ;;  %v2690_v25 = vand.u32 4294901760, %v2689_v8  ;;  %v2842_v8 = vld [vmem:[%s13960_s7 + $0x20] sm:$0xff] }
 0x2e8   : > { %v9741_v1 = vsub.f32 %v3038_v12, %v9728_v57 }
 0x2e9   : > { %v1602_v43 = vpop.f32.mrf.mxu3  ;;  %v9726_v61 = vpop.f32.mrf.mxu0  ;;  %2594 = vmatmul.f32.gmra.mxu3 %v14144_v45 }
 0x2ea   : > { %v1603_v13 = vadd.f32 %v1602_v43, %v1568_v3  ;;  %v13986_v12 = vand.u32 4294901760, %v9741_v1 }
 0x2eb   : > { %7929 = vset.pattern.permute.xlu2 %v13989_v38  ;;  %7944 = vset.pattern.permute.xlu0 %v14143_v20 }
 0x2ec   : > { %v9698_v28 = vld [vmem:[#allocation1 + $0x3] ss:$9 sm:$0xff]  ;;  %5464 = vperm.xlu2 %7929, %v9683_v56   ;;  %v1631_v3 = vadd.f32 %v1630_v2, %v1603_v13  ;;  %2691 = vmatmul.f32.gmra.mxu2 %v2690_v25  ;;  %v3221_v13 = vsel %vm1349_vm12, %v2842_v8, 0 }
 0x2ed   : > { %14140 = vst [vmem:[#allocation38_spill] sm:$0xff] %v9698_v28  ;;  %v9743_v17 = vpop.f32.mrf.mxu2  ;;  %3007 = vmatmul.f32.gmra.mxu0 %v9642_v41  ;;  %v9760_v28 = vand.u32 4294901760, %v3221_v13  ;;  %v2843_v8 = vld [vmem:[%s13960_s7 + $0x28] sm:$0xff] }
 0x2ee   : > { %6449 = vst [vmem:[#allocation1] sm:$0xff] %v9024_v58  ;;  %v1660_v2 = vadd.f32 %v9663_v27, %v1631_v3  ;;  %3156 = vmatmul.f32.vlgmr.msra.gmra.mxu1 %v13986_v12 }
 0x2ef   : > { %7936 = vset.pattern.permute.xlu1 %v14143_v20  ;;  %v1792_v15 = vpop.f32.mrf.mxu1  ;;  %3393 = vmatpush.xpose.msra.mxu1 %v9155_v63 }
 0x2f0   : > { %5099 = vperm.xlu1 %7936, %v9703_v7   ;;  %v1690_v27 = vadd.f32 %v1689_v44, %v1660_v2 }
 0x2f1   : > { %v9750_v43 = vpop.f32.mrf.mxu3  ;;  %v1762_v45 = vpop.f32.mrf.mxu0  ;;  %2717 = vmatmul.f32.vlgmr.msrb.gmra.mxu3 %v9585_v62 }
 0x2f2   : > { %v9754_v25 = vadd.f32 %v1792_v15, %v1762_v45  ;;  %2969 = vmatpush.xpose.msrb.mxu3 %v9038_v23  ;;  %v9782_v45 = vsub.f32 %v3221_v13, %v9760_v28  ;;  %v3224_v23 = vsel %vm1349_vm12, %v2843_v8, 0 }
 0x2f3   : > { %v9795_v13 = vand.u32 4294901760, %v3224_v23 }
 0x2f4   : > { %7930 = vset.pattern.permute.xlu2 %v13984_v53  ;;  %v9757_v53 = vand.u32 4294901760, %v3041_v24  ;;  %2804 = vmatmul.f32.vlgmr.msra.gmra.mxu2 %v9585_v62 }
 0x2f5   : > { %5833 = vperm.xlu2 %7930, %v9683_v56   ;;  %v9772_v3 = vpop.f32.mrf.mxu2  ;;  %3127 = vmatmul.f32.vlgmr.msra.gmra.mxu0 %v9741_v1  ;;  %v9810_v47 = vsub.f32 %v3224_v23, %v9795_v13  ;;  %v14147_v23 = vmov 4  }
 0x2f6   : > { %v9770_v15 = vsub.f32 %v3041_v24, %v9757_v53  ;;  %3367 = vmatpush.xpose.msra.mxu0 %v9202_v31  ;;  %3059 = vmatpush.xpose.msra.mxu2 %v9141_v5 }
 0x2f7   : > { %v9762_v41 = vpop.f32.mrf.mxu1  ;;  %v14003_v11 = vand.u32 4294901760, %v9810_v47 }
 0x2f8   : > { %7937 = vset.pattern.permute.xlu1 %v13989_v38  ;;  %v13993_v12 = vand.u32 4294901760, %v9770_v15 }
 0x2f9   : > { %5468 = vperm.xlu1 %7937, %v9703_v7   ;;  %v1715_v44 = vpop.f32.mrf.mxu3  ;;  %v9784_v24 = vpop.f32.mrf.mxu0  ;;  %2721 = vmatmul.f32.gmra.mxu3 %v9612_v48 }
 0x2fa   : > { %v9787_v2 = vadd.f32 %v1715_v44, %v1690_v27  ;;  %3162 = vmatmul.f32.gmra.mxu1 %v13993_v12  ;;  %v13994_v27 = vmov 5   ;;  %v14146_v12 = vmov 2  }
 0x2fc   : > { %5103 = vperm.xlu0 %7944, %v9787_v2   ;;  %2808 = vmatmul.f32.gmra.mxu2 %v9612_v48 }
 0x2fd   : > { %7931 = vset.pattern.permute.xlu2 %v13987_v14  ;;  %v13999_v14 = vand.u32 4294901760, %v9782_v45  ;;  %v1821_v31 = vpop.f32.mrf.mxu2  ;;  %3132 = vmatmul.f32.gmra.mxu0 %v9770_v15 }
 0x2fe   : > { %6202 = vperm.xlu2 %7931, %v9683_v56  }
 0x2ff   : > { %v1905_v38 = vpop.f32.mrf.mxu1  ;;  %v3246_v44 = vsub.f32 %v9782_v45, %v13999_v14 }
 0x301   : > { %7938 = vset.pattern.permute.xlu1 %v14145_v34  ;;  %v9804_v8 = vpop.f32.mrf.mxu3  ;;  %v1879_v60 = vpop.f32.mrf.mxu0  ;;  %2830 = vmatmul.f32.vlgmr.msra.gmra.mxu3 %v9585_v62 }
 0x302   : > { %5837 = vperm.xlu1 %7938, %v9703_v7   ;;  %3282 = vmatmul.f32.vlgmr.msrb.gmra.mxu1 %v9760_v28 }
 0x303   : > { %3097 = vmatpush.xpose.msra.mxu3 %v9264_v54  ;;  %3518 = vmatpush.xpose.msrb.mxu1 %v9259_v52 }
 0x304   : > { %7945 = vset.pattern.permute.xlu0 %v14146_v12  ;;  %2944 = vmatmul.f32.vlgmr.msrb.gmra.mxu2 %v9634_v22 }
 0x305   : > { %5472 = vperm.xlu0 %7945, %v9787_v2   ;;  %v1940_v54 = vpop.f32.mrf.mxu2  ;;  %3184 = vmatpush.xpose.msrb.mxu2 %v9210_v55  ;;  %v1607_v55 = vadd.f32 %v9750_v43, %v9696_v30  ;;  %v2844_v30 = vld [vmem:[%s13960_s7 + $0x30] sm:$0xff] }
 0x306   : > { %7932 = vset.pattern.permute.xlu2 %v13994_v27  ;;  %v3247_v27 = vand.u32 4294901760, %v3246_v44  ;;  %v3254_v44 = vsub.f32 %v9810_v47, %v14003_v11 }
 0x307   : > { %6571 = vperm.xlu2 %7932, %v9683_v56   ;;  %v9817_v6 = vpop.f32.mrf.mxu1 }
 0x308   : > { %3248 = vmatmul.f32.vlgmr.msrb.gmra.mxu0 %v3247_v27  ;;  %v3255_v62 = vand.u32 4294901760, %v3254_v44  ;;  %v1822_v27 = vadd.f32 %v1821_v31, %v9754_v25  ;;  %v14012_v44 = vmov 7   ;;  %v14149_v25 = vand.u32 4294901760, %v9741_v1 }
 0x309   : > { %v9824_v14 = vpop.f32.mrf.mxu3  ;;  %v2002_v58 = vpop.f32.mrf.mxu0  ;;  %3490 = vmatpush.xpose.msrb.mxu0 %v9292_v0  ;;  %2834 = vmatmul.f32.gmra.mxu3 %v9612_v48 }
 0x30a   : > { %7939 = vset.pattern.permute.xlu1 %v14147_v23  ;;  %3286 = vmatmul.f32.gmra.mxu1 %v9795_v13  ;;  %v3063_v31 = vsub.f32 %v9741_v1, %v14149_v25 }
 0x30b   : > { %6206 = vperm.xlu1 %7939, %v9703_v7  }
 0x30c   : > { %2949 = vmatmul.f32.gmra.mxu2 %v9657_v29 }
 0x30d   : > { %7946 = vset.pattern.permute.xlu0 %v14145_v34 }
 0x30e   : > { %5841 = vperm.xlu0 %7946, %v9787_v2  }
 0x30f   : > { %7933 = vset.pattern.permute.xlu2 %v14004_v39  ;;  %v9838_v11 = vpop.f32.mrf.mxu1 }
 0x310   : > { %6940 = vperm.xlu2 %7933, %v9683_v56   ;;  %3256 = vmatmul.f32.gmra.mxu0 %v3255_v62  ;;  %v9854_v62 = vpop.f32.mrf.mxu2 }
 0x311   : > { %v1851_v0 = vpop.f32.mrf.mxu3  ;;  %v9842_v39 = vpop.f32.mrf.mxu0 }
 0x312   : > { %v1852_v33 = vadd.f32 %v1851_v0, %v1822_v27  ;;  %v1636_v27 = vadd.f32 %v9701_v46, %v1607_v55  ;;  %3395 = vmatmul.f32.vlgmr.msra.gmra.mxu1 %v9760_v28  ;;  %v14151_v55 = vmov 6  }
 0x313   : > { %7940 = vset.pattern.permute.xlu1 %v14148_v42  ;;  %3646 = vmatpush.xpose.msra.mxu1 %v9343_v51 }
 0x314   : > { %6575 = vperm.xlu1 %7940, %v9703_v7   ;;  %v1880_v48 = vadd.f32 %v1879_v60, %v1852_v33  ;;  %v3404_v60 = vsel %vm1349_vm12, %v2844_v30, 0  ;;  %v1666_v0 = vadd.f32 %v9688_v18, %v1636_v27  ;;  %v9885_v18 = vpop.xlane.xlu2 %4362  ;;  %v14155_v27 = vand.u32 4294901760, %v9657_v29 }
 0x316   : > { %7947 = vset.pattern.permute.xlu0 %v14147_v23  ;;  %v9860_v43 = vadd.f32 %v1905_v38, %v1880_v48  ;;  %v3064_v38 = vand.u32 4294901760, %v3063_v31  ;;  %v1789_v48 = vadd.f32 %v9711_v59, %v9726_v61  ;;  %v14154_v31 = vand.u32 4294901760, %v9770_v15  ;;  %v2845_v61 = vld [vmem:[%s13960_s7 + $0x38] sm:$0xff] }
 0x317   : > { %v2160_v33 = vpop.f32.mrf.mxu1  ;;  %6210 = vperm.xlu0 %7947, %v9787_v2   ;;  %v3407_v29 = vsel %vm1349_vm12, %v2845_v61, 0  ;;  %v2847_v61 = vld [vmem:[%s13960_s7 + $0x48] sm:$0xff] }
 0x318   : > { %7934 = vset.pattern.permute.xlu2 %v14012_v44  ;;  %3369 = vmatmul.f32.vlgmr.msra.gmra.mxu0 %v9760_v28  ;;  %v14152_v28 = vmov 0   ;;  %v3071_v30 = vsub.f32 %v9770_v15, %v14154_v31  ;;  %v1817_v15 = vadd.f32 %v9772_v3, %v1789_v48 }
 0x319   : > { %7309 = vperm.xlu2 %7934, %v9683_v56   ;;  %v14150_v56 = vand.u32 4294901760, %v9634_v22  ;;  %v1974_v1 = vpop.f32.mrf.mxu3  ;;  %3608 = vmatpush.xpose.msra.mxu0 %v9283_v37  ;;  %v2126_v22 = vpop.f32.mrf.mxu0 }
 0x31a   : > { %v1975_v46 = vadd.f32 %v1974_v1, %v1940_v54  ;;  %v9876_v51 = vadd.f32 %v2160_v33, %v2126_v22  ;;  %3065 = vmatmul.f32.vlgmr.msra.gmra.mxu2 %v3064_v38  ;;  %v9883_v54 = vld [vmem:[#allocation1 + $0x4] ss:$9 sm:$0xff]  ;;  %3399 = vmatmul.f32.gmra.mxu1 %v9795_v13  ;;  %v3072_v38 = vand.u32 4294901760, %v3071_v30  ;;  %v1846_v48 = vadd.f32 %v9824_v14, %v1817_v15 }
 0x31b   : > { %2973 = vmatmul.f32.vlgmr.msrb.gmra.mxu3 %v14150_v56  ;;  %14153 = vst [vmem:[#allocation39_spill] sm:$0xff] %v9883_v54  ;;  %3307 = vmatpush.xpose.msra.mxu2 %v9188_v4  ;;  %v2061_v56 = vpop.f32.mrf.mxu2  ;;  %v2846_v33 = vld [vmem:[%s13960_s7 + $0x40] sm:$0xff] }
 0x31c   : > { %3210 = vmatpush.xpose.msrb.mxu3 %v9141_v5  ;;  %7941 = vset.pattern.permute.xlu1 %v14151_v55  ;;  %v9874_v5 = vand.u32 4294901760, %v3404_v60  ;;  %v2003_v25 = vadd.f32 %v2002_v58, %v1975_v46  ;;  %6452 = vst [vmem:[#allocation1] sm:$0xff] %v9059_v40  ;;  %v1694_v58 = vadd.f32 %v9743_v17, %v1666_v0  ;;  %v3587_v22 = vsel %vm1349_vm12, %v2846_v33, 0 }
 0x31d   : > { %6944 = vperm.xlu1 %7941, %v9703_v7   ;;  %v9928_v31 = vand.u32 4294901760, %v3587_v22  ;;  %v1876_v14 = vadd.f32 %v9784_v24, %v1846_v48 }
 0x31e   : > { %v2032_v59 = vadd.f32 %v9817_v6, %v2003_v25  ;;  %v9901_v4 = vsub.f32 %v3404_v60, %v9874_v5  ;;  %v9912_v46 = vadd.f32 %v9804_v8, %v1694_v58  ;;  %v9926_v8 = vpop.xlane.xlu2 %4371 }
 0x31f   : > { %7948 = vset.pattern.permute.xlu0 %v14148_v42  ;;  %v2164_v60 = vpop.f32.mrf.mxu1 }
 0x320   : > { %v2062_v6 = vadd.f32 %v2061_v56, %v2032_v59  ;;  %3373 = vmatmul.f32.gmra.mxu0 %v9795_v13  ;;  %6579 = vperm.xlu0 %7948, %v9787_v2   ;;  %v3428_v3 = vand.u32 4294901760, %v9901_v4  ;;  %v9920_v13 = vand.u32 4294901760, %v3407_v29 }
 0x321   : > { %7943 = vset.pattern.permute.xlu2 %v14152_v28  ;;  %v1978_v17 = vpop.f32.mrf.mxu3  ;;  %v2134_v1 = vpop.f32.mrf.mxu0 }
 0x322   : > { %4730 = vperm.xlu2 %7943, %v9787_v2   ;;  %v9916_v0 = vadd.f32 %v2164_v60, %v2134_v1  ;;  %3073 = vmatmul.f32.gmra.mxu2 %v3072_v38  ;;  %v1979_v30 = vadd.f32 %v1978_v17, %v9854_v62  ;;  %v9954_v62 = vadd.f32 %v9762_v41, %v1876_v14 }
 0x323   : > { %2979 = vmatmul.f32.gmra.mxu3 %v14155_v27  ;;  %v9924_v25 = vld [vmem:[#allocation1 + $0x4] ss:$9 sm:$0xff]  ;;  %3522 = vmatmul.f32.vlgmr.msrb.gmra.mxu1 %v3428_v3  ;;  %v3590_v27 = vsel %vm1349_vm12, %v2847_v61, 0  ;;  %v2065_v33 = vpop.f32.mrf.mxu2 }
 0x324   : > { %14156 = vst [vmem:[#allocation40_spill] sm:$0xff] %v9924_v25  ;;  %3759 = vmatpush.xpose.msrb.mxu1 %v9283_v37 }
 0x325   : > { %7942 = vset.pattern.permute.xlu1 %v14012_v44  ;;  %6454 = vst [vmem:[#allocation1] sm:$0xff] %v9104_v35 }
 0x326   : > { %7313 = vperm.xlu1 %7942, %v9703_v7   ;;  %v9938_v7 = vsub.f32 %v3407_v29, %v9920_v13  ;;  %v9963_v15 = vpop.xlane.xlu2 %4380 }
 0x327   : > { %v2273_v61 = vpop.f32.mrf.mxu1 }
 0x328   : > { %3493 = vmatmul.f32.vlgmr.msrb.gmra.mxu0 %v9901_v4  ;;  %7949 = vset.pattern.permute.xlu0 %v14151_v55  ;;  %v3436_v58 = vand.u32 4294901760, %v9938_v7 }
 0x329   : > { %v2087_v59 = vpop.f32.mrf.mxu3  ;;  %3733 = vmatpush.xpose.msrb.mxu0 %v9322_v16  ;;  %6948 = vperm.xlu0 %7949, %v9787_v2   ;;  %v2008_v16 = vadd.f32 %v9842_v39, %v1979_v30 }
 0x32a   : > { %4735 = vperm.xlu2 %7943, %v9912_v46   ;;  %v9947_v24 = vadd.f32 %v2087_v59, %v2062_v6  ;;  %3186 = vmatmul.f32.vlgmr.msrb.gmra.mxu2 %v9728_v57  ;;  %v9971_v6 = vand.u32 4294901760, %v3590_v27 }
 0x32b   : > { %3099 = vmatmul.f32.vlgmr.msra.gmra.mxu3 %v9728_v57  ;;  %3425 = vmatpush.xpose.msrb.mxu2 %v9259_v52  ;;  %v2038_v39 = vadd.f32 %v9838_v11, %v2008_v16  ;;  %v2188_v59 = vpop.f32.mrf.mxu2 }
 0x32c   : > { %3335 = vmatpush.xpose.msra.mxu3 %v9155_v63  ;;  %v9950_v63 = vsub.f32 %v3587_v22, %v9928_v31  ;;  %v9961_v56 = vld [vmem:[#allocation1 + $0x4] ss:$9 sm:$0xff]  ;;  %3528 = vmatmul.f32.gmra.mxu1 %v3436_v58  ;;  %v9983_v29 = vsub.f32 %v3590_v27, %v9971_v6  ;;  %v2247_v27 = vpop.f32.mrf.mxu0  ;;  %v2189_v16 = vadd.f32 %v2188_v59, %v9876_v51 }
 0x32d   : > { %14157 = vst [vmem:[#allocation41_spill] sm:$0xff] %v9961_v56  ;;  %v2066_v38 = vadd.f32 %v2065_v33, %v2038_v39 }
 0x32e   : > { %7958 = vset.pattern.permute.xlu1 %v14152_v28  ;;  %v14011_v41 = vand.u32 4294901760, %v9950_v63  ;;  %6456 = vst [vmem:[#allocation1] sm:$0xff] %v9169_v19  ;;  %v14010_v48 = vand.u32 4294901760, %v9983_v29 }
 0x32f   : > { %4740 = vperm.xlu1 %7958, %v9954_v62  }
 0x330   : > { %3498 = vmatmul.f32.gmra.mxu0 %v9938_v7  ;;  %v3612_v17 = vsub.f32 %v9950_v63, %v14011_v41  ;;  %v3620_v14 = vsub.f32 %v9983_v29, %v14010_v48  ;;  %v14170_v41 = vld [vmem:[#allocation2_spill] sm:$0xff] }
 0x331   : > { %7950 = vset.pattern.permute.xlu0 %v14012_v44  ;;  %v2091_v1 = vpop.f32.mrf.mxu3 }
 0x332   : > { %7951 = vset.pattern.permute.xlu2 %v14143_v20  ;;  %7317 = vperm.xlu0 %7950, %v9787_v2   ;;  %v3613_v22 = vand.u32 4294901760, %v3612_v17  ;;  %v10000_v2 = vadd.f32 %v2091_v1, %v2066_v38 }
 0x333   : > { %5107 = vperm.xlu2 %7951, %v9912_v46   ;;  %3103 = vmatmul.f32.gmra.mxu3 %v9757_v53  ;;  %v2193_v1 = vpop.f32.mrf.mxu2 }
 0x334   : > { %3190 = vmatmul.f32.gmra.mxu2 %v9757_v53  ;;  %3648 = vmatmul.f32.vlgmr.msra.gmra.mxu1 %v9928_v31  ;;  %v2194_v59 = vadd.f32 %v2193_v1, %v9916_v0  ;;  %v14165_v1 = vand.u32 4294901760, %v9810_v47 }
 0x335   : > { %v9986_v60 = vld [vmem:[#allocation1 + $0x4] ss:$9 sm:$0xff]  ;;  %3884 = vmatpush.xpose.msra.mxu1 %v9425_v9 }
 0x336   : > { %14158 = vst [vmem:[#allocation42_spill] sm:$0xff] %v9986_v60 }
 0x337   : > { %7959 = vset.pattern.permute.xlu1 %v14143_v20  ;;  %6458 = vst [vmem:[#allocation1] sm:$0xff] %v9241_v21 }
 0x338   : > { %5111 = vperm.xlu1 %7959, %v9954_v62   ;;  %3614 = vmatmul.f32.vlgmr.msra.gmra.mxu0 %v3613_v22  ;;  %v14161_v22 = vand.u32 4294901760, %v9782_v45 }
 0x339   : > { %3856 = vmatpush.xpose.msra.mxu0 %v9439_v32  ;;  %v3621_v32 = vand.u32 4294901760, %v3620_v14  ;;  %v2217_v39 = vpop.f32.mrf.mxu3 }
 0x33a   : > { %7982 = vset.pattern.permute.xlu0 %v14152_v28  ;;  %v2218_v33 = vadd.f32 %v2217_v39, %v2189_v16 }
 0x33b   : > { %7952 = vset.pattern.permute.xlu2 %v14146_v12  ;;  %3212 = vmatmul.f32.vlgmr.msrb.gmra.mxu3 %v9728_v57 }
 0x33c   : > { %5476 = vperm.xlu2 %7952, %v9912_v46   ;;  %3463 = vmatpush.xpose.msrb.mxu3 %v9429_v50  ;;  %v10011_v50 = vpop.xlane.xlu1 %4359  ;;  %v2248_v51 = vadd.f32 %v2247_v27, %v2218_v33  ;;  %v2251_v27 = vpop.f32.mrf.mxu0 }
 0x33d   : > { %v9990_v11 = vpop.permute.xlu2 %5095  ;;  %4755 = vperm.xlu0 %7982, %v10000_v2   ;;  %3310 = vmatmul.f32.vlgmr.msra.gmra.mxu2 %v9782_v45 }
 0x33e   : > { %v10009_v57 = vld [vmem:[#allocation1 + $0x4] ss:$9 sm:$0xff]  ;;  %3550 = vmatpush.xpose.msra.mxu2 %v9407_v49  ;;  %3652 = vmatmul.f32.gmra.mxu1 %v9971_v6 }
 0x33f   : > { %14159 = vst [vmem:[#allocation43_spill] sm:$0xff] %v10009_v57  ;;  %v2848_v49 = vld [vmem:[%s13960_s7 + $0x50] sm:$0xff] }
 0x340   : > { %6460 = vst [vmem:[#allocation1] sm:$0xff] %v9280_v26  ;;  %7960 = vset.pattern.permute.xlu1 %v14146_v12  ;;  %3622 = vmatmul.f32.gmra.mxu0 %v3621_v32  ;;  %v3429_v32 = vsub.f32 %v9901_v4, %v3428_v3  ;;  %v3770_v45 = vsel %vm1349_vm12, %v2848_v49, 0  ;;  %v14162_v3 = vld [vmem:[#allocation16_spill] sm:$0xff] }
 0x341   : > { %5480 = vperm.xlu1 %7960, %v9954_v62   ;;  %v2223_v16 = vpop.f32.mrf.mxu3 }
 0x342   : > { %v2224_v4 = vadd.f32 %v2223_v16, %v2194_v59  ;;  %v3430_v0 = vand.u32 4294901760, %v3429_v32  ;;  %v10075_v32 = vpop.f32.mrf.mxu2  ;;  %v14166_v59 = vld [vmem:[#allocation9_spill] sm:$0xff] }
 0x343   : > { %3216 = vmatmul.f32.gmra.mxu3 %v9757_v53  ;;  %v10037_v53 = vadd.f32 %v2273_v61, %v2248_v51  ;;  %v2277_v61 = vpop.f32.mrf.mxu1  ;;  %v14164_v51 = vld [vmem:[#allocation11_spill] sm:$0xff]  ;;  %v2850_v16 = vld [vmem:[%s13960_s7 + $0x60] sm:$0xff] }
 0x344   : > { %7953 = vset.pattern.permute.xlu2 %v14145_v34  ;;  %v10028_v38 = vpop.xlane.xlu1 %4368  ;;  %v2252_v33 = vadd.f32 %v2251_v27, %v2224_v4  ;;  %v10097_v4 = vpop.xlane.xlu0 %4365  ;;  %v3953_v48 = vsel %vm1349_vm12, %v2850_v16, 0 }
 0x345   : > { %5845 = vperm.xlu2 %7953, %v9912_v46   ;;  %7983 = vset.pattern.permute.xlu0 %v14143_v20 }
 0x346   : > { %v10016_v30 = vpop.permute.xlu2 %5464  ;;  %5123 = vperm.xlu0 %7983, %v10000_v2   ;;  %3315 = vmatmul.f32.gmra.mxu2 %v9810_v47  ;;  %v10068_v49 = vadd.f32 %v2277_v61, %v2252_v33 }
 0x347   : > { %v10026_v17 = vld [vmem:[#allocation1 + $0x4] ss:$9 sm:$0xff]  ;;  %3761 = vmatmul.f32.vlgmr.msrb.gmra.mxu1 %v9928_v31 }
 0x348   : > { %14160 = vst [vmem:[#allocation44_spill] sm:$0xff] %v10026_v17  ;;  %4012 = vmatpush.xpose.msrb.mxu1 %v9465_v36  ;;  %3735 = vmatmul.f32.vlgmr.msrb.gmra.mxu0 %v9928_v31  ;;  %v10061_v36 = vand.u32 4294901760, %v3770_v45  ;;  %v2849_v31 = vld [vmem:[%s13960_s7 + $0x58] sm:$0xff] }
 0x349   : > { %6462 = vst [vmem:[#allocation1] sm:$0xff] %v9318_v10  ;;  %7961 = vset.pattern.permute.xlu1 %v14145_v34  ;;  %3974 = vmatpush.xpose.msrb.mxu0 %v14162_v3  ;;  %v3773_v47 = vsel %vm1349_vm12, %v2849_v31, 0 }
 0x34a   : > { %5849 = vperm.xlu1 %7961, %v9954_v62   ;;  %v10080_v27 = vsub.f32 %v3770_v45, %v10061_v36  ;;  %v10095_v45 = vpop.f32.mrf.mxu0  ;;  %v2320_v16 = vpop.f32.mrf.mxu2 }
 0x34b   : > { %3339 = vmatmul.f32.vlgmr.msra.gmra.mxu3 %v14161_v22  ;;  %v3437_v22 = vsub.f32 %v9938_v7, %v3436_v58  ;;  %v10089_v7 = vpop.f32.mrf.mxu3  ;;  %v10093_v58 = vpop.f32.mrf.mxu1 }
 0x34c   : > { %3576 = vmatpush.xpose.msra.mxu3 %v9259_v52  ;;  %v10058_v39 = vpop.xlane.xlu1 %4377 }
 0x34d   : > { %7954 = vset.pattern.permute.xlu2 %v14147_v23 }
 0x34e   : > { %6214 = vperm.xlu2 %7954, %v9912_v46   ;;  %7984 = vset.pattern.permute.xlu0 %v14146_v12 }
 0x34f   : > { %v10042_v14 = vpop.permute.xlu2 %5833  ;;  %5492 = vperm.xlu0 %7984, %v10000_v2   ;;  %3431 = vmatmul.f32.vlgmr.msrb.gmra.mxu2 %v3430_v0  ;;  %v3438_v0 = vand.u32 4294901760, %v3437_v22 }
 0x350   : > { %v10056_v52 = vld [vmem:[#allocation1 + $0x4] ss:$9 sm:$0xff]  ;;  %3673 = vmatpush.xpose.msrb.mxu2 %v14166_v59  ;;  %3765 = vmatmul.f32.gmra.mxu1 %v9971_v6  ;;  %v10106_v59 = vand.u32 4294901760, %v3773_v47 }
 0x351   : > { %14163 = vst [vmem:[#allocation16_spill] sm:$0xff] %v10056_v52  ;;  %3739 = vmatmul.f32.gmra.mxu0 %v9971_v6  ;;  %v10113_v6 = vand.u32 4294901760, %v3953_v48  ;;  %v14173_v52 = vld [vmem:[#allocation19_spill] sm:$0xff] }
 0x352   : > { %6464 = vst [vmem:[#allocation1] sm:$0xff] %v14164_v51  ;;  %7962 = vset.pattern.permute.xlu1 %v14147_v23  ;;  %v10119_v22 = vsub.f32 %v3773_v47, %v10106_v59  ;;  %v2379_v60 = vpop.f32.mrf.mxu0 }
 0x353   : > { %3345 = vmatmul.f32.gmra.mxu3 %v14165_v1  ;;  %6218 = vperm.xlu1 %7962, %v9954_v62   ;;  %v14014_v1 = vand.u32 4294901760, %v10080_v27  ;;  %v2409_v17 = vpop.f32.mrf.mxu1 }
 0x354   : > { %v14015_v57 = vand.u32 4294901760, %v10119_v22 }
 0x356   : > { %7955 = vset.pattern.permute.xlu2 %v14148_v42 }
 0x357   : > { %6583 = vperm.xlu2 %7955, %v9912_v46   ;;  %7985 = vset.pattern.permute.xlu0 %v14145_v34 }
 0x358   : > { %v10083_v61 = vpop.permute.xlu2 %6202  ;;  %5861 = vperm.xlu0 %7985, %v10000_v2   ;;  %3439 = vmatmul.f32.gmra.mxu2 %v3438_v0  ;;  %v2350_v0 = vpop.f32.mrf.mxu3 }
 0x359   : > { %14167 = vst [vmem:[#allocation11_spill] sm:$0xff] %v10083_v61  ;;  %v10101_v33 = vld [vmem:[#allocation1 + $0x4] ss:$9 sm:$0xff]  ;;  %v10103_v31 = vpop.permute.xlu1 %4725  ;;  %3888 = vmatmul.f32.vlgmr.msra.gmra.mxu1 %v14014_v1  ;;  %3859 = vmatmul.f32.vlgmr.msra.gmra.mxu0 %v10080_v27  ;;  %v2351_v1 = vadd.f32 %v2350_v0, %v2320_v16  ;;  %v14177_v0 = vmov 7  }
 0x35a   : > { %14168 = vst [vmem:[#allocation9_spill] sm:$0xff] %v10101_v33  ;;  %4125 = vmatpush.xpose.msra.mxu1 %v14162_v3  ;;  %v10125_v33 = vpop.xlane.xlu0 %4374  ;;  %4099 = vmatpush.xpose.msra.mxu0 %v14173_v52 }
 0x35b   : > { %14169 = vst [vmem:[#allocation45_spill] sm:$0xff] %v10103_v31  ;;  %3465 = vmatmul.f32.vlgmr.msrb.gmra.mxu3 %v9874_v5  ;;  %7963 = vset.pattern.permute.xlu1 %v14148_v42 }
 0x35c   : > { %6818 = vst [vmem:[#allocation1] sm:$0xff] %v14170_v41  ;;  %3701 = vmatpush.xpose.msrb.mxu3 %v9283_v37  ;;  %v10130_v37 = vsub.f32 %v3953_v48, %v10113_v6  ;;  %6587 = vperm.xlu1 %7963, %v9954_v62  }
 0x35e   : > { %v14016_v48 = vand.u32 4294901760, %v10130_v37 }
 0x35f   : > { %7956 = vset.pattern.permute.xlu2 %v14151_v55 }
 0x360   : > { %6952 = vperm.xlu2 %7956, %v9912_v46   ;;  %7986 = vset.pattern.permute.xlu0 %v14147_v23 }
 0x361   : > { %v10123_v44 = vpop.permute.xlu2 %6571  ;;  %3552 = vmatmul.f32.vlgmr.msra.gmra.mxu2 %v9874_v5  ;;  %3894 = vmatmul.f32.gmra.mxu1 %v14015_v57  ;;  %v2532_v57 = vpop.f32.mrf.mxu1 }
 0x362   : > { %14171 = vst [vmem:[#allocation2_spill] sm:$0xff] %v10123_v44  ;;  %v10139_v56 = vpop.permute.xlu1 %5099  ;;  %v2380_v44 = vadd.f32 %v2379_v60, %v2351_v1  ;;  %3791 = vmatpush.xpose.msra.mxu2 %v9425_v9  ;;  %6230 = vperm.xlu0 %7986, %v10000_v2   ;;  %v3978_v60 = vsub.f32 %v10130_v37, %v14016_v48  ;;  %v10157_v16 = vpop.permute.xlu0 %4720 }
 0x363   : > { %v10132_v47 = vld [vmem:[#allocation1 + $0x5] ss:$9 sm:$0xff]  ;;  %14174 = vst [vmem:[#allocation19_spill] sm:$0xff] %v10139_v56  ;;  %3469 = vmatmul.f32.gmra.mxu3 %v9920_v13  ;;  %3864 = vmatmul.f32.gmra.mxu0 %v10119_v22  ;;  %v2498_v56 = vpop.f32.mrf.mxu0 }
 0x364   : > { %14172 = vst [vmem:[#allocation46_spill] sm:$0xff] %v10132_v47  ;;  %7964 = vset.pattern.permute.xlu1 %v14151_v55  ;;  %v3979_v48 = vand.u32 4294901760, %v3978_v60  ;;  %v14180_v47 = vld [vmem:[#allocation26_spill] sm:$0xff]  ;;  %v14186_v60 = vld [vmem:[#allocation24_spill] sm:$0xff] }
 0x365   : > { %6821 = vst [vmem:[#allocation1] sm:$0xff] %v9059_v40  ;;  %6956 = vperm.xlu1 %7964, %v9954_v62  }
 0x368   : > { %7957 = vset.pattern.permute.xlu2 %v14177_v0 }
 0x369   : > { %7321 = vperm.xlu2 %7957, %v9912_v46   ;;  %3556 = vmatmul.f32.gmra.mxu2 %v9920_v13 }
 0x36a   : > { %v10150_v52 = vpop.permute.xlu2 %6940  ;;  %4014 = vmatmul.f32.vlgmr.msrb.gmra.mxu1 %v10113_v6  ;;  %7987 = vset.pattern.permute.xlu0 %v14148_v42 }
 0x36b   : > { %14175 = vst [vmem:[#allocation47_spill] sm:$0xff] %v10150_v52  ;;  %v10164_v52 = vpop.permute.xlu1 %5468  ;;  %3578 = vmatmul.f32.vlgmr.msra.gmra.mxu3 %v9874_v5  ;;  %4250 = vmatpush.xpose.msrb.mxu1 %v14180_v47 }
 0x36c   : > { %v10155_v1 = vld [vmem:[#allocation1 + $0x5] ss:$9 sm:$0xff]  ;;  %14178 = vst [vmem:[#allocation49_spill] sm:$0xff] %v10164_v52  ;;  %6599 = vperm.xlu0 %7987, %v10000_v2   ;;  %3980 = vmatmul.f32.vlgmr.msrb.gmra.mxu0 %v3979_v48 }
 0x36d   : > { %14176 = vst [vmem:[#allocation48_spill] sm:$0xff] %v10155_v1  ;;  %v14179_v1 = vld [vmem:[#allocation27_spill] sm:$0xff]  ;;  %v14182_v52 = vld [vmem:[#allocation28_spill] sm:$0xff]  ;;  %7965 = vset.pattern.permute.xlu1 %v14177_v0 }
 0x36e   : > { %6823 = vst [vmem:[#allocation1] sm:$0xff] %v9104_v35  ;;  %3829 = vmatpush.xpose.msra.mxu3 %v14179_v1  ;;  %4222 = vmatpush.xpose.msrb.mxu0 %v14182_v52  ;;  %v10178_v5 = vpop.permute.xlu0 %5103  ;;  %v2433_v52 = vpop.f32.mrf.mxu2  ;;  %v2347_v1 = vadd.f32 %v10089_v7, %v10075_v32  ;;  %v2410_v7 = vadd.f32 %v2409_v17, %v2380_v44 }
 0x36f   : > { %14184 = vst [vmem:[#allocation28_spill] sm:$0xff] %v10178_v5  ;;  %7325 = vperm.xlu1 %7965, %v9954_v62   ;;  %v2459_v32 = vpop.f32.mrf.mxu3 }
 0x371   : > { %7966 = vset.pattern.permute.xlu2 %v14152_v28  ;;  %3676 = vmatmul.f32.vlgmr.msrb.gmra.mxu2 %v9950_v63 }
 0x372   : > { %4745 = vperm.xlu2 %7966, %v9860_v43   ;;  %3916 = vmatpush.xpose.msrb.mxu2 %v14186_v60 }
 0x373   : > { %v10176_v25 = vpop.permute.xlu2 %7309  ;;  %3582 = vmatmul.f32.gmra.mxu3 %v9920_v13  ;;  %v2375_v13 = vadd.f32 %v10095_v45, %v2347_v1 }
 0x374   : > { %14183 = vst [vmem:[#allocation26_spill] sm:$0xff] %v10176_v25  ;;  %v10187_v48 = vpop.permute.xlu1 %5837  ;;  %7988 = vset.pattern.permute.xlu0 %v14151_v55 }
 0x375   : > { %v10173_v46 = vld [vmem:[#allocation1 + $0x5] ss:$9 sm:$0xff]  ;;  %14185 = vst [vmem:[#allocation50_spill] sm:$0xff] %v10187_v48  ;;  %6968 = vperm.xlu0 %7988, %v10000_v2   ;;  %v2404_v45 = vadd.f32 %v10093_v58, %v2375_v13  ;;  %v14192_v48 = vand.u32 4294901760, %v10080_v27  ;;  %v2533_v13 = vadd.f32 %v2532_v57, %v2498_v56 }
 0x376   : > { %14181 = vst [vmem:[#allocation27_spill] sm:$0xff] %v10173_v46  ;;  %v2437_v60 = vpop.f32.mrf.mxu2 }
 0x377   : > { %6825 = vst [vmem:[#allocation1] sm:$0xff] %v9169_v19  ;;  %v10200_v5 = vpop.permute.xlu0 %5472  ;;  %7974 = vset.pattern.permute.xlu1 %v14152_v28  ;;  %v2438_v1 = vadd.f32 %v2437_v60, %v2410_v7  ;;  %v3795_v25 = vsub.f32 %v10080_v27, %v14192_v48  ;;  %v2434_v17 = vadd.f32 %v2433_v52, %v2404_v45  ;;  %v14198_v7 = vld [vmem:[#allocation18_spill] sm:$0xff] }
 0x378   : > { %14189 = vst [vmem:[#allocation52_spill] sm:$0xff] %v10200_v5  ;;  %4750 = vperm.xlu1 %7974, %v9947_v24  }
 0x379   : > { %3681 = vmatmul.f32.gmra.mxu2 %v9983_v29  ;;  %v3796_v58 = vand.u32 4294901760, %v3795_v25  ;;  %v10233_v48 = vadd.f32 %v2459_v32, %v2434_v17  ;;  %v14197_v25 = vand.u32 4294901760, %v10119_v22 }
 0x37a   : > { %7967 = vset.pattern.permute.xlu2 %v14143_v20 }
 0x37b   : > { %5115 = vperm.xlu2 %7967, %v9860_v43   ;;  %v3803_v52 = vsub.f32 %v10119_v22, %v14197_v25 }
 0x37c   : > { %v10198_v62 = vpop.permute.xlu2 %4730 }
 0x37d   : > { %14188 = vst [vmem:[#allocation51_spill] sm:$0xff] %v10198_v62  ;;  %v10211_v5 = vpop.permute.xlu1 %6206  ;;  %7989 = vset.pattern.permute.xlu0 %v14177_v0  ;;  %v3804_v32 = vand.u32 4294901760, %v3803_v52 }
 0x37e   : > { %v10194_v46 = vld [vmem:[#allocation1 + $0x5] ss:$9 sm:$0xff]  ;;  %14191 = vst [vmem:[#allocation53_spill] sm:$0xff] %v10211_v5  ;;  %7337 = vperm.xlu0 %7989, %v10000_v2   ;;  %v14196_v2 = vand.u32 4294901760, %v9983_v29  ;;  %v2560_v57 = vpop.f32.mrf.mxu2 }
 0x37f   : > { %14187 = vst [vmem:[#allocation24_spill] sm:$0xff] %v10194_v46  ;;  %v14190_v46 = vand.u32 4294901760, %v9950_v63  ;;  %v2561_v45 = vadd.f32 %v2560_v57, %v2533_v13 }
 0x380   : > { %6827 = vst [vmem:[#allocation1] sm:$0xff] %v9241_v21  ;;  %7975 = vset.pattern.permute.xlu1 %v14143_v20 }
 0x381   : > { %3705 = vmatmul.f32.vlgmr.msrb.gmra.mxu3 %v14190_v46  ;;  %v2463_v46 = vpop.f32.mrf.mxu3  ;;  %5119 = vperm.xlu1 %7975, %v9947_v24  }
 0x382   : > { %3942 = vmatpush.xpose.msrb.mxu3 %v9425_v9  ;;  %v10224_v9 = vpop.permute.xlu0 %5841  ;;  %v10228_v27 = vadd.f32 %v2463_v46, %v2438_v1  ;;  %3797 = vmatmul.f32.vlgmr.msra.gmra.mxu2 %v3796_v58 }
 0x383   : > { %14195 = vst [vmem:[#allocation56_spill] sm:$0xff] %v10224_v9  ;;  %7968 = vset.pattern.permute.xlu2 %v14146_v12  ;;  %4039 = vmatpush.xpose.msra.mxu2 %v14198_v7 }
 0x384   : > { %v10221_v63 = vpop.permute.xlu2 %4735  ;;  %5484 = vperm.xlu2 %7968, %v9860_v43  }
 0x385   : > { %14194 = vst [vmem:[#allocation55_spill] sm:$0xff] %v10221_v63 }
 0x386   : > { %v10239_v56 = vpop.permute.xlu1 %6575  ;;  %8006 = vset.pattern.permute.xlu0 %v14152_v28 }
 0x387   : > { %v10217_v44 = vld [vmem:[#allocation1 + $0x5] ss:$9 sm:$0xff]  ;;  %14199 = vst [vmem:[#allocation18_spill] sm:$0xff] %v10239_v56  ;;  %4770 = vperm.xlu0 %8006, %v10233_v48  }
 0x388   : > { %14193 = vst [vmem:[#allocation54_spill] sm:$0xff] %v10217_v44  ;;  %v2506_v44 = vpop.f32.mrf.mxu0 }
 0x389   : > { %6829 = vst [vmem:[#allocation1] sm:$0xff] %v9280_v26  ;;  %3711 = vmatmul.f32.gmra.mxu3 %v14196_v2  ;;  %v2589_v1 = vpop.f32.mrf.mxu3  ;;  %7976 = vset.pattern.permute.xlu1 %v14146_v12 }
 0x38a   : > { %v10249_v22 = vadd.f32 %v2589_v1, %v2561_v45  ;;  %5488 = vperm.xlu1 %7976, %v9947_v24   ;;  %v10253_v17 = vpop.permute.xlu0 %6210  ;;  %3805 = vmatmul.f32.gmra.mxu2 %v3804_v32  ;;  %v14212_v45 = vld [vmem:[#allocation36_spill] sm:$0xff] }
 0x38b   : > { %14202 = vst [vmem:[#allocation59_spill] sm:$0xff] %v10253_v17 }
 0x38c   : > { %7969 = vset.pattern.permute.xlu2 %v14145_v34 }
 0x38d   : > { %v10246_v29 = vpop.permute.xlu2 %5107  ;;  %5853 = vperm.xlu2 %7969, %v9860_v43  }
 0x38e   : > { %14201 = vst [vmem:[#allocation58_spill] sm:$0xff] %v10246_v29 }
 0x38f   : > { %v10260_v46 = vpop.permute.xlu1 %6944  ;;  %8007 = vset.pattern.permute.xlu0 %v14143_v20 }
 0x390   : > { %v10241_v60 = vld [vmem:[#allocation1 + $0x5] ss:$9 sm:$0xff]  ;;  %14204 = vst [vmem:[#allocation61_spill] sm:$0xff] %v10260_v46  ;;  %5135 = vperm.xlu0 %8007, %v10233_v48  }
 0x391   : > { %14200 = vst [vmem:[#allocation57_spill] sm:$0xff] %v10241_v60  ;;  %3831 = vmatmul.f32.vlgmr.msra.gmra.mxu3 %v10061_v36 }
 0x392   : > { %6831 = vst [vmem:[#allocation1] sm:$0xff] %v9318_v10  ;;  %4067 = vmatpush.xpose.msra.mxu3 %v14162_v3  ;;  %7977 = vset.pattern.permute.xlu1 %v14145_v34  ;;  %v10270_v2 = vpop.permute.xlu0 %6579 }
 0x393   : > { %3918 = vmatmul.f32.vlgmr.msrb.gmra.mxu2 %v10061_v36  ;;  %14206 = vst [vmem:[#allocation63_spill] sm:$0xff] %v10270_v2  ;;  %5857 = vperm.xlu1 %7977, %v9947_v24  }
 0x394   : > { %4157 = vmatpush.xpose.msrb.mxu2 %v14180_v47 }
 0x395   : > { %7970 = vset.pattern.permute.xlu2 %v14147_v23 }
 0x396   : > { %v10265_v13 = vpop.permute.xlu2 %5476  ;;  %6222 = vperm.xlu2 %7970, %v9860_v43  }
 0x397   : > { %14205 = vst [vmem:[#allocation62_spill] sm:$0xff] %v10265_v13 }
 0x398   : > { %v10279_v25 = vpop.permute.xlu1 %7313  ;;  %8008 = vset.pattern.permute.xlu0 %v14146_v12 }
 0x399   : > { %v10257_v58 = vld [vmem:[#allocation1 + $0x5] ss:$9 sm:$0xff]  ;;  %3835 = vmatmul.f32.gmra.mxu3 %v10106_v59  ;;  %14208 = vst [vmem:[#allocation65_spill] sm:$0xff] %v10279_v25  ;;  %5504 = vperm.xlu0 %8008, %v10233_v48  }
 0x39a   : > { %14203 = vst [vmem:[#allocation60_spill] sm:$0xff] %v10257_v58 }
 0x39b   : > { %6833 = vst [vmem:[#allocation1] sm:$0xff] %v14164_v51  ;;  %3922 = vmatmul.f32.gmra.mxu2 %v10106_v59  ;;  %v10287_v7 = vpop.permute.xlu0 %6948  ;;  %7978 = vset.pattern.permute.xlu1 %v14147_v23 }
 0x39c   : > { %14210 = vst [vmem:[#allocation67_spill] sm:$0xff] %v10287_v7  ;;  %6226 = vperm.xlu1 %7978, %v9947_v24  }
 0x39e   : > { %7971 = vset.pattern.permute.xlu2 %v14148_v42 }
 0x39f   : > { %v10284_v52 = vpop.permute.xlu2 %5845  ;;  %6591 = vperm.xlu2 %7971, %v9860_v43  }
 0x3a0   : > { %14209 = vst [vmem:[#allocation66_spill] sm:$0xff] %v10284_v52 }
 0x3a1   : > { %3944 = vmatmul.f32.vlgmr.msrb.gmra.mxu3 %v10061_v36  ;;  %v10297_v32 = vpop.permute.xlu1 %4740  ;;  %8009 = vset.pattern.permute.xlu0 %v14145_v34  ;;  %v14214_v36 = vld [vmem:[#allocation34_spill] sm:$0xff] }
 0x3a2   : > { %v10274_v3 = vld [vmem:[#allocation1 + $0x5] ss:$9 sm:$0xff]  ;;  %4195 = vmatpush.xpose.msrb.mxu3 %v14212_v45  ;;  %14213 = vst [vmem:[#allocation36_spill] sm:$0xff] %v10297_v32  ;;  %5873 = vperm.xlu0 %8009, %v10233_v48  }
 0x3a3   : > { %14207 = vst [vmem:[#allocation64_spill] sm:$0xff] %v10274_v3  ;;  %4042 = vmatmul.f32.vlgmr.msra.gmra.mxu2 %v10130_v37 }
 0x3a4   : > { %7187 = vst [vmem:[#allocation1] sm:$0xff] %v14170_v41  ;;  %4282 = vmatpush.xpose.msra.mxu2 %v14214_v36  ;;  %v10306_v45 = vpop.permute.xlu0 %7317  ;;  %7979 = vset.pattern.permute.xlu1 %v14148_v42 }
 0x3a5   : > { %14216 = vst [vmem:[#allocation69_spill] sm:$0xff] %v10306_v45  ;;  %6595 = vperm.xlu1 %7979, %v9947_v24  }
 0x3a7   : > { %7972 = vset.pattern.permute.xlu2 %v14151_v55 }
 0x3a8   : > { %v10304_v1 = vpop.permute.xlu2 %6214  ;;  %6960 = vperm.xlu2 %7972, %v9860_v43  }
 0x3a9   : > { %3948 = vmatmul.f32.gmra.mxu3 %v10106_v59  ;;  %14215 = vst [vmem:[#allocation34_spill] sm:$0xff] %v10304_v1  ;;  %v14218_v59 = vand.u32 4294901760, %v10130_v37 }
 0x3aa   : > { %v10312_v3 = vpop.permute.xlu1 %5111  ;;  %8010 = vset.pattern.permute.xlu0 %v14147_v23 }
 0x3ab   : > { %v10289_v57 = vld [vmem:[#allocation1 + $0x6] ss:$9 sm:$0xff]  ;;  %14217 = vst [vmem:[#allocation70_spill] sm:$0xff] %v10312_v3  ;;  %6242 = vperm.xlu0 %8010, %v10233_v48   ;;  %v2595_v3 = vpop.f32.mrf.mxu3 }
 0x3ac   : > { %14211 = vst [vmem:[#allocation68_spill] sm:$0xff] %v10289_v57 }
 0x3ad   : > { %7190 = vst [vmem:[#allocation1] sm:$0xff] %v9059_v40  ;;  %7980 = vset.pattern.permute.xlu1 %v14151_v55 }
 0x3ae   : > { %6964 = vperm.xlu1 %7980, %v9947_v24  }
 0x3af   : > { %v10321_v58 = vpop.permute.xlu0 %4755 }
 0x3b0   : > { %14220 = vst [vmem:[#allocation72_spill] sm:$0xff] %v10321_v58  ;;  %7973 = vset.pattern.permute.xlu2 %v14177_v0 }
 0x3b1   : > { %4071 = vmatmul.f32.vlgmr.msra.gmra.mxu3 %v14218_v59  ;;  %v10319_v36 = vpop.permute.xlu2 %6583  ;;  %7329 = vperm.xlu2 %7973, %v9860_v43   ;;  %v10344_v43 = vpop.f32.mrf.mxu0 }
 0x3b2   : > { %4308 = vmatpush.xpose.msra.mxu3 %v14180_v47  ;;  %14219 = vst [vmem:[#allocation71_spill] sm:$0xff] %v10319_v36  ;;  %v2536_v47 = vpop.f32.mrf.mxu1 }
 0x3b3   : > { %8011 = vset.pattern.permute.xlu0 %v14148_v42  ;;  %v10331_v37 = vpop.permute.xlu1 %5480 }
 0x3b4   : > { %v10323_v60 = vld [vmem:[#allocation1 + $0x6] ss:$9 sm:$0xff]  ;;  %14222 = vst [vmem:[#allocation74_spill] sm:$0xff] %v10331_v37  ;;  %6611 = vperm.xlu0 %8011, %v10233_v48   ;;  %v2537_v37 = vadd.f32 %v2536_v47, %v2506_v44 }
 0x3b5   : > { %14221 = vst [vmem:[#allocation73_spill] sm:$0xff] %v10323_v60 }
 0x3b6   : > { %7192 = vst [vmem:[#allocation1] sm:$0xff] %v9104_v35  ;;  %7981 = vset.pattern.permute.xlu1 %v14177_v0 }
 0x3b7   : > { %7333 = vperm.xlu1 %7981, %v9947_v24  }
 0x3b8   : > { %v10334_v59 = vpop.permute.xlu0 %5123 }
 0x3b9   : > { %14223 = vst [vmem:[#allocation75_spill] sm:$0xff] %v10334_v59  ;;  %7990 = vset.pattern.permute.xlu2 %v14152_v28  ;;  %v2565_v59 = vpop.f32.mrf.mxu2  ;;  %v2623_v47 = vpop.f32.mrf.mxu0 }
 0x3ba   : > { %v10339_v58 = vpop.permute.xlu2 %6952  ;;  %4760 = vperm.xlu2 %7990, %v10037_v53   ;;  %v10351_v36 = vpop.f32.mrf.mxu1 }
 0x3bb   : > { %14225 = vst [vmem:[#allocation77_spill] sm:$0xff] %v10339_v58  ;;  %v2566_v58 = vadd.f32 %v2565_v59, %v2537_v37 }
 0x3bc   : > { %8012 = vset.pattern.permute.xlu0 %v14151_v55 }
 0x3bd   : > { %v10336_v60 = vld [vmem:[#allocation1 + $0x6] ss:$9 sm:$0xff]  ;;  %6980 = vperm.xlu0 %8012, %v10233_v48   ;;  %v2596_v44 = vadd.f32 %v2595_v3, %v2566_v58 }
 0x3be   : > { %14224 = vst [vmem:[#allocation76_spill] sm:$0xff] %v10336_v60  ;;  %v10349_v60 = vpop.permute.xlu1 %5849 }
 0x3bf   : > { %7194 = vst [vmem:[#allocation1] sm:$0xff] %v9169_v19  ;;  %7998 = vset.pattern.permute.xlu1 %v14152_v28  ;;  %v2624_v59 = vadd.f32 %v2623_v47, %v2596_v44 }
 0x3c0   : > { %14226 = vst [vmem:[#allocation78_spill] sm:$0xff] %v10349_v60  ;;  %4765 = vperm.xlu1 %7998, %v10068_v49  }
 0x3c1   : > { %v10355_v1 = vpop.permute.xlu0 %5492 }
 0x3c2   : > { %14228 = vst [vmem:[#allocation80_spill] sm:$0xff] %v10355_v1  ;;  %7991 = vset.pattern.permute.xlu2 %v14143_v20 }
 0x3c3   : > { %v10359_v24 = vpop.permute.xlu2 %7321  ;;  %5127 = vperm.xlu2 %7991, %v10037_v53  }
 0x3c4   : > { %14229 = vst [vmem:[#allocation81_spill] sm:$0xff] %v10359_v24 }
 0x3c5   : > { %8013 = vset.pattern.permute.xlu0 %v14177_v0 }
 0x3c6   : > { %v10353_v45 = vld [vmem:[#allocation1 + $0x6] ss:$9 sm:$0xff]  ;;  %7349 = vperm.xlu0 %8013, %v10233_v48   ;;  %v10366_v37 = vpop.permute.xlu1 %6218 }
 0x3c7   : > { %14227 = vst [vmem:[#allocation79_spill] sm:$0xff] %v10353_v45  ;;  %v2649_v45 = vpop.f32.mrf.mxu1 }
 0x3c8   : > { %7196 = vst [vmem:[#allocation1] sm:$0xff] %v9241_v21  ;;  %7999 = vset.pattern.permute.xlu1 %v14143_v20  ;;  %v10374_v58 = vadd.f32 %v2649_v45, %v2624_v59  ;;  %v10388_v45 = vpop.f32.mrf.mxu0 }
 0x3c9   : > { %14230 = vst [vmem:[#allocation82_spill] sm:$0xff] %v10366_v37  ;;  %5131 = vperm.xlu1 %7999, %v10068_v49  }
 0x3ca   : > { %v10376_v3 = vpop.permute.xlu0 %5861 }
 0x3cb   : > { %14233 = vst [vmem:[#allocation85_spill] sm:$0xff] %v10376_v3  ;;  %7992 = vset.pattern.permute.xlu2 %v14146_v12 }
 0x3cc   : > { %v10372_v24 = vpop.permute.xlu2 %4745  ;;  %5496 = vperm.xlu2 %7992, %v10037_v53  }
 0x3cd   : > { %14232 = vst [vmem:[#allocation84_spill] sm:$0xff] %v10372_v24 }
 0x3ce   : > { %8030 = vset.pattern.permute.xlu0 %v14152_v28  ;;  %v10383_v48 = vpop.permute.xlu1 %6587 }
 0x3cf   : > { %v10368_v1 = vld [vmem:[#allocation1 + $0x6] ss:$9 sm:$0xff]  ;;  %4785 = vperm.xlu0 %8030, %v10374_v58   ;;  %14234 = vst [vmem:[#allocation86_spill] sm:$0xff] %v10383_v48 }
 0x3d0   : > { %14231 = vst [vmem:[#allocation83_spill] sm:$0xff] %v10368_v1  ;;  %v10397_v1 = vpop.f32.mrf.mxu1  ;;  %v10409_v3 = vpop.f32.mrf.mxu0 }
 0x3d1   : > { %7198 = vst [vmem:[#allocation1] sm:$0xff] %v9280_v26  ;;  %8000 = vset.pattern.permute.xlu1 %v14146_v12 }
 0x3d2   : > { %5500 = vperm.xlu1 %8000, %v10068_v49  }
 0x3d4   : > { %7993 = vset.pattern.permute.xlu2 %v14145_v34  ;;  %v10395_v59 = vpop.permute.xlu0 %6230 }
 0x3d5   : > { %v10391_v47 = vpop.permute.xlu2 %5115  ;;  %14237 = vst [vmem:[#allocation89_spill] sm:$0xff] %v10395_v59  ;;  %5865 = vperm.xlu2 %7993, %v10037_v53  }
 0x3d6   : > { %14236 = vst [vmem:[#allocation88_spill] sm:$0xff] %v10391_v47  ;;  %v10407_v47 = vpop.f32.mrf.mxu2 }
 0x3d7   : > { %8031 = vset.pattern.permute.xlu0 %v14143_v20  ;;  %v10404_v48 = vpop.permute.xlu1 %6956 }
 0x3d8   : > { %v10385_v44 = vld [vmem:[#allocation1 + $0x6] ss:$9 sm:$0xff]  ;;  %5147 = vperm.xlu0 %8031, %v10374_v58   ;;  %14239 = vst [vmem:[#allocation91_spill] sm:$0xff] %v10404_v48  ;;  %v10418_v37 = vpop.f32.mrf.mxu1  ;;  %v2883_v60 = vpop.f32.mrf.mxu0 }
 0x3d9   : > { %14235 = vst [vmem:[#allocation87_spill] sm:$0xff] %v10385_v44 }
 0x3da   : > { %7200 = vst [vmem:[#allocation1] sm:$0xff] %v9318_v10  ;;  %8001 = vset.pattern.permute.xlu1 %v14145_v34 }
 0x3db   : > { %5869 = vperm.xlu1 %8001, %v10068_v49  }
 0x3dd   : > { %7994 = vset.pattern.permute.xlu2 %v14147_v23 }
 0x3de   : > { %v10412_v59 = vpop.permute.xlu2 %5484  ;;  %v10416_v24 = vpop.permute.xlu0 %6599  ;;  %6234 = vperm.xlu2 %7994, %v10037_v53  }
 0x3df   : > { %14240 = vst [vmem:[#allocation92_spill] sm:$0xff] %v10412_v59  ;;  %v10430_v57 = vpop.f32.mrf.mxu2 }
 0x3e0   : > { %14241 = vst [vmem:[#allocation93_spill] sm:$0xff] %v10416_v24  ;;  %8032 = vset.pattern.permute.xlu0 %v14146_v12  ;;  %v2917_v32 = vpop.f32.mrf.mxu1  ;;  %v2891_v52 = vpop.f32.mrf.mxu0 }
 0x3e1   : > { %v10402_v44 = vld [vmem:[#allocation1 + $0x6] ss:$9 sm:$0xff]  ;;  %5516 = vperm.xlu0 %8032, %v10374_v58   ;;  %v10428_v59 = vpop.permute.xlu1 %7325 }
 0x3e2   : > { %14238 = vst [vmem:[#allocation90_spill] sm:$0xff] %v10402_v44  ;;  %v10422_v44 = vpop.f32.mrf.mxu3 }
 0x3e3   : > { %7202 = vst [vmem:[#allocation1] sm:$0xff] %v14164_v51  ;;  %8002 = vset.pattern.permute.xlu1 %v14147_v23 }
 0x3e4   : > { %14243 = vst [vmem:[#allocation95_spill] sm:$0xff] %v10428_v59  ;;  %6238 = vperm.xlu1 %8002, %v10068_v49  }
 0x3e6   : > { %7995 = vset.pattern.permute.xlu2 %v14148_v42 }
 0x3e7   : > { %v10433_v24 = vpop.permute.xlu2 %5853  ;;  %v10437_v7 = vpop.permute.xlu0 %6968  ;;  %6603 = vperm.xlu2 %7995, %v10037_v53  }
 0x3e8   : > { %14244 = vst [vmem:[#allocation96_spill] sm:$0xff] %v10433_v24  ;;  %v2921_v25 = vpop.f32.mrf.mxu1  ;;  %v10450_v2 = vpop.f32.mrf.mxu2 }
 0x3e9   : > { %14245 = vst [vmem:[#allocation97_spill] sm:$0xff] %v10437_v7  ;;  %8033 = vset.pattern.permute.xlu0 %v14145_v34  ;;  %v2922_v7 = vadd.f32 %v2921_v25, %v2891_v52 }
 0x3ea   : > { %v10424_v48 = vld [vmem:[#allocation1 + $0x6] ss:$9 sm:$0xff]  ;;  %5885 = vperm.xlu0 %8033, %v10374_v58   ;;  %v10445_v59 = vpop.f32.mrf.mxu3  ;;  %v10447_v24 = vpop.permute.xlu1 %4750 }
 0x3eb   : > { %14242 = vst [vmem:[#allocation94_spill] sm:$0xff] %v10424_v48 }
 0x3ec   : > { %7556 = vst [vmem:[#allocation1] sm:$0xff] %v14170_v41  ;;  %8003 = vset.pattern.permute.xlu1 %v14148_v42 }
 0x3ed   : > { %14247 = vst [vmem:[#allocation99_spill] sm:$0xff] %v10447_v24  ;;  %6607 = vperm.xlu1 %8003, %v10068_v49  }
 0x3ef   : > { %7996 = vset.pattern.permute.xlu2 %v14151_v55 }
 0x3f0   : > { %v10456_v13 = vpop.permute.xlu0 %7337  ;;  %6972 = vperm.xlu2 %7996, %v10037_v53  }
 0x3f1   : > { %14249 = vst [vmem:[#allocation101_spill] sm:$0xff] %v10456_v13 }
 0x3f2   : > { %8034 = vset.pattern.permute.xlu0 %v14147_v23  ;;  %v10466_v25 = vpop.f32.mrf.mxu3 }
 0x3f3   : > { %v10440_v48 = vld [vmem:[#allocation1 + $0x7] ss:$9 sm:$0xff]  ;;  %6254 = vperm.xlu0 %8034, %v10374_v58   ;;  %v10464_v24 = vpop.permute.xlu1 %5119 }
 0x3f4   : > { %14246 = vst [vmem:[#allocation98_spill] sm:$0xff] %v10440_v48  ;;  %v10454_v48 = vpop.permute.xlu2 %6222 }
 0x3f5   : > { %7559 = vst [vmem:[#allocation1] sm:$0xff] %v9059_v40  ;;  %8004 = vset.pattern.permute.xlu1 %v14151_v55 }
 0x3f6   : > { %14248 = vst [vmem:[#allocation100_spill] sm:$0xff] %v10454_v48  ;;  %6976 = vperm.xlu1 %8004, %v10068_v49   ;;  %v10476_v48 = vpop.f32.mrf.mxu2 }
 0x3f7   : > { %14251 = vst [vmem:[#allocation103_spill] sm:$0xff] %v10464_v24 }
 0x3f8   : > { %7997 = vset.pattern.permute.xlu2 %v14177_v0 }
 0x3f9   : > { %v10471_v52 = vpop.permute.xlu0 %4770  ;;  %7341 = vperm.xlu2 %7997, %v10037_v53  }
 0x3fa   : > { %14252 = vst [vmem:[#allocation104_spill] sm:$0xff] %v10471_v52 }
 0x3fb   : > { %8035 = vset.pattern.permute.xlu0 %v14148_v42 }
 0x3fc   : > { %v10458_v46 = vld [vmem:[#allocation1 + $0x7] ss:$9 sm:$0xff]  ;;  %v10474_v13 = vpop.permute.xlu2 %6591  ;;  %6623 = vperm.xlu0 %8035, %v10374_v58   ;;  %v10480_v24 = vpop.permute.xlu1 %5488 }
 0x3fd   : > { %14250 = vst [vmem:[#allocation102_spill] sm:$0xff] %v10458_v46  ;;  %v10482_v46 = vpop.f32.mrf.mxu3 }
 0x3fe   : > { %7561 = vst [vmem:[#allocation1] sm:$0xff] %v9104_v35  ;;  %8005 = vset.pattern.permute.xlu1 %v14177_v0  ;;  %v2945_v17 = vpop.f32.mrf.mxu2 }
 0x3ff   : > { %14253 = vst [vmem:[#allocation105_spill] sm:$0xff] %v10474_v13  ;;  %7345 = vperm.xlu1 %8005, %v10068_v49   ;;  %v2918_v13 = vadd.f32 %v2917_v32, %v2883_v60 }
 0x400   : > { %14254 = vst [vmem:[#allocation106_spill] sm:$0xff] %v10480_v24  ;;  %v2620_v24 = vadd.f32 %v10344_v43, %v10249_v22 }
 0x401   : > { %8014 = vset.pattern.permute.xlu2 %v14152_v28  ;;  %v2946_v56 = vadd.f32 %v2945_v17, %v2918_v13  ;;  %v3004_v17 = vpop.f32.mrf.mxu0 }
 0x402   : > { %v10487_v52 = vpop.permute.xlu0 %5135  ;;  %4775 = vperm.xlu2 %8014, %v10228_v27   ;;  %v10499_v49 = vadd.f32 %v10351_v36, %v2620_v24  ;;  %v3030_v36 = vpop.f32.mrf.mxu1 }
 0x403   : > { %14255 = vst [vmem:[#allocation107_spill] sm:$0xff] %v10487_v52 }
 0x404   : > { %v10490_v53 = vpop.permute.xlu2 %6960  ;;  %8036 = vset.pattern.permute.xlu0 %v14151_v55 }
 0x405   : > { %14256 = vst [vmem:[#allocation108_spill] sm:$0xff] %v10490_v53  ;;  %6992 = vperm.xlu0 %8036, %v10374_v58   ;;  %v10496_v9 = vpop.permute.xlu1 %5857  ;;  %v2974_v5 = vpop.f32.mrf.mxu3  ;;  %v2719_v53 = vadd.f32 %v10422_v44, %v10407_v47  ;;  %v8194_v44 = vld [vmem:[%s13963_s10] ss:$0 sm:$0xff] }
 0x406   : > { %14257 = vst [vmem:[#allocation109_spill] sm:$0xff] %v10496_v9  ;;  %v2975_v32 = vadd.f32 %v2974_v5, %v2946_v56 }
 0x407   : > { %8022 = vset.pattern.permute.xlu1 %v14152_v28 }
 0x408   : > { %4780 = vperm.xlu1 %8022, %v10499_v49   ;;  %v3005_v13 = vadd.f32 %v3004_v17, %v2975_v32  ;;  %v2950_v32 = vpop.f32.mrf.mxu2 }
 0x409   : > { %v2951_v17 = vadd.f32 %v2950_v32, %v2922_v7 }
 0x40a   : > { %8015 = vset.pattern.permute.xlu2 %v14143_v20  ;;  %v10514_v24 = vadd.f32 %v3030_v36, %v3005_v13 }
 0x40b   : > { %v10504_v60 = vpop.permute.xlu0 %5504  ;;  %5139 = vperm.xlu2 %8015, %v10228_v27  }
 0x40c   : > { %14258 = vst [vmem:[#allocation110_spill] sm:$0xff] %v10504_v60  ;;  %v10507_v22 = vpop.permute.xlu2 %7329 }
 0x40d   : > { %14259 = vst [vmem:[#allocation111_spill] sm:$0xff] %v10507_v22  ;;  %8037 = vset.pattern.permute.xlu0 %v14177_v0 }
 0x40e   : > { %7361 = vperm.xlu0 %8037, %v10374_v58   ;;  %v10511_v43 = vpop.permute.xlu1 %6226 }
 0x40f   : > { %14260 = vst [vmem:[#allocation112_spill] sm:$0xff] %v10511_v43 }
 0x410   : > { %8023 = vset.pattern.permute.xlu1 %v14143_v20  ;;  %v3066_v7 = vpop.f32.mrf.mxu2 }
 0x411   : > { %5143 = vperm.xlu1 %8023, %v10499_v49  }
 0x413   : > { %8016 = vset.pattern.permute.xlu2 %v14146_v12 }
 0x414   : > { %v10518_v5 = vpop.permute.xlu0 %5873  ;;  %5508 = vperm.xlu2 %8016, %v10228_v27   ;;  %v10521_v56 = vpop.permute.xlu2 %4760 }
 0x415   : > { %14261 = vst [vmem:[#allocation113_spill] sm:$0xff] %v10518_v5  ;;  %v2980_v5 = vpop.f32.mrf.mxu3 }
 0x416   : > { %14262 = vst [vmem:[#allocation114_spill] sm:$0xff] %v10521_v56  ;;  %8054 = vset.pattern.permute.xlu0 %v14152_v28  ;;  %v2981_v60 = vadd.f32 %v2980_v5, %v2951_v17  ;;  %v3008_v17 = vpop.f32.mrf.mxu0  ;;  %v3034_v56 = vpop.f32.mrf.mxu1 }
 0x417   : > { %4832 = vperm.xlu0 %8054, %v10514_v24   ;;  %v10525_v58 = vpop.permute.xlu1 %6595 }
 0x418   : > { %14263 = vst [vmem:[#allocation115_spill] sm:$0xff] %v10525_v58  ;;  %v3074_v22 = vpop.f32.mrf.mxu2 }
 0x419   : > { %8024 = vset.pattern.permute.xlu1 %v14146_v12 }
 0x41a   : > { %5512 = vperm.xlu1 %8024, %v10499_v49  }
 0x41c   : > { %8017 = vset.pattern.permute.xlu2 %v14145_v34 }
 0x41d   : > { %v10530_v13 = vpop.permute.xlu0 %6242  ;;  %5877 = vperm.xlu2 %8017, %v10228_v27   ;;  %v10533_v36 = vpop.permute.xlu2 %5127 }
 0x41e   : > { %14264 = vst [vmem:[#allocation116_spill] sm:$0xff] %v10530_v13 }
 0x41f   : > { %14265 = vst [vmem:[#allocation117_spill] sm:$0xff] %v10533_v36  ;;  %8055 = vset.pattern.permute.xlu0 %v14143_v20  ;;  %v3100_v36 = vpop.f32.mrf.mxu3 }
 0x420   : > { %5191 = vperm.xlu0 %8055, %v10514_v24   ;;  %v10537_v52 = vpop.permute.xlu1 %6964  ;;  %v3101_v5 = vadd.f32 %v3100_v36, %v3066_v7  ;;  %v3157_v7 = vpop.f32.mrf.mxu1 }
 0x421   : > { %14266 = vst [vmem:[#allocation118_spill] sm:$0xff] %v10537_v52  ;;  %v3009_v52 = vadd.f32 %v3008_v17, %v2981_v60 }
 0x422   : > { %8025 = vset.pattern.permute.xlu1 %v14145_v34 }
 0x423   : > { %5881 = vperm.xlu1 %8025, %v10499_v49   ;;  %v10551_v43 = vadd.f32 %v3034_v56, %v3009_v52  ;;  %v3128_v52 = vpop.f32.mrf.mxu0 }
 0x424   : > { %v3129_v60 = vadd.f32 %v3128_v52, %v3101_v5 }
 0x425   : > { %8018 = vset.pattern.permute.xlu2 %v14147_v23 }
 0x426   : > { %v10542_v32 = vpop.permute.xlu0 %6611  ;;  %6246 = vperm.xlu2 %8018, %v10228_v27   ;;  %v10545_v13 = vpop.permute.xlu2 %5496  ;;  %v3158_v17 = vadd.f32 %v3157_v7, %v3129_v60  ;;  %v8193_v7 = vld [vmem:[%s13962_s9] ss:$0 sm:$0xff] }
 0x427   : > { %14267 = vst [vmem:[#allocation119_spill] sm:$0xff] %v10542_v32  ;;  %v3104_v36 = vpop.f32.mrf.mxu3  ;;  %v4414_v47 = vmul.f32 %v8193_v7, %v10011_v50 }
 0x428   : > { %14268 = vst [vmem:[#allocation120_spill] sm:$0xff] %v10545_v13  ;;  %8056 = vset.pattern.permute.xlu0 %v14146_v12 }
 0x429   : > { %5560 = vperm.xlu0 %8056, %v10514_v24   ;;  %v10549_v58 = vpop.permute.xlu1 %7333  ;;  %v10601_v50 = vadd.f32 %v8194_v44, %v4414_v47  ;;  %v8197_v44 = vld [vmem:[%s13962_s9 + $0x2] ss:$0 sm:$0xff]  ;;  %v3105_v47 = vadd.f32 %v3104_v36, %v3074_v22 }
 0x42a   : > { %14269 = vst [vmem:[#allocation121_spill] sm:$0xff] %v10549_v58  ;;  %v3187_v58 = vpop.f32.mrf.mxu2  ;;  %v4416_v22 = vmul.f32 %v8197_v44, %v10097_v4 }
 0x42b   : > { %8026 = vset.pattern.permute.xlu1 %v14147_v23  ;;  %vm4470_vm5 = vcmp.ne.f32.partialorder %v10601_v50, %v10601_v50 }
 0x42c   : > { %6250 = vperm.xlu1 %8026, %v10499_v49  }
 0x42e   : > { %8019 = vset.pattern.permute.xlu2 %v14148_v42 }
 0x42f   : > { %v10556_v32 = vpop.permute.xlu0 %6980  ;;  %6615 = vperm.xlu2 %8019, %v10228_v27   ;;  %v10559_v13 = vpop.permute.xlu2 %5865 }
 0x430   : > { %14270 = vst [vmem:[#allocation122_spill] sm:$0xff] %v10556_v32  ;;  %v3213_v52 = vpop.f32.mrf.mxu3 }
 0x431   : > { %14271 = vst [vmem:[#allocation123_spill] sm:$0xff] %v10559_v13  ;;  %8057 = vset.pattern.permute.xlu0 %v14145_v34  ;;  %v3188_v13 = vadd.f32 %v3187_v58, %v3158_v17  ;;  %v2747_v58 = vadd.f32 %v10388_v45, %v2719_v53 }
 0x432   : > { %5929 = vperm.xlu0 %8057, %v10514_v24   ;;  %v10563_v56 = vpop.permute.xlu1 %4765 }
 0x433   : > { %14272 = vst [vmem:[#allocation124_spill] sm:$0xff] %v10563_v56  ;;  %v10576_v60 = vadd.f32 %v3213_v52, %v3188_v13  ;;  %v2776_v13 = vadd.f32 %v10397_v1, %v2747_v58  ;;  %v2723_v52 = vadd.f32 %v10445_v59, %v10430_v57  ;;  %v8195_v59 = vld [vmem:[%s13962_s9 + $0x1] ss:$0 sm:$0xff]  ;;  %v4633_v56 = vld [vmem:[%s13965_s12 + $0x3] sm:$0x1] }
 0x434   : > { %8027 = vset.pattern.permute.xlu1 %v14148_v42  ;;  %v10807_v29 = vmul.f32 %v4633_v56, %v9169_v19 }
 0x435   : > { %6619 = vperm.xlu1 %8027, %v10499_v49   ;;  %v2752_v1 = vadd.f32 %v10409_v3, %v2723_v52  ;;  %v2806_v57 = vadd.f32 %v10450_v2, %v2776_v13  ;;  %v8196_v3 = vld [vmem:[%s13963_s10 + $0x1] ss:$0 sm:$0xff]  ;;  %v4415_v2 = vmul.f32 %v8195_v59, %v9885_v18  ;;  %v3133_v52 = vpop.f32.mrf.mxu0  ;;  %v8199_v18 = vld [vmem:[%s13962_s9 + $0x3] ss:$0 sm:$0xff] }
 0x436   : > { %v3134_v36 = vadd.f32 %v3133_v52, %v3105_v47  ;;  %v3191_v47 = vpop.f32.mrf.mxu2  ;;  %14306 = vst [vmem:[#allocation150_spill] sm:$0xff] %v10807_v29 }
 0x437   : > { %8020 = vset.pattern.permute.xlu2 %v14151_v55  ;;  %v2782_v58 = vadd.f32 %v10418_v37, %v2752_v1  ;;  %v10637_v1 = vadd.f32 %v8196_v3, %v4415_v2 }
 0x438   : > { %v10568_v32 = vpop.permute.xlu0 %7349  ;;  %6984 = vperm.xlu2 %8020, %v10228_v27   ;;  %v10573_v5 = vpop.permute.xlu2 %6234 }
 0x439   : > { %14273 = vst [vmem:[#allocation125_spill] sm:$0xff] %v10568_v32  ;;  %v10614_v32 = vadd.f32 %v10466_v25, %v2806_v57  ;;  %v8198_v57 = vld [vmem:[%s13963_s10 + $0x2] ss:$0 sm:$0xff]  ;;  %v4487_v4 = vand.u32 2147483647, %v10637_v1  ;;  %vm4471_vm6 = vcmp.ne.f32.partialorder %v10637_v1, %v10637_v1 }
 0x43a   : > { %14274 = vst [vmem:[#allocation126_spill] sm:$0xff] %v10573_v5  ;;  %8058 = vset.pattern.permute.xlu0 %v14147_v23  ;;  %v10657_v2 = vadd.f32 %v8198_v57, %v4416_v22  ;;  %v8202_v57 = vld [vmem:[%s13963_s10 + $0x4] ss:$0 sm:$0xff] }
 0x43b   : > { %6298 = vperm.xlu0 %8058, %v10514_v24   ;;  %v10583_v17 = vpop.permute.xlu1 %5131 }
 0x43c   : > { %14275 = vst [vmem:[#allocation127_spill] sm:$0xff] %v10583_v17  ;;  %vm4472_vm8 = vcmp.ne.f32.partialorder %v10657_v2, %v10657_v2 }
 0x43d   : > { %8028 = vset.pattern.permute.xlu1 %v14151_v55 }
 0x43e   : > { %6988 = vperm.xlu1 %8028, %v10499_v49  }
 0x440   : > { %8021 = vset.pattern.permute.xlu2 %v14177_v0 }
 0x441   : > { %v10595_v45 = vpop.permute.xlu0 %4785  ;;  %7353 = vperm.xlu2 %8021, %v10228_v27   ;;  %v10598_v53 = vpop.permute.xlu2 %6603  ;;  %v4486_v27 = vand.u32 2147483647, %v10601_v50 }
 0x442   : > { %14276 = vst [vmem:[#allocation128_spill] sm:$0xff] %v10595_v45  ;;  %v10645_v45 = vld [vmem:[#allocation1 + $0x7] ss:$9 sm:$0xff] }
 0x443   : > { %14277 = vst [vmem:[#allocation129_spill] sm:$0xff] %v10598_v53  ;;  %8059 = vset.pattern.permute.xlu0 %v14148_v42  ;;  %v4494_v13 = vsub.f32 0.0, %v4486_v27 }
 0x444   : > { %6667 = vperm.xlu0 %8059, %v10514_v24   ;;  %v10609_v7 = vpop.permute.xlu1 %5500  ;;  %14282 = vst [vmem:[#allocation134_spill] sm:$0xff] %v10645_v45 }
 0x445   : > { %14278 = vst [vmem:[#allocation130_spill] sm:$0xff] %v10609_v7  ;;  %v4502_v59 = vmul.f32 1.442695, %v4494_v13  ;;  %v4630_v7 = vld [vmem:[%s13965_s12] sm:$0x1] }
 0x446   : > { %8029 = vset.pattern.permute.xlu1 %v14177_v0  ;;  %7563 = vst [vmem:[#allocation1] sm:$0xff] %v9169_v19 }
 0x447   : > { %7357 = vperm.xlu1 %8029, %v10499_v49   ;;  %v2810_v49 = vadd.f32 %v10476_v48, %v2782_v58  ;;  %v8200_v48 = vld [vmem:[%s13963_s10 + $0x3] ss:$0 sm:$0xff]  ;;  %v4417_v58 = vmul.f32 %v8199_v18, %v10028_v38  ;;  %8259 = vpow2.f32 %v4502_v59  ;;  %v8201_v38 = vld [vmem:[%s13962_s9 + $0x4] ss:$0 sm:$0xff]  ;;  %v4495_v18 = vsub.f32 0.0, %v4487_v4 }
 0x448   : > { %v4418_v22 = vmul.f32 %v8201_v38, %v9926_v8 }
 0x449   : > { %8038 = vset.pattern.permute.xlu2 %v14152_v28  ;;  %v10652_v3 = vadd.f32 %v10482_v46, %v2810_v49  ;;  %v10667_v13 = vadd.f32 %v8200_v48, %v4417_v58  ;;  %v8203_v48 = vld [vmem:[%s13962_s9 + $0x5] ss:$0 sm:$0xff] }
 0x44a   : > { %v10626_v37 = vpop.permute.xlu2 %6972  ;;  %4790 = vperm.xlu2 %8038, %v10614_v32   ;;  %v10629_v25 = vpop.permute.xlu0 %5147 }
 0x44b   : > { %14279 = vst [vmem:[#allocation131_spill] sm:$0xff] %v10626_v37  ;;  %v4489_v59 = vand.u32 2147483647, %v10667_v13  ;;  %vm4473_vm10 = vcmp.ne.f32.partialorder %v10667_v13, %v10667_v13 }
 0x44c   : > { %14280 = vst [vmem:[#allocation132_spill] sm:$0xff] %v10629_v25  ;;  %8060 = vset.pattern.permute.xlu0 %v14151_v55  ;;  %v3163_v25 = vpop.f32.mrf.mxu1 }
 0x44d   : > { %7036 = vperm.xlu0 %8060, %v10514_v24   ;;  %v10643_v27 = vpop.permute.xlu1 %5869  ;;  %v3164_v44 = vadd.f32 %v3163_v25, %v3134_v36  ;;  %v4488_v25 = vand.u32 2147483647, %v10657_v2  ;;  %v3217_v36 = vpop.f32.mrf.mxu3  ;;  %v4497_v38 = vsub.f32 0.0, %v4489_v59 }
 0x44e   : > { %14281 = vst [vmem:[#allocation133_spill] sm:$0xff] %v10643_v27  ;;  %v10684_v4 = vpop.eup %8259 }
 0x44f   : > { %8046 = vset.pattern.permute.xlu1 %v14152_v28  ;;  %v3192_v49 = vadd.f32 %v3191_v47, %v3164_v44  ;;  %v10689_v47 = vadd.f32 %v8202_v57, %v4418_v22  ;;  %v4518_v8 = vadd.f32 1.0, %v10684_v4  ;;  %v4524_v5 = vand.u32 2147483647, %v10684_v4 }
 0x450   : > { %4795 = vperm.xlu1 %8046, %v10652_v3  }
 0x451   : > { %v10687_v44 = vadd.f32 %v3217_v36, %v3192_v49  ;;  %v4490_v22 = vand.u32 2147483647, %v10689_v47  ;;  %v4508_v36 = vmul.f32 1.442695, %v4497_v38  ;;  %vm10740_vm4 = vcmp.lt.f32.partialorder %v4524_v5, 0.0004427343 }
 0x452   : > { %8039 = vset.pattern.permute.xlu2 %v14143_v20  ;;  %vm4474_vm14 = vcmp.ne.f32.partialorder %v10689_v47, %v10689_v47 }
 0x453   : > { %v10664_v46 = vpop.permute.xlu2 %7341  ;;  %5151 = vperm.xlu2 %8039, %v10614_v32   ;;  %v10669_v52 = vpop.permute.xlu0 %5516  ;;  %v4498_v53 = vsub.f32 0.0, %v4490_v22 }
 0x454   : > { %14283 = vst [vmem:[#allocation135_spill] sm:$0xff] %v10664_v46  ;;  %v8204_v46 = vld [vmem:[%s13963_s10 + $0x5] ss:$0 sm:$0xff] }
 0x455   : > { %14284 = vst [vmem:[#allocation136_spill] sm:$0xff] %v10669_v52  ;;  %8061 = vset.pattern.permute.xlu0 %v14177_v0  ;;  %v4496_v52 = vsub.f32 0.0, %v4488_v25  ;;  %v3340_v22 = vpop.f32.mrf.mxu3 }
 0x456   : > { %7405 = vperm.xlu0 %8061, %v10514_v24   ;;  %v10682_v58 = vpop.permute.xlu1 %6238  ;;  %v4504_v24 = vmul.f32 1.442695, %v4495_v18  ;;  %v4419_v18 = vmul.f32 %v8203_v48, %v10125_v33  ;;  %v3249_v33 = vpop.f32.mrf.mxu0 }
 0x457   : > { %14285 = vst [vmem:[#allocation137_spill] sm:$0xff] %v10682_v58  ;;  %v4506_v49 = vmul.f32 1.442695, %v4496_v52  ;;  %v3283_v48 = vpop.f32.mrf.mxu1  ;;  %v4521_v52 = vmul.f32 -0.5, %v10684_v4 }
 0x458   : > { %8047 = vset.pattern.permute.xlu1 %v14143_v20  ;;  %8261 = vpow2.f32 %v4504_v24  ;;  %v10706_v59 = vadd.f32 %v8204_v46, %v4419_v18 }
 0x459   : > { %5155 = vperm.xlu1 %8047, %v10652_v3   ;;  %8263 = vlog2.f32 %v4518_v8 }
 0x45a   : > { %8265 = vpow2.f32 %v4506_v49  ;;  %v4491_v8 = vand.u32 2147483647, %v10706_v59  ;;  %vm4475_vm1 = vcmp.ne.f32.partialorder %v10706_v59, %v10706_v59 }
 0x45b   : > { %8040 = vset.pattern.permute.xlu2 %v14146_v12  ;;  %8267 = vpow2.f32 %v4508_v36 }
 0x45c   : > { %v10698_v25 = vpop.permute.xlu2 %4775  ;;  %5520 = vperm.xlu2 %8040, %v10614_v32   ;;  %v10702_v57 = vpop.permute.xlu0 %5885  ;;  %v4499_v58 = vsub.f32 0.0, %v4491_v8 }
 0x45d   : > { %14286 = vst [vmem:[#allocation138_spill] sm:$0xff] %v10698_v25  ;;  %v3311_v25 = vpop.f32.mrf.mxu2 }
 0x45e   : > { %8078 = vset.pattern.permute.xlu0 %v14152_v28  ;;  %14287 = vst [vmem:[#allocation139_spill] sm:$0xff] %v10702_v57  ;;  %v10710_v24 = vpop.eup %8261  ;;  %v3284_v57 = vadd.f32 %v3283_v48, %v3249_v33  ;;  %v4510_v33 = vmul.f32 1.442695, %v4498_v53  ;;  %v3257_v53 = vpop.f32.mrf.mxu0 }
 0x45f   : > { %4847 = vperm.xlu0 %8078, %v10687_v44   ;;  %v10708_v37 = vpop.permute.xlu1 %6607  ;;  %v8264_v18 = vpop.eup %8263  ;;  %v4527_v49 = vadd.f32 1.0, %v10710_v24 }
 0x460   : > { %14288 = vst [vmem:[#allocation140_spill] sm:$0xff] %v10708_v37  ;;  %v3312_v38 = vadd.f32 %v3311_v25, %v3284_v57  ;;  %v4522_v37 = vadd.f32 1.0, %v4521_v52  ;;  %v10723_v48 = vpop.eup %8265  ;;  %v8205_v25 = vld [vmem:[%s13962_s9 + $0x6] ss:$0 sm:$0xff]  ;;  %v3287_v27 = vpop.f32.mrf.mxu1 }
 0x461   : > { %8048 = vset.pattern.permute.xlu1 %v14146_v12  ;;  %v10731_v45 = vpop.eup %8267  ;;  %8269 = vlog2.f32 %v4527_v49  ;;  %v8206_v49 = vld [vmem:[%s13963_s10 + $0x6] ss:$0 sm:$0xff] }
 0x462   : > { %5524 = vperm.xlu1 %8048, %v10652_v3   ;;  %v3341_v36 = vadd.f32 %v3340_v22, %v3312_v38  ;;  %v4523_v38 = vmul.f32 %v10684_v4, %v4522_v37  ;;  %v4536_v22 = vadd.f32 1.0, %v10723_v48  ;;  %8271 = vpow2.f32 %v4510_v33 }
 0x463   : > { %v4420_v37 = vmul.f32 %v8205_v25, %v10058_v39  ;;  %v3288_v4 = vadd.f32 %v3287_v27, %v3257_v53  ;;  %v4545_v5 = vadd.f32 1.0, %v10731_v45  ;;  %v4631_v27 = vld [vmem:[%s13965_s12 + $0x1] sm:$0x1]  ;;  %v10764_v25 = vmul.f32 %v4630_v7, %v14170_v41 }
 0x464   : > { %8041 = vset.pattern.permute.xlu2 %v14145_v34  ;;  %8273 = vlog2.f32 %v4536_v22 }
 0x465   : > { %v10717_v46 = vpop.permute.xlu2 %5139  ;;  %5889 = vperm.xlu2 %8041, %v10614_v32   ;;  %v10729_v57 = vpop.permute.xlu0 %6254  ;;  %14295 = vst [vmem:[#allocation145_spill] sm:$0xff] %v10764_v25  ;;  %v10785_v25 = vmul.f32 %v4631_v27, %v9059_v40 }
 0x466   : > { %14289 = vst [vmem:[#allocation141_spill] sm:$0xff] %v10717_v46  ;;  %v4520_v46 = vmul.f32 0.6931472, %v8264_v18  ;;  %v3316_v8 = vpop.f32.mrf.mxu2  ;;  %v4512_v18 = vmul.f32 1.442695, %v4499_v58  ;;  %v4462_v58 = vmax.f32 %v10601_v50, 0.0 }
 0x467   : > { %8079 = vset.pattern.permute.xlu0 %v14143_v20  ;;  %14290 = vst [vmem:[#allocation142_spill] sm:$0xff] %v10729_v57  ;;  %v3317_v39 = vadd.f32 %v3316_v8, %v3288_v4  ;;  %v14296_v57 = vld [vmem:[#allocation3_spill] sm:$0xff]  ;;  %v8270_v8 = vpop.eup %8269 }
 0x468   : > { %5203 = vperm.xlu0 %8079, %v10687_v44   ;;  %v10733_v52 = vpop.permute.xlu1 %6976  ;;  %v4526_v33 = vsel %vm10740_vm4, %v4523_v38, %v4520_v46  ;;  %v3346_v46 = vpop.f32.mrf.mxu3  ;;  %v10767_v53 = vmul.f32 %v14296_v57, %v4630_v7  ;;  %v10772_v38 = vld [vmem:[%s13965_s12 + $0x2] sm:$0x1]  ;;  %8275 = vpow2.f32 %v4512_v18  ;;  %14298 = vst [vmem:[#allocation146_spill] sm:$0xff] %v10785_v25  ;;  %v4533_v18 = vand.u32 2147483647, %v10710_v24 }
 0x469   : > { %14291 = vst [vmem:[#allocation143_spill] sm:$0xff] %v10733_v52  ;;  %v4530_v52 = vmul.f32 -0.5, %v10710_v24  ;;  %v4590_v4 = vadd.f32 %v4526_v33, %v4462_v58  ;;  %v10777_v22 = vadd.f32 %v3346_v46, %v3317_v39  ;;  %v10782_v57 = vpop.eup %8271  ;;  %8277 = vlog2.f32 %v4545_v5  ;;  %v3370_v58 = vpop.f32.mrf.mxu0 }
 0x46a   : > { %8049 = vset.pattern.permute.xlu1 %v14145_v34  ;;  %14297 = vst [vmem:[#allocation3_spill] sm:$0xff] %v10767_v53  ;;  %v14299_v53 = vld [vmem:[#allocation4_spill] sm:$0xff]  ;;  %v10796_v39 = vmul.f32 %v10772_v38, %v9104_v35  ;;  %v4529_v46 = vmul.f32 0.6931472, %v8270_v8  ;;  %v3371_v25 = vadd.f32 %v3370_v58, %v3341_v36  ;;  %v4554_v63 = vadd.f32 1.0, %v10782_v57 }
 0x46b   : > { %5893 = vperm.xlu1 %8049, %v10652_v3   ;;  %v4531_v9 = vadd.f32 1.0, %v4530_v52  ;;  %v10788_v33 = vmul.f32 %v14299_v53, %v4631_v27  ;;  %v14303_v52 = vld [vmem:[#allocation5_spill] sm:$0xff]  ;;  %vm10835_vm7 = vcmp.lt.f32.partialorder %v4533_v18, 0.0004427343 }
 0x46c   : > { %14302 = vst [vmem:[#allocation148_spill] sm:$0xff] %v10796_v39  ;;  %v10800_v5 = vmul.f32 %v14303_v52, %v10772_v38  ;;  %v4548_v39 = vmul.f32 -0.5, %v10731_v45  ;;  %v8207_v36 = vld [vmem:[%s13962_s9 + $0x7] ss:$0 sm:$0xff]  ;;  %8279 = vlog2.f32 %v4554_v63  ;;  %v4465_v63 = vmax.f32 %v10667_v13, 0.0 }
 0x46d   : > { %8042 = vset.pattern.permute.xlu2 %v14147_v23  ;;  %14300 = vst [vmem:[#allocation4_spill] sm:$0xff] %v10788_v33  ;;  %v3396_v33 = vpop.f32.mrf.mxu1  ;;  %v4532_v62 = vmul.f32 %v10710_v24, %v4531_v9  ;;  %v4463_v9 = vmax.f32 %v10637_v1, 0.0  ;;  %v8208_v24 = vld [vmem:[%s13963_s10 + $0x7] ss:$0 sm:$0xff] }
 0x46e   : > { %v10756_v17 = vpop.permute.xlu2 %5508  ;;  %6258 = vperm.xlu2 %8042, %v10614_v32   ;;  %14304 = vst [vmem:[#allocation5_spill] sm:$0xff] %v10800_v5  ;;  %v8274_v5 = vpop.eup %8273  ;;  %v10820_v8 = vadd.f32 %v3396_v33, %v3371_v25  ;;  %v4549_v54 = vadd.f32 1.0, %v4548_v39 }
 0x46f   : > { %14294 = vst [vmem:[#allocation144_spill] sm:$0xff] %v10756_v17  ;;  %v10774_v17 = vadd.f32 %v8206_v49, %v4420_v37  ;;  %v4539_v49 = vmul.f32 -0.5, %v10723_v48  ;;  %v10792_v37 = vpop.permute.xlu0 %6623  ;;  %v10822_v58 = vpop.f32.mrf.mxu2  ;;  %v4535_v33 = vsel %vm10835_vm7, %v4532_v62, %v4529_v46  ;;  %v4551_v62 = vand.u32 2147483647, %v10731_v45 }
 0x470   : > { %8080 = vset.pattern.permute.xlu0 %v14146_v12  ;;  %14301 = vst [vmem:[#allocation147_spill] sm:$0xff] %v10792_v37  ;;  %v10810_v37 = vsel %vm4470_vm5, %v10601_v50, %v4590_v4  ;;  %v14307_v50 = vld [vmem:[#allocation14_spill] sm:$0xff]  ;;  %v10830_v31 = vpop.eup %8275  ;;  %v10851_v18 = vpop.f32.mrf.mxu3  ;;  %vm7773_vm7 = vcmask 1041408  }
 0x471   : > { %5572 = vperm.xlu0 %8080, %v10687_v44   ;;  %v10804_v53 = vpop.permute.xlu1 %7345  ;;  %v4492_v52 = vand.u32 2147483647, %v10774_v17  ;;  %v10825_v4 = vmul.f32 %v14307_v50, %v4630_v7  ;;  %v4540_v25 = vadd.f32 1.0, %v4539_v49  ;;  %v8278_v7 = vpop.eup %8277  ;;  %v14314_v49 = vld [vmem:[#allocation15_spill] sm:$0xff]  ;;  %v4563_v46 = vadd.f32 1.0, %v10830_v31 }
 0x472   : > { %14305 = vst [vmem:[#allocation149_spill] sm:$0xff] %v10804_v53  ;;  %v14309_v53 = vld [vmem:[#allocation6_spill] sm:$0xff]  ;;  %v4547_v39 = vmul.f32 0.6931472, %v8278_v7  ;;  %vm10889_vm13 = vcmp.lt.f32.partialorder %v4551_v62, 0.0004427343  ;;  %vm4476_vm4 = vcmp.ne.f32.partialorder %v10774_v17, %v10774_v17 }
 0x473   : > { %8050 = vset.pattern.permute.xlu1 %v14147_v23  ;;  %14308 = vst [vmem:[#allocation14_spill] sm:$0xff] %v10825_v4  ;;  %v10828_v29 = vmul.f32 %v14309_v53, %v4633_v56  ;;  %v10843_v56 = vmul.f32 %v10810_v37, %v14170_v41  ;;  %v4542_v53 = vand.u32 2147483647, %v10723_v48  ;;  %v4538_v4 = vmul.f32 0.6931472, %v8274_v5 }
 0x474   : > { %6262 = vperm.xlu1 %8050, %v10652_v3   ;;  %v4500_v61 = vsub.f32 0.0, %v4492_v52  ;;  %v4464_v41 = vmax.f32 %v10657_v2, 0.0  ;;  %v3374_v52 = vpop.f32.mrf.mxu0  ;;  %8281 = vlog2.f32 %v4563_v46 }
 0x475   : > { %14310 = vst [vmem:[#allocation6_spill] sm:$0xff] %v10828_v29  ;;  %v10854_v29 = vmul.f32 %v14314_v49, %v4631_v27  ;;  %v4541_v27 = vmul.f32 %v10723_v48, %v4540_v25  ;;  %v4591_v49 = vadd.f32 %v4535_v33, %v4463_v9  ;;  %vm10870_vm9 = vcmp.lt.f32.partialorder %v4542_v53, 0.0004427343  ;;  %v10887_v53 = vld [vmem:[%s13964_s11] sm:$0xff]  ;;  %v3400_v5 = vpop.f32.mrf.mxu1 }
 0x476   : > { %8043 = vset.pattern.permute.xlu2 %v14148_v42  ;;  %v4550_v25 = vmul.f32 %v10731_v45, %v4549_v54  ;;  %v4514_v9 = vmul.f32 1.442695, %v4500_v61  ;;  %v8280_v61 = vpop.eup %8279 }
 0x477   : > { %v10848_v50 = vpop.permute.xlu2 %5877  ;;  %6627 = vperm.xlu2 %8043, %v10614_v32   ;;  %14315 = vst [vmem:[#allocation15_spill] sm:$0xff] %v10854_v29  ;;  %v4544_v48 = vsel %vm10870_vm9, %v4541_v27, %v4538_v4  ;;  %v10895_v4 = vpop.permute.xlu0 %6992  ;;  %vm7791_vm9 = vcmask 1043456  }
 0x478   : > { %14313 = vst [vmem:[#allocation151_spill] sm:$0xff] %v10848_v50  ;;  %v4421_v50 = vmul.f32 %v8207_v36, %v9963_v15  ;;  %v4557_v15 = vmul.f32 -0.5, %v10782_v57  ;;  %v3375_v36 = vadd.f32 %v3374_v52, %v10777_v22  ;;  %v4553_v45 = vsel %vm10889_vm13, %v4550_v25, %v4547_v39  ;;  %v3470_v25 = vpop.f32.mrf.mxu3 }
 0x479   : > { %8081 = vset.pattern.permute.xlu0 %v14145_v34  ;;  %14321 = vst [vmem:[#allocation153_spill] sm:$0xff] %v10895_v4  ;;  %v4592_v46 = vadd.f32 %v4544_v48, %v4464_v41  ;;  %v14322_v39 = vperm.slane %v10810_v37, 0  ;;  %v4560_v22 = vand.u32 2147483647, %v10782_v57  ;;  %v4566_v52 = vmul.f32 -0.5, %v10830_v31 }
 0x47a   : > { %5941 = vperm.xlu0 %8081, %v10687_v44   ;;  %v10882_v33 = vpop.permute.xlu1 %4780  ;;  %v10893_v29 = vadd.f32 %v8208_v24, %v4421_v50  ;;  %v10897_v54 = vadd.f32 %v3400_v5, %v3375_v36  ;;  %v10909_v50 = vsel %vm4471_vm6, %v10637_v1, %v4591_v49  ;;  %v4558_v24 = vadd.f32 1.0, %v4557_v15  ;;  %v3440_v36 = vpop.f32.mrf.mxu2 }
 0x47b   : > { %14318 = vst [vmem:[#allocation152_spill] sm:$0xff] %v10882_v33  ;;  %v4646_v5 = vmul.f32 %v14322_v39, %v10887_v53  ;;  %8283 = vpow2.f32 %v4514_v9  ;;  %v10921_v1 = vadd.f32 %v3470_v25, %v3440_v36  ;;  %v4593_v41 = vadd.f32 %v4553_v45, %v4465_v63  ;;  %v8282_v63 = vpop.eup %8281  ;;  %v14325_v25 = vld [vmem:[#allocation17_spill] sm:$0xff] }
 0x47c   : > { %8051 = vset.pattern.permute.xlu1 %v14148_v42  ;;  %v4556_v49 = vmul.f32 0.6931472, %v8280_v61  ;;  %v4493_v15 = vand.u32 2147483647, %v10893_v29  ;;  %v10928_v39 = vmul.f32 %v10909_v50, %v9059_v40  ;;  %v4466_v61 = vmax.f32 %v10689_v47, 0.0 }
 0x47d   : > { %6631 = vperm.xlu1 %8051, %v10652_v3   ;;  %v4559_v45 = vmul.f32 %v10782_v57, %v4558_v24  ;;  %v4662_v36 = vmul.f32 1.442695, %v4646_v5  ;;  %v10938_v48 = vmul.f32 %v14325_v25, %v10772_v38  ;;  %v10944_v40 = vsel %vm4472_vm8, %v10657_v2, %v4592_v46 }
 0x47e   : > { %14324 = vst [vmem:[#allocation155_spill] sm:$0xff] %v10928_v39  ;;  %vm10948_vm15 = vcmp.lt.f32.partialorder %v4560_v22, 0.0004427343  ;;  %v4567_v7 = vadd.f32 1.0, %v4566_v52  ;;  %v10956_v38 = vsel %vm4473_vm10, %v10667_v13, %v4593_v41  ;;  %v4569_v2 = vand.u32 2147483647, %v10830_v31 }
 0x47f   : > { %8044 = vset.pattern.permute.xlu2 %v14151_v55  ;;  %14326 = vst [vmem:[#allocation17_spill] sm:$0xff] %v10938_v48  ;;  %v4562_v57 = vsel %vm10948_vm15, %v4559_v45, %v4556_v49  ;;  %v4501_v46 = vsub.f32 0.0, %v4493_v15  ;;  %v4467_v22 = vmax.f32 %v10706_v59, 0.0  ;;  %v4565_v25 = vmul.f32 0.6931472, %v8282_v63 }
 0x480   : > { %v10918_v27 = vpop.permute.xlu2 %6246  ;;  %6996 = vperm.xlu2 %8044, %v10614_v32   ;;  %v10970_v13 = vmul.f32 %v10944_v40, %v9104_v35  ;;  %v10975_v15 = vpop.permute.xlu0 %7361  ;;  %v10980_v63 = vmul.f32 %v10956_v38, %v9169_v19  ;;  %v4594_v45 = vadd.f32 %v4562_v57, %v4466_v61  ;;  %v4568_v35 = vmul.f32 %v10830_v31, %v4567_v7 }
 0x481   : > { %14323 = vst [vmem:[#allocation154_spill] sm:$0xff] %v10918_v27  ;;  %v10963_v5 = vpop.eup %8283  ;;  %vm10988_vm2 = vcmp.lt.f32.partialorder %v4569_v2, 0.0004427343  ;;  %v4516_v19 = vmul.f32 1.442695, %v4501_v46  ;;  %8285 = vpow2.f32 %v4662_v36  ;;  %v14017_v2 = vperm.slane %v10810_v37, 1 }
 0x482   : > { %8082 = vset.pattern.permute.xlu0 %v14147_v23  ;;  %14330 = vst [vmem:[#allocation157_spill] sm:$0xff] %v10970_v13  ;;  %v4575_v41 = vmul.f32 -0.5, %v10963_v5  ;;  %v4571_v31 = vsel %vm10988_vm2, %v4568_v35, %v4565_v25  ;;  %v4572_v36 = vadd.f32 1.0, %v10963_v5  ;;  %v2851_v25 = vld [vmem:[%s13960_s7 + $0x68] sm:$0xff]  ;;  %v14350_v27 = vperm.slane %v10810_v37, 6 }
 0x483   : > { %6310 = vperm.xlu0 %8082, %v10687_v44   ;;  %v10961_v24 = vpop.permute.xlu1 %5143  ;;  %14331 = vst [vmem:[#allocation158_spill] sm:$0xff] %v10975_v15  ;;  %v4595_v35 = vadd.f32 %v4571_v31, %v4467_v22  ;;  %8287 = vpow2.f32 %v4516_v19  ;;  %v5022_v19 = vmul.f32 %v14017_v2, %v10887_v53  ;;  %v3956_v31 = vsel %vm1349_vm12, %v2851_v25, 0  ;;  %v3494_v2 = vpop.f32.mrf.mxu0 }
 0x484   : > { %14329 = vst [vmem:[#allocation156_spill] sm:$0xff] %v10961_v24  ;;  %v4576_v7 = vadd.f32 1.0, %v4575_v41  ;;  %v4578_v41 = vand.u32 2147483647, %v10963_v5  ;;  %8289 = vlog2.f32 %v4572_v36  ;;  %v11040_v52 = vand.u32 4294901760, %v3956_v31  ;;  %v3523_v15 = vpop.f32.mrf.mxu1 }
 0x485   : > { %8052 = vset.pattern.permute.xlu1 %v14151_v55  ;;  %14332 = vst [vmem:[#allocation159_spill] sm:$0xff] %v10980_v63  ;;  %v11046_v49 = vsel %vm4475_vm1, %v10706_v59, %v4595_v35  ;;  %v3467_v59 = vadd.f32 %v10851_v18, %v10822_v58  ;;  %vm4477_vm6 = vcmp.ne.f32.partialorder %v10893_v29, %v10893_v29  ;;  %vm7782_vm8 = vcmask 1042432  }
 0x486   : > { %7000 = vperm.xlu1 %8052, %v10652_v3   ;;  %14338 = vst [vmem:[#allocation163_spill] sm:$0xff] %v11046_v49  ;;  %v11049_v61 = vmul.f32 %v10963_v5, %v4576_v7  ;;  %v3984_v7 = vsub.f32 %v3956_v31, %v11040_v52  ;;  %4018 = vmatmul.f32.gmra.mxu1 %v11040_v52  ;;  %v14342_v5 = vperm.slane %v10810_v37, 2  ;;  %vm11086_vm3 = vcmp.lt.f32.partialorder %v4578_v41, 0.0004427343 }
 0x487   : > { %v11035_v9 = vpop.eup %8285  ;;  %v11075_v58 = vmul.f32 %v11046_v49, %v9280_v26  ;;  %v14347_v41 = vperm.slane %v10810_v37, 4  ;;  %v6867_v49 = vmul.f32 %v14350_v27, %v10887_v53  ;;  %vm7800_vm10 = vcmask 1044480  }
 0x488   : > { %8045 = vset.pattern.permute.xlu2 %v14177_v0  ;;  %v3985_v31 = vand.u32 4294901760, %v3984_v7  ;;  %4047 = vmatmul.f32.gmra.mxu2 %v3984_v7  ;;  %v5391_v46 = vmul.f32 %v14342_v5, %v10887_v53  ;;  %vm7809_vm13 = vcmask 1045504  }
 0x489   : > { %v10994_v57 = vpop.permute.xlu2 %6615  ;;  %7365 = vperm.xlu2 %8045, %v10614_v32   ;;  %v11011_v32 = vsel %vm4474_vm14, %v10689_v47, %v4594_v45  ;;  %v11052_v36 = vpop.permute.xlu0 %4832  ;;  %14341 = vst [vmem:[#allocation166_spill] sm:$0xff] %v11075_v58  ;;  %v6129_v33 = vmul.f32 %v14347_v41, %v10887_v53 }
 0x48a   : > { %14335 = vst [vmem:[#allocation160_spill] sm:$0xff] %v10994_v57  ;;  %v11028_v22 = vmul.f32 %v11011_v32, %v9241_v21  ;;  %v11066_v35 = vpop.eup %8287  ;;  %v3986_v24 = vsub.f32 %v3984_v7, %v3985_v31  ;;  %4077 = vmatmul.f32.gmra.mxu3 %v3985_v31  ;;  %v5407_v41 = vmul.f32 1.442695, %v5391_v46 }
 0x48b   : > { %8083 = vset.pattern.permute.xlu0 %v14148_v42  ;;  %14339 = vst [vmem:[#allocation164_spill] sm:$0xff] %v11052_v36  ;;  %v8290_v4 = vpop.eup %8289  ;;  %v4581_v18 = vadd.f32 1.0, %v11066_v35  ;;  %v4584_v47 = vmul.f32 -0.5, %v11066_v35 }
 0x48c   : > { %6679 = vperm.xlu0 %8083, %v10687_v44   ;;  %v11021_v45 = vpop.permute.xlu1 %5512  ;;  %14337 = vst [vmem:[#allocation162_spill] sm:$0xff] %v11028_v22  ;;  %v3987_v7 = vand.u32 4294901760, %v3986_v24  ;;  %v11113_v48 = vmul.f32 0.6931472, %v8290_v4  ;;  %v3553_v4 = vpop.f32.mrf.mxu2  ;;  %v6145_v24 = vmul.f32 1.442695, %v6129_v33 }
 0x48d   : > { %14336 = vst [vmem:[#allocation161_spill] sm:$0xff] %v11021_v45  ;;  %8291 = vlog2.f32 %v4581_v18  ;;  %v11142_v18 = vld [vmem:[%s13964_s11 + $0x8] sm:$0xff]  ;;  %v14025_v33 = vperm.slane %v10909_v50, 3  ;;  %v14359_v45 = vperm.slane %v10810_v37, 1  ;;  %v14408_v22 = vmax.f32 %v10893_v29, 0.0 }
 0x48e   : > { %8053 = vset.pattern.permute.xlu1 %v14177_v0  ;;  %3988 = vmatmul.f32.gmra.mxu0 %v3987_v7  ;;  %v4585_v7 = vadd.f32 1.0, %v4584_v47  ;;  %v4580_v47 = vsel %vm11086_vm3, %v11049_v61, %v11113_v48 }
 0x48f   : > { %7369 = vperm.xlu1 %8053, %v10652_v3   ;;  %v14345_v3 = vperm.slane %v10810_v37, 3  ;;  %4127 = vmatmul.f32.vlgmr.msra.gmra.mxu1 %v10113_v6 }
 0x491   : > { %8062 = vset.pattern.permute.xlu2 %v14152_v28  ;;  %v5760_v25 = vmul.f32 %v14345_v3, %v10887_v53  ;;  %v14348_v3 = vperm.slane %v10810_v37, 5 }
 0x492   : > { %v11058_v62 = vpop.permute.xlu2 %6984  ;;  %4837 = vperm.xlu2 %8062, %v10551_v43   ;;  %v11126_v63 = vpop.permute.xlu0 %5191 }
 0x493   : > { %14340 = vst [vmem:[#allocation165_spill] sm:$0xff] %v11058_v62  ;;  %v3495_v62 = vadd.f32 %v3494_v2, %v3467_v59  ;;  %v11105_v2 = vld [vmem:[%s13964_s11 + $0x18] sm:$0xff]  ;;  %v5038_v59 = vmul.f32 1.442695, %v5022_v19  ;;  %v6498_v31 = vmul.f32 %v14348_v3, %v10887_v53  ;;  %v5776_v5 = vmul.f32 1.442695, %v5760_v25  ;;  %v11168_v48 = vpop.eup %8291 }
 0x494   : > { %8084 = vset.pattern.permute.xlu0 %v14151_v55  ;;  %14351 = vst [vmem:[#allocation169_spill] sm:$0xff] %v11126_v63  ;;  %v14353_v19 = vperm.slane %v10810_v37, 7 }
 0x495   : > { %7048 = vperm.xlu0 %8084, %v10687_v44   ;;  %v11096_v57 = vpop.permute.xlu1 %5881  ;;  %v3524_v3 = vadd.f32 %v3523_v15, %v3495_v62  ;;  %8293 = vpow2.f32 %v5038_v59  ;;  %v6514_v62 = vmul.f32 1.442695, %v6498_v31  ;;  %v14354_v15 = vperm.slane %v10909_v50, 0 }
 0x496   : > { %14346 = vst [vmem:[#allocation167_spill] sm:$0xff] %v11096_v57  ;;  %v11111_v57 = vld [vmem:[#allocation1 + $0x7] ss:$9 sm:$0xff]  ;;  %v7236_v13 = vmul.f32 %v14353_v19, %v10887_v53  ;;  %8295 = vpow2.f32 %v5407_v41  ;;  %v6883_v53 = vmul.f32 1.442695, %v6867_v49  ;;  %v14355_v59 = vperm.slane %v10909_v50, 1  ;;  %v3579_v41 = vpop.f32.mrf.mxu3  ;;  %4101 = vmatmul.f32.vlgmr.msra.gmra.mxu0 %v10113_v6 }
 0x497   : > { %14349 = vst [vmem:[#allocation168_spill] sm:$0xff] %v11111_v57  ;;  %8070 = vset.pattern.permute.xlu1 %v14152_v28  ;;  %v14024_v57 = vperm.slane %v10909_v50, 2  ;;  %v4649_v25 = vmul.f32 %v14354_v15, %v11105_v2  ;;  %v3554_v19 = vadd.f32 %v3553_v4, %v3524_v3  ;;  %8297 = vpow2.f32 %v5776_v5  ;;  %4131 = vmatmul.f32.gmra.mxu1 %v11040_v52 }
 0x498   : > { %7565 = vst [vmem:[#allocation1] sm:$0xff] %v9241_v21  ;;  %4842 = vperm.xlu1 %8070, %v10576_v60   ;;  %v5025_v31 = vmul.f32 %v14355_v59, %v11105_v2  ;;  %8299 = vpow2.f32 %v6145_v24  ;;  %v14356_v49 = vperm.slane %v10810_v37, 0  ;;  %v5763_v4 = vmul.f32 %v14025_v33, %v11105_v2 }
 0x499   : > { %v5394_v15 = vmul.f32 %v14024_v57, %v11105_v2  ;;  %8301 = vpow2.f32 %v6514_v62  ;;  %v4668_v5 = vmul.f32 1.442695, %v4649_v25  ;;  %v5023_v24 = vmul.f32 %v14359_v45, %v11142_v18 }
 0x49a   : > { %8063 = vset.pattern.permute.xlu2 %v14143_v20  ;;  %v4647_v59 = vmul.f32 %v14356_v49, %v11142_v18  ;;  %8303 = vpow2.f32 %v6883_v53  ;;  %v5044_v61 = vmul.f32 1.442695, %v5025_v31  ;;  %v11178_v25 = vadd.f32 %v3579_v41, %v3554_v19 }
 0x49b   : > { %v11128_v27 = vpop.permute.xlu2 %7353  ;;  %5195 = vperm.xlu2 %8063, %v10551_v43   ;;  %v11175_v62 = vpop.eup %8293  ;;  %v5413_v49 = vmul.f32 1.442695, %v5394_v15  ;;  %v14360_v33 = vperm.slane %v10909_v50, 4  ;;  %v14361_v19 = vperm.slane %v10810_v37, 2  ;;  %v5040_v6 = vmul.f32 1.442695, %v5023_v24 }
 0x49c   : > { %14352 = vst [vmem:[#allocation170_spill] sm:$0xff] %v11128_v27  ;;  %v11184_v31 = vpop.eup %8295  ;;  %v4664_v45 = vmul.f32 1.442695, %v4647_v59 }
 0x49d   : > { %8085 = vset.pattern.permute.xlu0 %v14177_v0  ;;  %v6132_v57 = vmul.f32 %v14360_v33, %v11105_v2  ;;  %v5392_v15 = vmul.f32 %v14361_v19, %v11142_v18  ;;  %v11192_v41 = vpop.eup %8297  ;;  %v14362_v33 = vmax.f32 %v10774_v17, 0.0  ;;  %v11208_v19 = vld [vmem:[%s13964_s11 + $0x10] sm:$0xff] }
 0x49e   : > { %7417 = vperm.xlu0 %8085, %v10687_v44   ;;  %v7252_v44 = vmul.f32 1.442695, %v7236_v13  ;;  %v11160_v3 = vpop.permute.xlu1 %6250  ;;  %v5782_v13 = vmul.f32 1.442695, %v5763_v4  ;;  %v11210_v27 = vpop.eup %8299  ;;  %4105 = vmatmul.f32.gmra.mxu0 %v11040_v52 }
 0x49f   : > { %14357 = vst [vmem:[#allocation171_spill] sm:$0xff] %v11160_v3  ;;  %v11166_v46 = vld [vmem:[#allocation1 + $0x7] ss:$9 sm:$0xff]  ;;  %v11196_v3 = vadd.f32 %v4580_v47, %v14362_v33  ;;  %v11214_v47 = vpop.permute.xlu0 %5560  ;;  %v14369_v33 = vperm.slane %v10909_v50, 0  ;;  %v3529_v52 = vpop.f32.mrf.mxu1 }
 0x4a0   : > { %14358 = vst [vmem:[#allocation172_spill] sm:$0xff] %v11166_v46  ;;  %8071 = vset.pattern.permute.xlu1 %v14143_v20  ;;  %8305 = vpow2.f32 %v7252_v44  ;;  %v14364_v44 = vperm.slane %v10909_v50, 5  ;;  %v11225_v46 = vmul.f32 %v11066_v35, %v4585_v7 }
 0x4a1   : > { %7567 = vst [vmem:[#allocation1] sm:$0xff] %v9280_v26  ;;  %5199 = vperm.xlu1 %8071, %v10576_v60   ;;  %8307 = vpow2.f32 %v4668_v5  ;;  %v14366_v5 = vperm.slane %v10810_v37, 3  ;;  %v4648_v36 = vmul.f32 %v14369_v33, %v11208_v19 }
 0x4a2   : > { %v6501_v59 = vmul.f32 %v14364_v44, %v11105_v2  ;;  %14365 = vst [vmem:[#allocation174_spill] sm:$0xff] %v11214_v47  ;;  %8309 = vpow2.f32 %v5044_v61  ;;  %v11222_v44 = vpop.eup %8301  ;;  %v14367_v61 = vperm.slane %v10909_v50, 6 }
 0x4a3   : > { %8064 = vset.pattern.permute.xlu2 %v14146_v12  ;;  %v5761_v4 = vmul.f32 %v14366_v5, %v11142_v18  ;;  %8311 = vpow2.f32 %v5413_v49  ;;  %v11231_v24 = vpop.eup %8303  ;;  %v5409_v5 = vmul.f32 1.442695, %v5392_v15 }
 0x4a4   : > { %5564 = vperm.xlu2 %8064, %v10551_v43   ;;  %v11199_v53 = vpop.permute.xlu2 %4790  ;;  %v6870_v47 = vmul.f32 %v14367_v61, %v11105_v2  ;;  %14368 = vst [vmem:[#allocation175_spill] sm:$0xff] %v11231_v24  ;;  %8313 = vpow2.f32 %v4664_v45  ;;  %v6520_v39 = vmul.f32 1.442695, %v6501_v59  ;;  %v14373_v45 = vperm.slane %v10909_v50, 7  ;;  %v3499_v59 = vpop.f32.mrf.mxu0 }
 0x4a5   : > { %14363 = vst [vmem:[#allocation173_spill] sm:$0xff] %v11199_v53  ;;  %v6151_v53 = vmul.f32 1.442695, %v6132_v57  ;;  %8315 = vpow2.f32 %v5782_v13  ;;  %v14370_v57 = vperm.slane %v10810_v37, 4  ;;  %v5778_v63 = vmul.f32 1.442695, %v5761_v4 }
 0x4a6   : > { %8102 = vset.pattern.permute.xlu0 %v14152_v28  ;;  %v11241_v26 = vpop.eup %8305  ;;  %8317 = vpow2.f32 %v5040_v6  ;;  %v7239_v15 = vmul.f32 %v14373_v45, %v11105_v2  ;;  %v6889_v7 = vmul.f32 1.442695, %v6870_v47  ;;  %v11258_v6 = vld [vmem:[%s13964_s11 + $0x30] sm:$0xff]  ;;  %v3500_v2 = vadd.f32 %v3499_v59, %v10921_v1 }
 0x4a7   : > { %4862 = vperm.xlu0 %8102, %v11178_v25   ;;  %v6130_v49 = vmul.f32 %v14370_v57, %v11142_v18  ;;  %14371 = vst [vmem:[#allocation176_spill] sm:$0xff] %v11241_v26  ;;  %v11243_v61 = vpop.permute.xlu1 %6619  ;;  %v11249_v24 = vpop.eup %8307  ;;  %8319 = vpow2.f32 %v6151_v53  ;;  %v14374_v57 = vperm.slane %v10909_v50, 1  ;;  %v4666_v45 = vmul.f32 1.442695, %v4648_v36 }
 0x4a8   : > { %14372 = vst [vmem:[#allocation177_spill] sm:$0xff] %v11243_v61  ;;  %v11260_v4 = vpop.eup %8309  ;;  %8321 = vpow2.f32 %v5409_v5  ;;  %v14376_v53 = vperm.slane %v10810_v37, 5  ;;  %v14381_v36 = vperm.slane %v10909_v50, 2 }
 0x4a9   : > { %v5024_v26 = vmul.f32 %v14374_v57, %v11208_v19  ;;  %14375 = vst [vmem:[#allocation178_spill] sm:$0xff] %v11260_v4  ;;  %8072 = vset.pattern.permute.xlu1 %v14146_v12  ;;  %v11267_v13 = vpop.eup %8311  ;;  %v14378_v57 = vand.u32 2147483647, %v11066_v35  ;;  %8323 = vpow2.f32 %v6520_v39  ;;  %v6147_v1 = vmul.f32 1.442695, %v6130_v49  ;;  %v11305_v39 = vpop.permute.xlu0 %5929 }
 0x4aa   : > { %v6499_v47 = vmul.f32 %v14376_v53, %v11142_v18  ;;  %14377 = vst [vmem:[#allocation179_spill] sm:$0xff] %v11267_v13  ;;  %5568 = vperm.xlu1 %8072, %v10576_v60   ;;  %v5393_v5 = vmul.f32 %v14381_v36, %v11208_v19  ;;  %v11281_v59 = vpop.eup %8313  ;;  %8325 = vpow2.f32 %v5778_v63  ;;  %v7258_v53 = vmul.f32 1.442695, %v7239_v15 }
 0x4ab   : > { %vm11271_vm5 = vcmp.lt.f32.partialorder %v14378_v57, 0.0004427343  ;;  %v14383_v57 = vperm.slane %v10956_v38, 0  ;;  %v11291_v49 = vpop.eup %8315  ;;  %v11298_v36 = vsel %vm4476_vm4, %v10774_v17, %v11196_v3  ;;  %8327 = vpow2.f32 %v6889_v7  ;;  %14386 = vst [vmem:[#allocation183_spill] sm:$0xff] %v11305_v39 }
 0x4ac   : > { %8065 = vset.pattern.permute.xlu2 %v14145_v34  ;;  %14384 = vst [vmem:[#allocation181_spill] sm:$0xff] %v11291_v49  ;;  %v5042_v63 = vmul.f32 1.442695, %v5024_v26  ;;  %v11302_v15 = vpop.eup %8317  ;;  %v3530_v49 = vadd.f32 %v3529_v52, %v3500_v2  ;;  %8329 = vpow2.f32 %v4666_v45  ;;  %v6516_v13 = vmul.f32 1.442695, %v6499_v47 }
 0x4ad   : > { %5933 = vperm.xlu2 %8065, %v10551_v43   ;;  %v11284_v35 = vpop.permute.xlu2 %5151  ;;  %v4652_v61 = vmul.f32 %v14383_v57, %v11258_v6  ;;  %14385 = vst [vmem:[#allocation182_spill] sm:$0xff] %v11298_v36  ;;  %v11308_v17 = vpop.eup %8319  ;;  %8331 = vpow2.f32 %v6147_v1  ;;  %v14388_v26 = vperm.slane %v10810_v37, 6  ;;  %v4583_v57 = vmul.f32 0.6931472, %v11168_v48  ;;  %v11320_v47 = vld [vmem:[#allocation1 + $0x7] ss:$9 sm:$0xff] }
 0x4ae   : > { %14382 = vst [vmem:[#allocation180_spill] sm:$0xff] %v11284_v35  ;;  %v5411_v35 = vmul.f32 1.442695, %v5393_v5  ;;  %v11314_v4 = vpop.eup %8321  ;;  %8333 = vpow2.f32 %v7258_v53  ;;  %v14389_v2 = vperm.slane %v10956_v38, 1  ;;  %v14393_v5 = vperm.slane %v10909_v50, 3 }
 0x4af   : > { %8103 = vset.pattern.permute.xlu0 %v14143_v20  ;;  %14387 = vst [vmem:[#allocation184_spill] sm:$0xff] %v11308_v17  ;;  %v6868_v7 = vmul.f32 %v14388_v26, %v11142_v18  ;;  %v4674_v58 = vmul.f32 1.442695, %v4652_v61  ;;  %v11322_v52 = vpop.eup %8323  ;;  %8335 = vpow2.f32 %v5042_v63  ;;  %v14394_v48 = vperm.slane %v10810_v37, 7  ;;  %v11352_v61 = vld [vmem:[%s13964_s11 + $0x20] sm:$0xff] }
 0x4b0   : > { %5215 = vperm.xlu0 %8103, %v11178_v25   ;;  %v5028_v45 = vmul.f32 %v14389_v2, %v11258_v6  ;;  %14390 = vst [vmem:[#allocation185_spill] sm:$0xff] %v11320_v47  ;;  %v11324_v1 = vpop.permute.xlu1 %6988  ;;  %v5762_v26 = vmul.f32 %v14393_v5, %v11208_v19  ;;  %v11334_v2 = vpop.eup %8325  ;;  %v11338_v3 = vmul.f32 %v11298_v36, %v9318_v10  ;;  %8337 = vpow2.f32 %v6516_v13 }
 0x4b1   : > { %14391 = vst [vmem:[#allocation186_spill] sm:$0xff] %v11322_v52  ;;  %v7237_v53 = vmul.f32 %v14394_v48, %v11142_v18  ;;  %v11342_v47 = vpop.eup %8327  ;;  %v11346_v18 = vmul.f32 0.0, %v11035_v9  ;;  %8339 = vpow2.f32 %v5411_v35  ;;  %v6885_v48 = vmul.f32 1.442695, %v6868_v7  ;;  %v3557_v52 = vpop.f32.mrf.mxu2 }
 0x4b2   : > { %14392 = vst [vmem:[#allocation187_spill] sm:$0xff] %v11324_v1  ;;  %v3615_v1 = vpop.f32.mrf.mxu0  ;;  %8073 = vset.pattern.permute.xlu1 %v14145_v34  ;;  %v11354_v63 = vpop.eup %8329  ;;  %v4589_v13 = vsel %vm11271_vm5, %v11225_v46, %v4583_v57  ;;  %8341 = vpow2.f32 %v4674_v58  ;;  %v5050_v9 = vmul.f32 1.442695, %v5028_v45  ;;  %v14398_v35 = vperm.slane %v10909_v50, 4 }
 0x4b3   : > { %7569 = vst [vmem:[#allocation1] sm:$0xff] %v9318_v10  ;;  %5937 = vperm.xlu1 %8073, %v10576_v60   ;;  %v11364_v37 = vpop.eup %8331  ;;  %v3649_v46 = vpop.f32.mrf.mxu1  ;;  %v5780_v33 = vmul.f32 1.442695, %v5762_v26  ;;  %v7254_v57 = vmul.f32 1.442695, %v7237_v53  ;;  %v14401_v58 = vperm.slane %v10956_v38, 2  ;;  %8343 = vpow2.f32 %v6885_v48 }
 0x4b4   : > { %14395 = vst [vmem:[#allocation188_spill] sm:$0xff] %v11334_v2  ;;  %v6131_v7 = vmul.f32 %v14398_v35, %v11208_v19  ;;  %v11378_v35 = vadd.f32 %v3649_v46, %v3615_v1  ;;  %v14403_v36 = vperm.slane %v10944_v40, 0  ;;  %v14404_v26 = vperm.slane %v10909_v50, 5  ;;  %v11395_v17 = vpop.permute.xlu0 %6298 }
 0x4b5   : > { %14396 = vst [vmem:[#allocation189_spill] sm:$0xff] %v11338_v3  ;;  %8066 = vset.pattern.permute.xlu2 %v14147_v23  ;;  %v5397_v45 = vmul.f32 %v14401_v58, %v11258_v6  ;;  %v3558_v1 = vadd.f32 %v3557_v52, %v3530_v49  ;;  %8345 = vpow2.f32 %v5050_v9  ;;  %v4597_v2 = vadd.f32 %v4589_v13, %v14408_v22 }
 0x4b6   : > { %14397 = vst [vmem:[#allocation190_spill] sm:$0xff] %v11342_v47  ;;  %6302 = vperm.xlu2 %8066, %v10551_v43   ;;  %v11369_v5 = vpop.permute.xlu2 %5520  ;;  %v11375_v47 = vpop.eup %8333  ;;  %v6500_v53 = vmul.f32 %v14404_v26, %v11208_v19  ;;  %v6149_v26 = vmul.f32 1.442695, %v6131_v7  ;;  %8347 = vpow2.f32 %v5780_v33  ;;  %v14409_v49 = vperm.slane %v10956_v38, 3 }
 0x4b7   : > { %14399 = vst [vmem:[#allocation191_spill] sm:$0xff] %v11364_v37  ;;  %v11387_v58 = vpop.eup %8335  ;;  %8349 = vpow2.f32 %v7254_v57  ;;  %v14411_v39 = vperm.slane %v10944_v40, 1  ;;  %v14412_v22 = vperm.slane %v10843_v56, 0 }
 0x4b8   : > { %14400 = vst [vmem:[#allocation192_spill] sm:$0xff] %v11369_v5  ;;  %8104 = vset.pattern.permute.xlu0 %v14146_v12  ;;  %v4650_v5 = vmul.f32 %v14403_v36, %v11352_v61  ;;  %v11392_v46 = vpop.eup %8337  ;;  %v5766_v52 = vmul.f32 %v14409_v49, %v11258_v6  ;;  %v6518_v7 = vmul.f32 1.442695, %v6500_v53  ;;  %v14414_v49 = vperm.slane %v10909_v50, 6 }
 0x4b9   : > { %14402 = vst [vmem:[#allocation193_spill] sm:$0xff] %v11375_v47  ;;  %5584 = vperm.xlu0 %8104, %v11178_v25   ;;  %v11398_v37 = vpop.eup %8339  ;;  %v5419_v47 = vmul.f32 1.442695, %v5397_v45  ;;  %v11407_v36 = vpop.permute.xlu1 %7357  ;;  %v4798_v13 = vmul.f32 %v10157_v16, %v14412_v22  ;;  %8351 = vpow2.f32 %v6149_v26  ;;  %v14415_v16 = vperm.slane %v10956_v38, 4 }
 0x4ba   : > { %14405 = vst [vmem:[#allocation194_spill] sm:$0xff] %v11392_v46  ;;  %v11405_v48 = vpop.eup %8341  ;;  %v4670_v9 = vmul.f32 1.442695, %v4650_v5  ;;  %v5026_v46 = vmul.f32 %v14411_v39, %v11352_v61  ;;  %v11417_v45 = vpop.f32.mrf.mxu0  ;;  %v5788_v53 = vmul.f32 1.442695, %v5766_v52  ;;  %v11443_v26 = vsel %vm4477_vm6, %v10893_v29, %v4597_v2  ;;  %v2852_v29 = vld [vmem:[%s13960_s7 + $0x70] sm:$0xff] }
 0x4bb   : > { %14406 = vst [vmem:[#allocation195_spill] sm:$0xff] %v11395_v17  ;;  %v3583_v17 = vpop.f32.mrf.mxu3  ;;  %8074 = vset.pattern.permute.xlu1 %v14147_v23  ;;  %v6135_v39 = vmul.f32 %v14415_v16, %v11258_v6  ;;  %8353 = vpow2.f32 %v5419_v47  ;;  %v11452_v47 = vadd.f32 %v4798_v13, %v11346_v18  ;;  %v3677_v52 = vpop.f32.mrf.mxu2  ;;  %v4136_v13 = vsel %vm1349_vm12, %v2852_v29, 0 }
 0x4bc   : > { %14407 = vst [vmem:[#allocation196_spill] sm:$0xff] %v11398_v37  ;;  %v11415_v33 = vadd.f32 %v3583_v17, %v3558_v1  ;;  %v11429_v17 = vpop.eup %8343  ;;  %6306 = vperm.xlu1 %8074, %v10576_v60   ;;  %8355 = vpow2.f32 %v6518_v7  ;;  %v5046_v22 = vmul.f32 1.442695, %v5026_v46  ;;  %v14421_v7 = vperm.slane %v10944_v40, 2 }
 0x4bd   : > { %14410 = vst [vmem:[#allocation197_spill] sm:$0xff] %v11407_v36  ;;  %v6869_v36 = vmul.f32 %v14414_v49, %v11208_v19  ;;  %v11435_v49 = vpop.f32.mrf.mxu1  ;;  %v11437_v5 = vpop.eup %8345  ;;  %8357 = vpow2.f32 %v4670_v9  ;;  %v3678_v18 = vadd.f32 %v3677_v52, %v11378_v35  ;;  %v6157_v1 = vmul.f32 1.442695, %v6135_v39  ;;  %v11476_v9 = vld [vmem:[%s13965_s12] sm:$0x1] }
 0x4be   : > { %14413 = vst [vmem:[#allocation198_spill] sm:$0xff] %v11415_v33  ;;  %8067 = vset.pattern.permute.xlu2 %v14148_v42  ;;  %v11449_v57 = vpop.eup %8347  ;;  %v5395_v46 = vmul.f32 %v14421_v7, %v11352_v61  ;;  %v14424_v7 = vld [vmem:[#allocation29_spill] sm:$0xff]  ;;  %8359 = vpow2.f32 %v5788_v53  ;;  %v11484_v39 = vpop.permute.xlu0 %6667  ;;  %v14428_v29 = vperm.slane %v10956_v38, 5  ;;  %v11496_v53 = vld [vmem:[%s13964_s11 + $0x28] sm:$0xff] }
 0x4bf   : > { %14416 = vst [vmem:[#allocation199_spill] sm:$0xff] %v11429_v17  ;;  %6671 = vperm.xlu2 %8067, %v10551_v43   ;;  %v11446_v16 = vpop.permute.xlu2 %5889  ;;  %v6887_v2 = vmul.f32 1.442695, %v6869_v36  ;;  %v11461_v3 = vpop.eup %8349  ;;  %v11471_v36 = vand.u32 4294901760, %v4136_v13  ;;  %8361 = vpow2.f32 %v5046_v22  ;;  %v5070_v22 = vmul.f32 %v11175_v62, %v11452_v47 }
 0x4c0   : > { %14417 = vst [vmem:[#allocation200_spill] sm:$0xff] %v11437_v5  ;;  %v11469_v5 = vmul.f32 %v11443_v26, %v14164_v51  ;;  %v11482_v35 = vpop.eup %8351  ;;  %v5415_v17 = vmul.f32 1.442695, %v5395_v46  ;;  %v11523_v46 = vld [vmem:[#allocation1 + $0x7] ss:$9 sm:$0xff] }
 0x4c1   : > { %14418 = vst [vmem:[#allocation201_spill] sm:$0xff] %v11443_v26  ;;  %8105 = vset.pattern.permute.xlu0 %v14145_v34  ;;  %v14429_v26 = vperm.slane %v10909_v50, 7  ;;  %4197 = vmatmul.f32.vlgmr.msrb.gmra.mxu3 %v11471_v36  ;;  %8363 = vpow2.f32 %v6887_v2 }
 0x4c2   : > { %14419 = vst [vmem:[#allocation202_spill] sm:$0xff] %v11446_v16  ;;  %5953 = vperm.xlu0 %8105, %v11178_v25   ;;  %v6504_v16 = vmul.f32 %v14428_v29, %v11258_v6  ;;  %v4159_v29 = vsub.f32 %v4136_v13, %v11471_v36  ;;  %8365 = vpow2.f32 %v6157_v1  ;;  %v14434_v13 = vperm.slane %v10843_v56, 1 }
 0x4c3   : > { %14420 = vst [vmem:[#allocation203_spill] sm:$0xff] %v11449_v57  ;;  %v3706_v52 = vpop.f32.mrf.mxu3  ;;  %v7238_v33 = vmul.f32 %v14429_v26, %v11208_v19  ;;  %v11509_v19 = vmul.f32 0.0, %v11249_v24  ;;  %v3736_v26 = vpop.f32.mrf.mxu0  ;;  %v14435_v24 = vperm.slane %v10944_v40, 0  ;;  %8367 = vpow2.f32 %v5415_v17 }
 0x4c4   : > { %14422 = vst [vmem:[#allocation204_spill] sm:$0xff] %v11461_v3  ;;  %v11480_v3 = vmul.f32 %v11476_v9, %v14424_v7  ;;  %v11498_v7 = vpop.eup %8353  ;;  %8075 = vset.pattern.permute.xlu1 %v14148_v42  ;;  %v4160_v2 = vand.u32 4294901760, %v4159_v29  ;;  %4225 = vmatmul.f32.vlgmr.msrb.gmra.mxu0 %v4159_v29 }
 0x4c5   : > { %14423 = vst [vmem:[#allocation205_spill] sm:$0xff] %v11469_v5  ;;  %v11506_v50 = vpop.eup %8355  ;;  %v4651_v1 = vmul.f32 %v14435_v24, %v11496_v53  ;;  %6675 = vperm.xlu1 %8075, %v10576_v60  }
 0x4c6   : > { %14425 = vst [vmem:[#allocation29_spill] sm:$0xff] %v11480_v3  ;;  %v11502_v3 = vpop.permute.xlu1 %4795  ;;  %v4161_v57 = vsub.f32 %v4159_v29, %v4160_v2  ;;  %4254 = vmatmul.f32.vlgmr.msrb.gmra.mxu1 %v4160_v2 }
 0x4c7   : > { %14426 = vst [vmem:[#allocation206_spill] sm:$0xff] %v11482_v35  ;;  %v3707_v35 = vadd.f32 %v3706_v52, %v3678_v18  ;;  %v5158_v18 = vmul.f32 %v9990_v11, %v14434_v13  ;;  %8068 = vset.pattern.permute.xlu2 %v14151_v55  ;;  %v14437_v11 = vperm.slane %v10956_v38, 6 }
 0x4c8   : > { %14427 = vst [vmem:[#allocation207_spill] sm:$0xff] %v11484_v39  ;;  %v11514_v39 = vpop.eup %8357  ;;  %7040 = vperm.xlu2 %8068, %v10551_v43   ;;  %v4162_v2 = vand.u32 4294901760, %v4161_v57 }
 0x4c9   : > { %14430 = vst [vmem:[#allocation208_spill] sm:$0xff] %v11498_v7  ;;  %v14433_v7 = vperm.slane %v10944_v40, 3  ;;  %v3737_v52 = vadd.f32 %v3736_v26, %v3707_v35  ;;  %v6873_v13 = vmul.f32 %v14437_v11, %v11258_v6  ;;  %v11532_v26 = vpop.eup %8359  ;;  %v11534_v24 = vadd.f32 %v5158_v18, %v5070_v22 }
 0x4ca   : > { %14431 = vst [vmem:[#allocation209_spill] sm:$0xff] %v11502_v3  ;;  %v6526_v3 = vmul.f32 1.442695, %v6504_v16  ;;  %v11542_v16 = vpop.eup %8361  ;;  %8106 = vset.pattern.permute.xlu0 %v14147_v23  ;;  %v11549_v22 = vmul.f32 0.0, %v11281_v59  ;;  %v4672_v11 = vmul.f32 1.442695, %v4651_v1  ;;  %4163 = vmatmul.f32.vlgmr.msrb.gmra.mxu2 %v4162_v2 }
 0x4cb   : > { %14432 = vst [vmem:[#allocation210_spill] sm:$0xff] %v11506_v50  ;;  %v5764_v62 = vmul.f32 %v14433_v7, %v11352_v61  ;;  %v3762_v7 = vpop.f32.mrf.mxu1  ;;  %v7256_v50 = vmul.f32 1.442695, %v7238_v33  ;;  %6322 = vperm.xlu0 %8106, %v11178_v25   ;;  %v14442_v33 = vperm.slane %v10944_v40, 1  ;;  %v5439_v57 = vmul.f32 %v11184_v31, %v11534_v24 }
 0x4cc   : > { %14436 = vst [vmem:[#allocation211_spill] sm:$0xff] %v11523_v46  ;;  %v11537_v46 = vpop.permute.xlu2 %6258  ;;  %v11539_v37 = vadd.f32 %v3762_v7, %v3737_v52  ;;  %v11552_v52 = vpop.eup %8363  ;;  %v6895_v1 = vmul.f32 1.442695, %v6873_v13  ;;  %v14448_v13 = vperm.slane %v10843_v56, 2 }
 0x4cd   : > { %7571 = vst [vmem:[#allocation1] sm:$0xff] %v14164_v51  ;;  %v2853_v51 = vld [vmem:[%s13960_s7 + $0x78] sm:$0xff]  ;;  %v5784_v18 = vmul.f32 1.442695, %v5764_v62  ;;  %v5027_v35 = vmul.f32 %v14442_v33, %v11496_v53  ;;  %8369 = vpow2.f32 %v7256_v50  ;;  %v14444_v62 = vperm.slane %v10944_v40, 4  ;;  %8076 = vset.pattern.permute.xlu1 %v14151_v55 }
 0x4ce   : > { %14438 = vst [vmem:[#allocation212_spill] sm:$0xff] %v11532_v26  ;;  %v4139_v7 = vsel %vm1349_vm12, %v2853_v51, 0  ;;  %8371 = vpow2.f32 %v6526_v3  ;;  %v14445_v33 = vperm.slane %v10956_v38, 7  ;;  %v11574_v59 = vpop.permute.xlu1 %5155  ;;  %v5527_v2 = vmul.f32 %v10016_v30, %v14448_v13  ;;  %7044 = vperm.xlu1 %8076, %v10576_v60  }
 0x4cf   : > { %14439 = vst [vmem:[#allocation213_spill] sm:$0xff] %v11537_v46  ;;  %v11559_v46 = vpop.eup %8365  ;;  %v11562_v17 = vand.u32 4294901760, %v4139_v7  ;;  %v6133_v29 = vmul.f32 %v14444_v62, %v11352_v61  ;;  %8373 = vpow2.f32 %v5784_v18  ;;  %v14447_v62 = vperm.slane %v10944_v40, 5 }
 0x4d0   : > { %14440 = vst [vmem:[#allocation214_spill] sm:$0xff] %v11542_v16  ;;  %v7242_v51 = vmul.f32 %v14445_v33, %v11258_v6  ;;  %8375 = vpow2.f32 %v4672_v11  ;;  %v5048_v33 = vmul.f32 1.442695, %v5027_v35  ;;  %v11591_v18 = vpop.eup %8367  ;;  %v11598_v11 = vadd.f32 %v5527_v2, %v5439_v57  ;;  %8069 = vset.pattern.permute.xlu2 %v14177_v0 }
 0x4d1   : > { %14441 = vst [vmem:[#allocation215_spill] sm:$0xff] %v11552_v52  ;;  %v4167_v50 = vsub.f32 %v4139_v7, %v11562_v17  ;;  %4201 = vmatmul.f32.gmra.mxu3 %v11562_v17  ;;  %v6502_v31 = vmul.f32 %v14447_v62, %v11352_v61  ;;  %v11589_v7 = vld [vmem:[%s13964_s11 + $0x48] sm:$0xff]  ;;  %v6153_v3 = vmul.f32 1.442695, %v6133_v29  ;;  %8377 = vpow2.f32 %v6895_v1  ;;  %7409 = vperm.xlu2 %8069, %v10551_v43  }
 0x4d2   : > { %14443 = vst [vmem:[#allocation216_spill] sm:$0xff] %v11559_v46  ;;  %v11572_v46 = vpop.permute.xlu0 %7036  ;;  %v7264_v35 = vmul.f32 1.442695, %v7242_v51  ;;  %v14453_v57 = vperm.slane %v11011_v32, 0  ;;  %8379 = vpow2.f32 %v5048_v33  ;;  %v14455_v43 = vperm.slane %v10944_v40, 3 }
 0x4d3   : > { %14446 = vst [vmem:[#allocation217_spill] sm:$0xff] %v11574_v59  ;;  %v4168_v62 = vand.u32 4294901760, %v4167_v50  ;;  %4230 = vmatmul.f32.gmra.mxu0 %v4167_v50  ;;  %v14450_v59 = vperm.slane %v10944_v40, 2  ;;  %v11603_v26 = vpop.eup %8369  ;;  %8107 = vset.pattern.permute.xlu0 %v14148_v42  ;;  %8381 = vpow2.f32 %v6153_v3  ;;  %v14457_v13 = vperm.slane %v10944_v40, 6  ;;  %v11637_v3 = vld [vmem:[%s13964_s11 + $0x38] sm:$0xff] }
 0x4d4   : > { %14449 = vst [vmem:[#allocation218_spill] sm:$0xff] %v11591_v18  ;;  %v11606_v29 = vpop.permute.xlu2 %6627  ;;  %v4655_v2 = vmul.f32 %v14453_v57, %v11589_v7  ;;  %v11612_v16 = vpop.eup %8371  ;;  %v5765_v51 = vmul.f32 %v14455_v43, %v11496_v53  ;;  %6691 = vperm.xlu0 %8107, %v11178_v25   ;;  %v5808_v33 = vmul.f32 %v11192_v41, %v11598_v11  ;;  %8383 = vpow2.f32 %v7264_v35 }
 0x4d5   : > { %v5396_v30 = vmul.f32 %v14450_v59, %v11496_v53  ;;  %14451 = vst [vmem:[#allocation219_spill] sm:$0xff] %v11603_v26  ;;  %v4169_v18 = vsub.f32 %v4167_v50, %v4168_v62  ;;  %4260 = vmatmul.f32.gmra.mxu1 %v4168_v62  ;;  %v6522_v59 = vmul.f32 1.442695, %v6502_v31  ;;  %v11620_v31 = vpop.eup %8373  ;;  %v6871_v1 = vmul.f32 %v14457_v13, %v11352_v61 }
 0x4d6   : > { %14452 = vst [vmem:[#allocation220_spill] sm:$0xff] %v11606_v29  ;;  %v11626_v6 = vpop.eup %8375  ;;  %v14458_v50 = vperm.slane %v11011_v32, 1  ;;  %v14459_v41 = vperm.slane %v10944_v40, 7  ;;  %v11658_v26 = vmul.f32 0.0, %v11354_v63  ;;  %8077 = vset.pattern.permute.xlu1 %v14177_v0 }
 0x4d7   : > { %14454 = vst [vmem:[#allocation221_spill] sm:$0xff] %v11612_v16  ;;  %v4170_v62 = vand.u32 4294901760, %v4169_v18  ;;  %v5417_v57 = vmul.f32 1.442695, %v5396_v30  ;;  %8385 = vpow2.f32 %v6522_v59  ;;  %v4680_v30 = vmul.f32 1.442695, %v4655_v2  ;;  %v11644_v35 = vpop.eup %8377  ;;  %v11649_v16 = vpop.permute.xlu1 %5524  ;;  %7413 = vperm.xlu1 %8077, %v10576_v60  }
 0x4d8   : > { %14456 = vst [vmem:[#allocation222_spill] sm:$0xff] %v11620_v31  ;;  %v5031_v29 = vmul.f32 %v14458_v50, %v11589_v7  ;;  %v7240_v13 = vmul.f32 %v14459_v41, %v11352_v61  ;;  %v14461_v50 = vperm.slane %v10843_v56, 3  ;;  %v5786_v31 = vmul.f32 1.442695, %v5765_v51 }
 0x4d9   : > { %4171 = vmatmul.f32.gmra.mxu2 %v4170_v62  ;;  %4310 = vmatmul.f32.vlgmr.msra.gmra.mxu3 %v11471_v36  ;;  %14460 = vst [vmem:[#allocation223_spill] sm:$0xff] %v11644_v35  ;;  %v14463_v62 = vperm.slane %v11011_v32, 2  ;;  %8387 = vpow2.f32 %v5417_v57  ;;  %v6891_v61 = vmul.f32 1.442695, %v6871_v1  ;;  %v14464_v41 = vperm.slane %v10956_v38, 0 }
 0x4da   : > { %v5896_v43 = vmul.f32 %v10042_v14, %v14461_v50  ;;  %14462 = vst [vmem:[#allocation224_spill] sm:$0xff] %v11649_v16  ;;  %v11655_v2 = vpop.permute.xlu0 %7405  ;;  %v11663_v50 = vpop.eup %8379  ;;  %v14466_v59 = vperm.slane %v10944_v40, 4  ;;  %8086 = vset.pattern.permute.xlu2 %v14152_v28  ;;  %8389 = vpow2.f32 %v4680_v30  ;;  %v7260_v57 = vmul.f32 1.442695, %v7240_v13 }
 0x4db   : > { %v5400_v18 = vmul.f32 %v14463_v62, %v11589_v7  ;;  %v4653_v14 = vmul.f32 %v14464_v41, %v11637_v3  ;;  %14465 = vst [vmem:[#allocation225_spill] sm:$0xff] %v11663_v50  ;;  %v5056_v62 = vmul.f32 1.442695, %v5031_v29  ;;  %v11672_v16 = vpop.eup %8381  ;;  %4852 = vperm.xlu2 %8086, %v10820_v8   ;;  %v3654_v41 = vadd.f32 %v11435_v49, %v11417_v45 }
 0x4dc   : > { %v11665_v51 = vadd.f32 %v5896_v43, %v5808_v33  ;;  %v6134_v35 = vmul.f32 %v14466_v59, %v11496_v53  ;;  %14467 = vst [vmem:[#allocation226_spill] sm:$0xff] %v11672_v16  ;;  %v14468_v33 = vperm.slane %v10944_v40, 5  ;;  %v11680_v43 = vpop.eup %8383  ;;  %v11683_v59 = vpop.permute.xlu2 %6996  ;;  %8391 = vpow2.f32 %v5786_v31  ;;  %8108 = vset.pattern.permute.xlu0 %v14151_v55 }
 0x4dd   : > { %14469 = vst [vmem:[#allocation227_spill] sm:$0xff] %v11680_v43  ;;  %v5425_v1 = vmul.f32 1.442695, %v5400_v18  ;;  %v14471_v60 = vperm.slane %v11011_v32, 3  ;;  %v11690_v13 = vpop.eup %8385  ;;  %8393 = vpow2.f32 %v6891_v61  ;;  %v4676_v43 = vmul.f32 1.442695, %v4653_v14  ;;  %7060 = vperm.xlu0 %8108, %v11178_v25  }
 0x4de   : > { %v6503_v29 = vmul.f32 %v14468_v33, %v11496_v53  ;;  %14470 = vst [vmem:[#allocation228_spill] sm:$0xff] %v11683_v59  ;;  %v3682_v33 = vpop.f32.mrf.mxu2  ;;  %v14473_v59 = vperm.slane %v10956_v38, 1  ;;  %v6177_v45 = vmul.f32 %v11210_v27, %v11665_v51  ;;  %8395 = vpow2.f32 %v5056_v62  ;;  %v11711_v27 = vld [vmem:[%s13965_s12 + $0x1] sm:$0x1]  ;;  %v14476_v14 = vld [vmem:[#allocation30_spill] sm:$0xff] }
 0x4df   : > { %v5769_v30 = vmul.f32 %v14471_v60, %v11589_v7  ;;  %14472 = vst [vmem:[#allocation229_spill] sm:$0xff] %v11690_v13  ;;  %v6155_v49 = vmul.f32 1.442695, %v6134_v35  ;;  %v14474_v31 = vperm.slane %v11011_v32, 4  ;;  %v11703_v60 = vpop.eup %8387  ;;  %v11715_v35 = vmul.f32 %v11711_v27, %v14476_v14  ;;  %v11720_v13 = vpop.permute.xlu1 %5893  ;;  %8094 = vset.pattern.permute.xlu1 %v14152_v28 }
 0x4e0   : > { %v5029_v16 = vmul.f32 %v14473_v59, %v11637_v3  ;;  %14475 = vst [vmem:[#allocation230_spill] sm:$0xff] %v11703_v60  ;;  %8397 = vpow2.f32 %v7260_v57  ;;  %v6524_v62 = vmul.f32 1.442695, %v6503_v29  ;;  %v14478_v59 = vperm.slane %v10843_v56, 4  ;;  %v8390_v5 = vpop.eup %8389  ;;  %v3712_v60 = vpop.f32.mrf.mxu3  ;;  %4857 = vperm.xlu1 %8094, %v10897_v54  }
 0x4e1   : > { %v6138_v18 = vmul.f32 %v14474_v31, %v11589_v7  ;;  %4284 = vmatmul.f32.vlgmr.msra.gmra.mxu2 %v11471_v36  ;;  %4314 = vmatmul.f32.gmra.mxu3 %v11562_v17  ;;  %14477 = vst [vmem:[#allocation30_spill] sm:$0xff] %v11715_v35  ;;  %v14479_v31 = vld [vmem:[#allocation11_spill] sm:$0xff]  ;;  %v3683_v61 = vadd.f32 %v3682_v33, %v3654_v41  ;;  %8399 = vpow2.f32 %v5425_v1  ;;  %v5794_v36 = vmul.f32 1.442695, %v5769_v30 }
 0x4e2   : > { %v6265_v63 = vmul.f32 %v14479_v31, %v14478_v59  ;;  %14480 = vst [vmem:[#allocation11_spill] sm:$0xff] %v11720_v13  ;;  %v11723_v50 = vmul.f32 0.0, %v11405_v48  ;;  %8401 = vpow2.f32 %v4676_v43  ;;  %v5052_v52 = vmul.f32 1.442695, %v5029_v16  ;;  %v11728_v14 = vpop.eup %8391  ;;  %v14484_v41 = vld [vmem:[#allocation39_spill] sm:$0xff]  ;;  %v11738_v48 = vpop.permute.xlu0 %4847 }
 0x4e3   : > { %v14482_v57 = vperm.slane %v10944_v40, 6  ;;  %14483 = vst [vmem:[#allocation232_spill] sm:$0xff] %v11728_v14  ;;  %v11734_v1 = vmul.f32 %v11476_v9, %v14484_v41  ;;  %8403 = vpow2.f32 %v6155_v49  ;;  %v6163_v30 = vmul.f32 1.442695, %v6138_v18  ;;  %v11736_v33 = vpop.eup %8393  ;;  %v14488_v43 = vld [vmem:[#allocation31_spill] sm:$0xff]  ;;  %8087 = vset.pattern.permute.xlu2 %v14143_v20 }
 0x4e4   : > { %14481 = vst [vmem:[#allocation231_spill] sm:$0xff] %v11723_v50  ;;  %v11730_v35 = vadd.f32 %v6265_v63, %v6177_v45  ;;  %v11742_v16 = vmul.f32 0.0, %v11514_v39  ;;  %v11747_v63 = vld [vmem:[%s13965_s12 + $0x2] sm:$0x1]  ;;  %8405 = vpow2.f32 %v6524_v62  ;;  %v14490_v49 = vperm.slane %v10956_v38, 2  ;;  %v11761_v39 = vpop.eup %8395  ;;  %5207 = vperm.xlu2 %8087, %v10820_v8   ;;  %v14547_v50 = vld [vmem:[#allocation55_spill] sm:$0xff] }
 0x4e5   : > { %v6872_v29 = vmul.f32 %v14482_v57, %v11496_v53  ;;  %14485 = vst [vmem:[#allocation39_spill] sm:$0xff] %v11734_v1  ;;  %v11751_v45 = vmul.f32 %v11747_v63, %v14488_v43  ;;  %v11759_v59 = vld [vmem:[%s13965_s12 + $0x4] sm:$0x1]  ;;  %v14492_v31 = vperm.slane %v10843_v56, 0  ;;  %v3713_v62 = vadd.f32 %v3712_v60, %v3683_v61  ;;  %8109 = vset.pattern.permute.xlu0 %v14177_v0 }
 0x4e6   : > { %14486 = vst [vmem:[#allocation233_spill] sm:$0xff] %v11736_v33  ;;  %v5398_v18 = vmul.f32 %v14490_v49, %v11637_v3  ;;  %v14493_v57 = vld [vmem:[#allocation45_spill] sm:$0xff]  ;;  %v11769_v43 = vmul.f32 0.0, %v11626_v6  ;;  %8407 = vpow2.f32 %v5794_v36  ;;  %v11776_v13 = vpop.eup %8397  ;;  %v11785_v60 = vmul.f32 0.0, %v8390_v5  ;;  %7429 = vperm.xlu0 %8109, %v11178_v25   ;;  %v14511_v25 = vld [vmem:[#allocation2_spill] sm:$0xff] }
 0x4e7   : > { %14487 = vst [vmem:[#allocation234_spill] sm:$0xff] %v11742_v16  ;;  %v4799_v41 = vmul.f32 %v14493_v57, %v14492_v31  ;;  %v11774_v49 = vld [vmem:[%s13965_s12 + $0x5] sm:$0x1]  ;;  %v3740_v31 = vpop.f32.mrf.mxu0  ;;  %v14497_v57 = vld [vmem:[#allocation40_spill] sm:$0xff]  ;;  %8409 = vpow2.f32 %v5052_v52  ;;  %v6893_v6 = vmul.f32 1.442695, %v6872_v29  ;;  %v11787_v61 = vpop.eup %8399  ;;  %v6546_v36 = vmul.f32 %v11222_v44, %v11730_v35 }
 0x4e8   : > { %14489 = vst [vmem:[#allocation31_spill] sm:$0xff] %v11751_v45  ;;  %v11779_v45 = vpop.permute.xlu2 %7365  ;;  %8411 = vpow2.f32 %v6163_v30  ;;  %v11800_v5 = vmul.f32 %v11759_v59, %v9241_v21  ;;  %v4636_v52 = vld [vmem:[%s13965_s12 + $0x6] sm:$0x1]  ;;  %v8402_v29 = vpop.eup %8401  ;;  %v5421_v44 = vmul.f32 1.442695, %v5398_v18  ;;  %v14504_v30 = vperm.slane %v10944_v40, 7  ;;  %8095 = vset.pattern.permute.xlu1 %v14143_v20 }
 0x4e9   : > { %14491 = vst [vmem:[#allocation235_spill] sm:$0xff] %v11761_v39  ;;  %v11783_v39 = vmul.f32 %v11711_v27, %v14497_v57  ;;  %4288 = vmatmul.f32.gmra.mxu2 %v11562_v17  ;;  %v14507_v21 = vld [vmem:[#allocation7_spill] sm:$0xff]  ;;  %v4815_v17 = vadd.f32 %v4799_v41, %v11549_v22  ;;  %v3741_v18 = vadd.f32 %v3740_v31, %v3713_v62  ;;  %8413 = vpow2.f32 %v6893_v6  ;;  %v14524_v40 = vld [vmem:[#allocation41_spill] sm:$0xff] }
 0x4ea   : > { %14494 = vst [vmem:[#allocation45_spill] sm:$0xff] %v11769_v43  ;;  %v7241_v57 = vmul.f32 %v14504_v30, %v11496_v53  ;;  %v3766_v30 = vpop.f32.mrf.mxu1  ;;  %v14517_v22 = vperm.slane %v10843_v56, 1  ;;  %v14518_v41 = vld [vmem:[#allocation19_spill] sm:$0xff]  ;;  %v11844_v6 = vmul.f32 0.0, %v8402_v29  ;;  %v11864_v29 = vld [vmem:[%s13964_s11 + $0x40] sm:$0xff]  ;;  %5211 = vperm.xlu1 %8095, %v10897_v54   ;;  %8415 = vpow2.f32 %v5421_v44 }
 0x4eb   : > { %14495 = vst [vmem:[#allocation236_spill] sm:$0xff] %v11776_v13  ;;  %v14501_v13 = vld [vmem:[#allocation20_spill] sm:$0xff] }
 0x4ec   : > { %14496 = vst [vmem:[#allocation237_spill] sm:$0xff] %v11779_v45  ;;  %v8550_v45 = vld [vmem:[%s13965_s12 + $0x3] sm:$0x1]  ;;  %v5159_v62 = vmul.f32 %v14518_v41, %v14517_v22  ;;  %v14530_v41 = vld [vmem:[#allocation155_spill] sm:$0xff]  ;;  %8088 = vset.pattern.permute.xlu2 %v14146_v12 }
 0x4ed   : > { %14498 = vst [vmem:[#allocation40_spill] sm:$0xff] %v11783_v39  ;;  %v11796_v33 = vmul.f32 %v8550_v45, %v14501_v13  ;;  %v14505_v13 = vld [vmem:[#allocation8_spill] sm:$0xff]  ;;  %5576 = vperm.xlu2 %8088, %v10820_v8  }
 0x4ee   : > { %14499 = vst [vmem:[#allocation238_spill] sm:$0xff] %v11785_v60  ;;  %v14510_v60 = vperm.slane %v10843_v56, 5  ;;  %8126 = vset.pattern.permute.xlu0 %v14152_v28 }
 0x4ef   : > { %14500 = vst [vmem:[#allocation239_spill] sm:$0xff] %v11787_v61  ;;  %v11818_v61 = vpop.eup %8403 }
 0x4f0   : > { %14502 = vst [vmem:[#allocation20_spill] sm:$0xff] %v11796_v33  ;;  %v11812_v33 = vmul.f32 %v14505_v13, %v11759_v59  ;;  %v6634_v14 = vmul.f32 %v14511_v25, %v14510_v60  ;;  %v11825_v53 = vpop.eup %8405  ;;  %v11842_v60 = vpop.permute.xlu1 %6262  ;;  %v14521_v25 = vld [vmem:[#allocation12_spill] sm:$0xff] }
 0x4f1   : > { %14503 = vst [vmem:[#allocation240_spill] sm:$0xff] %v11800_v5  ;;  %v11816_v5 = vmul.f32 %v11774_v49, %v14507_v21  ;;  %v14513_v21 = vld [vmem:[#allocation10_spill] sm:$0xff]  ;;  %v11847_v13 = vmul.f32 %v14521_v25, %v4636_v52  ;;  %v14531_v25 = vperm.slane %v14530_v41, 0 }
 0x4f2   : > { %14506 = vst [vmem:[#allocation8_spill] sm:$0xff] %v11812_v33  ;;  %v11833_v33 = vmul.f32 %v4636_v52, %v9318_v10  ;;  %v11840_v31 = vadd.f32 %v6634_v14, %v6546_v36  ;;  %v11853_v10 = vmul.f32 %v11747_v63, %v14524_v40  ;;  %v14527_v14 = vld [vmem:[#allocation32_spill] sm:$0xff]  ;;  %8096 = vset.pattern.permute.xlu1 %v14146_v12 }
 0x4f3   : > { %14508 = vst [vmem:[#allocation7_spill] sm:$0xff] %v11816_v5  ;;  %v11830_v5 = vmul.f32 %v14513_v21, %v11774_v49  ;;  %v11859_v36 = vmul.f32 %v8550_v45, %v14527_v14  ;;  %v14533_v45 = vperm.slane %v11011_v32, 5  ;;  %5580 = vperm.xlu1 %8096, %v10897_v54  }
 0x4f4   : > { %14509 = vst [vmem:[#allocation241_spill] sm:$0xff] %v11818_v61  ;;  %v11835_v61 = vpop.eup %8407 }
 0x4f5   : > { %14512 = vst [vmem:[#allocation2_spill] sm:$0xff] %v11825_v53  ;;  %v11849_v21 = vpop.eup %8409  ;;  %v6507_v14 = vmul.f32 %v14533_v45, %v11589_v7  ;;  %v14541_v53 = vld [vmem:[#allocation21_spill] sm:$0xff]  ;;  %8089 = vset.pattern.permute.xlu2 %v14145_v34 }
 0x4f6   : > { %14514 = vst [vmem:[#allocation10_spill] sm:$0xff] %v11830_v5  ;;  %v14526_v5 = vperm.slane %v10956_v38, 3  ;;  %v11866_v52 = vpop.eup %8411  ;;  %5945 = vperm.xlu2 %8089, %v10820_v8  }
 0x4f7   : > { %14515 = vst [vmem:[#allocation242_spill] sm:$0xff] %v11833_v33  ;;  %v7262_v33 = vmul.f32 1.442695, %v7241_v57  ;;  %v11872_v57 = vadd.f32 %v3766_v30, %v3741_v18  ;;  %v14539_v30 = vld [vmem:[#allocation175_spill] sm:$0xff]  ;;  %v11901_v44 = vpop.eup %8413 }
 0x4f8   : > { %14516 = vst [vmem:[#allocation243_spill] sm:$0xff] %v11835_v61  ;;  %v5767_v22 = vmul.f32 %v14526_v5, %v11637_v3  ;;  %v5071_v5 = vmul.f32 %v11302_v15, %v4815_v17  ;;  %v11880_v61 = vpop.permute.xlu0 %5203  ;;  %v14538_v15 = vperm.slane %v11011_v32, 6  ;;  %v6915_v45 = vmul.f32 %v14539_v30, %v11840_v31 }
 0x4f9   : > { %14519 = vst [vmem:[#allocation19_spill] sm:$0xff] %v11842_v60  ;;  %v14546_v30 = vperm.slane %v14530_v41, 0  ;;  %4877 = vperm.xlu0 %8126, %v11872_v57   ;;  %8417 = vpow2.f32 %v7262_v33  ;;  %v14555_v33 = vld [vmem:[#allocation26_spill] sm:$0xff] }
 0x4fa   : > { %14520 = vst [vmem:[#allocation244_spill] sm:$0xff] %v11844_v6  ;;  %v6876_v18 = vmul.f32 %v14538_v15, %v11589_v7  ;;  %v14545_v15 = vld [vmem:[#allocation47_spill] sm:$0xff] }
 0x4fb   : > { %14522 = vst [vmem:[#allocation12_spill] sm:$0xff] %v11847_v13  ;;  %v14532_v13 = vld [vmem:[#allocation51_spill] sm:$0xff]  ;;  %v4801_v39 = vmul.f32 %v14547_v50, %v14546_v30  ;;  %8097 = vset.pattern.permute.xlu1 %v14145_v34 }
 0x4fc   : > { %14523 = vst [vmem:[#allocation245_spill] sm:$0xff] %v11849_v21  ;;  %v4800_v40 = vmul.f32 %v14532_v13, %v14531_v25  ;;  %v14536_v13 = vld [vmem:[#allocation46_spill] sm:$0xff]  ;;  %v14544_v21 = vperm.slane %v10843_v56, 6  ;;  %v6901_v50 = vmul.f32 1.442695, %v6876_v18  ;;  %5949 = vperm.xlu1 %8097, %v10897_v54  }
 0x4fd   : > { %14525 = vst [vmem:[#allocation41_spill] sm:$0xff] %v11853_v10  ;;  %v11886_v25 = vmul.f32 %v11476_v9, %v14536_v13  ;;  %v11899_v13 = vmul.f32 %v14541_v53, %v11759_v59  ;;  %v11935_v18 = vadd.f32 %v4801_v39, %v11509_v19  ;;  %v14563_v19 = vld [vmem:[#allocation48_spill] sm:$0xff] }
 0x4fe   : > { %14528 = vst [vmem:[#allocation32_spill] sm:$0xff] %v11859_v36  ;;  %v14534_v36 = vld [vmem:[#allocation164_spill] sm:$0xff]  ;;  %v7003_v6 = vmul.f32 %v14545_v15, %v14544_v21  ;;  %v11915_v53 = vadd.f32 %v4800_v40, %v11658_v26  ;;  %v14554_v26 = vperm.slane %v10843_v56, 7  ;;  %v11952_v39 = vmul.f32 %v11711_v27, %v14563_v19  ;;  %8090 = vset.pattern.permute.xlu2 %v14147_v23 }
 0x4ff   : > { %14529 = vst [vmem:[#allocation246_spill] sm:$0xff] %v11866_v52  ;;  %v4910_v60 = vmul.f32 %v14534_v36, %v11452_v47  ;;  %v4838_v47 = vpop.permute.xlu2 %4837  ;;  %v5175_v36 = vadd.f32 %v5159_v62, %v5071_v5  ;;  %v14540_v52 = vperm.slane %v11011_v32, 0  ;;  %v5790_v62 = vmul.f32 1.442695, %v5767_v22  ;;  %v14549_v5 = vld [vmem:[#allocation49_spill] sm:$0xff]  ;;  %v14573_v19 = vld [vmem:[#allocation56_spill] sm:$0xff]  ;;  %6314 = vperm.xlu2 %8090, %v10820_v8  }
 0x500   : > { %14535 = vst [vmem:[#allocation155_spill] sm:$0xff] %v11880_v61  ;;  %v4911_v43 = vmul.f32 %v4838_v47, %v4815_v17  ;;  %v14551_v17 = vld [vmem:[#allocation22_spill] sm:$0xff]  ;;  %v11923_v22 = vadd.f32 %v7003_v6, %v6915_v45  ;;  %v7372_v40 = vmul.f32 %v14555_v33, %v14554_v26 }
 0x501   : > { %14537 = vst [vmem:[#allocation51_spill] sm:$0xff] %v11886_v25  ;;  %v4654_v10 = vmul.f32 %v14540_v52, %v11864_v29  ;;  %v14548_v52 = vperm.slane %v10843_v56, 2  ;;  %v4926_v21 = vsel %vm1349_vm12, %v4910_v60, 0.0  ;;  %v11921_v47 = vmul.f32 %v14551_v17, %v11774_v49  ;;  %v11937_v49 = vpop.permute.xlu1 %6631  ;;  %v14562_v26 = vld [vmem:[#allocation58_spill] sm:$0xff]  ;;  %8127 = vset.pattern.permute.xlu0 %v14143_v20  ;;  %v14594_v25 = vld [vmem:[#allocation65_spill] sm:$0xff] }
 0x502   : > { %14542 = vst [vmem:[#allocation164_spill] sm:$0xff] %v11899_v13  ;;  %v6532_v13 = vmul.f32 1.442695, %v6507_v14  ;;  %v4927_v15 = vsel %vm1349_vm12, %v4911_v43, 0.0  ;;  %v14556_v60 = vperm.slane %v14530_v41, 1  ;;  %v14557_v43 = vld [vmem:[#allocation28_spill] sm:$0xff]  ;;  %8419 = vpow2.f32 %v5790_v62  ;;  %5227 = vperm.xlu0 %8127, %v11872_v57  }
 0x503   : > { %14543 = vst [vmem:[#allocation46_spill] sm:$0xff] %v11901_v44  ;;  %v5528_v16 = vmul.f32 %v14549_v5, %v14548_v52  ;;  %v4928_v30 = vadd.f32 %v4927_v15, %v4926_v21  ;;  %v5440_v52 = vmul.f32 %v11314_v4, %v5175_v36  ;;  %v4678_v5 = vmul.f32 1.442695, %v4654_v10  ;;  %v11926_v44 = vpop.eup %8415  ;;  %v14560_v21 = vld [vmem:[#allocation50_spill] sm:$0xff] }
 0x504   : > { %14550 = vst [vmem:[#allocation175_spill] sm:$0xff] %v11915_v53  ;;  %v5160_v14 = vmul.f32 %v14557_v43, %v14556_v60  ;;  %v5072_v4 = vmul.f32 %v11387_v58, %v11915_v53  ;;  %8421 = vpow2.f32 %v6532_v13  ;;  %v14559_v10 = vperm.slane %v10843_v56, 3  ;;  %v14567_v13 = vld [vmem:[#allocation52_spill] sm:$0xff]  ;;  %8098 = vset.pattern.permute.xlu1 %v14147_v23 }
 0x505   : > { %14552 = vst [vmem:[#allocation21_spill] sm:$0xff] %v11921_v47  ;;  %v4929_v6 = vrot.slane %v4928_v30, 4  ;;  %v11939_v45 = vadd.f32 %v5528_v16, %v5440_v52  ;;  %v14561_v17 = vmov %v14556_v60  ;;  %8423 = vpow2.f32 %v6901_v50  ;;  %v11954_v16 = vpop.eup %8417  ;;  %v14568_v52 = vld [vmem:[#allocation169_spill] sm:$0xff]  ;;  %v14569_v43 = vld [vmem:[#allocation176_spill] sm:$0xff]  ;;  %6318 = vperm.xlu1 %8098, %v10897_v54  }
 0x506   : > { %14553 = vst [vmem:[#allocation47_spill] sm:$0xff] %v11926_v44  ;;  %v5897_v15 = vmul.f32 %v14560_v21, %v14559_v10  ;;  %v5161_v33 = vmul.f32 %v14562_v26, %v14561_v17  ;;  %v14566_v58 = vperm.slane %v14530_v41, 2  ;;  %v5254_v60 = vmul.f32 %v14568_v52, %v11534_v24  ;;  %v14571_v50 = vld [vmem:[#allocation53_spill] sm:$0xff]  ;;  %v14604_v53 = vld [vmem:[#allocation36_spill] sm:$0xff] }
 0x507   : > { %14558 = vst [vmem:[#allocation55_spill] sm:$0xff] %v11937_v49  ;;  %v7284_v10 = vmul.f32 %v14569_v43, %v11923_v22  ;;  %8425 = vpow2.f32 %v4678_v5  ;;  %v14570_v21 = vperm.slane %v10843_v56, 4  ;;  %v14572_v26 = vperm.slane %v14530_v41, 3  ;;  %v5196_v43 = vpop.permute.xlu2 %5195  ;;  %8091 = vset.pattern.permute.xlu2 %v14148_v42 }
 0x508   : > { %14564 = vst [vmem:[#allocation49_spill] sm:$0xff] %v11952_v39  ;;  %v5529_v62 = vmul.f32 %v14567_v13, %v14566_v58  ;;  %v14574_v58 = vld [vmem:[#allocation178_spill] sm:$0xff]  ;;  %v11975_v13 = vpop.permute.xlu0 %5572  ;;  %v4930_v52 = vadd.f32 %v4929_v6, %v4928_v30  ;;  %v5255_v5 = vmul.f32 %v5196_v43, %v5175_v36  ;;  %v14581_v30 = vperm.slane %v14530_v41, 4  ;;  %v14582_v6 = vld [vmem:[#allocation59_spill] sm:$0xff]  ;;  %6683 = vperm.xlu2 %8091, %v10820_v8  }
 0x509   : > { %14565 = vst [vmem:[#allocation22_spill] sm:$0xff] %v11954_v16  ;;  %v6266_v17 = vmul.f32 %v14571_v50, %v14570_v21  ;;  %v11971_v47 = vmul.f32 %v14573_v19, %v14572_v26  ;;  %v5073_v24 = vmul.f32 %v14574_v58, %v11935_v18  ;;  %v11978_v49 = vadd.f32 %v7372_v40, %v7284_v10  ;;  %v14576_v21 = vld [vmem:[#allocation188_spill] sm:$0xff]  ;;  %v11985_v26 = vpop.eup %8419  ;;  %v14580_v58 = vld [vmem:[#allocation18_spill] sm:$0xff]  ;;  %v14583_v10 = vld [vmem:[#allocation27_spill] sm:$0xff] }
 0x50a   : > { %14575 = vst [vmem:[#allocation26_spill] sm:$0xff] %v11975_v13  ;;  %v5809_v50 = vmul.f32 %v14576_v21, %v11939_v45  ;;  %v11983_v16 = vadd.f32 %v5160_v14, %v5072_v4  ;;  %v14579_v19 = vperm.slane %v10843_v56, 5  ;;  %v11995_v40 = vmul.f32 %v14582_v6, %v14581_v30  ;;  %v12004_v4 = vpop.eup %8421  ;;  %v14587_v21 = vld [vmem:[#allocation61_spill] sm:$0xff]  ;;  %8128 = vset.pattern.permute.xlu0 %v14146_v12 }
 0x50b   : > { %14578 = vst [vmem:[#allocation50_spill] sm:$0xff] %v11985_v26  ;;  %v11997_v36 = vadd.f32 %v5161_v33, %v5073_v24  ;;  %v12002_v14 = vmul.f32 %v11747_v63, %v14583_v10  ;;  %v14586_v43 = vperm.slane %v10843_v56, 6  ;;  %v5271_v30 = vsel %vm1349_vm12, %v5255_v5, 0.0  ;;  %v12015_v33 = vpop.eup %8423  ;;  %v14590_v26 = vld [vmem:[#allocation62_spill] sm:$0xff]  ;;  %5596 = vperm.xlu0 %8128, %v11872_v57  }
 0x50c   : > { %14577 = vst [vmem:[#allocation28_spill] sm:$0xff] %v11983_v16  ;;  %v11990_v44 = vmul.f32 %v14580_v58, %v14579_v19  ;;  %v5270_v58 = vsel %vm1349_vm12, %v5254_v60, 0.0  ;;  %v12013_v6 = vadd.f32 %v5897_v15, %v5809_v50  ;;  %v14589_v24 = vperm.slane %v14530_v41, 2  ;;  %v14596_v50 = vld [vmem:[#allocation66_spill] sm:$0xff] }
 0x50d   : > { %14584 = vst [vmem:[#allocation58_spill] sm:$0xff] %v12002_v14  ;;  %v12009_v19 = vmul.f32 %v14587_v21, %v14586_v43  ;;  %v14591_v10 = vperm.slane %v14530_v41, 5  ;;  %v4931_v39 = vrot.slane %v4930_v52, 2  ;;  %v5272_v43 = vadd.f32 %v5271_v30, %v5270_v58  ;;  %v8426_v21 = vpop.eup %8425  ;;  %v14601_v58 = vld [vmem:[#allocation196_spill] sm:$0xff]  ;;  %8099 = vset.pattern.permute.xlu1 %v14148_v42 }
 0x50e   : > { %14585 = vst [vmem:[#allocation48_spill] sm:$0xff] %v12004_v4  ;;  %v5530_v63 = vmul.f32 %v14590_v26, %v14589_v24  ;;  %v14592_v4 = vld [vmem:[#allocation63_spill] sm:$0xff]  ;;  %v14593_v60 = vperm.slane %v10843_v56, 7  ;;  %v14595_v15 = vperm.slane %v14530_v41, 3  ;;  %v14597_v26 = vperm.slane %v14530_v41, 6  ;;  %6687 = vperm.xlu1 %8099, %v10897_v54  }
 0x50f   : > { %14588 = vst [vmem:[#allocation52_spill] sm:$0xff] %v12015_v33  ;;  %v12023_v14 = vmul.f32 %v14592_v4, %v14591_v10  ;;  %v14598_v24 = vld [vmem:[#allocation67_spill] sm:$0xff]  ;;  %v12040_v4 = vpop.permute.xlu1 %7000  ;;  %v5441_v30 = vmul.f32 %v14601_v58, %v11983_v16  ;;  %v14602_v10 = vld [vmem:[#allocation157_spill] sm:$0xff] }
 0x510   : > { %v12028_v5 = vmul.f32 %v14594_v25, %v14593_v60  ;;  %v12033_v33 = vmul.f32 %v14596_v50, %v14595_v15  ;;  %v12038_v1 = vmul.f32 %v14598_v24, %v14597_v26  ;;  %14600 = vst [vmem:[#allocation176_spill] sm:$0xff] %v12040_v4  ;;  %v14603_v56 = vperm.slane %v14602_v10, 0  ;;  %v14606_v60 = vld [vmem:[#allocation179_spill] sm:$0xff]  ;;  %v14607_v50 = vld [vmem:[#allocation68_spill] sm:$0xff]  ;;  %v14610_v24 = vld [vmem:[#allocation34_spill] sm:$0xff]  ;;  %8092 = vset.pattern.permute.xlu2 %v14151_v55 }
 0x511   : > { %v5442_v13 = vmul.f32 %v14606_v60, %v11997_v36  ;;  %v5273_v15 = vrot.slane %v5272_v43, 4  ;;  %v12053_v61 = vmul.f32 %v11476_v9, %v14607_v50  ;;  %v14609_v26 = vperm.slane %v14530_v41, 4  ;;  %v14611_v58 = vld [vmem:[#allocation191_spill] sm:$0xff]  ;;  %v14613_v60 = vld [vmem:[#allocation33_spill] sm:$0xff]  ;;  %v14615_v9 = vld [vmem:[#allocation174_spill] sm:$0xff]  ;;  %7052 = vperm.xlu2 %8092, %v10820_v8  }
 0x512   : > { %14599 = vst [vmem:[#allocation169_spill] sm:$0xff] %v12038_v1  ;;  %v12047_v25 = vmul.f32 %v14604_v53, %v14603_v56  ;;  %v6178_v1 = vmul.f32 %v14611_v58, %v12013_v6  ;;  %v14612_v53 = vperm.slane %v10956_v38, 4  ;;  %v5623_v50 = vmul.f32 %v14615_v9, %v11598_v11  ;;  %v5565_v58 = vpop.permute.xlu2 %5564  ;;  %v14626_v9 = vld [vmem:[#allocation70_spill] sm:$0xff] }
 0x513   : > { %14608 = vst [vmem:[#allocation56_spill] sm:$0xff] %v12053_v61  ;;  %v12058_v4 = vmul.f32 %v14610_v24, %v14609_v26  ;;  %v4932_v61 = vadd.f32 %v4931_v39, %v4930_v52  ;;  %v5274_v16 = vadd.f32 %v5273_v15, %v5272_v43  ;;  %v12074_v26 = vmul.f32 0.0, %v8426_v21  ;;  %v12086_v52 = vpop.permute.xlu0 %5941  ;;  %v14623_v21 = vld [vmem:[#allocation69_spill] sm:$0xff]  ;;  %8129 = vset.pattern.permute.xlu0 %v14145_v34 }
 0x514   : > { %14605 = vst [vmem:[#allocation53_spill] sm:$0xff] %v12047_v25  ;;  %v6136_v56 = vmul.f32 %v14612_v53, %v11637_v3  ;;  %v12068_v25 = vmul.f32 %v14613_v60, %v11759_v59  ;;  %v12076_v24 = vadd.f32 %v5530_v63, %v5442_v13  ;;  %v12079_v53 = vadd.f32 %v6266_v17, %v6178_v1 }
 0x515   : > { %14616 = vst [vmem:[#allocation188_spill] sm:$0xff] %v12074_v26  ;;  %v12081_v59 = vadd.f32 %v5529_v62, %v5441_v30  ;;  %v14618_v11 = vperm.slane %v10956_v38, 5  ;;  %v5275_v43 = vrot.slane %v5274_v16, 2  ;;  %v5624_v15 = vmul.f32 %v5565_v58, %v11939_v45  ;;  %v14629_v26 = vld [vmem:[#allocation203_spill] sm:$0xff]  ;;  %5965 = vperm.xlu0 %8129, %v11872_v57  }
 0x516   : > { %14614 = vst [vmem:[#allocation178_spill] sm:$0xff] %v12068_v25  ;;  %v14620_v13 = vperm.slane %v10956_v38, 6  ;;  %v14621_v1 = vperm.slane %v10956_v38, 7  ;;  %v14622_v17 = vperm.slane %v14530_v41, 7  ;;  %v14625_v60 = vperm.slane %v14602_v10, 1  ;;  %8100 = vset.pattern.permute.xlu1 %v14151_v55 }
 0x517   : > { %14617 = vst [vmem:[#allocation18_spill] sm:$0xff] %v12081_v59  ;;  %v6505_v39 = vmul.f32 %v14618_v11, %v11637_v3  ;;  %v6159_v45 = vmul.f32 1.442695, %v6136_v56  ;;  %v4933_v25 = vrot.slane %v4932_v61, 1  ;;  %v5276_v38 = vadd.f32 %v5275_v43, %v5274_v16  ;;  %v12116_v12 = vpop.permute.xlu1 %7369  ;;  %v14633_v43 = vld [vmem:[#allocation71_spill] sm:$0xff]  ;;  %7056 = vperm.xlu1 %8100, %v10897_v54  }
 0x518   : > { %14619 = vst [vmem:[#allocation59_spill] sm:$0xff] %v12086_v52  ;;  %v6874_v63 = vmul.f32 %v14620_v13, %v11637_v3  ;;  %v7243_v62 = vmul.f32 %v14621_v1, %v11637_v3  ;;  %v12099_v30 = vmul.f32 %v14623_v21, %v14622_v17  ;;  %v12104_v11 = vmul.f32 %v14626_v9, %v14625_v60  ;;  %v14628_v17 = vld [vmem:[#allocation194_spill] sm:$0xff]  ;;  %v14630_v9 = vld [vmem:[#allocation181_spill] sm:$0xff] }
 0x519   : > { %v5639_v13 = vsel %vm1349_vm12, %v5623_v50, 0.0  ;;  %v5640_v3 = vsel %vm1349_vm12, %v5624_v15, 0.0  ;;  %v6547_v21 = vmul.f32 %v14628_v17, %v12079_v53  ;;  %v6528_v60 = vmul.f32 1.442695, %v6505_v39  ;;  %14631 = vst [vmem:[#allocation62_spill] sm:$0xff] %v12116_v12  ;;  %v14636_v17 = vld [vmem:[#allocation72_spill] sm:$0xff]  ;;  %8093 = vset.pattern.permute.xlu2 %v14177_v0 }
 0x51a   : > { %14624 = vst [vmem:[#allocation27_spill] sm:$0xff] %v12099_v30  ;;  %v5641_v1 = vadd.f32 %v5640_v3, %v5639_v13  ;;  %v5810_v30 = vmul.f32 %v14629_v26, %v12081_v59  ;;  %v5277_v56 = vrot.slane %v5276_v38, 1  ;;  %v6897_v58 = vmul.f32 1.442695, %v6874_v63  ;;  %v14634_v13 = vld [vmem:[#allocation159_spill] sm:$0xff]  ;;  %7421 = vperm.xlu2 %8093, %v10820_v8  }
 0x51b   : > { %14627 = vst [vmem:[#allocation61_spill] sm:$0xff] %v12104_v11  ;;  %v5811_v11 = vmul.f32 %v14630_v9, %v12076_v24  ;;  %v7266_v50 = vmul.f32 1.442695, %v7243_v62  ;;  %v14632_v16 = vperm.slane %v14530_v41, 5  ;;  %v14635_v3 = vperm.slane %v14634_v13, 0  ;;  %v14638_v9 = vld [vmem:[#allocation73_spill] sm:$0xff] }
 0x51c   : > { %v5642_v26 = vrot.slane %v5641_v1, 4  ;;  %8427 = vpow2.f32 %v6159_v45  ;;  %v4934_v39 = vadd.f32 %v4933_v25, %v4932_v61  ;;  %v5278_v59 = vadd.f32 %v5277_v56, %v5276_v38  ;;  %v14643_v38 = vld [vmem:[#allocation74_spill] sm:$0xff] }
 0x51d   : > { %v12121_v15 = vmul.f32 %v14633_v43, %v14632_v16  ;;  %v12126_v52 = vmul.f32 %v14636_v17, %v14635_v3  ;;  %v12131_v63 = vmul.f32 %v11711_v27, %v14638_v9  ;;  %v14640_v62 = vperm.slane %v11011_v32, 7  ;;  %v3798_v3 = vpop.f32.mrf.mxu2  ;;  %v12151_v17 = vpop.permute.xlu2 %5933  ;;  %8130 = vset.pattern.permute.xlu0 %v14147_v23 }
 0x51e   : > { %v5643_v43 = vadd.f32 %v5642_v26, %v5641_v1  ;;  %v12139_v45 = vadd.f32 %v11971_v47, %v5810_v30  ;;  %v14641_v61 = vperm.slane %v11011_v32, 1  ;;  %8429 = vpow2.f32 %v6528_v60  ;;  %v3832_v26 = vpop.f32.mrf.mxu3  ;;  %6334 = vperm.xlu0 %8130, %v11872_v57  }
 0x51f   : > { %14637 = vst [vmem:[#allocation63_spill] sm:$0xff] %v12126_v52  ;;  %v7245_v16 = vmul.f32 %v14640_v62, %v11589_v7  ;;  %v14642_v27 = vperm.slane %v14602_v10, 2  ;;  %v14645_v7 = vld [vmem:[#allocation3_spill] sm:$0xff]  ;;  %v14646_v47 = vperm.slane %v11011_v32, 2  ;;  %8431 = vpow2.f32 %v6897_v58  ;;  %v3860_v62 = vpop.f32.mrf.mxu0  ;;  %v12164_v52 = vpop.permute.xlu0 %6310  ;;  %8101 = vset.pattern.permute.xlu1 %v14177_v0 }
 0x520   : > { %14639 = vst [vmem:[#allocation65_spill] sm:$0xff] %v12131_v63  ;;  %v5030_v25 = vmul.f32 %v14641_v61, %v11864_v29  ;;  %v5375_v1 = vadd.f32 %v14645_v7, %v5278_v59  ;;  %v5644_v9 = vrot.slane %v5643_v43, 2  ;;  %v3833_v60 = vadd.f32 %v3832_v26, %v3798_v3  ;;  %7425 = vperm.xlu1 %8101, %v10897_v54  }
 0x521   : > { %v12147_v56 = vmul.f32 %v14643_v38, %v14642_v27  ;;  %v5399_v30 = vmul.f32 %v14646_v47, %v11864_v29  ;;  %v12158_v61 = vadd.f32 %v11990_v44, %v6547_v21  ;;  %v14647_v59 = vperm.slane %v11011_v32, 3  ;;  %v14648_v38 = vld [vmem:[#allocation145_spill] sm:$0xff]  ;;  %14649 = vst [vmem:[#allocation67_spill] sm:$0xff] %v12164_v52  ;;  %v12181_v52 = vpop.permute.xlu1 %4842 }
 0x522   : > { %v5006_v7 = vadd.f32 %v14648_v38, %v4934_v39  ;;  %v7605_v12 = vrot.slane %v5375_v1, 7  ;;  %v7270_v58 = vmul.f32 1.442695, %v7245_v16  ;;  %v14650_v47 = vperm.slane %v11011_v32, 4  ;;  %v12170_v26 = vpop.eup %8427  ;;  %v3889_v38 = vpop.f32.mrf.mxu1  ;;  %8110 = vset.pattern.permute.xlu2 %v14152_v28 }
 0x523   : > { %14644 = vst [vmem:[#allocation66_spill] sm:$0xff] %v12147_v56  ;;  %v5768_v27 = vmul.f32 %v14647_v59, %v11864_v29  ;;  %v5645_v44 = vadd.f32 %v5644_v9, %v5643_v43  ;;  %v3861_v21 = vadd.f32 %v3860_v62, %v3833_v60  ;;  %v5054_v56 = vmul.f32 1.442695, %v5030_v25  ;;  %v14654_v25 = vld [vmem:[#allocation199_spill] sm:$0xff] }
 0x524   : > { %v6137_v3 = vmul.f32 %v14650_v47, %v11864_v29  ;;  %14651 = vst [vmem:[#allocation196_spill] sm:$0xff] %v12170_v26  ;;  %v14652_v59 = vperm.slane %v11011_v32, 5  ;;  %v12176_v39 = vadd.f32 %v12033_v33, %v5811_v11  ;;  %v7765_v1 = vsel %vm1084_vm0, %v5006_v7, %v7605_v12  ;;  %v12179_v34 = vpop.eup %8429  ;;  %v14655_v60 = vld [vmem:[#allocation163_spill] sm:$0xff] }
 0x525   : > { %v5423_v16 = vmul.f32 1.442695, %v5399_v30  ;;  %8433 = vpow2.f32 %v7266_v50  ;;  %14653 = vst [vmem:[#allocation157_spill] sm:$0xff] %v12179_v34  ;;  %v5646_v47 = vrot.slane %v5645_v44, 1  ;;  %v12183_v43 = vadd.f32 %v3889_v38, %v3861_v21  ;;  %v12193_v11 = vld [vmem:[%s13964_s11 + $0x50] sm:$0xff]  ;;  %v3806_v21 = vpop.f32.mrf.mxu2  ;;  %v14662_v34 = vld [vmem:[#allocation184_spill] sm:$0xff] }
 0x526   : > { %v6506_v63 = vmul.f32 %v14652_v59, %v11864_v29  ;;  %v6916_v9 = vmul.f32 %v14654_v25, %v12158_v61  ;;  %v4643_v62 = vperm.slane %v14655_v60, 0  ;;  %v12188_v59 = vpop.eup %8431  ;;  %8435 = vpow2.f32 %v7270_v58  ;;  %v14660_v25 = vld [vmem:[#allocation75_spill] sm:$0xff]  ;;  %8131 = vset.pattern.permute.xlu0 %v14148_v42 }
 0x527   : > { %14656 = vst [vmem:[#allocation36_spill] sm:$0xff] %v12188_v59  ;;  %v5792_v33 = vmul.f32 1.442695, %v5768_v27  ;;  %v6161_v12 = vmul.f32 1.442695, %v6137_v3  ;;  %v14657_v50 = vperm.slane %v11011_v32, 6  ;;  %v5647_v7 = vadd.f32 %v5646_v47, %v5645_v44  ;;  %v3836_v44 = vpop.f32.mrf.mxu3  ;;  %6703 = vperm.xlu0 %8131, %v11872_v57  }
 0x528   : > { %8437 = vpow2.f32 %v5054_v56  ;;  %v6530_v38 = vmul.f32 1.442695, %v6506_v63  ;;  %v14658_v58 = vperm.slane %v11011_v32, 7  ;;  %v14659_v3 = vperm.slane %v14634_v13, 1  ;;  %v14665_v47 = vld [vmem:[#allocation14_spill] sm:$0xff]  ;;  %8118 = vset.pattern.permute.xlu1 %v14152_v28 }
 0x529   : > { %v6875_v30 = vmul.f32 %v14657_v50, %v11864_v29  ;;  %v12209_v26 = vmul.f32 %v14662_v34, %v12176_v39  ;;  %8439 = vpow2.f32 %v5423_v16  ;;  %v14663_v32 = vperm.slane %v14530_v41, 6  ;;  %4872 = vperm.xlu1 %8118, %v11539_v37  }
 0x52a   : > { %v7244_v27 = vmul.f32 %v14658_v58, %v11864_v29  ;;  %v12205_v59 = vmul.f32 %v14660_v25, %v14659_v3  ;;  %v14664_v29 = vld [vmem:[#allocation77_spill] sm:$0xff]  ;;  %v5744_v50 = vadd.f32 %v14665_v47, %v5647_v7  ;;  %v6303_v58 = vpop.permute.xlu2 %6302  ;;  %v3837_v34 = vadd.f32 %v3836_v44, %v3806_v21  ;;  %v3865_v3 = vpop.f32.mrf.mxu0  ;;  %v12232_v21 = vld [vmem:[%s13964_s11 + $0x58] sm:$0xff] }
 0x52b   : > { %v12217_v56 = vmul.f32 %v14664_v29, %v14663_v32  ;;  %v4656_v25 = vmul.f32 %v4643_v62, %v12193_v11  ;;  %8441 = vpow2.f32 %v5792_v33  ;;  %v6899_v16 = vmul.f32 1.442695, %v6875_v30  ;;  %v12236_v47 = vpop.permute.xlu0 %6679  ;;  %v3895_v30 = vpop.f32.mrf.mxu1 }
 0x52c   : > { %14661 = vst [vmem:[#allocation179_spill] sm:$0xff] %v12205_v59  ;;  %v12222_v59 = vpop.eup %8433  ;;  %v7629_v32 = vrot.slane %v5744_v50, 6  ;;  %v5993_v7 = vmul.f32 %v12151_v17, %v12013_v6  ;;  %v3866_v29 = vadd.f32 %v3865_v3, %v3837_v34  ;;  %8443 = vpow2.f32 %v6161_v12  ;;  %v14670_v12 = vld [vmem:[#allocation183_spill] sm:$0xff] }
 0x52d   : > { %14666 = vst [vmem:[#allocation68_spill] sm:$0xff] %v12222_v59  ;;  %v12234_v44 = vpop.eup %8435  ;;  %v6362_v33 = vmul.f32 %v6303_v58, %v12079_v53  ;;  %8445 = vpow2.f32 %v6530_v38  ;;  %v14668_v6 = vperm.slane %v14655_v60, 1  ;;  %v7268_v50 = vmul.f32 1.442695, %v7244_v27  ;;  %v14672_v53 = vld [vmem:[#allocation195_spill] sm:$0xff]  ;;  %v12255_v58 = vpop.permute.xlu1 %5199 }
 0x52e   : > { %14667 = vst [vmem:[#allocation34_spill] sm:$0xff] %v12234_v44  ;;  %v12242_v34 = vpop.eup %8437  ;;  %v5992_v3 = vmul.f32 %v14670_v12, %v11665_v51  ;;  %v12247_v63 = vsel %vm7773_vm7, %v7765_v1, %v7629_v32  ;;  %v12249_v44 = vadd.f32 %v3895_v30, %v3866_v29  ;;  %v4682_v59 = vmul.f32 1.442695, %v4656_v25  ;;  %v14675_v32 = vld [vmem:[#allocation78_spill] sm:$0xff]  ;;  %v3919_v30 = vpop.f32.mrf.mxu2 }
 0x52f   : > { %v5032_v17 = vmul.f32 %v14668_v6, %v12193_v11  ;;  %14669 = vst [vmem:[#allocation191_spill] sm:$0xff] %v12242_v34  ;;  %v12251_v23 = vpop.eup %8439  ;;  %v6361_v38 = vmul.f32 %v14672_v53, %v11730_v35  ;;  %v14673_v27 = vperm.slane %v14655_v60, 2  ;;  %v4657_v51 = vmul.f32 %v4643_v62, %v12232_v21  ;;  %8132 = vset.pattern.permute.xlu0 %v14151_v55  ;;  %v14711_v55 = vld [vmem:[#allocation82_spill] sm:$0xff] }
 0x530   : > { %14671 = vst [vmem:[#allocation33_spill] sm:$0xff] %v12251_v23  ;;  %v14674_v1 = vperm.slane %v14602_v10, 3  ;;  %v6009_v25 = vsel %vm1349_vm12, %v5993_v7, 0.0  ;;  %v12269_v35 = vadd.f32 %v12009_v19, %v6916_v9  ;;  %8447 = vpow2.f32 %v6899_v16  ;;  %v14679_v7 = vld [vmem:[#allocation207_spill] sm:$0xff]  ;;  %v3945_v19 = vpop.f32.mrf.mxu3  ;;  %v14680_v9 = vld [vmem:[#allocation206_spill] sm:$0xff]  ;;  %7072 = vperm.xlu0 %8132, %v11872_v57  }
 0x531   : > { %v5401_v6 = vmul.f32 %v14673_v27, %v12193_v11  ;;  %v12271_v12 = vpop.eup %8441  ;;  %v6378_v53 = vsel %vm1349_vm12, %v6362_v33, 0.0  ;;  %v3920_v62 = vadd.f32 %v3919_v30, %v12183_v43  ;;  %v5058_v27 = vmul.f32 1.442695, %v5032_v17  ;;  %8119 = vset.pattern.permute.xlu1 %v14143_v20 }
 0x532   : > { %v12265_v29 = vmul.f32 %v14675_v32, %v14674_v1  ;;  %14677 = vst [vmem:[#allocation69_spill] sm:$0xff] %v12271_v12  ;;  %8449 = vpow2.f32 %v7268_v50  ;;  %v12276_v34 = vpop.eup %8443  ;;  %v6008_v1 = vsel %vm1349_vm12, %v5992_v3, 0.0  ;;  %v6730_v32 = vmul.f32 %v14679_v7, %v11840_v31  ;;  %v6672_v50 = vpop.permute.xlu2 %6671  ;;  %v14683_v12 = vld [vmem:[#allocation182_spill] sm:$0xff]  ;;  %5223 = vperm.xlu1 %8119, %v11539_v37  }
 0x533   : > { %14678 = vst [vmem:[#allocation70_spill] sm:$0xff] %v12276_v34  ;;  %v6179_v16 = vmul.f32 %v14680_v9, %v12139_v45  ;;  %8451 = vpow2.f32 %v4682_v59  ;;  %v12285_v33 = vpop.eup %8445  ;;  %v6377_v43 = vsel %vm1349_vm12, %v6361_v38, 0.0  ;;  %v6010_v17 = vadd.f32 %v6009_v25, %v6008_v1  ;;  %v3981_v31 = vpop.f32.mrf.mxu0  ;;  %v14690_v9 = vld [vmem:[#allocation80_spill] sm:$0xff] }
 0x534   : > { %14676 = vst [vmem:[#allocation174_spill] sm:$0xff] %v12265_v29  ;;  %v12289_v3 = vadd.f32 %v3945_v19, %v3920_v62  ;;  %v5427_v30 = vmul.f32 1.442695, %v5401_v6  ;;  %v6379_v7 = vadd.f32 %v6378_v53, %v6377_v43  ;;  %v6731_v34 = vmul.f32 %v6672_v50, %v12158_v61  ;;  %v4015_v8 = vpop.f32.mrf.mxu1  ;;  %v4626_v6 = vld [vmem:[%s13964_s11 + $0x60] sm:$0xff]  ;;  %v12316_v50 = vpop.permute.xlu0 %7048 }
 0x535   : > { %14681 = vst [vmem:[#allocation194_spill] sm:$0xff] %v12285_v33  ;;  %v14684_v59 = vperm.slane %v14655_v60, 3  ;;  %v12299_v38 = vadd.f32 %v12058_v4, %v12209_v26  ;;  %8453 = vpow2.f32 %v5058_v27  ;;  %v12306_v25 = vmul.f32 1.442695, %v4657_v51 }
 0x536   : > { %14682 = vst [vmem:[#allocation203_spill] sm:$0xff] %v12289_v3  ;;  %v12308_v53 = vpop.eup %8447  ;;  %v6746_v62 = vsel %vm1349_vm12, %v6730_v32, 0.0  ;;  %v6747_v1 = vsel %vm1349_vm12, %v6731_v34, 0.0  ;;  %v6011_v43 = vrot.slane %v6010_v17, 4  ;;  %v14688_v51 = vperm.slane %v14655_v60, 1 }
 0x537   : > { %v5770_v33 = vmul.f32 %v14684_v59, %v12193_v11  ;;  %14685 = vst [vmem:[#allocation181_spill] sm:$0xff] %v12306_v25  ;;  %v6748_v59 = vadd.f32 %v6747_v1, %v6746_v62  ;;  %v14689_v34 = vperm.slane %v14634_v13, 2  ;;  %v6380_v26 = vrot.slane %v6379_v7, 4  ;;  %v12329_v25 = vpop.permute.xlu1 %5568 }
 0x538   : > { %14686 = vst [vmem:[#allocation71_spill] sm:$0xff] %v12308_v53  ;;  %v12314_v19 = vpop.eup %8449  ;;  %v12322_v61 = vmul.f32 %v14688_v51, %v12232_v21  ;;  %v14692_v53 = vperm.slane %v14683_v12, 0  ;;  %v14693_v21 = vperm.slane %v14683_v12, 1  ;;  %8455 = vpow2.f32 %v5427_v30  ;;  %8133 = vset.pattern.permute.xlu0 %v14177_v0 }
 0x539   : > { %14687 = vst [vmem:[#allocation72_spill] sm:$0xff] %v12314_v19  ;;  %v8452_v32 = vpop.eup %8451  ;;  %v12327_v4 = vmul.f32 %v14690_v9, %v14689_v34  ;;  %v3923_v19 = vpop.f32.mrf.mxu2  ;;  %v6749_v27 = vrot.slane %v6748_v59, 4  ;;  %v14694_v3 = vperm.slane %v14530_v41, 7  ;;  %v14695_v9 = vld [vmem:[#allocation81_spill] sm:$0xff]  ;;  %v12344_v29 = vadd.f32 %v11995_v40, %v6179_v16  ;;  %v14701_v40 = vld [vmem:[#allocation186_spill] sm:$0xff]  ;;  %7441 = vperm.xlu0 %8133, %v11872_v57  }
 0x53a   : > { %v4658_v62 = vmul.f32 %v14692_v53, %v4626_v6  ;;  %v3924_v23 = vadd.f32 %v3923_v19, %v12249_v44  ;;  %v5034_v51 = vmul.f32 %v14693_v21, %v4626_v6  ;;  %v14697_v53 = vperm.slane %v14683_v12, 2  ;;  %v7041_v44 = vpop.permute.xlu2 %7040 }
 0x53b   : > { %14691 = vst [vmem:[#allocation73_spill] sm:$0xff] %v12327_v4  ;;  %v12340_v34 = vmul.f32 %v14695_v9, %v14694_v3  ;;  %v3949_v4 = vpop.f32.mrf.mxu3  ;;  %v12349_v19 = vpop.eup %8453  ;;  %v7099_v30 = vmul.f32 %v11572_v46, %v11923_v22  ;;  %v6012_v41 = vadd.f32 %v6011_v43, %v6010_v17  ;;  %v12357_v21 = vmul.f32 1.442695, %v5770_v33 }
 0x53c   : > { %v5403_v1 = vmul.f32 %v14697_v53, %v4626_v6  ;;  %14698 = vst [vmem:[#allocation3_spill] sm:$0xff] %v12349_v19  ;;  %v12355_v3 = vadd.f32 %v3949_v4, %v3924_v23  ;;  %v6549_v16 = vmul.f32 %v14701_v40, %v12299_v38  ;;  %v6381_v9 = vadd.f32 %v6380_v26, %v6379_v7  ;;  %v14702_v53 = vld [vmem:[#allocation198_spill] sm:$0xff]  ;;  %v3989_v19 = vpop.f32.mrf.mxu0  ;;  %v4019_v23 = vpop.f32.mrf.mxu1 }
 0x53d   : > { %14696 = vst [vmem:[#allocation74_spill] sm:$0xff] %v12340_v34  ;;  %4867 = vperm.xlu2 %8110, %v14702_v53   ;;  %v4686_v42 = vmul.f32 1.442695, %v4658_v62  ;;  %v14703_v46 = vperm.slane %v14683_v12, 3  ;;  %v6750_v17 = vadd.f32 %v6749_v27, %v6748_v59  ;;  %v7100_v43 = vmul.f32 %v7041_v44, %v12269_v35  ;;  %v14705_v7 = vld [vmem:[#allocation210_spill] sm:$0xff] }
 0x53e   : > { %14699 = vst [vmem:[#allocation145_spill] sm:$0xff] %v12355_v3  ;;  %v4016_v54 = vadd.f32 %v4015_v8, %v3981_v31  ;;  %v5062_v33 = vmul.f32 1.442695, %v5034_v51  ;;  %v12367_v4 = vadd.f32 %v4019_v23, %v3989_v19  ;;  %v6548_v26 = vmul.f32 %v14705_v7, %v12344_v29  ;;  %v12375_v27 = vpop.eup %8455 }
 0x53f   : > { %14700 = vst [vmem:[#allocation199_spill] sm:$0xff] %v12357_v21  ;;  %v5772_v22 = vmul.f32 %v14703_v46, %v4626_v6  ;;  %v14706_v62 = vperm.slane %v14683_v12, 4  ;;  %v14707_v46 = vperm.slane %v14683_v12, 5  ;;  %v7115_v31 = vsel %vm1349_vm12, %v7099_v30, 0.0  ;;  %v5938_v30 = vpop.permute.xlu1 %5937 }
 0x540   : > { %14704 = vst [vmem:[#allocation75_spill] sm:$0xff] %v12367_v4  ;;  %v6013_v8 = vrot.slane %v6012_v41, 2  ;;  %v7116_v51 = vsel %vm1349_vm12, %v7100_v43, 0.0  ;;  %v5431_v44 = vmul.f32 1.442695, %v5403_v1  ;;  %v6382_v21 = vrot.slane %v6381_v9, 2 }
 0x541   : > { %v6141_v40 = vmul.f32 %v14706_v62, %v4626_v6  ;;  %v6510_v59 = vmul.f32 %v14707_v46, %v4626_v6  ;;  %14708 = vst [vmem:[#allocation184_spill] sm:$0xff] %v12375_v27  ;;  %v7117_v19 = vadd.f32 %v7116_v51, %v7115_v31  ;;  %v4043_v23 = vpop.f32.mrf.mxu2  ;;  %v12379_v3 = vmul.f32 0.0, %v8452_v32  ;;  %v12388_v6 = vpop.permute.xlu0 %7417  ;;  %v14712_v27 = vld [vmem:[#allocation204_spill] sm:$0xff]  ;;  %8150 = vset.pattern.permute.xlu0 %v14152_v28 }
 0x542   : > { %v12381_v7 = vmul.f32 1.442695, %v5772_v22  ;;  %v14710_v62 = vperm.slane %v14602_v10, 4  ;;  %v6751_v46 = vrot.slane %v6750_v17, 2  ;;  %v7285_v43 = vmul.f32 %v14712_v27, %v12269_v35 }
 0x543   : > { %14709 = vst [vmem:[#allocation77_spill] sm:$0xff] %v12379_v3  ;;  %v4044_v1 = vadd.f32 %v4043_v23, %v4016_v54  ;;  %v7118_v34 = vrot.slane %v7117_v19, 4  ;;  %v4072_v31 = vpop.f32.mrf.mxu3  ;;  %8457 = vpow2.f32 %v4686_v42  ;;  %v12392_v32 = vmul.f32 1.442695, %v6141_v40 }
 0x544   : > { %v12386_v4 = vmul.f32 %v14711_v55, %v14710_v62  ;;  %v12394_v22 = vmul.f32 1.442695, %v6510_v59  ;;  %v7468_v51 = vmul.f32 %v11655_v2, %v11978_v49  ;;  %v12399_v55 = vadd.f32 %v12121_v15, %v6549_v16  ;;  %v7410_v2 = vpop.permute.xlu2 %7409  ;;  %v4102_v49 = vpop.f32.mrf.mxu0 }
 0x545   : > { %14713 = vst [vmem:[#allocation14_spill] sm:$0xff] %v12392_v32  ;;  %v6014_v62 = vadd.f32 %v6013_v8, %v6012_v41  ;;  %v7389_v3 = vadd.f32 %v12028_v5, %v7285_v43  ;;  %v6383_v35 = vadd.f32 %v6382_v21, %v6381_v9  ;;  %v7119_v54 = vadd.f32 %v7118_v34, %v7117_v19  ;;  %v14718_v8 = vld [vmem:[#allocation190_spill] sm:$0xff]  ;;  %v4128_v57 = vpop.f32.mrf.mxu1 }
 0x546   : > { %14714 = vst [vmem:[#allocation183_spill] sm:$0xff] %v12394_v22  ;;  %8111 = vset.pattern.permute.xlu2 %v14143_v20  ;;  %v4073_v42 = vadd.f32 %v4072_v31, %v4044_v1  ;;  %8459 = vpow2.f32 %v5062_v33  ;;  %v6752_v40 = vadd.f32 %v6751_v46, %v6750_v17  ;;  %v14715_v41 = vperm.slane %v14655_v60, 4  ;;  %v14717_v33 = vld [vmem:[#allocation155_spill] sm:$0xff]  ;;  %v14721_v46 = vld [vmem:[#allocation98_spill] sm:$0xff] }
 0x547   : > { %5219 = vperm.xlu2 %8111, %v14702_v53   ;;  %8461 = vpow2.f32 %v5431_v44  ;;  %v4913_v34 = vmul.f32 %v11738_v48, %v11935_v18  ;;  %v7120_v21 = vrot.slane %v7119_v54, 2  ;;  %v7469_v16 = vmul.f32 %v7410_v2, %v7389_v3  ;;  %v14724_v2 = vld [vmem:[#allocation59_spill] sm:$0xff] }
 0x548   : > { %v12410_v5 = vmul.f32 %v14715_v41, %v12193_v11  ;;  %v12416_v9 = vadd.f32 %v12023_v14, %v6548_v26  ;;  %v7484_v17 = vsel %vm1349_vm12, %v7468_v51, 0.0  ;;  %v5257_v59 = vmul.f32 %v14717_v33, %v11997_v36  ;;  %v14720_v26 = vld [vmem:[#allocation28_spill] sm:$0xff]  ;;  %v8551_v36 = vld [vmem:[%s13965_s12] sm:$0x1]  ;;  %v6307_v41 = vpop.permute.xlu1 %6306 }
 0x549   : > { %v6015_v27 = vrot.slane %v6014_v62, 1  ;;  %v12423_v11 = vmul.f32 %v14718_v8, %v12399_v55  ;;  %v12426_v48 = vpop.eup %8457  ;;  %v6384_v18 = vrot.slane %v6383_v35, 1  ;;  %v7121_v3 = vadd.f32 %v7120_v21, %v7119_v54  ;;  %v14723_v54 = vld [vmem:[#allocation26_spill] sm:$0xff]  ;;  %v12447_v8 = vpop.permute.xlu0 %4862 }
 0x54a   : > { %14716 = vst [vmem:[#allocation195_spill] sm:$0xff] %v12410_v5  ;;  %v7485_v44 = vsel %vm1349_vm12, %v7469_v16, 0.0  ;;  %v4103_v14 = vadd.f32 %v4102_v49, %v4073_v42  ;;  %v5256_v19 = vmul.f32 %v12255_v58, %v14720_v26  ;;  %v6753_v23 = vrot.slane %v6752_v40, 1 }
 0x54b   : > { %14719 = vst [vmem:[#allocation78_spill] sm:$0xff] %v12426_v48  ;;  %v12435_v43 = vmul.f32 %v8551_v36, %v14721_v46  ;;  %v7486_v1 = vadd.f32 %v7485_v44, %v7484_v17  ;;  %v4936_v51 = vsel %vm1349_vm12, %v4913_v34, 0.0  ;;  %v5626_v42 = vmul.f32 %v14723_v54, %v12076_v24  ;;  %v14726_v17 = vld [vmem:[#allocation18_spill] sm:$0xff]  ;;  %v14727_v34 = vld [vmem:[#allocation67_spill] sm:$0xff] }
 0x54c   : > { %v12437_v31 = vpop.eup %8459  ;;  %v5995_v58 = vmul.f32 %v14724_v2, %v12176_v39  ;;  %v7122_v49 = vrot.slane %v7121_v3, 1  ;;  %v5280_v16 = vsel %vm1349_vm12, %v5257_v59, 0.0  ;;  %v6016_v33 = vadd.f32 %v6015_v27, %v6014_v62 }
 0x54d   : > { %14722 = vst [vmem:[#allocation207_spill] sm:$0xff] %v12437_v31  ;;  %v12444_v21 = vpop.eup %8461  ;;  %v5625_v44 = vmul.f32 %v12329_v25, %v14726_v17  ;;  %v7487_v26 = vrot.slane %v7486_v1, 4  ;;  %v6364_v36 = vmul.f32 %v14727_v34, %v12299_v38  ;;  %v6385_v24 = vadd.f32 %v6384_v18, %v6383_v35  ;;  %v14729_v35 = vld [vmem:[#allocation175_spill] sm:$0xff]  ;;  %v12466_v18 = vpop.permute.xlu2 %4852  ;;  %v14733_v17 = vld [vmem:[#allocation56_spill] sm:$0xff] }
 0x54e   : > { %14725 = vst [vmem:[#allocation206_spill] sm:$0xff] %v12444_v21  ;;  %v5994_v46 = vmul.f32 %v5938_v30, %v12139_v45  ;;  %v12455_v39 = vadd.f32 %v4128_v57, %v4103_v14  ;;  %v5279_v54 = vsel %vm1349_vm12, %v5256_v19, 0.0  ;;  %v6754_v59 = vadd.f32 %v6753_v23, %v6752_v40  ;;  %v4132_v32 = vpop.f32.mrf.mxu1 }
 0x54f   : > { %v7488_v62 = vadd.f32 %v7487_v26, %v7486_v1  ;;  %v6363_v27 = vmul.f32 %v6307_v41, %v12344_v29  ;;  %v14728_v2 = vmov 2   ;;  %v5649_v25 = vsel %vm1349_vm12, %v5626_v42, 0.0  ;;  %v14730_v29 = vld [vmem:[#allocation29_spill] sm:$0xff]  ;;  %v14731_v1 = vld [vmem:[#allocation39_spill] sm:$0xff] }
 0x550   : > { %8112 = vset.pattern.permute.xlu2 %v14728_v2  ;;  %v6018_v38 = vsel %vm1349_vm12, %v5995_v58, 0.0  ;;  %v4912_v45 = vmul.f32 %v12181_v52, %v14729_v35  ;;  %v7123_v30 = vadd.f32 %v7122_v49, %v7121_v3  ;;  %v6733_v40 = vmul.f32 %v12236_v47, %v12399_v55  ;;  %4892 = vperm.xlu0 %8150, %v12455_v39   ;;  %v14732_v58 = vld [vmem:[#allocation51_spill] sm:$0xff] }
 0x551   : > { %5588 = vperm.xlu2 %8112, %v14702_v53   ;;  %v6113_v14 = vadd.f32 %v14730_v29, %v6016_v33  ;;  %v5648_v19 = vsel %vm1349_vm12, %v5625_v44, 0.0  ;;  %v7489_v23 = vrot.slane %v7488_v62, 2  ;;  %v6482_v57 = vadd.f32 %v14731_v1, %v6385_v24  ;;  %v12483_v29 = vpop.permute.xlu0 %5215  ;;  %8120 = vset.pattern.permute.xlu1 %v14728_v2 }
 0x552   : > { %v5281_v42 = vadd.f32 %v5280_v16, %v5279_v54  ;;  %v6017_v52 = vsel %vm1349_vm12, %v5994_v46, 0.0  ;;  %v6387_v3 = vsel %vm1349_vm12, %v6364_v36, 0.0  ;;  %v6851_v49 = vadd.f32 %v14732_v58, %v6754_v59  ;;  %v6676_v46 = vpop.permute.xlu1 %6675  ;;  %5592 = vperm.xlu1 %8120, %v11539_v37   ;;  %v14735_v58 = vld [vmem:[#allocation215_spill] sm:$0xff] }
 0x553   : > { %v7490_v47 = vadd.f32 %v7489_v23, %v7488_v62  ;;  %v6386_v55 = vsel %vm1349_vm12, %v6363_v27, 0.0  ;;  %v4935_v41 = vsel %vm1349_vm12, %v4912_v45, 0.0  ;;  %v5650_v33 = vadd.f32 %v5649_v25, %v5648_v19 }
 0x554   : > { %v7220_v44 = vadd.f32 %v14733_v17, %v7123_v30  ;;  %v6756_v26 = vsel %vm1349_vm12, %v6733_v40, 0.0  ;;  %v7653_v16 = vrot.slane %v6113_v14, 5  ;;  %v6019_v34 = vadd.f32 %v6018_v38, %v6017_v52 }
 0x555   : > { %v7491_v24 = vrot.slane %v7490_v47, 1  ;;  %v7677_v54 = vrot.slane %v6482_v57, 4  ;;  %v5282_v35 = vrot.slane %v5281_v42, 4  ;;  %v6388_v36 = vadd.f32 %v6387_v3, %v6386_v55  ;;  %v12493_v1 = vpop.permute.xlu2 %5207 }
 0x556   : > { %v6732_v59 = vmul.f32 %v6676_v46, %v12416_v9  ;;  %v4937_v62 = vadd.f32 %v4936_v51, %v4935_v41  ;;  %v7701_v27 = vrot.slane %v6851_v49, 3  ;;  %v5651_v25 = vrot.slane %v5650_v33, 4 }
 0x557   : > { %v7492_v45 = vadd.f32 %v7491_v24, %v7490_v47  ;;  %v7725_v30 = vrot.slane %v7220_v44, 2  ;;  %v14734_v40 = vmov 3   ;;  %v7783_v51 = vsel %vm7782_vm8, %v12247_v63, %v7653_v16 }
 0x558   : > { %v6755_v38 = vsel %vm1349_vm12, %v6732_v59, 0.0  ;;  %v6020_v14 = vrot.slane %v6019_v34, 4  ;;  %v7792_v57 = vsel %vm7791_vm9, %v7783_v51, %v7677_v54  ;;  %v5283_v52 = vadd.f32 %v5282_v35, %v5281_v42  ;;  %8151 = vset.pattern.permute.xlu0 %v14143_v20  ;;  %v14738_v35 = vld [vmem:[#allocation201_spill] sm:$0xff] }
 0x559   : > { %8113 = vset.pattern.permute.xlu2 %v14734_v40  ;;  %v7589_v19 = vadd.f32 %v12435_v43, %v7492_v45  ;;  %v6757_v23 = vadd.f32 %v6756_v26, %v6755_v38  ;;  %v6389_v3 = vrot.slane %v6388_v36, 4  ;;  %v6917_v49 = vmul.f32 %v14735_v58, %v12416_v9  ;;  %5239 = vperm.xlu0 %8151, %v12455_v39   ;;  %v14736_v9 = vld [vmem:[#allocation169_spill] sm:$0xff]  ;;  %v12541_v58 = vpop.permute.xlu0 %5584 }
 0x55a   : > { %5957 = vperm.xlu2 %8113, %v14702_v53   ;;  %v7022_v63 = vadd.f32 %v12217_v56, %v12423_v11  ;;  %v7801_v43 = vsel %vm7800_vm10, %v7792_v57, %v7701_v27  ;;  %v5652_v55 = vadd.f32 %v5651_v25, %v5650_v33  ;;  %v12513_v44 = vmul.f32 1.442695, %v12322_v61  ;;  %v7045_v54 = vpop.permute.xlu1 %7044  ;;  %v12525_v61 = vld [vmem:[%s13964_s11 + $0x78] sm:$0xff]  ;;  %v14742_v38 = vld [vmem:[#allocation85_spill] sm:$0xff]  ;;  %8121 = vset.pattern.permute.xlu1 %v14734_v40 }
 0x55b   : > { %v7749_v47 = vrot.slane %v7589_v19, 1  ;;  %v6758_v42 = vrot.slane %v6757_v23, 4  ;;  %v7810_v41 = vsel %vm7809_vm13, %v7801_v43, %v7725_v30  ;;  %v7021_v17 = vadd.f32 %v14736_v9, %v6917_v49  ;;  %v14740_v25 = vld [vmem:[#allocation84_spill] sm:$0xff]  ;;  %5961 = vperm.xlu1 %8121, %v11539_v37   ;;  %v4048_v9 = vpop.f32.mrf.mxu2 }
 0x55c   : > { %14737 = vst [vmem:[#allocation80_spill] sm:$0xff] %v12513_v44  ;;  %v7102_v26 = vmul.f32 %v12316_v50, %v7022_v63  ;;  %v4938_v16 = vrot.slane %v4937_v62, 4  ;;  %v6021_v24 = vadd.f32 %v6020_v14, %v6019_v34  ;;  %v5284_v11 = vrot.slane %v5283_v52, 2  ;;  %v14743_v14 = vld [vmem:[#allocation193_spill] sm:$0xff]  ;;  %v14766_v44 = vld [vmem:[#allocation15_spill] sm:$0xff] }
 0x55d   : > { %v7818_v56 = vsel %vm1109_vm11, %v7810_v41, %v7749_v47  ;;  %v6390_v46 = vadd.f32 %v6389_v3, %v6388_v36  ;;  %v14053_v59 = vperm.slane %v14738_v35, 0  ;;  %v6759_v27 = vadd.f32 %v6758_v42, %v6757_v23 }
 0x55e   : > { %7826 = vst.msk [vmem:[%s12504_s22] sm:$0xff] %vm1349_vm12, %v7818_v56  ;;  %v7101_v45 = vmul.f32 %v7045_v54, %v7021_v17  ;;  %8463 = vpow2.f32 %v12381_v7  ;;  %v14052_v50 = vperm.slane %v14738_v35, 1  ;;  %v14739_v34 = vperm.slane %v14602_v10, 0  ;;  %v14746_v54 = vld [vmem:[#allocation75_spill] sm:$0xff] }
 0x55f   : > { %v14741_v30 = vperm.slane %v14634_v13, 3  ;;  %v7287_v19 = vmul.f32 %v14743_v14, %v7022_v63  ;;  %v5653_v7 = vrot.slane %v5652_v55, 2  ;;  %v7125_v23 = vsel %vm1349_vm12, %v7102_v26, 0.0  ;;  %v12547_v63 = vpop.permute.xlu2 %5576  ;;  %v14745_v26 = vld [vmem:[#allocation74_spill] sm:$0xff] }
 0x560   : > { %v12531_v36 = vmul.f32 %v14740_v25, %v14739_v34  ;;  %v4939_v57 = vadd.f32 %v4938_v16, %v4937_v62  ;;  %v6022_v3 = vrot.slane %v6021_v24, 2  ;;  %v7124_v49 = vsel %vm1349_vm12, %v7101_v45, 0.0  ;;  %v14747_v25 = vld [vmem:[#allocation219_spill] sm:$0xff] }
 0x561   : > { %v12536_v51 = vmul.f32 %v14742_v38, %v14741_v30  ;;  %v14744_v43 = vmov 4   ;;  %v5285_v47 = vadd.f32 %v5284_v11, %v5283_v52  ;;  %v6391_v42 = vrot.slane %v6390_v46, 2  ;;  %8152 = vset.pattern.permute.xlu0 %v14728_v2 }
 0x562   : > { %8114 = vset.pattern.permute.xlu2 %v14744_v43  ;;  %v7126_v41 = vadd.f32 %v7125_v23, %v7124_v49  ;;  %v4661_v62 = vmul.f32 %v14053_v59, %v12525_v61  ;;  %v7391_v16 = vadd.f32 %v14745_v26, %v7287_v19  ;;  %v6760_v56 = vrot.slane %v6759_v27, 2  ;;  %5608 = vperm.xlu0 %8152, %v12455_v39   ;;  %v14749_v26 = vld [vmem:[#allocation76_spill] sm:$0xff] }
 0x563   : > { %6326 = vperm.xlu2 %8114, %v14702_v53   ;;  %v12555_v45 = vadd.f32 %v4048_v9, %v14746_v54  ;;  %v5037_v52 = vmul.f32 %v14052_v50, %v12525_v61  ;;  %v5654_v11 = vadd.f32 %v5653_v7, %v5652_v55  ;;  %v7286_v30 = vmul.f32 %v14747_v25, %v7021_v17  ;;  %v12569_v9 = vld [vmem:[%s13965_s12 + $0x2] sm:$0x1]  ;;  %v14751_v25 = vld [vmem:[#allocation27_spill] sm:$0xff]  ;;  %v14753_v50 = vld [vmem:[#allocation86_spill] sm:$0xff] }
 0x564   : > { %v7127_v34 = vrot.slane %v7126_v41, 4  ;;  %v12563_v14 = vpop.eup %8463  ;;  %v4940_v19 = vrot.slane %v4939_v57, 2  ;;  %v7471_v23 = vmul.f32 %v12388_v6, %v7391_v16  ;;  %v6023_v49 = vadd.f32 %v6022_v3, %v6021_v24  ;;  %v7414_v24 = vpop.permute.xlu1 %7413  ;;  %8122 = vset.pattern.permute.xlu1 %v14744_v43 }
 0x565   : > { %14748 = vst [vmem:[#allocation81_spill] sm:$0xff] %v12563_v14  ;;  %v12573_v55 = vmul.f32 %v12569_v9, %v14749_v26  ;;  %v5286_v7 = vrot.slane %v5285_v47, 1  ;;  %v6392_v54 = vadd.f32 %v6391_v42, %v6390_v46  ;;  %v7390_v33 = vadd.f32 %v14751_v25, %v7286_v30  ;;  %6330 = vperm.xlu1 %8122, %v11539_v37   ;;  %v12595_v30 = vpop.permute.xlu0 %5953  ;;  %v14761_v25 = vld [vmem:[#allocation234_spill] sm:$0xff] }
 0x566   : > { %v7128_v17 = vadd.f32 %v7127_v34, %v7126_v41  ;;  %v14752_v15 = vperm.slane %v14602_v10, 5  ;;  %v6761_v6 = vadd.f32 %v6760_v56, %v6759_v27  ;;  %v4692_v3 = vmul.f32 1.442695, %v4661_v62  ;;  %v14757_v34 = vld [vmem:[#allocation88_spill] sm:$0xff]  ;;  %14758 = vst [vmem:[#allocation198_spill] sm:$0xff] %v12595_v30 }
 0x567   : > { %14750 = vst [vmem:[#allocation186_spill] sm:$0xff] %v12573_v55  ;;  %v5068_v16 = vmul.f32 1.442695, %v5037_v52  ;;  %v5655_v38 = vrot.slane %v5654_v11, 1  ;;  %v7470_v21 = vmul.f32 %v7414_v24, %v7390_v33  ;;  %v14754_v26 = vperm.slane %v14738_v35, 2  ;;  %v14762_v24 = vld [vmem:[#allocation53_spill] sm:$0xff] }
 0x568   : > { %v12579_v59 = vmul.f32 %v14753_v50, %v14752_v15  ;;  %v7129_v14 = vrot.slane %v7128_v17, 2  ;;  %v4941_v46 = vadd.f32 %v4940_v19, %v4939_v57  ;;  %v7494_v42 = vsel %vm1349_vm12, %v7471_v23, 0.0  ;;  %v14824_v55 = vld [vmem:[#allocation63_spill] sm:$0xff] }
 0x569   : > { %v5406_v31 = vmul.f32 %v14754_v26, %v12525_v61  ;;  %v6024_v41 = vrot.slane %v6023_v49, 1  ;;  %v5287_v50 = vadd.f32 %v5286_v7, %v5285_v47  ;;  %v6393_v27 = vrot.slane %v6392_v54, 1  ;;  %v12598_v47 = vpop.permute.xlu2 %5945 }
 0x56a   : > { %v7130_v56 = vadd.f32 %v7129_v14, %v7128_v17  ;;  %v7493_v62 = vsel %vm1349_vm12, %v7470_v21, 0.0  ;;  %v14755_v52 = vmov 5   ;;  %v14756_v33 = vperm.slane %v14602_v10, 1  ;;  %v14760_v14 = vld [vmem:[#allocation89_spill] sm:$0xff]  ;;  %8153 = vset.pattern.permute.xlu0 %v14734_v40 }
 0x56b   : > { %8115 = vset.pattern.permute.xlu2 %v14755_v52  ;;  %v6762_v19 = vrot.slane %v6761_v6, 1  ;;  %v7495_v23 = vadd.f32 %v7494_v42, %v7493_v62  ;;  %8465 = vpow2.f32 %v4692_v3  ;;  %v14759_v21 = vperm.slane %v14634_v13, 4  ;;  %5977 = vperm.xlu0 %8153, %v12455_v39   ;;  %v14763_v62 = vld [vmem:[#allocation4_spill] sm:$0xff] }
 0x56c   : > { %v12593_v57 = vmul.f32 %v14757_v34, %v14756_v33  ;;  %6695 = vperm.xlu2 %8115, %v14702_v53   ;;  %v5656_v17 = vadd.f32 %v5655_v38, %v5654_v11  ;;  %v4818_v26 = vadd.f32 %v14762_v24, %v14761_v25  ;;  %v7131_v33 = vrot.slane %v7130_v56, 1  ;;  %v14765_v24 = vld [vmem:[#allocation45_spill] sm:$0xff] }
 0x56d   : > { %v12603_v7 = vmul.f32 %v14760_v14, %v14759_v21  ;;  %v4942_v34 = vrot.slane %v4941_v46, 1  ;;  %v6025_v15 = vadd.f32 %v6024_v41, %v6023_v49  ;;  %v7496_v42 = vrot.slane %v7495_v23, 4  ;;  %v4078_v41 = vpop.f32.mrf.mxu3  ;;  %8123 = vset.pattern.permute.xlu1 %v14755_v52 }
 0x56e   : > { %8467 = vpow2.f32 %v5068_v16  ;;  %v5376_v3 = vadd.f32 %v14763_v62, %v5287_v50  ;;  %v6394_v48 = vadd.f32 %v6393_v27, %v6392_v54  ;;  %v12610_v22 = vmul.f32 1.442695, %v5406_v31  ;;  %v14767_v16 = vld [vmem:[#allocation214_spill] sm:$0xff]  ;;  %v4858_v54 = vpop.permute.xlu1 %4857  ;;  %6699 = vperm.xlu1 %8123, %v11539_v37  }
 0x56f   : > { %v14764_v11 = vperm.slane %v14738_v35, 3  ;;  %v4914_v21 = vmul.f32 %v12466_v18, %v4818_v26  ;;  %v6763_v14 = vadd.f32 %v6762_v19, %v6761_v6  ;;  %v7497_v25 = vadd.f32 %v7496_v42, %v7495_v23  ;;  %v4164_v19 = vpop.f32.mrf.mxu2  ;;  %v14769_v42 = vld [vmem:[#allocation40_spill] sm:$0xff] }
 0x570   : > { %v4819_v49 = vadd.f32 %v12531_v36, %v14765_v24  ;;  %v5745_v60 = vadd.f32 %v14766_v44, %v5656_v17  ;;  %v5074_v5 = vmul.f32 %v14767_v16, %v4818_v26  ;;  %v7132_v50 = vadd.f32 %v7131_v33, %v7130_v56  ;;  %v14770_v26 = vld [vmem:[#allocation49_spill] sm:$0xff]  ;;  %v4106_v56 = vpop.f32.mrf.mxu0 }
 0x571   : > { %v5775_v38 = vmul.f32 %v14764_v11, %v12525_v61  ;;  %v4079_v31 = vadd.f32 %v4078_v41, %v12555_v45  ;;  %v12621_v27 = vpop.eup %8465  ;;  %v4943_v62 = vadd.f32 %v4942_v34, %v4941_v46  ;;  %v14768_v11 = vld [vmem:[#allocation30_spill] sm:$0xff]  ;;  %v7498_v18 = vrot.slane %v7497_v25, 2  ;;  %v12638_v41 = vpop.permute.xlu2 %6314 }
 0x572   : > { %v6114_v12 = vadd.f32 %v14768_v11, %v6025_v15  ;;  %v4915_v6 = vmul.f32 %v4858_v54, %v4819_v49  ;;  %v7606_v23 = vrot.slane %v5376_v3, 7  ;;  %v6483_v36 = vadd.f32 %v14769_v42, %v6394_v48  ;;  %v14772_v3 = vld [vmem:[#allocation65_spill] sm:$0xff] }
 0x573   : > { %v12626_v44 = vmul.f32 1.442695, %v5775_v38  ;;  %v4944_v45 = vsel %vm1349_vm12, %v4914_v21, 0.0  ;;  %v6852_v46 = vadd.f32 %v14770_v26, %v6763_v14  ;;  %v7499_v33 = vadd.f32 %v7498_v18, %v7497_v25  ;;  %v14773_v21 = vld [vmem:[#allocation146_spill] sm:$0xff]  ;;  %v12642_v25 = vpop.permute.xlu0 %6322  ;;  %8154 = vset.pattern.permute.xlu0 %v14744_v43  ;;  %v14775_v18 = vld [vmem:[#allocation225_spill] sm:$0xff] }
 0x574   : > { %v12629_v17 = vpop.eup %8467  ;;  %v4945_v15 = vsel %vm1349_vm12, %v4915_v6, 0.0  ;;  %v14771_v34 = vmov 6   ;;  %v7630_v48 = vrot.slane %v5745_v60, 6  ;;  %v7221_v24 = vadd.f32 %v14772_v3, %v7132_v50  ;;  %14774 = vst [vmem:[#allocation210_spill] sm:$0xff] %v12642_v25  ;;  %v14776_v42 = vld [vmem:[#allocation61_spill] sm:$0xff]  ;;  %v14777_v26 = vld [vmem:[#allocation102_spill] sm:$0xff]  ;;  %6346 = vperm.xlu0 %8154, %v12455_v39  }
 0x575   : > { %8116 = vset.pattern.permute.xlu2 %v14771_v34  ;;  %v4946_v38 = vadd.f32 %v4945_v15, %v4944_v45  ;;  %v5007_v54 = vadd.f32 %v14773_v21, %v4943_v62  ;;  %v7654_v14 = vrot.slane %v6114_v12, 5  ;;  %v7500_v11 = vrot.slane %v7499_v33, 1  ;;  %v8553_v45 = vld [vmem:[%s13965_s12 + $0x1] sm:$0x1] }
 0x576   : > { %7064 = vperm.xlu2 %8116, %v14702_v53   ;;  %v5075_v6 = vmul.f32 %v14775_v18, %v4819_v49  ;;  %v7678_v60 = vrot.slane %v6483_v36, 4  ;;  %v5178_v50 = vadd.f32 %v14776_v42, %v5074_v5  ;;  %v7582_v15 = vmul.f32 %v8553_v45, %v14777_v26  ;;  %v4198_v49 = vpop.f32.mrf.mxu3  ;;  %v5212_v30 = vpop.permute.xlu1 %5211  ;;  %8124 = vset.pattern.permute.xlu1 %v14771_v34 }
 0x577   : > { %v4947_v3 = vrot.slane %v4946_v38, 4  ;;  %v7766_v12 = vsel %vm1084_vm0, %v5007_v54, %v7606_v23  ;;  %v7702_v62 = vrot.slane %v6852_v46, 3  ;;  %v7501_v21 = vadd.f32 %v7500_v11, %v7499_v33  ;;  %v14778_v33 = vld [vmem:[#allocation218_spill] sm:$0xff]  ;;  %7068 = vperm.xlu1 %8124, %v11539_v37  }
 0x578   : > { %v12654_v16 = vadd.f32 %v12593_v57, %v5075_v6  ;;  %v7775_v36 = vsel %vm7773_vm7, %v7766_v12, %v7630_v48  ;;  %v5258_v5 = vmul.f32 %v12493_v1, %v5178_v50  ;;  %v7726_v18 = vrot.slane %v7221_v24, 2 }
 0x579   : > { %v4199_v42 = vadd.f32 %v4198_v49, %v4164_v19  ;;  %v7784_v45 = vsel %vm7782_vm8, %v7775_v36, %v7654_v14  ;;  %v7590_v26 = vadd.f32 %v7582_v15, %v7501_v21  ;;  %v4948_v25 = vadd.f32 %v4947_v3, %v4946_v38  ;;  %v12668_v19 = vld [vmem:[%s13964_s11 + $0x70] sm:$0xff] }
 0x57a   : > { %v4107_v23 = vadd.f32 %v4106_v56, %v4079_v31  ;;  %v7793_v46 = vsel %vm7791_vm9, %v7784_v45, %v7678_v60  ;;  %v5443_v57 = vmul.f32 %v14778_v33, %v5178_v50  ;;  %v5259_v54 = vmul.f32 %v5212_v30, %v12654_v16  ;;  %v12674_v56 = vpop.f32.mrf.mxu2  ;;  %v14782_v60 = vld [vmem:[#allocation66_spill] sm:$0xff] }
 0x57b   : > { %v14779_v48 = vperm.slane %v14738_v35, 4  ;;  %v7802_v24 = vsel %vm7800_vm10, %v7793_v46, %v7702_v62  ;;  %v7750_v38 = vrot.slane %v7590_v26, 1  ;;  %v14781_v30 = vperm.slane %v14738_v35, 5  ;;  %v12689_v62 = vpop.permute.xlu2 %6683  ;;  %v14787_v26 = vld [vmem:[#allocation99_spill] sm:$0xff]  ;;  %v14789_v46 = vld [vmem:[#allocation42_spill] sm:$0xff] }
 0x57c   : > { %v12672_v31 = vadd.f32 %v4132_v32, %v4107_v23  ;;  %v5288_v11 = vsel %vm1349_vm12, %v5258_v5, 0.0  ;;  %v7811_v6 = vsel %vm7809_vm13, %v7802_v24, %v7726_v18  ;;  %v12682_v50 = vadd.f32 %v14782_v60, %v5443_v57  ;;  %v14785_v5 = vld [vmem:[#allocation91_spill] sm:$0xff]  ;;  %8155 = vset.pattern.permute.xlu0 %v14755_v52 }
 0x57d   : > { %v6144_v1 = vmul.f32 %v14779_v48, %v12525_v61  ;;  %v6513_v14 = vmul.f32 %v14781_v30, %v12525_v61  ;;  %v5289_v15 = vsel %vm1349_vm12, %v5259_v54, 0.0  ;;  %v7819_v32 = vsel %vm1109_vm11, %v7811_v6, %v7750_v38  ;;  %v12714_v54 = vpop.permute.xlu0 %6691  ;;  %6715 = vperm.xlu0 %8155, %v12455_v39   ;;  %v14793_v6 = vld [vmem:[#allocation92_spill] sm:$0xff] }
 0x57e   : > { %14780 = vst [vmem:[#allocation82_spill] sm:$0xff] %v12672_v31  ;;  %8117 = vset.pattern.permute.xlu2 %v14177_v0  ;;  %v4949_v3 = vrot.slane %v4948_v25, 2  ;;  %v5290_v12 = vadd.f32 %v5289_v15, %v5288_v11  ;;  %v14783_v21 = vperm.slane %v14738_v35, 0  ;;  %v14784_v36 = vperm.slane %v14602_v10, 6  ;;  %v4202_v24 = vpop.f32.mrf.mxu3 }
 0x57f   : > { %7433 = vperm.xlu2 %8117, %v14702_v53   ;;  %v14786_v45 = vperm.slane %v14634_v13, 0  ;;  %7827 = vst.msk [vmem:[%s12504_s22 + $0x8] sm:$0xff] %vm1349_vm12, %v7819_v32  ;;  %v12708_v53 = vld [vmem:[%s13965_s12 + $0x3] sm:$0x1]  ;;  %v6175_v57 = vmul.f32 1.442695, %v6144_v1  ;;  %8469 = vpow2.f32 %v12610_v22  ;;  %8125 = vset.pattern.permute.xlu1 %v14177_v0 }
 0x580   : > { %v4660_v49 = vmul.f32 %v14783_v21, %v12668_v19  ;;  %v12697_v18 = vmul.f32 %v14785_v5, %v14784_v36  ;;  %14788 = vst [vmem:[#allocation204_spill] sm:$0xff] %v12708_v53  ;;  %v12712_v33 = vmul.f32 %v12708_v53, %v14789_v46  ;;  %v5291_v48 = vrot.slane %v5290_v12, 4  ;;  %v14795_v32 = vld [vmem:[#allocation93_spill] sm:$0xff]  ;;  %v14797_v21 = vld [vmem:[#allocation222_spill] sm:$0xff]  ;;  %v4255_v46 = vpop.f32.mrf.mxu1  ;;  %v14801_v5 = vld [vmem:[#allocation95_spill] sm:$0xff]  ;;  %7437 = vperm.xlu1 %8125, %v11539_v37  }
 0x581   : > { %v4804_v23 = vmul.f32 %v14787_v26, %v14786_v45  ;;  %14791 = vst [vmem:[#allocation190_spill] sm:$0xff] %v12714_v54  ;;  %v12718_v38 = vmul.f32 0.0, %v12621_v27  ;;  %v6544_v30 = vmul.f32 1.442695, %v6513_v14  ;;  %v14792_v11 = vperm.slane %v14602_v10, 2  ;;  %v4226_v26 = vpop.f32.mrf.mxu0  ;;  %v14798_v14 = vld [vmem:[#allocation231_spill] sm:$0xff] }
 0x582   : > { %14790 = vst [vmem:[#allocation155_spill] sm:$0xff] %v12712_v33  ;;  %v14794_v15 = vperm.slane %v14634_v13, 5  ;;  %v5812_v36 = vmul.f32 %v14797_v21, %v12682_v50  ;;  %v4950_v45 = vadd.f32 %v4949_v3, %v4948_v25  ;;  %v5292_v27 = vadd.f32 %v5291_v48, %v5290_v12  ;;  %v14803_v12 = vld [vmem:[#allocation96_spill] sm:$0xff]  ;;  %v14805_v48 = vld [vmem:[#allocation103_spill] sm:$0xff] }
 0x583   : > { %v5532_v60 = vmul.f32 %v14793_v6, %v14792_v11  ;;  %8471 = vpow2.f32 %v12626_v44  ;;  %v4690_v22 = vmul.f32 1.442695, %v4660_v49  ;;  %v12734_v33 = vadd.f32 %v4804_v23, %v14798_v14  ;;  %v14799_v11 = vld [vmem:[#allocation174_spill] sm:$0xff] }
 0x584   : > { %v12727_v1 = vmul.f32 %v14795_v32, %v14794_v15  ;;  %v12737_v6 = vadd.f32 %v14799_v11, %v5812_v36  ;;  %v12739_v15 = vpop.permute.xlu1 %5580  ;;  %v4227_v32 = vadd.f32 %v4226_v26, %v4199_v42  ;;  %8473 = vpow2.f32 %v6175_v57 }
 0x585   : > { %v14800_v21 = vperm.slane %v14602_v10, 7  ;;  %v14802_v3 = vperm.slane %v14602_v10, 3  ;;  %v5293_v49 = vrot.slane %v5292_v27, 2  ;;  %8475 = vpow2.f32 %v6544_v30  ;;  %v12759_v11 = vpop.eup %8469  ;;  %v14809_v30 = vld [vmem:[#allocation230_spill] sm:$0xff]  ;;  %8156 = vset.pattern.permute.xlu0 %v14771_v34  ;;  %v14831_v34 = vld [vmem:[#allocation229_spill] sm:$0xff] }
 0x586   : > { %14796 = vst [vmem:[#allocation28_spill] sm:$0xff] %v12727_v1  ;;  %v14804_v23 = vperm.slane %v14634_v13, 1  ;;  %v4256_v14 = vadd.f32 %v4255_v46, %v4227_v32  ;;  %v14806_v42 = vperm.slane %v14738_v35, 6  ;;  %v4285_v46 = vpop.f32.mrf.mxu2  ;;  %8477 = vpow2.f32 %v4690_v22  ;;  %v14810_v32 = vld [vmem:[#allocation200_spill] sm:$0xff]  ;;  %v4311_v37 = vpop.f32.mrf.mxu3  ;;  %7084 = vperm.xlu0 %8156, %v12455_v39  }
 0x587   : > { %v12744_v25 = vmul.f32 %v14801_v5, %v14800_v21  ;;  %v5901_v44 = vmul.f32 %v14803_v12, %v14802_v3  ;;  %v14807_v5 = vperm.slane %v14738_v35, 1  ;;  %14808 = vst [vmem:[#allocation98_spill] sm:$0xff] %v12759_v11  ;;  %v4951_v21 = vrot.slane %v4950_v45, 1  ;;  %8134 = vset.pattern.permute.xlu2 %v14152_v28  ;;  %v14823_v11 = vld [vmem:[#allocation244_spill] sm:$0xff] }
 0x588   : > { %v5164_v36 = vmul.f32 %v14805_v48, %v14804_v23  ;;  %v6882_v57 = vmul.f32 %v14806_v42, %v12525_v61  ;;  %v5294_v3 = vadd.f32 %v5293_v49, %v5292_v27  ;;  %v5444_v12 = vmul.f32 %v14809_v30, %v12654_v16  ;;  %v14811_v23 = vld [vmem:[#allocation226_spill] sm:$0xff]  ;;  %v14812_v42 = vld [vmem:[#allocation203_spill] sm:$0xff]  ;;  %8142 = vset.pattern.permute.xlu1 %v14152_v28 }
 0x589   : > { %v5036_v26 = vmul.f32 %v14807_v5, %v12668_v19  ;;  %v5076_v61 = vmul.f32 %v14810_v32, %v12734_v33  ;;  %v6181_v48 = vmul.f32 %v14811_v23, %v12737_v6  ;;  %4882 = vperm.xlu2 %8134, %v14812_v42   ;;  %v12770_v5 = vpop.permute.xlu2 %7052  ;;  %v4203_v27 = vadd.f32 %v4202_v24, %v12674_v56  ;;  %v12773_v16 = vpop.eup %8471  ;;  %v14818_v24 = vld [vmem:[#allocation97_spill] sm:$0xff] }
 0x58a   : > { %v4286_v49 = vadd.f32 %v4285_v46, %v4256_v14  ;;  %14813 = vst [vmem:[#allocation26_spill] sm:$0xff] %v12773_v16  ;;  %v5295_v30 = vrot.slane %v5294_v3, 1  ;;  %v12775_v31 = vadd.f32 %v5532_v60, %v5444_v12  ;;  %v14814_v22 = vperm.slane %v14738_v35, 2  ;;  %v12784_v54 = vpop.eup %8473  ;;  %v12801_v16 = vpop.permute.xlu0 %7060 }
 0x58b   : > { %v14815_v23 = vperm.slane %v14738_v35, 3  ;;  %14816 = vst [vmem:[#allocation59_spill] sm:$0xff] %v12784_v54  ;;  %v14817_v56 = vperm.slane %v14634_v13, 6  ;;  %v12791_v60 = vadd.f32 %v5164_v36, %v5076_v61  ;;  %v12794_v12 = vadd.f32 %v12386_v4, %v6181_v48  ;;  %v4231_v1 = vpop.f32.mrf.mxu0  ;;  %v14826_v61 = vld [vmem:[#allocation106_spill] sm:$0xff]  ;;  %v14830_v36 = vld [vmem:[#allocation208_spill] sm:$0xff] }
 0x58c   : > { %v5405_v32 = vmul.f32 %v14814_v22, %v12668_v19  ;;  %v12797_v46 = vadd.f32 %v4311_v37, %v4286_v49  ;;  %v12799_v22 = vpop.eup %8475  ;;  %14822 = vst [vmem:[#allocation29_spill] sm:$0xff] %v12801_v16  ;;  %v5296_v54 = vadd.f32 %v5295_v30, %v5294_v3  ;;  %v14825_v4 = vperm.slane %v14634_v13, 2  ;;  %v5950_v3 = vpop.permute.xlu1 %5949 }
 0x58d   : > { %v5774_v53 = vmul.f32 %v14815_v23, %v12668_v19  ;;  %v12789_v14 = vmul.f32 %v14818_v24, %v14817_v56  ;;  %14821 = vst [vmem:[#allocation175_spill] sm:$0xff] %v12799_v22  ;;  %v4952_v23 = vadd.f32 %v4951_v21, %v4950_v45  ;;  %v12805_v56 = vadd.f32 %v14824_v55, %v14823_v11  ;;  %v8478_v22 = vpop.eup %8477  ;;  %v14829_v45 = vld [vmem:[#allocation232_spill] sm:$0xff]  ;;  %v4261_v30 = vpop.f32.mrf.mxu1 }
 0x58e   : > { %14820 = vst [vmem:[#allocation67_spill] sm:$0xff] %v12797_v46  ;;  %v5533_v48 = vmul.f32 %v14826_v61, %v14825_v4  ;;  %v4232_v24 = vadd.f32 %v4231_v1, %v4203_v27  ;;  %v12811_v49 = vmul.f32 1.442695, %v6882_v57  ;;  %v5066_v37 = vmul.f32 1.442695, %v5036_v26  ;;  %v14828_v46 = vld [vmem:[#allocation5_spill] sm:$0xff]  ;;  %8157 = vset.pattern.permute.xlu0 %v14177_v0  ;;  %v4315_v0 = vpop.f32.mrf.mxu3 }
 0x58f   : > { %14819 = vst [vmem:[#allocation18_spill] sm:$0xff] %v12789_v14  ;;  %v5377_v16 = vadd.f32 %v14828_v46, %v5296_v54  ;;  %v5813_v21 = vmul.f32 %v14829_v45, %v12775_v31  ;;  %v5435_v55 = vmul.f32 1.442695, %v5405_v32  ;;  %v5804_v11 = vmul.f32 1.442695, %v5774_v53  ;;  %v14834_v27 = vld [vmem:[#allocation148_spill] sm:$0xff]  ;;  %7453 = vperm.xlu0 %8157, %v12455_v39  }
 0x590   : > { %14827 = vst [vmem:[#allocation39_spill] sm:$0xff] %v12811_v49  ;;  %v5445_v14 = vmul.f32 %v14830_v36, %v12791_v60  ;;  %v6550_v4 = vmul.f32 %v14831_v34, %v12794_v12  ;;  %v14832_v1 = vperm.slane %v14738_v35, 4  ;;  %v14833_v54 = vperm.slane %v14738_v35, 5  ;;  %v14835_v53 = vld [vmem:[#allocation245_spill] sm:$0xff] }
 0x591   : > { %v5008_v46 = vadd.f32 %v14834_v27, %v4952_v23  ;;  %v7607_v61 = vrot.slane %v5377_v16, 7  ;;  %v5917_v45 = vadd.f32 %v5901_v44, %v5813_v21  ;;  %v5077_v32 = vmul.f32 %v14835_v53, %v12805_v56  ;;  %8135 = vset.pattern.permute.xlu2 %v14143_v20  ;;  %v14838_v16 = vld [vmem:[#allocation100_spill] sm:$0xff] }
 0x592   : > { %v6143_v57 = vmul.f32 %v14832_v1, %v12668_v19  ;;  %v6512_v26 = vmul.f32 %v14833_v54, %v12668_v19  ;;  %v12830_v36 = vadd.f32 %v5533_v48, %v5445_v14  ;;  %v12833_v34 = vadd.f32 %v12579_v59, %v6550_v4  ;;  %v14836_v1 = vld [vmem:[#allocation145_spill] sm:$0xff]  ;;  %5231 = vperm.xlu2 %8135, %v14812_v42   ;;  %v12849_v59 = vpop.permute.xlu2 %7421  ;;  %v4289_v48 = vpop.f32.mrf.mxu2 }
 0x593   : > { %4887 = vperm.xlu1 %8142, %v14836_v1   ;;  %v4262_v49 = vadd.f32 %v4261_v30, %v4232_v24  ;;  %8479 = vpow2.f32 %v5066_v37  ;;  %v14837_v23 = vperm.slane %v14602_v10, 4  ;;  %v14839_v21 = vperm.slane %v14634_v13, 7  ;;  %v14840_v54 = vld [vmem:[#allocation101_spill] sm:$0xff]  ;;  %v12878_v39 = vpop.permute.xlu0 %7429 }
 0x594   : > { %v12846_v14 = vsel %vm1084_vm0, %v5008_v46, %v7607_v61  ;;  %v14842_v24 = vperm.slane %v14738_v35, 6  ;;  %v14843_v30 = vperm.slane %v14634_v13, 3  ;;  %v14844_v4 = vld [vmem:[#allocation109_spill] sm:$0xff]  ;;  %v12861_v46 = vmul.f32 0.0, %v8478_v22  ;;  %14852 = vst [vmem:[#allocation169_spill] sm:$0xff] %v12878_v39 }
 0x595   : > { %v6270_v44 = vmul.f32 %v14838_v16, %v14837_v23  ;;  %v12843_v27 = vmul.f32 %v14840_v54, %v14839_v21  ;;  %v14845_v23 = vld [vmem:[#allocation179_spill] sm:$0xff]  ;;  %8481 = vpow2.f32 %v5435_v55  ;;  %v14846_v61 = vld [vmem:[#allocation241_spill] sm:$0xff]  ;;  %v12865_v54 = vmul.f32 1.442695, %v6143_v57 }
 0x596   : > { %v6881_v37 = vmul.f32 %v14842_v24, %v12668_v19  ;;  %v5902_v53 = vmul.f32 %v14844_v4, %v14843_v30  ;;  %v12859_v16 = vadd.f32 %v14845_v23, %v5077_v32  ;;  %v6182_v21 = vmul.f32 %v14846_v61, %v5917_v45  ;;  %v14849_v30 = vld [vmem:[#allocation212_spill] sm:$0xff]  ;;  %v14850_v32 = vld [vmem:[#allocation233_spill] sm:$0xff] }
 0x597   : > { %14841 = vst [vmem:[#allocation51_spill] sm:$0xff] %v12843_v27  ;;  %8483 = vpow2.f32 %v5804_v11  ;;  %v14847_v24 = vperm.slane %v14738_v35, 7  ;;  %v5814_v4 = vmul.f32 %v14849_v30, %v12830_v36  ;;  %v6919_v22 = vmul.f32 %v14850_v32, %v12833_v34  ;;  %v14855_v30 = vld [vmem:[#allocation105_spill] sm:$0xff]  ;;  %8172 = vset.pattern.permute.xlu0 %v14152_v28  ;;  %v14887_v28 = vld [vmem:[#allocation238_spill] sm:$0xff] }
 0x598   : > { %v4290_v23 = vadd.f32 %v4289_v48, %v4262_v49  ;;  %v12876_v55 = vmul.f32 1.442695, %v6512_v26  ;;  %v5628_v11 = vmul.f32 %v12739_v15, %v12775_v31  ;;  %v5997_v57 = vmul.f32 %v5950_v3, %v5917_v45  ;;  %v6319_v26 = vpop.permute.xlu1 %6318  ;;  %v14856_v48 = vld [vmem:[#allocation47_spill] sm:$0xff]  ;;  %v14858_v3 = vld [vmem:[#allocation108_spill] sm:$0xff] }
 0x599   : > { %v12870_v27 = vmul.f32 %v14847_v24, %v12668_v19  ;;  %v6286_v61 = vadd.f32 %v6270_v44, %v6182_v21  ;;  %v12882_v35 = vmul.f32 1.442695, %v6881_v37  ;;  %v12884_v19 = vpop.eup %8479  ;;  %v14854_v24 = vperm.slane %v14602_v10, 5 }
 0x59a   : > { %14851 = vst [vmem:[#allocation215_spill] sm:$0xff] %v12876_v55  ;;  %v12889_v32 = vadd.f32 %v5902_v53, %v5814_v4  ;;  %v12892_v49 = vadd.f32 %v12697_v18, %v6919_v22  ;;  %v5446_v31 = vmul.f32 %v14856_v48, %v12859_v16  ;;  %v14857_v15 = vperm.slane %v14602_v10, 6  ;;  %v14860_v4 = vld [vmem:[#allocation111_spill] sm:$0xff]  ;;  %8136 = vset.pattern.permute.xlu2 %v14728_v2 }
 0x59b   : > { %14848 = vst [vmem:[#allocation56_spill] sm:$0xff] %v12870_v27  ;;  %v6639_v27 = vmul.f32 %v14855_v30, %v14854_v24  ;;  %v5627_v44 = vmul.f32 %v12547_v63, %v12682_v50  ;;  %v5996_v37 = vmul.f32 %v12598_v47, %v12737_v6  ;;  %v6366_v53 = vmul.f32 %v6319_v26, %v6286_v61  ;;  %v12905_v21 = vpop.eup %8481  ;;  %v14862_v30 = vld [vmem:[#allocation112_spill] sm:$0xff]  ;;  %v14863_v63 = vld [vmem:[#allocation73_spill] sm:$0xff] }
 0x59c   : > { %14853 = vst [vmem:[#allocation84_spill] sm:$0xff] %v12882_v35  ;;  %v12899_v45 = vmul.f32 %v14858_v3, %v14857_v15  ;;  %v14859_v18 = vperm.slane %v14602_v10, 7  ;;  %v14861_v24 = vperm.slane %v14634_v13, 4  ;;  %8143 = vset.pattern.permute.xlu1 %v14143_v20  ;;  %v12916_v15 = vadd.f32 %v4315_v0, %v4290_v23  ;;  %v14864_v0 = vld [vmem:[#allocation162_spill] sm:$0xff]  ;;  %5600 = vperm.xlu2 %8136, %v14812_v42  }
 0x59d   : > { %v12919_v50 = vadd.f32 %v14863_v63, %v5446_v31  ;;  %v12921_v47 = vpop.eup %8483  ;;  %v4916_v6 = vmul.f32 %v12447_v8, %v12734_v33  ;;  %v6365_v10 = vmul.f32 %v12638_v41, %v12794_v12  ;;  %v5658_v26 = vsel %vm1349_vm12, %v5628_v11, 0.0  ;;  %5235 = vperm.xlu1 %8143, %v14836_v1   ;;  %v14866_v31 = vld [vmem:[#allocation114_spill] sm:$0xff]  ;;  %v14868_v8 = vld [vmem:[#allocation236_spill] sm:$0xff]  ;;  %v4868_v41 = vpop.permute.xlu2 %4867 }
 0x59e   : > { %v12910_v22 = vmul.f32 %v14860_v4, %v14859_v18  ;;  %v6271_v48 = vmul.f32 %v14862_v30, %v14861_v24  ;;  %v6027_v3 = vsel %vm1349_vm12, %v5997_v57, 0.0  ;;  %v14865_v23 = vperm.slane %v14864_v0, 0  ;;  %v14867_v4 = vld [vmem:[#allocation216_spill] sm:$0xff]  ;;  %v14869_v12 = vld [vmem:[#allocation2_spill] sm:$0xff]  ;;  %4907 = vperm.xlu0 %8172, %v12916_v15  }
 0x59f   : > { %v6183_v24 = vmul.f32 %v14867_v4, %v12889_v32  ;;  %v7288_v33 = vmul.f32 %v14868_v8, %v12892_v49  ;;  %v6551_v11 = vmul.f32 %v14869_v12, %v6286_v61  ;;  %v5657_v57 = vsel %vm1349_vm12, %v5627_v44, 0.0  ;;  %v14871_v4 = vld [vmem:[#allocation124_spill] sm:$0xff] }
 0x5a0   : > { %v12934_v18 = vmul.f32 %v14866_v31, %v14865_v23  ;;  %v6026_v30 = vsel %vm1349_vm12, %v5996_v37, 0.0  ;;  %v6396_v63 = vsel %vm1349_vm12, %v6366_v53, 0.0  ;;  %v4917_v23 = vmul.f32 %v4868_v41, %v12805_v56  ;;  %v14874_v41 = vld [vmem:[#allocation115_spill] sm:$0xff] }
 0x5a1   : > { %v14870_v31 = vperm.slane %v14864_v0, 0  ;;  %v5659_v8 = vadd.f32 %v5658_v26, %v5657_v57  ;;  %v6028_v35 = vadd.f32 %v6027_v3, %v6026_v30  ;;  %v6655_v55 = vadd.f32 %v6639_v27, %v6551_v11  ;;  %v14876_v27 = vld [vmem:[#allocation117_spill] sm:$0xff]  ;;  %v14881_v30 = vld [vmem:[#allocation127_spill] sm:$0xff] }
 0x5a2   : > { %v4953_v61 = vsel %vm1349_vm12, %v4916_v6, 0.0  ;;  %v12952_v44 = vadd.f32 %v6271_v48, %v6183_v24  ;;  %v6395_v37 = vsel %vm1349_vm12, %v6365_v10, 0.0  ;;  %v4954_v53 = vsel %vm1349_vm12, %v4917_v23, 0.0  ;;  %v14878_v6 = vld [vmem:[#allocation120_spill] sm:$0xff] }
 0x5a3   : > { %v4807_v39 = vmul.f32 %v14871_v4, %v14870_v31  ;;  %v14873_v56 = vperm.slane %v14634_v13, 5  ;;  %v6734_v31 = vmul.f32 %v12689_v62, %v12833_v34  ;;  %v6397_v26 = vadd.f32 %v6396_v63, %v6395_v37  ;;  %v12974_v4 = vpop.permute.xlu0 %4877  ;;  %v6688_v34 = vpop.permute.xlu1 %6687  ;;  %v14891_v13 = vld [vmem:[#allocation235_spill] sm:$0xff] }
 0x5a4   : > { %14872 = vst [vmem:[#allocation85_spill] sm:$0xff] %v12952_v44  ;;  %v4955_v3 = vadd.f32 %v4954_v53, %v4953_v61  ;;  %v14875_v57 = vperm.slane %v14864_v0, 1  ;;  %v14877_v48 = vperm.slane %v14864_v0, 2  ;;  %v12977_v62 = vadd.f32 %v12744_v25, %v7288_v33  ;;  %8137 = vset.pattern.permute.xlu2 %v14734_v40 }
 0x5a5   : > { %v6640_v12 = vmul.f32 %v14874_v41, %v14873_v56  ;;  %14882 = vst [vmem:[#allocation74_spill] sm:$0xff] %v12974_v4  ;;  %v5660_v63 = vrot.slane %v5659_v8, 4  ;;  %v6029_v61 = vrot.slane %v6028_v35, 4  ;;  %v6735_v53 = vmul.f32 %v6688_v34, %v6655_v55  ;;  %v14883_v56 = vld [vmem:[#allocation205_spill] sm:$0xff]  ;;  %8144 = vset.pattern.permute.xlu1 %v14728_v2  ;;  %5969 = vperm.xlu2 %8137, %v14812_v42  }
 0x5a6   : > { %v12964_v11 = vmul.f32 %v14876_v27, %v14875_v57  ;;  %v12969_v10 = vmul.f32 %v14878_v6, %v14877_v48  ;;  %v14880_v24 = vmov %v14875_v57  ;;  %v4956_v37 = vrot.slane %v4955_v3, 4  ;;  %v14885_v57 = vld [vmem:[#allocation173_spill] sm:$0xff]  ;;  %5604 = vperm.xlu1 %8144, %v14836_v1   ;;  %8173 = vset.pattern.permute.xlu0 %v14143_v20 }
 0x5a7   : > { %v5167_v23 = vmul.f32 %v14881_v30, %v14880_v24  ;;  %v14884_v41 = vperm.slane %v14883_v56, 0  ;;  %v14886_v48 = vld [vmem:[#allocation221_spill] sm:$0xff]  ;;  %v14888_v24 = vld [vmem:[#allocation46_spill] sm:$0xff]  ;;  %v5260_v33 = vmul.f32 %v12483_v29, %v12791_v60  ;;  %v6764_v30 = vsel %vm1349_vm12, %v6734_v31, 0.0  ;;  %5251 = vperm.xlu0 %8173, %v12916_v15  }
 0x5a8   : > { %14879 = vst [vmem:[#allocation193_spill] sm:$0xff] %v12969_v10  ;;  %v6552_v6 = vmul.f32 %v14886_v48, %v12952_v44  ;;  %v12985_v10 = vadd.f32 %v4807_v39, %v14887_v28  ;;  %v6920_v25 = vmul.f32 %v14888_v24, %v6655_v55  ;;  %v6398_v34 = vrot.slane %v6397_v26, 4  ;;  %v14890_v28 = vld [vmem:[#allocation130_spill] sm:$0xff]  ;;  %v5220_v55 = vpop.permute.xlu2 %5219 }
 0x5a9   : > { %v4812_v27 = vmul.f32 %v14885_v57, %v14884_v41  ;;  %v6765_v4 = vsel %vm1349_vm12, %v6735_v53, 0.0  ;;  %v14889_v41 = vperm.slane %v14864_v0, 2  ;;  %v4957_v57 = vadd.f32 %v4956_v37, %v4955_v3  ;;  %v14892_v3 = vld [vmem:[#allocation50_spill] sm:$0xff] }
 0x5aa   : > { %v6766_v48 = vadd.f32 %v6765_v4, %v6764_v30  ;;  %v7024_v29 = vadd.f32 %v12899_v45, %v6920_v25  ;;  %v13002_v60 = vadd.f32 %v6640_v12, %v6552_v6  ;;  %v5661_v31 = vadd.f32 %v5660_v63, %v5659_v8  ;;  %v14897_v6 = vld [vmem:[#allocation180_spill] sm:$0xff] }
 0x5ab   : > { %v12998_v39 = vmul.f32 %v14890_v28, %v14889_v41  ;;  %v6030_v53 = vadd.f32 %v6029_v61, %v6028_v35  ;;  %v5261_v24 = vmul.f32 %v5220_v55, %v12859_v16  ;;  %v5079_v44 = vmul.f32 %v14891_v13, %v12985_v10  ;;  %v14895_v13 = vld [vmem:[#allocation133_spill] sm:$0xff]  ;;  %v7057_v55 = vpop.permute.xlu1 %7056 }
 0x5ac   : > { %v6767_v41 = vrot.slane %v6766_v48, 4  ;;  %v5815_v4 = vmul.f32 %v14892_v3, %v12919_v50  ;;  %v13012_v37 = vadd.f32 %v4812_v27, %v12861_v46  ;;  %v5297_v45 = vsel %vm1349_vm12, %v5260_v33, 0.0 }
 0x5ad   : > { %v7103_v35 = vmul.f32 %v12770_v5, %v12892_v49  ;;  %v6399_v16 = vadd.f32 %v6398_v34, %v6397_v26  ;;  %v5298_v8 = vsel %vm1349_vm12, %v5261_v24, 0.0  ;;  %v14894_v12 = vperm.slane %v14864_v0, 3  ;;  %v13031_v49 = vpop.permute.xlu0 %5227  ;;  %8138 = vset.pattern.permute.xlu2 %v14744_v43 }
 0x5ae   : > { %14893 = vst [vmem:[#allocation75_spill] sm:$0xff] %v13012_v37  ;;  %v14896_v61 = vperm.slane %v14883_v56, 1  ;;  %v4958_v30 = vrot.slane %v4957_v57, 2  ;;  %v5299_v46 = vadd.f32 %v5298_v8, %v5297_v45  ;;  %v5662_v27 = vrot.slane %v5661_v31, 2  ;;  %8145 = vset.pattern.permute.xlu1 %v14734_v40  ;;  %6338 = vperm.xlu2 %8138, %v14812_v42  }
 0x5af   : > { %v13021_v63 = vmul.f32 %v14895_v13, %v14894_v12  ;;  %v13026_v28 = vadd.f32 %v5167_v23, %v5079_v44  ;;  %v6031_v33 = vrot.slane %v6030_v53, 2  ;;  %v13029_v5 = vadd.f32 %v12536_v51, %v5815_v4  ;;  %v14898_v23 = vld [vmem:[#allocation22_spill] sm:$0xff]  ;;  %5973 = vperm.xlu1 %8145, %v14836_v1   ;;  %8174 = vset.pattern.permute.xlu0 %v14728_v2 }
 0x5b0   : > { %v5172_v25 = vmul.f32 %v14897_v6, %v14896_v61  ;;  %v6768_v26 = vadd.f32 %v6767_v41, %v6766_v48  ;;  %v5300_v34 = vrot.slane %v5299_v46, 4  ;;  %v7104_v24 = vmul.f32 %v7057_v55, %v7024_v29  ;;  %v5589_v41 = vpop.permute.xlu2 %5588  ;;  %5620 = vperm.xlu0 %8174, %v12916_v15  }
 0x5b1   : > { %v5084_v3 = vmul.f32 %v12884_v19, %v13012_v37  ;;  %v5629_v12 = vmul.f32 %v12541_v58, %v12830_v36  ;;  %v7133_v45 = vsel %vm1349_vm12, %v7103_v35, 0.0  ;;  %v6400_v44 = vrot.slane %v6399_v16, 2 }
 0x5b2   : > { %v7289_v8 = vmul.f32 %v14898_v23, %v7024_v29  ;;  %v4959_v51 = vadd.f32 %v4958_v30, %v4957_v57  ;;  %v5301_v4 = vadd.f32 %v5300_v34, %v5299_v46  ;;  %v7134_v13 = vsel %vm1349_vm12, %v7104_v24, 0.0  ;;  %v14901_v30 = vld [vmem:[#allocation209_spill] sm:$0xff]  ;;  %v14904_v34 = vld [vmem:[#allocation192_spill] sm:$0xff] }
 0x5b3   : > { %v13043_v48 = vadd.f32 %v5172_v25, %v5084_v3  ;;  %v5663_v19 = vadd.f32 %v5662_v27, %v5661_v31  ;;  %v7472_v58 = vmul.f32 %v12849_v59, %v12977_v62  ;;  %v7135_v36 = vadd.f32 %v7134_v13, %v7133_v45  ;;  %v14902_v62 = vld [vmem:[#allocation196_spill] sm:$0xff] }
 0x5b4   : > { %v7393_v29 = vadd.f32 %v12910_v22, %v7289_v8  ;;  %v6032_v57 = vadd.f32 %v6031_v33, %v6030_v53  ;;  %v6769_v35 = vrot.slane %v6768_v26, 2  ;;  %v5302_v61 = vrot.slane %v5301_v4, 2 }
 0x5b5   : > { %14899 = vst [vmem:[#allocation219_spill] sm:$0xff] %v13043_v48  ;;  %v5630_v6 = vmul.f32 %v5589_v41, %v12919_v50  ;;  %v14900_v25 = vperm.slane %v14883_v56, 0  ;;  %v5666_v46 = vsel %vm1349_vm12, %v5629_v12, 0.0  ;;  %v7136_v59 = vrot.slane %v7135_v36, 4 }
 0x5b6   : > { %v6184_v27 = vmul.f32 %v14902_v62, %v13029_v5  ;;  %v6401_v22 = vadd.f32 %v6400_v44, %v6399_v16  ;;  %v4960_v53 = vrot.slane %v4959_v51, 1  ;;  %v5303_v33 = vadd.f32 %v5302_v61, %v5301_v4  ;;  %v13065_v4 = vpop.permute.xlu0 %5596  ;;  %8139 = vset.pattern.permute.xlu2 %v14755_v52 }
 0x5b7   : > { %v4813_v31 = vmul.f32 %v14901_v30, %v14900_v25  ;;  %v5667_v55 = vsel %vm1349_vm12, %v5630_v6, 0.0  ;;  %v14903_v50 = vperm.slane %v14883_v56, 2  ;;  %v5664_v3 = vrot.slane %v5663_v19, 1  ;;  %v7426_v25 = vpop.permute.xlu1 %7425  ;;  %8146 = vset.pattern.permute.xlu1 %v14744_v43  ;;  %6707 = vperm.xlu2 %8139, %v14812_v42  }
 0x5b8   : > { %v7137_v45 = vadd.f32 %v7136_v59, %v7135_v36  ;;  %v5668_v23 = vadd.f32 %v5667_v55, %v5666_v46  ;;  %v6033_v8 = vrot.slane %v6032_v57, 1  ;;  %v7502_v12 = vsel %vm1349_vm12, %v7472_v58, 0.0  ;;  %6342 = vperm.xlu1 %8146, %v14836_v1   ;;  %v14908_v46 = vld [vmem:[#allocation217_spill] sm:$0xff]  ;;  %8175 = vset.pattern.permute.xlu0 %v14734_v40 }
 0x5b9   : > { %v5541_v24 = vmul.f32 %v14904_v34, %v14903_v50  ;;  %v6770_v13 = vadd.f32 %v6769_v35, %v6768_v26  ;;  %v5304_v41 = vrot.slane %v5303_v33, 1  ;;  %v7473_v16 = vmul.f32 %v7426_v25, %v7393_v29  ;;  %5989 = vperm.xlu0 %8175, %v12916_v15  }
 0x5ba   : > { %v7138_v30 = vrot.slane %v7137_v45, 2  ;;  %v5669_v62 = vrot.slane %v5668_v23, 4  ;;  %v5453_v44 = vmul.f32 %v12905_v21, %v13043_v48  ;;  %v6402_v61 = vrot.slane %v6401_v22, 1 }
 0x5bb   : > { %v4961_v6 = vadd.f32 %v4960_v53, %v4959_v51  ;;  %v5305_v50 = vadd.f32 %v5304_v41, %v5303_v33  ;;  %v13069_v36 = vadd.f32 %v4813_v31, %v12718_v38  ;;  %v7503_v35 = vsel %vm1349_vm12, %v7473_v16, 0.0  ;;  %v14909_v53 = vld [vmem:[#allocation6_spill] sm:$0xff]  ;;  %v5958_v38 = vpop.permute.xlu2 %5957 }
 0x5bc   : > { %v7139_v58 = vadd.f32 %v7138_v30, %v7137_v45  ;;  %v5670_v26 = vadd.f32 %v5669_v62, %v5668_v23  ;;  %v13074_v29 = vadd.f32 %v5541_v24, %v5453_v44  ;;  %v14907_v21 = vperm.slane %v14883_v56, 1  ;;  %v14910_v41 = vld [vmem:[#allocation150_spill] sm:$0xff] }
 0x5bd   : > { %14905 = vst [vmem:[#allocation76_spill] sm:$0xff] %v13069_v36  ;;  %v6771_v59 = vrot.slane %v6770_v13, 1  ;;  %v5378_v33 = vadd.f32 %v14909_v53, %v5305_v50  ;;  %v7504_v55 = vadd.f32 %v7503_v35, %v7502_v12  ;;  %v5665_v31 = vadd.f32 %v5664_v3, %v5663_v19  ;;  %v14912_v16 = vld [vmem:[#allocation202_spill] sm:$0xff] }
 0x5be   : > { %14906 = vst [vmem:[#allocation27_spill] sm:$0xff] %v13074_v29  ;;  %v5173_v51 = vmul.f32 %v14908_v46, %v14907_v21  ;;  %v6034_v34 = vadd.f32 %v6033_v8, %v6032_v57  ;;  %v7140_v45 = vrot.slane %v7139_v58, 1  ;;  %v5671_v23 = vrot.slane %v5670_v26, 2  ;;  %v14913_v57 = vld [vmem:[#allocation188_spill] sm:$0xff]  ;;  %v14915_v46 = vld [vmem:[#allocation17_spill] sm:$0xff] }
 0x5bf   : > { %v5009_v24 = vadd.f32 %v14910_v41, %v4961_v6  ;;  %v7608_v25 = vrot.slane %v5378_v33, 7  ;;  %v7505_v30 = vrot.slane %v7504_v55, 4  ;;  %v5085_v62 = vmul.f32 %v12629_v17, %v13069_v36  ;;  %v14916_v41 = vld [vmem:[#allocation134_spill] sm:$0xff]  ;;  %v14991_v36 = vld [vmem:[#allocation51_spill] sm:$0xff] }
 0x5c0   : > { %v14911_v12 = vperm.slane %v14883_v56, 3  ;;  %v6403_v50 = vadd.f32 %v6402_v61, %v6401_v22  ;;  %v5672_v19 = vadd.f32 %v5671_v23, %v5670_v26  ;;  %v13091_v3 = vadd.f32 %v12934_v18, %v14913_v57  ;;  %v14917_v22 = vld [vmem:[#allocation31_spill] sm:$0xff]  ;;  %8147 = vset.pattern.permute.xlu1 %v14755_v52  ;;  %v13111_v23 = vpop.permute.xlu0 %5965  ;;  %v14927_v57 = vld [vmem:[#allocation20_spill] sm:$0xff] }
 0x5c1   : > { %v6772_v8 = vadd.f32 %v6771_v59, %v6770_v13  ;;  %v7768_v6 = vsel %vm1084_vm0, %v5009_v24, %v7608_v25  ;;  %v7506_v35 = vadd.f32 %v7505_v30, %v7504_v55  ;;  %v13094_v21 = vadd.f32 %v5173_v51, %v5085_v62  ;;  %v14918_v51 = vld [vmem:[#allocation239_spill] sm:$0xff]  ;;  %v14919_v55 = vld [vmem:[#allocation41_spill] sm:$0xff]  ;;  %6711 = vperm.xlu1 %8147, %v14836_v1   ;;  %v14925_v30 = vld [vmem:[#allocation224_spill] sm:$0xff] }
 0x5c2   : > { %v5910_v44 = vmul.f32 %v14912_v16, %v14911_v12  ;;  %v5746_v53 = vadd.f32 %v14915_v46, %v5665_v31  ;;  %v7141_v33 = vadd.f32 %v7140_v45, %v7139_v58  ;;  %v5673_v17 = vrot.slane %v5672_v19, 1  ;;  %v13099_v12 = vpop.permute.xlu1 %4872  ;;  %8176 = vset.pattern.permute.xlu0 %v14744_v43 }
 0x5c3   : > { %14914 = vst [vmem:[#allocation86_spill] sm:$0xff] %v13094_v21  ;;  %v7583_v48 = vmul.f32 %v12569_v9, %v14916_v41  ;;  %v6115_v61 = vadd.f32 %v14917_v22, %v6034_v34  ;;  %v7507_v26 = vrot.slane %v7506_v35, 2  ;;  %v6288_v18 = vadd.f32 %v12603_v7, %v6184_v27  ;;  %v14920_v9 = vld [vmem:[#allocation191_spill] sm:$0xff]  ;;  %v14921_v34 = vld [vmem:[#allocation58_spill] sm:$0xff]  ;;  %6358 = vperm.xlu0 %8176, %v12916_v15  }
 0x5c4   : > { %v5822_v13 = vmul.f32 %v12921_v47, %v13074_v29  ;;  %v5448_v59 = vmul.f32 %v14918_v51, %v13026_v28  ;;  %v6484_v31 = vadd.f32 %v14919_v55, %v6403_v50  ;;  %v5674_v58 = vadd.f32 %v5673_v17, %v5672_v19  ;;  %v14926_v50 = vld [vmem:[#allocation186_spill] sm:$0xff] }
 0x5c5   : > { %v5078_v45 = vmul.f32 %v14920_v9, %v13091_v3  ;;  %v6853_v24 = vadd.f32 %v14921_v34, %v6772_v8  ;;  %v7508_v25 = vadd.f32 %v7507_v26, %v7506_v35  ;;  %v14922_v7 = vmov 6   ;;  %v6327_v8 = vpop.permute.xlu2 %6326  ;;  %v14930_v51 = vld [vmem:[#allocation198_spill] sm:$0xff] }
 0x5c6   : > { %8140 = vset.pattern.permute.xlu2 %v14922_v7  ;;  %v13116_v47 = vadd.f32 %v5910_v44, %v5822_v13  ;;  %8485 = vpow2.f32 %v12865_v54  ;;  %v14924_v27 = vperm.slane %v14883_v56, 2  ;;  %v7631_v16 = vrot.slane %v5746_v53, 6  ;;  %v14928_v54 = vld [vmem:[#allocation157_spill] sm:$0xff]  ;;  %v14972_v29 = vld [vmem:[#allocation82_spill] sm:$0xff] }
 0x5c7   : > { %v7222_v19 = vadd.f32 %v14926_v50, %v7141_v33  ;;  %v5747_v46 = vadd.f32 %v14927_v57, %v5674_v58  ;;  %7076 = vperm.xlu2 %8140, %v14812_v42   ;;  %v7655_v35 = vrot.slane %v6115_v61, 5  ;;  %v7509_v17 = vrot.slane %v7508_v25, 1  ;;  %v14929_v33 = vld [vmem:[#allocation98_spill] sm:$0xff] }
 0x5c8   : > { %14923 = vst [vmem:[#allocation88_spill] sm:$0xff] %v13116_v47  ;;  %v5542_v62 = vmul.f32 %v14925_v30, %v14924_v27  ;;  %v13127_v44 = vadd.f32 %v12964_v11, %v5078_v45  ;;  %v6553_v41 = vmul.f32 %v14928_v54, %v6288_v18  ;;  %v7679_v22 = vrot.slane %v6484_v31, 4  ;;  %v14933_v27 = vld [vmem:[#allocation210_spill] sm:$0xff] }
 0x5c9   : > { %v7632_v26 = vrot.slane %v5747_v46, 6  ;;  %v5999_v53 = vmul.f32 %v5958_v38, %v13029_v5  ;;  %v5454_v13 = vmul.f32 %v14929_v33, %v13094_v21  ;;  %v5998_v61 = vmul.f32 %v14930_v51, %v12889_v32  ;;  %v14932_v38 = vld [vmem:[#allocation85_spill] sm:$0xff]  ;;  %8148 = vset.pattern.permute.xlu1 %v14922_v7  ;;  %v14939_v54 = vld [vmem:[#allocation190_spill] sm:$0xff]  ;;  %v13172_v51 = vpop.permute.xlu0 %6334 }
 0x5ca   : > { %v7703_v55 = vrot.slane %v6853_v24, 3  ;;  %v7510_v58 = vadd.f32 %v7509_v17, %v7508_v25  ;;  %v6368_v9 = vmul.f32 %v6327_v8, %v6288_v18  ;;  %v7776_v11 = vsel %vm7773_vm7, %v12846_v14, %v7631_v16  ;;  %v13149_v18 = vpop.permute.xlu1 %5223  ;;  %v14935_v25 = vld [vmem:[#allocation213_spill] sm:$0xff]  ;;  %v14938_v8 = vld [vmem:[#allocation11_spill] sm:$0xff]  ;;  %7080 = vperm.xlu1 %8148, %v14836_v1  }
 0x5cb   : > { %v7727_v45 = vrot.slane %v7222_v19, 2  ;;  %v13139_v31 = vsel %vm7773_vm7, %v7768_v6, %v7632_v26  ;;  %v13141_v34 = vadd.f32 %v5542_v62, %v5454_v13  ;;  %v6367_v30 = vmul.f32 %v14933_v27, %v14932_v38  ;;  %v14936_v19 = vld [vmem:[#allocation28_spill] sm:$0xff]  ;;  %8177 = vset.pattern.permute.xlu0 %v14755_v52 }
 0x5cc   : > { %v8486_v5 = vpop.eup %8485  ;;  %v7785_v50 = vsel %vm7782_vm8, %v7776_v11, %v7655_v35  ;;  %v13147_v32 = vadd.f32 %v12998_v39, %v5448_v59  ;;  %v7591_v24 = vadd.f32 %v7583_v48, %v7510_v58  ;;  %v14934_v14 = vperm.slane %v14883_v56, 4  ;;  %v14942_v11 = vld [vmem:[#allocation243_spill] sm:$0xff]  ;;  %6727 = vperm.xlu0 %8177, %v12916_v15   ;;  %v14993_v52 = vld [vmem:[#allocation228_spill] sm:$0xff] }
 0x5cd   : > { %14931 = vst [vmem:[#allocation89_spill] sm:$0xff] %v13141_v34  ;;  %v7794_v6 = vsel %vm7791_vm9, %v7785_v50, %v7679_v22  ;;  %v6036_v62 = vsel %vm1349_vm12, %v5999_v53, 0.0  ;;  %v6657_v57 = vadd.f32 %v14936_v19, %v6553_v41  ;;  %v14937_v46 = vperm.slane %v14883_v56, 3  ;;  %v14941_v53 = vld [vmem:[#allocation33_spill] sm:$0xff]  ;;  %v14944_v50 = vld [vmem:[#allocation159_spill] sm:$0xff] }
 0x5ce   : > { %v6279_v16 = vmul.f32 %v14935_v25, %v14934_v14  ;;  %v7803_v39 = vsel %vm7800_vm10, %v7794_v6, %v7703_v55  ;;  %v7751_v59 = vrot.slane %v7591_v24, 1  ;;  %v6405_v48 = vsel %vm1349_vm12, %v6368_v9, 0.0  ;;  %v14946_v14 = vld [vmem:[#allocation118_spill] sm:$0xff] }
 0x5cf   : > { %v5911_v35 = vmul.f32 %v14938_v8, %v14937_v46  ;;  %v6035_v17 = vsel %vm1349_vm12, %v5998_v61, 0.0  ;;  %v6736_v22 = vmul.f32 %v14939_v54, %v13002_v60  ;;  %v7812_v26 = vsel %vm7809_vm13, %v7803_v39, %v7727_v45  ;;  %v6696_v61 = vpop.permute.xlu2 %6695  ;;  %v14951_v8 = vld [vmem:[#allocation123_spill] sm:$0xff] }
 0x5d0   : > { %v14940_v41 = vmov 7   ;;  %v5447_v33 = vmul.f32 %v14941_v53, %v13127_v44  ;;  %v6404_v13 = vsel %vm1349_vm12, %v6367_v30, 0.0  ;;  %v7820_v55 = vsel %vm1109_vm11, %v7812_v26, %v7751_v59  ;;  %v14943_v30 = vld [vmem:[#allocation215_spill] sm:$0xff] }
 0x5d1   : > { %8141 = vset.pattern.permute.xlu2 %v14940_v41  ;;  %v6037_v58 = vadd.f32 %v6036_v62, %v6035_v17  ;;  %v6191_v9 = vmul.f32 %v8486_v5, %v13116_v47  ;;  %v5817_v45 = vmul.f32 %v14942_v11, %v13147_v32  ;;  %7828 = vst.msk [vmem:[%s12504_s22 + $0x10] sm:$0xff] %vm1349_vm12, %v7820_v55  ;;  %8487 = vpow2.f32 %v14943_v30  ;;  %v14948_v5 = vld [vmem:[#allocation26_spill] sm:$0xff]  ;;  %v14952_v54 = vld [vmem:[#allocation223_spill] sm:$0xff]  ;;  %v14954_v55 = vld [vmem:[#allocation24_spill] sm:$0xff]  ;;  %v13249_v21 = vpop.permute.xlu0 %6703 }
 0x5d2   : > { %7445 = vperm.xlu2 %8141, %v14812_v42   ;;  %v6406_v38 = vadd.f32 %v6405_v48, %v6404_v13  ;;  %v6737_v27 = vmul.f32 %v6696_v61, %v6657_v57  ;;  %v14945_v24 = vperm.slane %v14944_v50, 6  ;;  %v14947_v42 = vld [vmem:[#allocation193_spill] sm:$0xff]  ;;  %v5823_v62 = vmul.f32 %v14948_v5, %v13141_v34  ;;  %v14955_v61 = vld [vmem:[#allocation204_spill] sm:$0xff]  ;;  %v13210_v11 = vpop.permute.xlu1 %5592  ;;  %8149 = vset.pattern.permute.xlu1 %v14940_v41 }
 0x5d3   : > { %v13188_v6 = vadd.f32 %v14947_v42, %v5447_v33  ;;  %v13192_v19 = vadd.f32 %v6279_v16, %v6191_v9  ;;  %v14950_v46 = vperm.slane %v14864_v0, 3  ;;  %v6773_v59 = vsel %vm1349_vm12, %v6736_v22, 0.0  ;;  %v14956_v22 = vld [vmem:[#allocation36_spill] sm:$0xff]  ;;  %7449 = vperm.xlu1 %8149, %v14836_v1  }
 0x5d4   : > { %v7009_v25 = vmul.f32 %v14946_v14, %v14945_v24  ;;  %v13199_v48 = vadd.f32 %v13021_v63, %v5817_v45  ;;  %v6774_v17 = vsel %vm1349_vm12, %v6737_v27, 0.0  ;;  %v6921_v26 = vmul.f32 %v14952_v54, %v13002_v60  ;;  %v14957_v63 = vld [vmem:[#allocation56_spill] sm:$0xff]  ;;  %v14959_v24 = vld [vmem:[#allocation121_spill] sm:$0xff]  ;;  %8178 = vset.pattern.permute.xlu0 %v14922_v7 }
 0x5d5   : > { %14949 = vst [vmem:[#allocation234_spill] sm:$0xff] %v13192_v19  ;;  %v5904_v39 = vmul.f32 %v14951_v8, %v14950_v46  ;;  %v6038_v53 = vrot.slane %v6037_v58, 4  ;;  %v6775_v33 = vadd.f32 %v6774_v17, %v6773_v59  ;;  %v13204_v13 = vadd.f32 %v5911_v35, %v5823_v62  ;;  %v14960_v35 = vld [vmem:[#allocation69_spill] sm:$0xff]  ;;  %v14964_v54 = vld [vmem:[#allocation220_spill] sm:$0xff]  ;;  %7096 = vperm.xlu0 %8178, %v12916_v15  }
 0x5d6   : > { %v6407_v16 = vrot.slane %v6406_v38, 4  ;;  %v13208_v9 = vmul.f32 %v14955_v61, %v14954_v55  ;;  %v6922_v30 = vmul.f32 %v14956_v22, %v6657_v57  ;;  %v7280_v45 = vmul.f32 1.442695, %v14957_v63  ;;  %v14962_v8 = vld [vmem:[#allocation137_spill] sm:$0xff]  ;;  %v14965_v55 = vld [vmem:[#allocation246_spill] sm:$0xff] }
 0x5d7   : > { %14953 = vst [vmem:[#allocation53_spill] sm:$0xff] %v13204_v13  ;;  %v14958_v27 = vperm.slane %v14944_v50, 7  ;;  %v7025_v60 = vadd.f32 %v7009_v25, %v6921_v26  ;;  %v6776_v42 = vrot.slane %v6775_v33, 4  ;;  %v5816_v5 = vmul.f32 %v14960_v35, %v13188_v6  ;;  %v8488_v62 = vpop.eup %8487  ;;  %v14966_v50 = vld [vmem:[#allocation18_spill] sm:$0xff]  ;;  %v14967_v26 = vld [vmem:[#allocation29_spill] sm:$0xff] }
 0x5d8   : > { %v14961_v46 = vperm.slane %v14864_v0, 4  ;;  %v14963_v17 = vperm.slane %v14883_v56, 5  ;;  %v6186_v22 = vmul.f32 %v14965_v55, %v13199_v48  ;;  %v7026_v25 = vadd.f32 %v14966_v50, %v6922_v30  ;;  %v7065_v30 = vpop.permute.xlu2 %7064 }
 0x5d9   : > { %v7378_v14 = vmul.f32 %v14959_v24, %v14958_v27  ;;  %v7105_v63 = vmul.f32 %v14967_v26, %v7025_v60  ;;  %v6039_v27 = vadd.f32 %v6038_v53, %v6037_v58  ;;  %v14968_v24 = vmov 0   ;;  %v14974_v53 = vld [vmem:[#allocation126_spill] sm:$0xff] }
 0x5da   : > { %v6274_v59 = vmul.f32 %v14962_v8, %v14961_v46  ;;  %v6648_v57 = vmul.f32 %v14964_v54, %v14963_v17  ;;  %8158 = vset.pattern.permute.xlu2 %v14968_v24  ;;  %v13232_v35 = vadd.f32 %v5904_v39, %v5816_v5  ;;  %v14969_v46 = vld [vmem:[#allocation84_spill] sm:$0xff]  ;;  %v14970_v8 = vperm.slane %v14883_v56, 4  ;;  %v14971_v17 = vld [vmem:[#allocation19_spill] sm:$0xff]  ;;  %v14976_v39 = vld [vmem:[#allocation129_spill] sm:$0xff] }
 0x5db   : > { %8489 = vpow2.f32 %v14969_v46  ;;  %v6408_v55 = vadd.f32 %v6407_v16, %v6406_v38  ;;  %v6777_v47 = vadd.f32 %v6776_v42, %v6775_v33  ;;  %4897 = vperm.xlu2 %8158, %v14972_v29   ;;  %v6560_v50 = vmul.f32 %v8488_v62, %v13192_v19  ;;  %v14977_v46 = vld [vmem:[#allocation227_spill] sm:$0xff]  ;;  %v14978_v16 = vld [vmem:[#allocation68_spill] sm:$0xff]  ;;  %8165 = vset.pattern.permute.xlu1 %v14968_v24 }
 0x5dc   : > { %v6280_v54 = vmul.f32 %v14971_v17, %v14970_v8  ;;  %v14973_v58 = vperm.slane %v14864_v0, 4  ;;  %v14975_v1 = vperm.slane %v14864_v0, 5  ;;  %v7290_v34 = vmul.f32 %v14977_v46, %v7025_v60  ;;  %v14979_v62 = vld [vmem:[#allocation59_spill] sm:$0xff] }
 0x5dd   : > { %v7106_v38 = vmul.f32 %v7065_v30, %v7026_v25  ;;  %v13252_v33 = vadd.f32 %v6274_v59, %v6186_v22  ;;  %v7291_v42 = vmul.f32 %v14978_v16, %v7026_v25  ;;  %v6192_v8 = vmul.f32 %v14979_v62, %v13204_v13  ;;  %v14981_v30 = vld [vmem:[#allocation70_spill] sm:$0xff]  ;;  %v14984_v16 = vld [vmem:[#allocation131_spill] sm:$0xff]  ;;  %8181 = vset.pattern.permute.xlu0 %v14940_v41 }
 0x5de   : > { %v6273_v26 = vmul.f32 %v14974_v53, %v14973_v58  ;;  %v13246_v5 = vmul.f32 %v14976_v39, %v14975_v1  ;;  %v13258_v17 = vadd.f32 %v6648_v57, %v6560_v50  ;;  %v7142_v58 = vsel %vm1349_vm12, %v7105_v63, 0.0  ;;  %v14987_v63 = vld [vmem:[#allocation140_spill] sm:$0xff]  ;;  %7465 = vperm.xlu0 %8181, %v12916_v15  }
 0x5df   : > { %v6040_v53 = vrot.slane %v6039_v27, 2  ;;  %v7143_v60 = vsel %vm1349_vm12, %v7106_v38, 0.0  ;;  %v6185_v1 = vmul.f32 %v14981_v30, %v13232_v35  ;;  %v6409_v39 = vrot.slane %v6408_v55, 2  ;;  %v14988_v38 = vld [vmem:[#allocation79_spill] sm:$0xff]  ;;  %v5962_v30 = vpop.permute.xlu1 %5961 }
 0x5e0   : > { %14980 = vst [vmem:[#allocation4_spill] sm:$0xff] %v13258_v17  ;;  %v6778_v59 = vrot.slane %v6777_v47, 2  ;;  %v7144_v22 = vadd.f32 %v7143_v60, %v7142_v58  ;;  %v13264_v46 = vadd.f32 %v6280_v54, %v6192_v8  ;;  %v14983_v25 = vperm.slane %v14864_v0, 6  ;;  %v14990_v54 = vld [vmem:[#allocation143_spill] sm:$0xff]  ;;  %v7434_v24 = vpop.permute.xlu2 %7433 }
 0x5e1   : > { %v8490_v19 = vpop.eup %8489  ;;  %v14986_v57 = vperm.slane %v14864_v0, 5  ;;  %v7394_v13 = vadd.f32 %v7378_v14, %v7290_v34  ;;  %v13276_v37 = vmul.f32 %v14955_v61, %v14988_v38  ;;  %v7395_v7 = vadd.f32 %v14991_v36, %v7291_v42  ;;  %v14995_v14 = vld [vmem:[#allocation48_spill] sm:$0xff] }
 0x5e2   : > { %14982 = vst [vmem:[#allocation45_spill] sm:$0xff] %v13264_v46  ;;  %v13269_v62 = vmul.f32 %v14984_v16, %v14983_v25  ;;  %v14989_v58 = vmov %v14983_v25  ;;  %v7145_v60 = vrot.slane %v7144_v22, 4  ;;  %v6289_v25 = vadd.f32 %v6273_v26, %v6185_v1  ;;  %v14998_v26 = vld [vmem:[#allocation237_spill] sm:$0xff] }
 0x5e3   : > { %v6643_v50 = vmul.f32 %v14987_v63, %v14986_v57  ;;  %v13281_v8 = vmul.f32 %v14990_v54, %v14989_v58  ;;  %v14992_v16 = vperm.slane %v14883_v56, 6  ;;  %v14994_v57 = vld [vmem:[#allocation169_spill] sm:$0xff]  ;;  %v6555_v63 = vmul.f32 %v14995_v14, %v13252_v33  ;;  %8159 = vset.pattern.permute.xlu2 %v14143_v20  ;;  %v14996_v54 = vld [vmem:[#allocation67_spill] sm:$0xff] }
 0x5e4   : > { %14985 = vst [vmem:[#allocation15_spill] sm:$0xff] %v13269_v62  ;;  %v7474_v34 = vmul.f32 %v14994_v57, %v7394_v13  ;;  %v6041_v38 = vadd.f32 %v6040_v53, %v6039_v27  ;;  %v6410_v0 = vadd.f32 %v6409_v39, %v6408_v55  ;;  %v6779_v62 = vadd.f32 %v6778_v59, %v6777_v47  ;;  %v14999_v13 = vld [vmem:[#allocation168_spill] sm:$0xff]  ;;  %v15003_v57 = vld [vmem:[#allocation55_spill] sm:$0xff] }
 0x5e5   : > { %v7017_v43 = vmul.f32 %v14993_v52, %v14992_v16  ;;  %v7146_v58 = vadd.f32 %v7145_v60, %v7144_v22  ;;  %4902 = vperm.xlu1 %8165, %v14996_v54   ;;  %8491 = vpow2.f32 %v7280_v45  ;;  %v14997_v36 = vperm.slane %v14883_v56, 7  ;;  %5243 = vperm.xlu2 %8159, %v14972_v29   ;;  %v15000_v45 = vld [vmem:[#allocation194_spill] sm:$0xff] }
 0x5e6   : > { %v6659_v42 = vadd.f32 %v6643_v50, %v6555_v63  ;;  %v13299_v27 = vmul.f32 %v14955_v61, %v14999_v13  ;;  %v6929_v47 = vmul.f32 %v8490_v19, %v13258_v17  ;;  %v5263_v55 = vmul.f32 %v13031_v49, %v13026_v28  ;;  %v13309_v61 = vpop.permute.xlu0 %7072 }
 0x5e7   : > { %v7386_v52 = vmul.f32 %v14998_v26, %v14997_v36  ;;  %v7147_v53 = vrot.slane %v7146_v58, 2  ;;  %v7475_v1 = vmul.f32 %v7434_v24, %v7395_v7  ;;  %v6554_v39 = vmul.f32 %v15000_v45, %v6289_v25  ;;  %v6331_v13 = vpop.permute.xlu1 %6330 }
 0x5e8   : > { %v7511_v59 = vsel %vm1349_vm12, %v7474_v34, 0.0  ;;  %v5632_v22 = vmul.f32 %v13065_v4, %v13147_v32  ;;  %v6042_v50 = vrot.slane %v6041_v38, 1  ;;  %v13312_v19 = vadd.f32 %v7017_v43, %v6929_v47  ;;  %v15004_v34 = vld [vmem:[#allocation52_spill] sm:$0xff]  ;;  %v15005_v43 = vld [vmem:[#allocation74_spill] sm:$0xff] }
 0x5e9   : > { %v6411_v60 = vrot.slane %v6410_v0, 1  ;;  %v6780_v28 = vrot.slane %v6779_v62, 1  ;;  %v7148_v49 = vadd.f32 %v7147_v53, %v7146_v58  ;;  %v7512_v7 = vsel %vm1349_vm12, %v7475_v1, 0.0 }
 0x5ea   : > { %15001 = vst [vmem:[#allocation214_spill] sm:$0xff] %v13312_v19  ;;  %v15002_v16 = vperm.slane %v14883_v56, 5  ;;  %v13319_v63 = vmul.f32 %v15004_v34, %v6659_v42  ;;  %v5262_v4 = vmul.f32 %v13149_v18, %v13127_v44  ;;  %v7513_v32 = vadd.f32 %v7512_v7, %v7511_v59 }
 0x5eb   : > { %v8492_v36 = vpop.eup %8491  ;;  %v4919_v15 = vmul.f32 %v15005_v43, %v12985_v10  ;;  %v5307_v26 = vsel %vm1349_vm12, %v5263_v55, 0.0  ;;  %v7149_v58 = vrot.slane %v7148_v49, 1  ;;  %v13327_v24 = vadd.f32 %v13246_v5, %v6554_v39 }
 0x5ec   : > { %v6649_v14 = vmul.f32 %v15003_v57, %v15002_v16  ;;  %v5676_v47 = vsel %vm1349_vm12, %v5632_v22, 0.0  ;;  %v6043_v53 = vadd.f32 %v6042_v50, %v6041_v38  ;;  %v5631_v1 = vmul.f32 %v13210_v11, %v13188_v6  ;;  %v15006_v6 = vld [vmem:[#allocation175_spill] sm:$0xff] }
 0x5ed   : > { %v7514_v45 = vrot.slane %v7513_v32, 4  ;;  %v6001_v44 = vmul.f32 %v13111_v23, %v13199_v48  ;;  %v6412_v18 = vadd.f32 %v6411_v60, %v6410_v0  ;;  %v6781_v59 = vadd.f32 %v6780_v28, %v6779_v62  ;;  %8166 = vset.pattern.permute.xlu1 %v14143_v20  ;;  %8160 = vset.pattern.permute.xlu2 %v14728_v2  ;;  %v13346_v20 = vpop.permute.xlu2 %4882  ;;  %v15007_v62 = vld [vmem:[#allocation32_spill] sm:$0xff]  ;;  %v15009_v50 = vld [vmem:[#allocation155_spill] sm:$0xff] }
 0x5ee   : > { %v6000_v10 = vmul.f32 %v5962_v30, %v13232_v35  ;;  %v5306_v55 = vsel %vm1349_vm12, %v5262_v4, 0.0  ;;  %v6369_v39 = vmul.f32 %v6331_v13, %v6289_v25  ;;  %5247 = vperm.xlu1 %8166, %v14996_v54   ;;  %v6561_v11 = vmul.f32 %v15006_v6, %v13264_v46  ;;  %5612 = vperm.xlu2 %8160, %v14972_v29   ;;  %v13358_v28 = vpop.permute.xlu0 %7441 }
 0x5ef   : > { %v7515_v5 = vadd.f32 %v7514_v45, %v7513_v32  ;;  %v6370_v23 = vmul.f32 %v13172_v51, %v13252_v33  ;;  %v4918_v0 = vmul.f32 %v13099_v12, %v13091_v3  ;;  %v7150_v48 = vadd.f32 %v7149_v58, %v7148_v49 }
 0x5f0   : > { %v7298_v35 = vmul.f32 %v8492_v36, %v13312_v19  ;;  %v6116_v30 = vadd.f32 %v15007_v62, %v6043_v53  ;;  %v5675_v25 = vsel %vm1349_vm12, %v5631_v1, 0.0  ;;  %v13351_v22 = vadd.f32 %v6649_v14, %v6561_v11  ;;  %v15011_v11 = vld [vmem:[#allocation71_spill] sm:$0xff] }
 0x5f1   : > { %v7516_v38 = vrot.slane %v7515_v5, 2  ;;  %v6485_v60 = vadd.f32 %v15009_v50, %v6412_v18  ;;  %v5308_v51 = vadd.f32 %v5307_v26, %v5306_v55  ;;  %v6044_v33 = vsel %vm1349_vm12, %v6000_v10, 0.0 }
 0x5f2   : > { %15008 = vst [vmem:[#allocation30_spill] sm:$0xff] %v13351_v22  ;;  %v13355_v3 = vadd.f32 %v7386_v52, %v7298_v35  ;;  %v6739_v12 = vmul.f32 %v13249_v21, %v6659_v42  ;;  %v6854_v49 = vadd.f32 %v13208_v9, %v6781_v59  ;;  %v6413_v16 = vsel %vm1349_vm12, %v6369_v39, 0.0  ;;  %v6700_v21 = vpop.permute.xlu1 %6699 }
 0x5f3   : > { %v7517_v7 = vadd.f32 %v7516_v38, %v7515_v5  ;;  %v6045_v57 = vsel %vm1349_vm12, %v6001_v44, 0.0  ;;  %v6414_v14 = vsel %vm1349_vm12, %v6370_v23, 0.0  ;;  %v5677_v34 = vadd.f32 %v5676_v47, %v5675_v25  ;;  %v15013_v25 = vld [vmem:[#allocation15_spill] sm:$0xff] }
 0x5f4   : > { %15010 = vst [vmem:[#allocation40_spill] sm:$0xff] %v13355_v3  ;;  %v7223_v4 = vadd.f32 %v13276_v37, %v7150_v48  ;;  %v7656_v32 = vrot.slane %v6116_v30, 5  ;;  %v4962_v52 = vsel %vm1349_vm12, %v4918_v0, 0.0  ;;  %v6046_v36 = vadd.f32 %v6045_v57, %v6044_v33  ;;  %v15012_v30 = vld [vmem:[#allocation14_spill] sm:$0xff]  ;;  %v15016_v57 = vld [vmem:[#allocation39_spill] sm:$0xff] }
 0x5f5   : > { %v7518_v43 = vrot.slane %v7517_v7, 1  ;;  %v7680_v42 = vrot.slane %v6485_v60, 4  ;;  %v5309_v26 = vrot.slane %v5308_v51, 4  ;;  %v6415_v58 = vadd.f32 %v6414_v14, %v6413_v16  ;;  %v13377_v5 = vpop.permute.xlu2 %5231  ;;  %v15017_v14 = vld [vmem:[#allocation162_spill] sm:$0xff] }
 0x5f6   : > { %v6738_v9 = vmul.f32 %v6700_v21, %v13327_v24  ;;  %v4963_v13 = vsel %vm1349_vm12, %v4919_v15, 0.0  ;;  %v6783_v53 = vsel %vm1349_vm12, %v6739_v12, 0.0  ;;  %v7704_v1 = vrot.slane %v6854_v49, 3  ;;  %8167 = vset.pattern.permute.xlu1 %v14728_v2  ;;  %8161 = vset.pattern.permute.xlu2 %v14734_v40  ;;  %v13397_v49 = vld [vmem:[%s13964_s11 + $0x60] sm:$0xff] }
 0x5f7   : > { %v7519_v45 = vadd.f32 %v7518_v43, %v7517_v7  ;;  %v4964_v37 = vadd.f32 %v4963_v13, %v4962_v52  ;;  %v5678_v47 = vrot.slane %v5677_v34, 4  ;;  %v7728_v44 = vrot.slane %v7223_v4, 2  ;;  %5616 = vperm.xlu1 %8167, %v14996_v54   ;;  %5981 = vperm.xlu2 %8161, %v14972_v29   ;;  %v15014_v7 = vld [vmem:[#allocation182_spill] sm:$0xff]  ;;  %v15019_v4 = vld [vmem:[#allocation149_spill] sm:$0xff]  ;;  %v8556_v43 = vld [vmem:[%s13964_s11 + $0x78] sm:$0xff] }
 0x5f8   : > { %v6782_v18 = vsel %vm1349_vm12, %v6738_v9, 0.0  ;;  %v7786_v59 = vsel %vm7782_vm8, %v13139_v31, %v7656_v32  ;;  %v6047_v10 = vrot.slane %v6046_v36, 4  ;;  %v5310_v39 = vadd.f32 %v5309_v26, %v5308_v51  ;;  %v13389_v51 = vpop.permute.xlu0 %4892  ;;  %v15020_v21 = vld [vmem:[#allocation201_spill] sm:$0xff] }
 0x5f9   : > { %v7592_v15 = vadd.f32 %v13299_v27, %v7519_v45  ;;  %v6784_v55 = vadd.f32 %v6783_v53, %v6782_v18  ;;  %v7795_v2 = vsel %vm7791_vm9, %v7786_v59, %v7680_v42  ;;  %v6416_v6 = vrot.slane %v6415_v58, 4  ;;  %v15023_v53 = vld [vmem:[#allocation181_spill] sm:$0xff] }
 0x5fa   : > { %v6923_v23 = vmul.f32 %v15011_v11, %v13327_v24  ;;  %v7028_v0 = vadd.f32 %v13281_v8, %v13319_v63  ;;  %v7804_v31 = vsel %vm7800_vm10, %v7795_v2, %v7704_v1  ;;  %v5679_v35 = vadd.f32 %v5678_v47, %v5677_v34  ;;  %v7069_v12 = vpop.permute.xlu1 %7068  ;;  %v15024_v1 = vld [vmem:[#allocation195_spill] sm:$0xff] }
 0x5fb   : > { %v7752_v48 = vrot.slane %v7592_v15, 1  ;;  %v6785_v27 = vrot.slane %v6784_v55, 4  ;;  %v7813_v62 = vsel %vm7809_vm13, %v7804_v31, %v7728_v44  ;;  %8493 = vpow2.f32 %v15012_v30  ;;  %v15029_v31 = vld [vmem:[#allocation176_spill] sm:$0xff] }
 0x5fc   : > { %v7027_v38 = vadd.f32 %v15013_v25, %v6923_v23  ;;  %v7108_v50 = vmul.f32 %v13309_v61, %v7028_v0  ;;  %v4965_v60 = vrot.slane %v4964_v37, 4  ;;  %v6048_v24 = vadd.f32 %v6047_v10, %v6046_v36 }
 0x5fd   : > { %v7821_v33 = vsel %vm1109_vm11, %v7813_v62, %v7752_v48  ;;  %v5311_v8 = vrot.slane %v5310_v39, 2  ;;  %v6417_v63 = vadd.f32 %v6416_v6, %v6415_v58  ;;  %v15015_v16 = vperm.slane %v15014_v7, 6  ;;  %v15022_v58 = vld [vmem:[#allocation34_spill] sm:$0xff] }
 0x5fe   : > { %7829 = vst.msk [vmem:[%s12504_s22 + $0x18] sm:$0xff] %vm1349_vm12, %v7821_v33  ;;  %8495 = vpow2.f32 %v15016_v57  ;;  %v15018_v34 = vperm.slane %v15017_v14, 7  ;;  %v6786_v52 = vadd.f32 %v6785_v27, %v6784_v55  ;;  %v7107_v36 = vmul.f32 %v7069_v12, %v7027_v38  ;;  %v15030_v33 = vld [vmem:[#allocation72_spill] sm:$0xff] }
 0x5ff   : > { %v13402_v61 = vmul.f32 %v13397_v49, %v15015_v16  ;;  %v15021_v42 = vperm.slane %v15020_v21, 7  ;;  %v7293_v9 = vmul.f32 %v15022_v58, %v7028_v0  ;;  %v5680_v13 = vrot.slane %v5679_v35, 2  ;;  %8168 = vset.pattern.permute.xlu1 %v14734_v40  ;;  %v15027_v40 = vld [vmem:[#allocation135_spill] sm:$0xff]  ;;  %v13429_v0 = vpop.permute.xlu2 %5600 }
 0x600   : > { %v7381_v32 = vmul.f32 %v15019_v4, %v15018_v34  ;;  %8497 = vpow2.f32 %v15023_v53  ;;  %v13417_v45 = vmul.f32 1.442695, %v15024_v1  ;;  %v7152_v47 = vsel %vm1349_vm12, %v7108_v50, 0.0  ;;  %5985 = vperm.xlu1 %8168, %v14996_v54  }
 0x601   : > { %v7251_v26 = vmul.f32 %v8556_v43, %v15021_v42  ;;  %v4966_v44 = vadd.f32 %v4965_v60, %v4964_v37  ;;  %v6049_v18 = vrot.slane %v6048_v24, 2  ;;  %v7151_v59 = vsel %vm1349_vm12, %v7107_v36, 0.0  ;;  %v13423_v15 = vpop.eup %8493  ;;  %v13447_v42 = vpop.permute.xlu0 %5239 }
 0x602   : > { %v15025_v10 = vmov 4   ;;  %v15026_v55 = vmov %v15018_v34  ;;  %v5312_v6 = vadd.f32 %v5311_v8, %v5310_v39  ;;  %v6418_v11 = vrot.slane %v6417_v63, 2  ;;  %v13438_v39 = vld [vmem:[%s13964_s11 + $0x50] sm:$0xff]  ;;  %v7438_v58 = vpop.permute.xlu1 %7437 }
 0x603   : > { %8162 = vset.pattern.permute.xlu2 %v15025_v10  ;;  %v7380_v2 = vmul.f32 %v15027_v40, %v15026_v55  ;;  %v7153_v23 = vadd.f32 %v7152_v47, %v7151_v59  ;;  %v15028_v37 = vperm.slane %v14883_v56, 6  ;;  %v7397_v27 = vadd.f32 %v7381_v32, %v7293_v9  ;;  %v15031_v8 = vld [vmem:[#allocation163_spill] sm:$0xff]  ;;  %v13452_v9 = vld [vmem:[%s13964_s11 + $0x58] sm:$0xff] }
 0x604   : > { %6350 = vperm.xlu2 %8162, %v14972_v29   ;;  %v6787_v62 = vrot.slane %v6786_v52, 2  ;;  %v7282_v30 = vmul.f32 1.442695, %v7251_v26  ;;  %v8496_v25 = vpop.eup %8495  ;;  %v5681_v50 = vadd.f32 %v5680_v13, %v5679_v35  ;;  %v7292_v12 = vmul.f32 %v15030_v33, %v7027_v38  ;;  %v15035_v47 = vld [vmem:[#allocation80_spill] sm:$0xff] }
 0x605   : > { %v7018_v48 = vmul.f32 %v15029_v31, %v15028_v37  ;;  %v7154_v60 = vrot.slane %v7153_v23, 4  ;;  %v15032_v16 = vperm.slane %v15031_v8, 5  ;;  %v4967_v14 = vrot.slane %v4966_v44, 2  ;;  %v15038_v59 = vld [vmem:[#allocation104_spill] sm:$0xff] }
 0x606   : > { %v7477_v34 = vmul.f32 %v13358_v28, %v7397_v27  ;;  %v6050_v4 = vadd.f32 %v6049_v18, %v6048_v24  ;;  %v6930_v32 = vmul.f32 %v8496_v25, %v13351_v22  ;;  %v8498_v35 = vpop.eup %8497  ;;  %v5313_v36 = vrot.slane %v5312_v6, 1 }
 0x607   : > { %v13443_v57 = vmul.f32 %v13438_v39, %v15032_v16  ;;  %v6419_v43 = vadd.f32 %v6418_v11, %v6417_v63  ;;  %v7155_v38 = vadd.f32 %v7154_v60, %v7153_v23  ;;  %v7396_v21 = vadd.f32 %v7380_v2, %v7292_v12  ;;  %v13474_v33 = vpop.permute.xlu2 %5969  ;;  %v15043_v12 = vld [vmem:[#allocation62_spill] sm:$0xff] }
 0x608   : > { %v6788_v26 = vadd.f32 %v6787_v62, %v6786_v52  ;;  %v15033_v13 = vperm.slane %v15031_v8, 2  ;;  %v13459_v24 = vadd.f32 %v7018_v48, %v6930_v32  ;;  %8499 = vpow2.f32 %v7282_v30  ;;  %v15036_v52 = vld [vmem:[#allocation166_spill] sm:$0xff]  ;;  %8169 = vset.pattern.permute.xlu1 %v15025_v10  ;;  %v15044_v32 = vld [vmem:[#allocation43_spill] sm:$0xff] }
 0x609   : > { %v5682_v63 = vrot.slane %v5681_v50, 1  ;;  %v7156_v53 = vrot.slane %v7155_v38, 2  ;;  %v7476_v1 = vmul.f32 %v7438_v58, %v7396_v21  ;;  %8501 = vpow2.f32 %v15035_v47  ;;  %6354 = vperm.xlu1 %8169, %v14996_v54   ;;  %v15041_v30 = vld [vmem:[#allocation138_spill] sm:$0xff] }
 0x60a   : > { %v13457_v28 = vmul.f32 %v13452_v9, %v15033_v13  ;;  %15034 = vst [vmem:[#allocation49_spill] sm:$0xff] %v13459_v24  ;;  %v15037_v18 = vperm.slane %v15036_v52, 0  ;;  %v4968_v40 = vadd.f32 %v4967_v14, %v4966_v44  ;;  %v7521_v2 = vsel %vm1349_vm12, %v7477_v34, 0.0  ;;  %v8559_v34 = vld [vmem:[%s13965_s12 + $0x4] sm:$0x1]  ;;  %v4888_v3 = vpop.permute.xlu1 %4887 }
 0x60b   : > { %v6051_v11 = vrot.slane %v6050_v4, 1  ;;  %v5314_v23 = vadd.f32 %v5313_v36, %v5312_v6  ;;  %v6420_v37 = vrot.slane %v6419_v43, 1  ;;  %v7157_v31 = vadd.f32 %v7156_v53, %v7155_v38  ;;  %v15045_v53 = vld [vmem:[#allocation77_spill] sm:$0xff] }
 0x60c   : > { %v4808_v55 = vmul.f32 %v15038_v59, %v15037_v18  ;;  %v7520_v48 = vsel %vm1349_vm12, %v7476_v1, 0.0  ;;  %v15039_v27 = vmov 5   ;;  %v15040_v62 = vmov %v15037_v18 }
 0x60d   : > { %8163 = vset.pattern.permute.xlu2 %v15039_v27  ;;  %v4809_v25 = vmul.f32 %v15041_v30, %v15040_v62  ;;  %v6789_v60 = vrot.slane %v6788_v26, 1  ;;  %v7522_v44 = vadd.f32 %v7521_v2, %v7520_v48  ;;  %v4705_v10 = vmul.f32 0.0, %v8498_v35  ;;  %v15048_v2 = vld [vmem:[#allocation8_spill] sm:$0xff] }
 0x60e   : > { %6719 = vperm.xlu2 %8163, %v14972_v29   ;;  %v15042_v6 = vperm.slane %v14883_v56, 7  ;;  %v5683_v14 = vadd.f32 %v5682_v63, %v5681_v50  ;;  %v6478_v36 = vmul.f32 %v8559_v34, %v15044_v32  ;;  %v7158_v38 = vrot.slane %v7157_v31, 1  ;;  %v8500_v21 = vpop.eup %8499  ;;  %v15047_v56 = vld [vmem:[#allocation107_spill] sm:$0xff]  ;;  %v15049_v32 = vld [vmem:[#allocation164_spill] sm:$0xff] }
 0x60f   : > { %v4969_v58 = vrot.slane %v4968_v40, 1  ;;  %v6052_v13 = vadd.f32 %v6051_v11, %v6050_v4  ;;  %v4824_v1 = vadd.f32 %v4808_v55, %v15045_v53  ;;  %v7523_v47 = vrot.slane %v7522_v44, 4  ;;  %v8502_v18 = vpop.eup %8501  ;;  %v15050_v11 = vld [vmem:[#allocation54_spill] sm:$0xff] }
 0x610   : > { %v7387_v16 = vmul.f32 %v15043_v12, %v15042_v6  ;;  %v15046_v35 = vperm.slane %v15036_v52, 1  ;;  %v5379_v50 = vadd.f32 %v15048_v2, %v5314_v23  ;;  %v6421_v63 = vadd.f32 %v6420_v37, %v6419_v43  ;;  %v13495_v23 = vpop.permute.xlu0 %5608 }
 0x611   : > { %v7299_v48 = vmul.f32 %v8500_v21, %v13459_v24  ;;  %v4920_v62 = vmul.f32 %v13346_v20, %v4824_v1  ;;  %v6790_v30 = vadd.f32 %v6789_v60, %v6788_v26  ;;  %v7524_v6 = vadd.f32 %v7523_v47, %v7522_v44  ;;  %v15054_v26 = vld [vmem:[#allocation141_spill] sm:$0xff]  ;;  %8170 = vset.pattern.permute.xlu1 %v15039_v27  ;;  %v15058_v27 = vld [vmem:[#allocation240_spill] sm:$0xff] }
 0x612   : > { %v5168_v59 = vmul.f32 %v15047_v56, %v15046_v35  ;;  %v4825_v12 = vadd.f32 %v4809_v25, %v4705_v10  ;;  %v5748_v4 = vadd.f32 %v15049_v32, %v5683_v14  ;;  %v6847_v55 = vmul.f32 %v8559_v34, %v15050_v11  ;;  %v15052_v35 = vld [vmem:[#allocation178_spill] sm:$0xff]  ;;  %v15055_v10 = vld [vmem:[#allocation83_spill] sm:$0xff]  ;;  %6723 = vperm.xlu1 %8170, %v14996_v54  }
 0x613   : > { %v7159_v53 = vadd.f32 %v7158_v38, %v7157_v31  ;;  %v13492_v19 = vadd.f32 %v7387_v16, %v7299_v48  ;;  %v4970_v17 = vadd.f32 %v4969_v58, %v4968_v40  ;;  %v6117_v56 = vadd.f32 %v15052_v35, %v6052_v13  ;;  %v15057_v58 = vld [vmem:[#allocation3_spill] sm:$0xff] }
 0x614   : > { %v7525_v43 = vrot.slane %v7524_v6, 2  ;;  %v4921_v37 = vmul.f32 %v4888_v3, %v4825_v12  ;;  %v15053_v20 = vperm.slane %v15036_v52, 1  ;;  %v7609_v25 = vrot.slane %v5379_v50, 7 }
 0x615   : > { %15051 = vst [vmem:[#allocation65_spill] sm:$0xff] %v13492_v19  ;;  %v6486_v44 = vadd.f32 %v6478_v36, %v6421_v63  ;;  %v7216_v14 = vmul.f32 %v8559_v34, %v15055_v10  ;;  %v4971_v31 = vsel %vm1349_vm12, %v4920_v62, 0.0  ;;  %v6855_v16 = vadd.f32 %v6847_v55, %v6790_v30  ;;  %v13508_v36 = vpop.permute.xlu2 %6338 }
 0x616   : > { %v5169_v60 = vmul.f32 %v15054_v26, %v15053_v20  ;;  %v7526_v40 = vadd.f32 %v7525_v43, %v7524_v6  ;;  %v4972_v38 = vsel %vm1349_vm12, %v4921_v37, 0.0  ;;  %v15056_v21 = vmov 6   ;;  %v15060_v26 = vld [vmem:[#allocation183_spill] sm:$0xff] }
 0x617   : > { %8164 = vset.pattern.permute.xlu2 %v15056_v21  ;;  %v7633_v3 = vrot.slane %v5748_v4, 6  ;;  %v5080_v13 = vmul.f32 %v15057_v58, %v4824_v1  ;;  %v7224_v47 = vadd.f32 %v7216_v14, %v7159_v53  ;;  %v4973_v2 = vadd.f32 %v4972_v38, %v4971_v31  ;;  %v15059_v1 = vld [vmem:[#allocation172_spill] sm:$0xff]  ;;  %v15061_v31 = vld [vmem:[#allocation199_spill] sm:$0xff] }
 0x618   : > { %7088 = vperm.xlu2 %8164, %v14972_v29   ;;  %v5010_v50 = vadd.f32 %v15058_v27, %v4970_v17  ;;  %v7657_v63 = vrot.slane %v6117_v56, 5  ;;  %v7527_v48 = vrot.slane %v7526_v40, 1  ;;  %v6864_v62 = vperm.slane %v15031_v8, 6  ;;  %v13524_v14 = vpop.permute.xlu0 %5977  ;;  %v13548_v27 = vld [vmem:[%s13964_s11 + $0x68] sm:$0xff] }
 0x619   : > { %v7681_v30 = vrot.slane %v6486_v44, 4  ;;  %v5184_v6 = vadd.f32 %v5168_v59, %v5080_v13  ;;  %v4974_v32 = vrot.slane %v4973_v2, 4  ;;  %v5081_v11 = vmul.f32 %v8502_v18, %v4825_v12  ;;  %v5236_v18 = vpop.permute.xlu1 %5235 }
 0x61a   : > { %v7769_v4 = vsel %vm1084_vm0, %v5010_v50, %v7609_v25  ;;  %v7705_v55 = vrot.slane %v6855_v16, 3  ;;  %v7585_v53 = vmul.f32 %v8559_v34, %v15059_v1  ;;  %v7528_v35 = vadd.f32 %v7527_v48, %v7526_v40  ;;  %8171 = vset.pattern.permute.xlu1 %v15056_v21 }
 0x61b   : > { %v7778_v43 = vsel %vm7773_vm7, %v7769_v4, %v7633_v3  ;;  %v5264_v37 = vmul.f32 %v13377_v5, %v5184_v6  ;;  %v7729_v20 = vrot.slane %v7224_v47, 2  ;;  %v13516_v17 = vadd.f32 %v5169_v60, %v5081_v11  ;;  %7092 = vperm.xlu1 %8171, %v14996_v54  }
 0x61c   : > { %v7787_v56 = vsel %vm7782_vm8, %v7778_v43, %v7657_v63  ;;  %8503 = vpow2.f32 %v15060_v26  ;;  %v7593_v59 = vadd.f32 %v7585_v53, %v7528_v35  ;;  %v4975_v44 = vadd.f32 %v4974_v32, %v4973_v2  ;;  %v15064_v32 = vld [vmem:[#allocation110_spill] sm:$0xff]  ;;  %v15068_v43 = vld [vmem:[#allocation23_spill] sm:$0xff] }
 0x61d   : > { %v7796_v12 = vsel %vm7791_vm9, %v7787_v56, %v7681_v30  ;;  %v6907_v25 = vmul.f32 1.442695, %v13402_v61  ;;  %v5265_v34 = vmul.f32 %v5236_v18, %v13516_v17  ;;  %v7233_v10 = vperm.slane %v15031_v8, 7  ;;  %v15069_v56 = vld [vmem:[#allocation184_spill] sm:$0xff] }
 0x61e   : > { %v7805_v5 = vsel %vm7800_vm10, %v7796_v12, %v7705_v55  ;;  %v7753_v60 = vrot.slane %v7593_v59, 1  ;;  %8505 = vpow2.f32 %v15061_v31  ;;  %v5429_v16 = vmul.f32 1.442695, %v13457_v28  ;;  %v13540_v28 = vpop.permute.xlu2 %6707 }
 0x61f   : > { %v5315_v40 = vsel %vm1349_vm12, %v5264_v37, 0.0  ;;  %v7814_v61 = vsel %vm7809_vm13, %v7805_v5, %v7729_v20  ;;  %v5316_v38 = vsel %vm1349_vm12, %v5265_v34, 0.0  ;;  %v6877_v3 = vmul.f32 %v13438_v39, %v6864_v62 }
 0x620   : > { %8179 = vset.pattern.permute.xlu2 %v14940_v41  ;;  %v7822_v58 = vsel %vm1109_vm11, %v7814_v61, %v7753_v60  ;;  %v4976_v13 = vrot.slane %v4975_v44, 2  ;;  %v5317_v21 = vadd.f32 %v5316_v38, %v5315_v40  ;;  %v15062_v47 = vperm.slane %v15031_v8, 3  ;;  %v15073_v38 = vld [vmem:[#allocation144_spill] sm:$0xff] }
 0x621   : > { %7457 = vperm.xlu2 %8179, %v14972_v29   ;;  %7830 = vst.msk [vmem:[%s12504_s22 + $0x20] sm:$0xff] %vm1349_vm12, %v7822_v58  ;;  %8507 = vpow2.f32 %v6907_v25  ;;  %v7234_v50 = vperm.slane %v15014_v7, 7  ;;  %v6534_v63 = vmul.f32 1.442695, %v13443_v57  ;;  %v7246_v29 = vmul.f32 %v13438_v39, %v7233_v10  ;;  %v13572_v39 = vld [vmem:[%s13965_s12 + $0x6] sm:$0x1]  ;;  %v13584_v25 = vpop.permute.xlu1 %5604 }
 0x622   : > { %v5771_v2 = vmul.f32 %v13452_v9, %v15062_v47  ;;  %v13557_v48 = vpop.eup %8503  ;;  %v15063_v30 = vperm.slane %v15036_v52, 2  ;;  %v5318_v4 = vrot.slane %v5317_v21, 4  ;;  %8509 = vpow2.f32 %v5429_v16  ;;  %15067 = vst [vmem:[#allocation146_spill] sm:$0xff] %v13572_v39 }
 0x623   : > { %v15065_v55 = vperm.slane %v15031_v8, 4  ;;  %8511 = vpow2.f32 %v13417_v45  ;;  %v6903_v53 = vmul.f32 1.442695, %v6877_v3  ;;  %v15066_v57 = vperm.slane %v15014_v7, 0  ;;  %8180 = vset.pattern.permute.xlu1 %v14940_v41 }
 0x624   : > { %v5537_v11 = vmul.f32 %v15064_v32, %v15063_v30  ;;  %v13576_v37 = vmul.f32 %v13572_v39, %v15068_v43  ;;  %v8506_v20 = vpop.eup %8505  ;;  %v5449_v26 = vmul.f32 %v15069_v56, %v5184_v6  ;;  %v4977_v59 = vadd.f32 %v4976_v13, %v4975_v44  ;;  %7461 = vperm.xlu1 %8180, %v14996_v54  }
 0x625   : > { %v6140_v1 = vmul.f32 %v13452_v9, %v15065_v55  ;;  %v4659_v35 = vmul.f32 %v15066_v57, %v13548_v27  ;;  %v5319_v18 = vadd.f32 %v5318_v4, %v5317_v21  ;;  %v5798_v45 = vmul.f32 1.442695, %v5771_v2  ;;  %v15075_v2 = vld [vmem:[#allocation113_spill] sm:$0xff] }
 0x626   : > { %v13582_v12 = vmul.f32 %v13397_v49, %v7234_v50  ;;  %8513 = vpow2.f32 %v6534_v63  ;;  %v7272_v34 = vmul.f32 1.442695, %v7246_v29  ;;  %v15070_v5 = vperm.slane %v15031_v8, 5  ;;  %v13606_v29 = vpop.permute.xlu0 %6346  ;;  %v13610_v4 = vpop.permute.xlu2 %7076 }
 0x627   : > { %v13589_v31 = vadd.f32 %v5537_v11, %v5449_v26  ;;  %v5320_v16 = vrot.slane %v5319_v18, 2  ;;  %v6167_v6 = vmul.f32 1.442695, %v6140_v1  ;;  %v15071_v44 = vperm.slane %v15014_v7, 1  ;;  %v13594_v61 = vpop.eup %8507 }
 0x628   : > { %v6509_v60 = vmul.f32 %v13452_v9, %v15070_v5  ;;  %v15072_v49 = vmov %v15063_v30  ;;  %8515 = vpow2.f32 %v6903_v53  ;;  %v4688_v58 = vmul.f32 1.442695, %v4659_v35  ;;  %v8510_v21 = vpop.eup %8509 }
 0x629   : > { %v5035_v40 = vmul.f32 %v15071_v44, %v13548_v27  ;;  %v5538_v3 = vmul.f32 %v15073_v38, %v15072_v49  ;;  %v6878_v13 = vmul.f32 %v13452_v9, %v6864_v62  ;;  %v15074_v47 = vperm.slane %v15036_v52, 3  ;;  %v8512_v11 = vpop.eup %8511  ;;  %v15083_v38 = vld [vmem:[#allocation10_spill] sm:$0xff] }
 0x62a   : > { %v4978_v30 = vrot.slane %v4977_v59, 1  ;;  %v5321_v32 = vadd.f32 %v5320_v16, %v5319_v18  ;;  %8517 = vpow2.f32 %v5798_v45  ;;  %v5450_v41 = vmul.f32 %v8510_v21, %v13516_v17  ;;  %v15079_v16 = vld [vmem:[#allocation151_spill] sm:$0xff] }
 0x62b   : > { %v5906_v63 = vmul.f32 %v15075_v2, %v15074_v47  ;;  %8519 = vpow2.f32 %v7272_v34  ;;  %v6536_v55 = vmul.f32 1.442695, %v6509_v60  ;;  %v15076_v62 = vperm.slane %v15014_v7, 2 }
 0x62c   : > { %v5818_v53 = vmul.f32 %v8506_v20, %v13589_v31  ;;  %v5322_v57 = vrot.slane %v5321_v32, 1  ;;  %8521 = vpow2.f32 %v6167_v6  ;;  %v5064_v35 = vmul.f32 1.442695, %v5035_v40  ;;  %v8514_v43 = vpop.eup %8513  ;;  %v15082_v40 = vld [vmem:[#allocation116_spill] sm:$0xff] }
 0x62d   : > { %v5404_v1 = vmul.f32 %v15076_v62, %v13548_v27  ;;  %v13616_v56 = vadd.f32 %v5538_v3, %v5450_v41  ;;  %8523 = vpow2.f32 %v4688_v58  ;;  %v6905_v54 = vmul.f32 1.442695, %v6878_v13  ;;  %v5974_v58 = vpop.permute.xlu1 %5973 }
 0x62e   : > { %v7247_v17 = vmul.f32 %v13452_v9, %v7233_v10  ;;  %v13621_v26 = vadd.f32 %v5906_v63, %v5818_v53  ;;  %v4979_v18 = vadd.f32 %v4978_v30, %v4977_v59  ;;  %v5323_v45 = vadd.f32 %v5322_v57, %v5321_v32  ;;  %v13626_v5 = vpop.eup %8515 }
 0x62f   : > { %v15077_v34 = vperm.slane %v15014_v7, 3  ;;  %v15078_v60 = vmov %v15074_v47  ;;  %8525 = vpow2.f32 %v6536_v55  ;;  %v5433_v44 = vmul.f32 1.442695, %v5404_v1  ;;  %v15086_v55 = vld [vmem:[#allocation7_spill] sm:$0xff] }
 0x630   : > { %v5907_v6 = vmul.f32 %v15079_v16, %v15078_v60  ;;  %v15080_v8 = vperm.slane %v15014_v7, 4  ;;  %v8518_v10 = vpop.eup %8517  ;;  %v15081_v59 = vperm.slane %v15036_v52, 4  ;;  %v5380_v3 = vadd.f32 %v15083_v38, %v5323_v45  ;;  %v13658_v16 = vpop.permute.xlu0 %6715 }
 0x631   : > { %v5773_v20 = vmul.f32 %v15077_v34, %v13548_v27  ;;  %8527 = vpow2.f32 %v5064_v35  ;;  %v15084_v13 = vperm.slane %v15014_v7, 5  ;;  %v13641_v47 = vpop.eup %8519  ;;  %v5819_v2 = vmul.f32 %v8518_v10, %v13616_v56  ;;  %v13652_v34 = vld [vmem:[%s13965_s12 + $0x5] sm:$0x1] }
 0x632   : > { %v6142_v9 = vmul.f32 %v15080_v8, %v13548_v27  ;;  %v6275_v49 = vmul.f32 %v15082_v40, %v15081_v59  ;;  %8529 = vpow2.f32 %v6905_v54  ;;  %v7274_v63 = vmul.f32 1.442695, %v7247_v17  ;;  %v8522_v41 = vpop.eup %8521  ;;  %v15087_v54 = vld [vmem:[#allocation35_spill] sm:$0xff]  ;;  %v15088_v40 = vld [vmem:[#allocation154_spill] sm:$0xff] }
 0x633   : > { %v6511_v21 = vmul.f32 %v15084_v13, %v13548_v27  ;;  %v15085_v30 = vperm.slane %v15014_v7, 6  ;;  %v5011_v62 = vadd.f32 %v15086_v55, %v4979_v18  ;;  %v6187_v1 = vmul.f32 %v8512_v11, %v13621_v26  ;;  %v8524_v35 = vpop.eup %8523  ;;  %v15090_v13 = vld [vmem:[#allocation119_spill] sm:$0xff]  ;;  %v15093_v55 = vld [vmem:[#allocation152_spill] sm:$0xff] }
 0x634   : > { %v7610_v53 = vrot.slane %v5380_v3, 7  ;;  %v5802_v57 = vmul.f32 1.442695, %v5773_v20  ;;  %v5923_v45 = vadd.f32 %v5907_v6, %v5819_v2  ;;  %v13656_v17 = vmul.f32 %v13652_v34, %v15087_v54  ;;  %v13663_v20 = vpop.permute.xlu2 %7445 }
 0x635   : > { %v6880_v32 = vmul.f32 %v15085_v30, %v13548_v27  ;;  %8531 = vpow2.f32 %v5433_v44  ;;  %v6171_v60 = vmul.f32 1.442695, %v6142_v9  ;;  %v6291_v18 = vadd.f32 %v6275_v49, %v6187_v1  ;;  %v8526_v10 = vpop.eup %8525  ;;  %v6343_v19 = vpop.permute.xlu1 %6342 }
 0x636   : > { %v13661_v11 = vsel %vm1084_vm0, %v5011_v62, %v7610_v53  ;;  %v6540_v6 = vmul.f32 1.442695, %v6511_v21  ;;  %v7249_v8 = vmul.f32 %v7234_v50, %v13548_v27  ;;  %v6276_v38 = vmul.f32 %v15088_v40, %v15081_v59  ;;  %v15091_v21 = vld [vmem:[#allocation189_spill] sm:$0xff]  ;;  %v15094_v27 = vld [vmem:[#allocation78_spill] sm:$0xff]  ;;  %v15097_v59 = vld [vmem:[#allocation44_spill] sm:$0xff] }
 0x637   : > { %v13672_v44 = vmul.f32 1.442695, %v13582_v12  ;;  %8533 = vpow2.f32 %v7274_v63  ;;  %v6909_v9 = vmul.f32 1.442695, %v6880_v32  ;;  %v8528_v49 = vpop.eup %8527  ;;  %v15089_v3 = vperm.slane %v15036_v52, 5  ;;  %v15096_v12 = vld [vmem:[#allocation128_spill] sm:$0xff] }
 0x638   : > { %v15092_v30 = vperm.slane %v15091_v21, 0  ;;  %v4706_v50 = vmul.f32 0.0, %v15094_v27  ;;  %8535 = vpow2.f32 %v5802_v57  ;;  %v13681_v62 = vpop.eup %8529  ;;  %v6188_v63 = vmul.f32 %v8522_v41, %v5923_v45 }
 0x639   : > { %v6644_v2 = vmul.f32 %v15090_v13, %v15089_v3  ;;  %v4707_v32 = vmul.f32 0.0, %v8524_v35  ;;  %8537 = vpow2.f32 %v6171_v60  ;;  %v6556_v54 = vmul.f32 %v8514_v43, %v6291_v18  ;;  %v15102_v35 = vld [vmem:[#allocation125_spill] sm:$0xff] }
 0x63a   : > { %v4810_v7 = vmul.f32 %v15093_v55, %v15092_v30  ;;  %v15095_v1 = vmov %v15092_v30  ;;  %v13688_v40 = vmul.f32 %v13652_v34, %v15097_v59  ;;  %8539 = vpow2.f32 %v6540_v6  ;;  %v15099_v30 = vld [vmem:[#allocation122_spill] sm:$0xff] }
 0x63b   : > { %v4811_v53 = vmul.f32 %v15096_v12, %v15095_v1  ;;  %v13690_v3 = vmul.f32 1.442695, %v7249_v8  ;;  %v13692_v13 = vpop.eup %8531  ;;  %v15098_v57 = vperm.slane %v15036_v52, 6  ;;  %v6292_v27 = vadd.f32 %v6276_v38, %v6188_v63  ;;  %v15100_v1 = vld [vmem:[#allocation57_spill] sm:$0xff]  ;;  %v15104_v63 = vld [vmem:[#allocation132_spill] sm:$0xff] }
 0x63c   : > { %v13699_v41 = vmul.f32 %v13652_v34, %v15100_v1  ;;  %8541 = vpow2.f32 %v6909_v9  ;;  %v15101_v43 = vperm.slane %v15036_v52, 7  ;;  %v4826_v6 = vadd.f32 %v4810_v7, %v4706_v50  ;;  %v15106_v1 = vld [vmem:[#allocation160_spill] sm:$0xff] }
 0x63d   : > { %v7013_v55 = vmul.f32 %v15099_v30, %v15098_v57  ;;  %v6660_v8 = vadd.f32 %v6644_v2, %v6556_v54  ;;  %v5634_v12 = vmul.f32 %v13584_v25, %v13616_v56  ;;  %v13708_v59 = vpop.eup %8533  ;;  %v15103_v38 = vperm.slane %v15091_v21, 1  ;;  %v15108_v2 = vld [vmem:[#allocation136_spill] sm:$0xff] }
 0x63e   : > { %v13704_v60 = vmul.f32 %v15102_v35, %v15101_v43  ;;  %v15105_v30 = vperm.slane %v15036_v52, 5  ;;  %v6003_v24 = vmul.f32 %v5974_v58, %v5923_v45  ;;  %v4827_v22 = vadd.f32 %v4811_v53, %v4707_v32  ;;  %v13716_v39 = vpop.eup %8535  ;;  %v15112_v45 = vld [vmem:[#allocation156_spill] sm:$0xff] }
 0x63f   : > { %v5171_v57 = vmul.f32 %v15104_v63, %v15103_v38  ;;  %v15107_v7 = vperm.slane %v15091_v21, 2  ;;  %v4922_v25 = vmul.f32 %v13389_v51, %v4826_v6  ;;  %v5633_v56 = vmul.f32 %v13429_v0, %v13589_v31  ;;  %v13724_v43 = vpop.eup %8537  ;;  %v15110_v38 = vld [vmem:[#allocation139_spill] sm:$0xff]  ;;  %v13738_v0 = vpop.permute.xlu0 %7084 }
 0x640   : > { %v6645_v9 = vmul.f32 %v15106_v1, %v15105_v30  ;;  %v6372_v54 = vmul.f32 %v6343_v19, %v6292_v27  ;;  %v15109_v35 = vperm.slane %v15091_v21, 3  ;;  %v15111_v58 = vperm.slane %v15091_v21, 1  ;;  %v4898_v30 = vpop.permute.xlu2 %4897  ;;  %v13736_v1 = vpop.eup %8539  ;;  %15113 = vst [vmem:[#allocation225_spill] sm:$0xff] %v13738_v0  ;;  %v15116_v0 = vld [vmem:[#allocation142_spill] sm:$0xff] }
 0x641   : > { %v5540_v50 = vmul.f32 %v15108_v2, %v15107_v7  ;;  %v6002_v32 = vmul.f32 %v13474_v33, %v13621_v26  ;;  %v6557_v51 = vmul.f32 %v8526_v10, %v6292_v27  ;;  %v6371_v19 = vmul.f32 %v13508_v36, %v6291_v18 }
 0x642   : > { %v13729_v63 = vmul.f32 %v15110_v38, %v15109_v35  ;;  %v5170_v53 = vmul.f32 %v15112_v45, %v15111_v58  ;;  %v5685_v31 = vsel %vm1349_vm12, %v5634_v12, 0.0  ;;  %v6925_v7 = vmul.f32 %v13626_v5, %v6660_v8  ;;  %v13743_v35 = vpop.eup %8541  ;;  %v15114_v38 = vld [vmem:[#allocation207_spill] sm:$0xff] }
 0x643   : > { %v4923_v2 = vmul.f32 %v4898_v30, %v4827_v22  ;;  %v5082_v58 = vmul.f32 %v15114_v38, %v4826_v6  ;;  %v6054_v45 = vsel %vm1349_vm12, %v6003_v24, 0.0  ;;  %v6661_v33 = vadd.f32 %v6645_v9, %v6557_v51  ;;  %v6712_v9 = vpop.permute.xlu1 %6711 }
 0x644   : > { %v5083_v26 = vmul.f32 %v8528_v49, %v4827_v22  ;;  %v4980_v10 = vsel %vm1349_vm12, %v4922_v25, 0.0  ;;  %v5684_v27 = vsel %vm1349_vm12, %v5633_v56, 0.0  ;;  %v6423_v46 = vsel %vm1349_vm12, %v6372_v54, 0.0 }
 0x645   : > { %v4981_v36 = vsel %vm1349_vm12, %v4923_v2, 0.0  ;;  %v6053_v18 = vsel %vm1349_vm12, %v6002_v32, 0.0  ;;  %v6740_v5 = vmul.f32 %v13540_v28, %v6660_v8  ;;  %v5686_v12 = vadd.f32 %v5685_v31, %v5684_v27  ;;  %v15118_v28 = vld [vmem:[#allocation147_spill] sm:$0xff] }
 0x646   : > { %v4982_v30 = vadd.f32 %v4981_v36, %v4980_v10  ;;  %v6422_v6 = vsel %vm1349_vm12, %v6371_v19, 0.0  ;;  %v7029_v38 = vadd.f32 %v7013_v55, %v6925_v7  ;;  %v6055_v24 = vadd.f32 %v6054_v45, %v6053_v18  ;;  %v15120_v55 = vld [vmem:[#allocation165_spill] sm:$0xff]  ;;  %v15121_v7 = vld [vmem:[#allocation87_spill] sm:$0xff] }
 0x647   : > { %v5187_v22 = vadd.f32 %v5171_v57, %v5083_v26  ;;  %v5186_v49 = vadd.f32 %v5170_v53, %v5082_v58  ;;  %v6424_v25 = vadd.f32 %v6423_v46, %v6422_v6  ;;  %v6741_v56 = vmul.f32 %v6712_v9, %v6661_v33  ;;  %v15123_v6 = vld [vmem:[#allocation161_spill] sm:$0xff] }
 0x648   : > { %v4983_v51 = vrot.slane %v4982_v30, 4  ;;  %v15115_v54 = vperm.slane %v15091_v21, 4  ;;  %v15117_v32 = vperm.slane %v15091_v21, 5  ;;  %v15119_v19 = vperm.slane %v15036_v52, 6  ;;  %v5244_v27 = vpop.permute.xlu2 %5243 }
 0x649   : > { %v13769_v57 = vmul.f32 %v13652_v34, %v15121_v7  ;;  %v5266_v46 = vmul.f32 %v13447_v42, %v5186_v49  ;;  %v6791_v53 = vsel %vm1349_vm12, %v6740_v5, 0.0  ;;  %v5687_v58 = vrot.slane %v5686_v12, 4  ;;  %v15124_v42 = vld [vmem:[#allocation206_spill] sm:$0xff]  ;;  %v13780_v5 = vpop.permute.xlu0 %7453 }
 0x64a   : > { %v13757_v2 = vmul.f32 %v15116_v0, %v15115_v54  ;;  %v13762_v8 = vmul.f32 %v15118_v28, %v15117_v32  ;;  %v7014_v31 = vmul.f32 %v15120_v55, %v15119_v19  ;;  %v6792_v0 = vsel %vm1349_vm12, %v6741_v56, 0.0  ;;  %15125 = vst [vmem:[#allocation61_spill] sm:$0xff] %v13780_v5  ;;  %v15129_v5 = vld [vmem:[#allocation170_spill] sm:$0xff] }
 0x64b   : > { %v6056_v45 = vrot.slane %v6055_v24, 4  ;;  %v4984_v26 = vadd.f32 %v4983_v51, %v4982_v30  ;;  %v6793_v10 = vadd.f32 %v6792_v0, %v6791_v53  ;;  %v5452_v36 = vmul.f32 %v13692_v13, %v5187_v22 }
 0x64c   : > { %v15122_v18 = vperm.slane %v15091_v21, 2  ;;  %v7294_v54 = vmul.f32 %v13641_v47, %v7029_v38  ;;  %v6425_v32 = vrot.slane %v6424_v25, 4  ;;  %v5267_v28 = vmul.f32 %v5244_v27, %v5187_v22 }
 0x64d   : > { %v5451_v19 = vmul.f32 %v15124_v42, %v5186_v49  ;;  %v6794_v55 = vrot.slane %v6793_v10, 4  ;;  %v6926_v56 = vmul.f32 %v13681_v62, %v6661_v33  ;;  %v5556_v30 = vadd.f32 %v5540_v50, %v5452_v36  ;;  %v15127_v49 = vld [vmem:[#allocation167_spill] sm:$0xff] }
 0x64e   : > { %v5539_v9 = vmul.f32 %v15123_v6, %v15122_v18  ;;  %v5324_v51 = vsel %vm1349_vm12, %v5266_v46, 0.0  ;;  %v5688_v7 = vadd.f32 %v5687_v58, %v5686_v12  ;;  %v7109_v13 = vmul.f32 %v13610_v4, %v7029_v38  ;;  %v7081_v46 = vpop.permute.xlu1 %7080 }
 0x64f   : > { %v5325_v53 = vsel %vm1349_vm12, %v5267_v28, 0.0  ;;  %v6057_v0 = vadd.f32 %v6056_v45, %v6055_v24  ;;  %v4985_v18 = vrot.slane %v4984_v26, 2  ;;  %v7030_v6 = vadd.f32 %v7014_v31, %v6926_v56 }
 0x650   : > { %v5326_v47 = vadd.f32 %v5325_v53, %v5324_v51  ;;  %v15126_v22 = vperm.slane %v15091_v21, 3  ;;  %v15128_v42 = vperm.slane %v15036_v52, 7  ;;  %v5555_v50 = vadd.f32 %v5539_v9, %v5451_v19  ;;  %v15130_v9 = vld [vmem:[#allocation81_spill] sm:$0xff] }
 0x651   : > { %v6426_v33 = vadd.f32 %v6425_v32, %v6424_v25  ;;  %v7398_v12 = vadd.f32 %v13704_v60, %v7294_v54  ;;  %v6795_v4 = vadd.f32 %v6794_v55, %v6793_v10  ;;  %v7110_v58 = vmul.f32 %v7081_v46, %v7030_v6  ;;  %v5613_v60 = vpop.permute.xlu2 %5612 }
 0x652   : > { %v5908_v27 = vmul.f32 %v15127_v49, %v15126_v22  ;;  %v7383_v62 = vmul.f32 %v15129_v5, %v15128_v42  ;;  %v5327_v38 = vrot.slane %v5326_v47, 4  ;;  %v5635_v24 = vmul.f32 %v13495_v23, %v5555_v50 }
 0x653   : > { %v5689_v45 = vrot.slane %v5688_v7, 2  ;;  %v7160_v31 = vsel %vm1349_vm12, %v7109_v13, 0.0  ;;  %v5821_v36 = vmul.f32 %v13716_v39, %v5556_v30  ;;  %v6058_v28 = vrot.slane %v6057_v0, 2 }
 0x654   : > { %v4986_v56 = vadd.f32 %v4985_v18, %v4984_v26  ;;  %v5328_v52 = vadd.f32 %v5327_v38, %v5326_v47  ;;  %v7161_v5 = vsel %vm1349_vm12, %v7110_v58, 0.0  ;;  %v5820_v25 = vmul.f32 %v15130_v9, %v5555_v50  ;;  %v4908_v18 = vpop.permute.xlu0 %4907 }
 0x655   : > { %v6427_v32 = vrot.slane %v6426_v33, 2  ;;  %v7162_v19 = vadd.f32 %v7161_v5, %v7160_v31  ;;  %v13799_v10 = vadd.f32 %v13729_v63, %v5821_v36  ;;  %v6796_v54 = vrot.slane %v6795_v4, 2 }
 0x656   : > { %v5329_v23 = vrot.slane %v5328_v52, 2  ;;  %v5636_v55 = vmul.f32 %v5613_v60, %v5556_v30  ;;  %v7295_v51 = vmul.f32 %v13708_v59, %v7030_v6  ;;  %v5693_v39 = vsel %vm1349_vm12, %v5635_v24, 0.0  ;;  %v7450_v59 = vpop.permute.xlu1 %7449 }
 0x657   : > { %v5690_v13 = vadd.f32 %v5689_v45, %v5688_v7  ;;  %v7478_v26 = vmul.f32 %v13663_v20, %v7398_v12  ;;  %v7163_v53 = vrot.slane %v7162_v19, 4  ;;  %v6059_v47 = vadd.f32 %v6058_v28, %v6057_v0 }
 0x658   : > { %v4987_v22 = vrot.slane %v4986_v56, 1  ;;  %v5330_v49 = vadd.f32 %v5329_v23, %v5328_v52  ;;  %v5694_v42 = vsel %vm1349_vm12, %v5636_v55, 0.0  ;;  %v6428_v50 = vadd.f32 %v6427_v32, %v6426_v33 }
 0x659   : > { %v7164_v63 = vadd.f32 %v7163_v53, %v7162_v19  ;;  %v5695_v46 = vadd.f32 %v5694_v42, %v5693_v39  ;;  %v7399_v38 = vadd.f32 %v7383_v62, %v7295_v51  ;;  %v5924_v58 = vadd.f32 %v5908_v27, %v5820_v25  ;;  %v5982_v60 = vpop.permute.xlu2 %5981  ;;  %v15134_v39 = vld [vmem:[#allocation242_spill] sm:$0xff]  ;;  %v15136_v42 = vld [vmem:[#allocation177_spill] sm:$0xff] }
 0x65a   : > { %v6797_v30 = vadd.f32 %v6796_v54, %v6795_v4  ;;  %v5331_v31 = vrot.slane %v5330_v49, 1  ;;  %v6190_v7 = vmul.f32 %v13724_v43, %v13799_v10  ;;  %v5691_v6 = vrot.slane %v5690_v13, 1  ;;  %v15132_v4 = vld [vmem:[#allocation171_spill] sm:$0xff]  ;;  %v15133_v43 = vld [vmem:[#allocation12_spill] sm:$0xff] }
 0x65b   : > { %v7165_v20 = vrot.slane %v7164_v63, 2  ;;  %v5696_v12 = vrot.slane %v5695_v46, 4  ;;  %v7479_v24 = vmul.f32 %v7450_v59, %v7399_v38  ;;  %v6060_v0 = vrot.slane %v6059_v47, 1  ;;  %v15137_v59 = vld [vmem:[#allocation76_spill] sm:$0xff] }
 0x65c   : > { %v7529_v45 = vsel %vm1349_vm12, %v7478_v26, 0.0  ;;  %v4988_v36 = vadd.f32 %v4987_v22, %v4986_v56  ;;  %v5332_v28 = vadd.f32 %v5331_v31, %v5330_v49  ;;  %v6429_v33 = vrot.slane %v6428_v50, 1 }
 0x65d   : > { %v7166_v52 = vadd.f32 %v7165_v20, %v7164_v63  ;;  %v5697_v5 = vadd.f32 %v5696_v12, %v5695_v46  ;;  %v7530_v27 = vsel %vm1349_vm12, %v7479_v24, 0.0  ;;  %v15131_v62 = vperm.slane %v15091_v21, 4 }
 0x65e   : > { %v6798_v25 = vrot.slane %v6797_v30, 1  ;;  %v5381_v32 = vadd.f32 %v15133_v43, %v5332_v28  ;;  %v7531_v19 = vadd.f32 %v7530_v27, %v7529_v45  ;;  %v5692_v54 = vadd.f32 %v5691_v6, %v5690_v13  ;;  %v5252_v13 = vpop.permute.xlu0 %5251  ;;  %v4903_v45 = vpop.permute.xlu1 %4902 }
 0x65f   : > { %v6277_v9 = vmul.f32 %v15132_v4, %v15131_v62  ;;  %v7167_v23 = vrot.slane %v7166_v52, 1  ;;  %v5698_v55 = vrot.slane %v5697_v5, 2  ;;  %v6294_v56 = vadd.f32 %v13757_v2, %v6190_v7 }
 0x660   : > { %v6061_v51 = vadd.f32 %v6060_v0, %v6059_v47  ;;  %v5012_v26 = vadd.f32 %v15134_v39, %v4988_v36  ;;  %v7611_v53 = vrot.slane %v5381_v32, 7  ;;  %v7532_v22 = vrot.slane %v7531_v19, 4  ;;  %v15138_v47 = vld [vmem:[#allocation21_spill] sm:$0xff] }
 0x661   : > { %v15135_v49 = vperm.slane %v15091_v21, 5  ;;  %v6189_v46 = vmul.f32 %v13423_v15, %v5924_v58  ;;  %v6430_v38 = vadd.f32 %v6429_v33, %v6428_v50  ;;  %v5699_v31 = vadd.f32 %v5698_v55, %v5697_v5  ;;  %v15139_v50 = vld [vmem:[#allocation75_spill] sm:$0xff] }
 0x662   : > { %v4925_v20 = vmul.f32 %v4908_v18, %v15137_v59  ;;  %v6799_v6 = vadd.f32 %v6798_v25, %v6797_v30  ;;  %v7771_v12 = vsel %vm1084_vm0, %v5012_v26, %v7611_v53  ;;  %v7533_v2 = vadd.f32 %v7532_v22, %v7531_v19  ;;  %v15140_v30 = vld [vmem:[#allocation185_spill] sm:$0xff] }
 0x663   : > { %v6646_v63 = vmul.f32 %v15136_v42, %v15135_v49  ;;  %v5749_v7 = vadd.f32 %v15138_v47, %v5692_v54  ;;  %v7168_v24 = vadd.f32 %v7167_v23, %v7166_v52  ;;  %v5700_v0 = vrot.slane %v5699_v31, 1  ;;  %v15141_v49 = vld [vmem:[#allocation86_spill] sm:$0xff] }
 0x664   : > { %v6559_v36 = vmul.f32 %v13736_v1, %v6294_v56  ;;  %v6293_v28 = vadd.f32 %v6277_v9, %v6189_v46  ;;  %v6118_v27 = vadd.f32 %v13656_v17, %v6061_v51  ;;  %v7534_v15 = vrot.slane %v7533_v2, 2 }
 0x665   : > { %v4924_v33 = vmul.f32 %v4903_v45, %v15139_v50  ;;  %v6487_v18 = vadd.f32 %v13688_v40, %v6430_v38  ;;  %v5701_v5 = vadd.f32 %v5700_v0, %v5699_v31  ;;  %v7586_v62 = vmul.f32 %v13652_v34, %v15140_v30  ;;  %v6351_v40 = vpop.permute.xlu2 %6350  ;;  %v15144_v50 = vld [vmem:[#allocation187_spill] sm:$0xff]  ;;  %v15146_v30 = vld [vmem:[#allocation153_spill] sm:$0xff] }
 0x666   : > { %v6663_v4 = vadd.f32 %v13762_v8, %v6559_v36  ;;  %v4990_v52 = vsel %vm1349_vm12, %v4925_v20, 0.0  ;;  %v6856_v25 = vadd.f32 %v13699_v41, %v6799_v6  ;;  %v7535_v43 = vadd.f32 %v7534_v15, %v7533_v2  ;;  %v5621_v38 = vpop.permute.xlu0 %5620  ;;  %v5248_v31 = vpop.permute.xlu1 %5247 }
 0x667   : > { %v4989_v1 = vsel %vm1349_vm12, %v4924_v33, 0.0  ;;  %v7634_v9 = vrot.slane %v5749_v7, 6  ;;  %v7225_v17 = vadd.f32 %v13769_v57, %v7168_v24  ;;  %v5750_v32 = vadd.f32 %v13576_v37, %v5701_v5 }
 0x668   : > { %v4991_v19 = vadd.f32 %v4990_v52, %v4989_v1  ;;  %v6004_v54 = vmul.f32 %v13524_v14, %v5924_v58  ;;  %v6558_v34 = vmul.f32 %v13557_v48, %v6293_v28  ;;  %v7658_v23 = vrot.slane %v6118_v27, 5 }
 0x669   : > { %v7536_v8 = vrot.slane %v7535_v43, 1  ;;  %v7682_v55 = vrot.slane %v6487_v18, 4  ;;  %v7635_v51 = vrot.slane %v5750_v32, 6  ;;  %v6005_v41 = vmul.f32 %v5982_v60, %v13799_v10 }
 0x66a   : > { %v4992_v39 = vrot.slane %v4991_v19, 4  ;;  %v6373_v26 = vmul.f32 %v13606_v29, %v6293_v28  ;;  %v7706_v53 = vrot.slane %v6856_v25, 3  ;;  %v6374_v57 = vmul.f32 %v6351_v40, %v6294_v56 }
 0x66b   : > { %v7537_v22 = vadd.f32 %v7536_v8, %v7535_v43  ;;  %v7779_v37 = vsel %vm7773_vm7, %v13661_v11, %v7634_v9  ;;  %v5269_v42 = vmul.f32 %v5252_v13, %v15141_v49  ;;  %v7730_v14 = vrot.slane %v7225_v17, 2  ;;  %v15142_v11 = vld [vmem:[#allocation219_spill] sm:$0xff]  ;;  %v15147_v9 = vld [vmem:[#allocation89_spill] sm:$0xff] }
 0x66c   : > { %v13842_v48 = vsel %vm7773_vm7, %v7771_v12, %v7635_v51  ;;  %v6662_v58 = vadd.f32 %v6646_v63, %v6558_v34  ;;  %v7788_v46 = vsel %vm7782_vm8, %v7779_v37, %v7658_v23  ;;  %v4993_v60 = vadd.f32 %v4992_v39, %v4991_v19  ;;  %v15150_v37 = vld [vmem:[#allocation13_spill] sm:$0xff] }
 0x66d   : > { %v7594_v10 = vadd.f32 %v7586_v62, %v7537_v22  ;;  %v6062_v29 = vsel %vm1349_vm12, %v6004_v54, 0.0  ;;  %v7797_v56 = vsel %vm7791_vm9, %v7788_v46, %v7682_v55  ;;  %v6063_v59 = vsel %vm1349_vm12, %v6005_v41, 0.0  ;;  %v6720_v27 = vpop.permute.xlu2 %6719 }
 0x66e   : > { %v5268_v20 = vmul.f32 %v5248_v31, %v15142_v11  ;;  %v6431_v13 = vsel %vm1349_vm12, %v6373_v26, 0.0  ;;  %v7806_v6 = vsel %vm7800_vm10, %v7797_v56, %v7706_v53  ;;  %v6432_v12 = vsel %vm1349_vm12, %v6374_v57, 0.0  ;;  %v5617_v8 = vpop.permute.xlu1 %5616  ;;  %v5990_v55 = vpop.permute.xlu0 %5989  ;;  %v15149_v53 = vld [vmem:[#allocation225_spill] sm:$0xff] }
 0x66f   : > { %v7754_v63 = vrot.slane %v7594_v10, 1  ;;  %v6742_v2 = vmul.f32 %v13658_v16, %v6662_v58  ;;  %v5334_v47 = vsel %vm1349_vm12, %v5269_v42, 0.0  ;;  %v7815_v7 = vsel %vm7809_vm13, %v7806_v6, %v7730_v14  ;;  %v15151_v10 = vld [vmem:[#allocation158_spill] sm:$0xff]  ;;  %v15152_v31 = vld [vmem:[#allocation197_spill] sm:$0xff] }
 0x670   : > { %v5333_v24 = vsel %vm1349_vm12, %v5268_v20, 0.0  ;;  %v6064_v45 = vadd.f32 %v6063_v59, %v6062_v29  ;;  %v4994_v36 = vrot.slane %v4993_v60, 2  ;;  %v15143_v15 = vperm.slane %v15091_v21, 6 }
 0x671   : > { %v7823_v0 = vsel %vm1109_vm11, %v7815_v7, %v7754_v63  ;;  %v5335_v28 = vadd.f32 %v5334_v47, %v5333_v24  ;;  %8543 = vpow2.f32 %v13672_v44  ;;  %v6433_v16 = vadd.f32 %v6432_v12, %v6431_v13 }
 0x672   : > { %v7015_v33 = vmul.f32 %v15144_v50, %v15143_v15  ;;  %7831 = vst.msk [vmem:[%s12504_s22 + $0x28] sm:$0xff] %vm1349_vm12, %v7823_v0  ;;  %v6743_v18 = vmul.f32 %v6720_v27, %v6663_v4  ;;  %v15145_v5 = vmov %v15143_v15  ;;  %v6928_v25 = vmul.f32 %v13743_v35, %v6663_v4 }
 0x673   : > { %v7016_v62 = vmul.f32 %v15146_v30, %v15145_v5  ;;  %v5336_v52 = vrot.slane %v5335_v28, 4  ;;  %8545 = vpow2.f32 %v13690_v3  ;;  %v6800_v43 = vsel %vm1349_vm12, %v6742_v2, 0.0  ;;  %v13875_v3 = vld [vmem:[%s13965_s12 + $0x7] sm:$0x1] }
 0x674   : > { %v6927_v1 = vmul.f32 %v13594_v61, %v6662_v58  ;;  %v5638_v17 = vmul.f32 %v5621_v38, %v15147_v9  ;;  %v6801_v44 = vsel %vm1349_vm12, %v6743_v18, 0.0  ;;  %v6065_v32 = vrot.slane %v6064_v45, 4  ;;  %v15148_v61 = vld [vmem:[#allocation27_spill] sm:$0xff]  ;;  %v15153_v2 = vld [vmem:[#allocation53_spill] sm:$0xff]  ;;  %v15155_v9 = vld [vmem:[#allocation88_spill] sm:$0xff] }
 0x675   : > { %v4995_v19 = vadd.f32 %v4994_v36, %v4993_v60  ;;  %v5337_v40 = vadd.f32 %v5336_v52, %v5335_v28  ;;  %v6802_v54 = vadd.f32 %v6801_v44, %v6800_v43  ;;  %v6434_v23 = vrot.slane %v6433_v16, 4  ;;  %v15154_v52 = vld [vmem:[#allocation61_spill] sm:$0xff] }
 0x676   : > { %v7031_v34 = vadd.f32 %v7015_v33, %v6927_v1  ;;  %v5637_v51 = vmul.f32 %v5617_v8, %v15148_v61  ;;  %v7032_v41 = vadd.f32 %v7016_v62, %v6928_v25  ;;  %v7306_v26 = vperm.slane %v15091_v21, 7  ;;  %v7089_v21 = vpop.permute.xlu2 %7088  ;;  %v8562_v33 = vld [vmem:[#allocation1] sm:$0xff]  ;;  %v5986_v30 = vpop.permute.xlu1 %5985 }
 0x677   : > { %v5338_v35 = vrot.slane %v5337_v40, 2  ;;  %v6803_v4 = vrot.slane %v6802_v54, 4  ;;  %v8544_v39 = vpop.eup %8543  ;;  %v5703_v57 = vsel %vm1349_vm12, %v5638_v17, 0.0  ;;  %v5374_v49 = vmul.f32 %v15150_v37, %v13875_v3  ;;  %v15157_v37 = vld [vmem:[#allocation45_spill] sm:$0xff] }
 0x678   : > { %v7111_v22 = vmul.f32 %v15149_v53, %v7031_v34  ;;  %v6066_v14 = vadd.f32 %v6065_v32, %v6064_v45  ;;  %v4996_v58 = vrot.slane %v4995_v19, 1  ;;  %v5702_v38 = vsel %vm1349_vm12, %v5637_v51, 0.0  ;;  %v6359_v32 = vpop.permute.xlu0 %6358 }
 0x679   : > { %v8546_v42 = vpop.eup %8545  ;;  %v5339_v46 = vadd.f32 %v5338_v35, %v5337_v40  ;;  %v7385_v60 = vmul.f32 %v15151_v10, %v7306_v26  ;;  %v7384_v29 = vmul.f32 %v15152_v31, %v7306_v26  ;;  %v6435_v56 = vadd.f32 %v6434_v23, %v6433_v16 }
 0x67a   : > { %v5704_v59 = vadd.f32 %v5703_v57, %v5702_v38  ;;  %v6804_v20 = vadd.f32 %v6803_v4, %v6802_v54  ;;  %v7112_v13 = vmul.f32 %v7089_v21, %v7032_v41  ;;  %v7297_v6 = vmul.f32 %v8546_v42, %v7032_v41  ;;  %v15156_v41 = vld [vmem:[#allocation25_spill] sm:$0xff] }
 0x67b   : > { %v5340_v11 = vrot.slane %v5339_v46, 1  ;;  %v7169_v63 = vsel %vm1349_vm12, %v7111_v22, 0.0  ;;  %v7296_v12 = vmul.f32 %v8544_v39, %v7031_v34  ;;  %v6007_v47 = vmul.f32 %v5990_v55, %v15153_v2  ;;  %v15159_v2 = vld [vmem:[#allocation37_spill] sm:$0xff] }
 0x67c   : > { %v5705_v7 = vrot.slane %v5704_v59, 4  ;;  %v6067_v24 = vrot.slane %v6066_v14, 2  ;;  %v4997_v0 = vadd.f32 %v4996_v58, %v4995_v19  ;;  %v7170_v36 = vsel %vm1349_vm12, %v7112_v13, 0.0 }
 0x67d   : > { %v5341_v45 = vadd.f32 %v5340_v11, %v5339_v46  ;;  %v7400_v28 = vadd.f32 %v7384_v29, %v7296_v12  ;;  %v6436_v27 = vrot.slane %v6435_v56, 2  ;;  %v7171_v50 = vadd.f32 %v7170_v36, %v7169_v63 }
 0x67e   : > { %v5706_v15 = vadd.f32 %v5705_v7, %v5704_v59  ;;  %v5005_v16 = vmul.f32 %v8562_v33, %v13875_v3  ;;  %v6805_v5 = vrot.slane %v6804_v20, 2  ;;  %v7401_v62 = vadd.f32 %v7385_v60, %v7297_v6  ;;  %v7458_v51 = vpop.permute.xlu2 %7457  ;;  %v6355_v21 = vpop.permute.xlu1 %6354  ;;  %v15158_v6 = vld [vmem:[#allocation234_spill] sm:$0xff] }
 0x67f   : > { %v5382_v18 = vadd.f32 %v5374_v49, %v5341_v45  ;;  %v7480_v25 = vmul.f32 %v15154_v52, %v7400_v28  ;;  %v7172_v1 = vrot.slane %v7171_v50, 4  ;;  %v6006_v17 = vmul.f32 %v5986_v30, %v15155_v9  ;;  %v15163_v9 = vld [vmem:[#allocation90_spill] sm:$0xff] }
 0x680   : > { %v5707_v43 = vrot.slane %v5706_v15, 2  ;;  %v6072_v44 = vsel %vm1349_vm12, %v6007_v47, 0.0  ;;  %v6068_v19 = vadd.f32 %v6067_v24, %v6066_v14  ;;  %v5013_v40 = vadd.f32 %v5005_v16, %v4997_v0  ;;  %v15160_v47 = vld [vmem:[#allocation146_spill] sm:$0xff]  ;;  %v6728_v45 = vpop.permute.xlu0 %6727 }
 0x681   : > { %v7612_v54 = vrot.slane %v5382_v18, 7  ;;  %v6437_v34 = vadd.f32 %v6436_v27, %v6435_v56  ;;  %v7173_v8 = vadd.f32 %v7172_v1, %v7171_v50  ;;  %v6071_v55 = vsel %vm1349_vm12, %v6006_v17, 0.0  ;;  %v15161_v50 = vld [vmem:[#allocation16_spill] sm:$0xff] }
 0x682   : > { %v5708_v23 = vadd.f32 %v5707_v43, %v5706_v15  ;;  %v6806_v4 = vadd.f32 %v6805_v5, %v6804_v20  ;;  %v6073_v61 = vadd.f32 %v6072_v44, %v6071_v55  ;;  %v5743_v39 = vmul.f32 %v15156_v41, %v13875_v3 }
 0x683   : > { %v7772_v35 = vsel %vm1084_vm0, %v5013_v40, %v7612_v54  ;;  %v7174_v53 = vrot.slane %v7173_v8, 2  ;;  %v7481_v22 = vmul.f32 %v7458_v51, %v7401_v62  ;;  %v7538_v57 = vsel %vm1349_vm12, %v7480_v25, 0.0  ;;  %v15162_v62 = vld [vmem:[#allocation60_spill] sm:$0xff] }
 0x684   : > { %v5709_v26 = vrot.slane %v5708_v23, 1  ;;  %v6376_v49 = vmul.f32 %v6359_v32, %v15157_v37  ;;  %v6069_v42 = vrot.slane %v6068_v19, 1  ;;  %v6074_v14 = vrot.slane %v6073_v61, 4 }
 0x685   : > { %v6438_v58 = vrot.slane %v6437_v34, 1  ;;  %v7175_v38 = vadd.f32 %v7174_v53, %v7173_v8  ;;  %v7539_v10 = vsel %vm1349_vm12, %v7481_v22, 0.0  ;;  %v6807_v60 = vrot.slane %v6806_v4, 1  ;;  %v15166_v53 = vld [vmem:[#allocation4_spill] sm:$0xff] }
 0x686   : > { %v5710_v46 = vadd.f32 %v5709_v26, %v5708_v23  ;;  %v6075_v31 = vadd.f32 %v6074_v14, %v6073_v61  ;;  %v7540_v29 = vadd.f32 %v7539_v10, %v7538_v57  ;;  %v6070_v11 = vadd.f32 %v6069_v42, %v6068_v19  ;;  %v15164_v19 = vld [vmem:[#allocation38_spill] sm:$0xff]  ;;  %v6724_v41 = vpop.permute.xlu1 %6723 }
 0x687   : > { %v7176_v59 = vrot.slane %v7175_v38, 1  ;;  %v6375_v63 = vmul.f32 %v6355_v21, %v15158_v6  ;;  %v6441_v12 = vsel %vm1349_vm12, %v6376_v49, 0.0  ;;  %v6111_v7 = vmul.f32 %v15160_v47, %v15159_v2  ;;  %v15165_v23 = vld [vmem:[#allocation30_spill] sm:$0xff]  ;;  %v15167_v49 = vld [vmem:[#allocation211_spill] sm:$0xff] }
 0x688   : > { %v5751_v56 = vadd.f32 %v5743_v39, %v5710_v46  ;;  %v6076_v20 = vrot.slane %v6075_v31, 2  ;;  %v7541_v13 = vrot.slane %v7540_v29, 4  ;;  %v6439_v24 = vadd.f32 %v6438_v58, %v6437_v34 }
 0x689   : > { %v6808_v36 = vadd.f32 %v6807_v60, %v6806_v4  ;;  %v6440_v15 = vsel %vm1349_vm12, %v6375_v63, 0.0  ;;  %v6480_v33 = vmul.f32 %v15160_v47, %v15161_v50  ;;  %v7177_v18 = vadd.f32 %v7176_v59, %v7175_v38 }
 0x68a   : > { %v7636_v0 = vrot.slane %v5751_v56, 6  ;;  %v6077_v28 = vadd.f32 %v6076_v20, %v6075_v31  ;;  %v7542_v27 = vadd.f32 %v7541_v13, %v7540_v29  ;;  %v6442_v5 = vadd.f32 %v6441_v12, %v6440_v15  ;;  %v7097_v31 = vpop.permute.xlu0 %7096  ;;  %v15168_v12 = vld [vmem:[#allocation9_spill] sm:$0xff] }
 0x68b   : > { %v6119_v30 = vadd.f32 %v6111_v7, %v6070_v11  ;;  %v6849_v52 = vmul.f32 %v15160_v47, %v15162_v62  ;;  %v6488_v1 = vadd.f32 %v6480_v33, %v6439_v24  ;;  %v7218_v17 = vmul.f32 %v15160_v47, %v15163_v9 }
 0x68c   : > { %v7781_v16 = vsel %vm7773_vm7, %v7772_v35, %v7636_v0  ;;  %v6078_v25 = vrot.slane %v6077_v28, 1  ;;  %v7543_v43 = vrot.slane %v7542_v27, 2  ;;  %v6443_v44 = vrot.slane %v6442_v5, 4 }
 0x68d   : > { %v6857_v32 = vadd.f32 %v6849_v52, %v6808_v36  ;;  %v6112_v40 = vmul.f32 %v15164_v19, %v13875_v3  ;;  %v6745_v8 = vmul.f32 %v6728_v45, %v15165_v23  ;;  %v7226_v55 = vadd.f32 %v7218_v17, %v7177_v18  ;;  %v15172_v17 = vld [vmem:[#allocation65_spill] sm:$0xff] }
 0x68e   : > { %v6079_v54 = vadd.f32 %v6078_v25, %v6077_v28  ;;  %v7544_v34 = vadd.f32 %v7543_v43, %v7542_v27  ;;  %v6444_v35 = vadd.f32 %v6443_v44, %v6442_v5  ;;  %v7659_v4 = vrot.slane %v6119_v30, 5  ;;  %v7093_v36 = vpop.permute.xlu1 %7092  ;;  %v15170_v27 = vld [vmem:[#allocation214_spill] sm:$0xff]  ;;  %v15171_v43 = vld [vmem:[#allocation64_spill] sm:$0xff] }
 0x68f   : > { %v7683_v39 = vrot.slane %v6488_v1, 4  ;;  %v6744_v22 = vmul.f32 %v6724_v41, %v15166_v53  ;;  %v7707_v57 = vrot.slane %v6857_v32, 3  ;;  %v7587_v42 = vmul.f32 %v15160_v47, %v15167_v49 }
 0x690   : > { %v6120_v61 = vadd.f32 %v6112_v40, %v6079_v54  ;;  %v7545_v51 = vrot.slane %v7544_v34, 1  ;;  %v6445_v26 = vrot.slane %v6444_v35, 2  ;;  %v6810_v58 = vsel %vm1349_vm12, %v6745_v8, 0.0 }
 0x691   : > { %v7731_v46 = vrot.slane %v7226_v55, 2  ;;  %v6809_v10 = vsel %vm1349_vm12, %v6744_v22, 0.0  ;;  %v7789_v60 = vsel %vm7782_vm8, %v13842_v48, %v7659_v4  ;;  %v6481_v2 = vmul.f32 %v15168_v12, %v13875_v3  ;;  %v15169_v48 = vld [vmem:[#allocation49_spill] sm:$0xff] }
 0x692   : > { %v7660_v37 = vrot.slane %v6120_v61, 5  ;;  %v7546_v14 = vadd.f32 %v7545_v51, %v7544_v34  ;;  %v6446_v38 = vadd.f32 %v6445_v26, %v6444_v35  ;;  %v6811_v59 = vadd.f32 %v6810_v58, %v6809_v10  ;;  %v7466_v62 = vpop.permute.xlu0 %7465  ;;  %v15173_v34 = vld [vmem:[#allocation40_spill] sm:$0xff]  ;;  %v15174_v26 = vld [vmem:[#allocation94_spill] sm:$0xff] }
 0x693   : > { %v7798_v21 = vsel %vm7791_vm9, %v7789_v60, %v7683_v39  ;;  %v7114_v7 = vmul.f32 %v7097_v31, %v15169_v48  ;;  %v7113_v15 = vmul.f32 %v7093_v36, %v15170_v27  ;;  %v6850_v1 = vmul.f32 %v15171_v43, %v13875_v3 }
 0x694   : > { %v7790_v29 = vsel %vm7782_vm8, %v7781_v16, %v7660_v37  ;;  %v7595_v56 = vadd.f32 %v7587_v42, %v7546_v14  ;;  %v6447_v11 = vrot.slane %v6446_v38, 1  ;;  %v7807_v20 = vsel %vm7800_vm10, %v7798_v21, %v7707_v57 }
 0x695   : > { %v6812_v6 = vrot.slane %v6811_v59, 4  ;;  %v7816_v63 = vsel %vm7809_vm13, %v7807_v20, %v7731_v46  ;;  %v7179_v33 = vsel %vm1349_vm12, %v7114_v7, 0.0  ;;  %v7178_v18 = vsel %vm1349_vm12, %v7113_v15, 0.0  ;;  %v7572_v46 = vld [vmem:[#allocation1 + $0x7] ss:$9 sm:$0xff] }
 0x696   : > { %v7755_v13 = vrot.slane %v7595_v56, 1  ;;  %v6448_v47 = vadd.f32 %v6447_v11, %v6446_v38  ;;  %v7180_v30 = vadd.f32 %v7179_v33, %v7178_v18  ;;  %v7483_v44 = vmul.f32 %v7466_v62, %v15172_v17  ;;  %v7462_v40 = vpop.permute.xlu1 %7461 }
 0x697   : > { %v6813_v0 = vadd.f32 %v6812_v6, %v6811_v59  ;;  %v7482_v23 = vmul.f32 %v7462_v40, %v15173_v34  ;;  %v7219_v53 = vmul.f32 %v15174_v26, %v13875_v3  ;;  %v7588_v10 = vmul.f32 %v7572_v46, %v13875_v3 }
 0x698   : > { %v7824_v24 = vsel %vm1109_vm11, %v7816_v63, %v7755_v13  ;;  %v6489_v45 = vadd.f32 %v6481_v2, %v6448_v47  ;;  %v7181_v25 = vrot.slane %v7180_v30, 4  ;;  %v7548_v55 = vsel %vm1349_vm12, %v7483_v44, 0.0 }
 0x699   : > { %7832 = vst.msk [vmem:[%s12504_s22 + $0x30] sm:$0xff] %vm1349_vm12, %v7824_v24  ;;  %v6814_v28 = vrot.slane %v6813_v0, 2  ;;  %v7547_v4 = vsel %vm1349_vm12, %v7482_v23, 0.0 }
 0x69a   : > { %v7684_v50 = vrot.slane %v6489_v45, 4  ;;  %v7182_v32 = vadd.f32 %v7181_v25, %v7180_v30  ;;  %v7549_v51 = vadd.f32 %v7548_v55, %v7547_v4 }
 0x69b   : > { %v6815_v16 = vadd.f32 %v6814_v28, %v6813_v0 }
 0x69c   : > { %v7799_v5 = vsel %vm7791_vm9, %v7790_v29, %v7684_v50  ;;  %v7183_v54 = vrot.slane %v7182_v32, 2  ;;  %v7550_v39 = vrot.slane %v7549_v51, 4 }
 0x69d   : > { %v6816_v52 = vrot.slane %v6815_v16, 1 }
 0x69e   : > { %v7184_v35 = vadd.f32 %v7183_v54, %v7182_v32  ;;  %v7551_v57 = vadd.f32 %v7550_v39, %v7549_v51 }
 0x69f   : > { %v6817_v9 = vadd.f32 %v6816_v52, %v6815_v16 }
 0x6a0   : > { %v7185_v41 = vrot.slane %v7184_v35, 1  ;;  %v7552_v49 = vrot.slane %v7551_v57, 2 }
 0x6a1   : > { %v6858_v19 = vadd.f32 %v6850_v1, %v6817_v9 }
 0x6a2   : > { %v7186_v22 = vadd.f32 %v7185_v41, %v7184_v35  ;;  %v7553_v14 = vadd.f32 %v7552_v49, %v7551_v57 }
 0x6a3   : > { %v7708_v8 = vrot.slane %v6858_v19, 3 }
 0x6a4   : > { %v7227_v37 = vadd.f32 %v7219_v53, %v7186_v22  ;;  %v7554_v38 = vrot.slane %v7553_v14, 1 }
 0x6a5   : > { %v7808_v61 = vsel %vm7800_vm10, %v7799_v5, %v7708_v8 }
 0x6a6   : > { %v7732_v42 = vrot.slane %v7227_v37, 2  ;;  %v7555_v60 = vadd.f32 %v7554_v38, %v7553_v14 }
 0x6a8   : > { %v7817_v58 = vsel %vm7809_vm13, %v7808_v61, %v7732_v42  ;;  %v7596_v31 = vadd.f32 %v7588_v10, %v7555_v60 }
 0x6aa   : > { %v7756_v29 = vrot.slane %v7596_v31, 1 }
 0x6ac   : > { %v7825_v56 = vsel %vm1109_vm11, %v7817_v58, %v7756_v29 }
 0x6ad   : > { %7833 = vst.msk [vmem:[%s12504_s22 + $0x38] sm:$0xff] %vm1349_vm12, %v7825_v56 }
 0x6ae PF: > { %s23_s25 = sadd.s32 1, %s8569_s25  }
 0x6af   : > { %p20_p4 = scmp.ge.s32.totalorder %s23_s25, 4  }
 0x6b1   :  { %22 = sbr.rel (!%p20_p4) target bundleno = 1 (0x1), region = 109 }

</bundles_post_ra>
